<compile_context>
chip_gen: v7x
topology: tpu7x:2x2x1
jax: 0.10.0
libtpu: 0.0.40
codegen_flags: <defaults>
</compile_context>

<pallas_src>
import functools
import math

import jax
import jax.numpy as jnp
from jax import lax
from jax.experimental import pallas as pl
from jax.experimental.pallas import tpu as pltpu


# Ordered weight names as passed to the kernel (all 2-D, kernel-friendly layouts).
_W_NAMES = (
    "conv1_w", "conv1_b", "conv2_w", "conv2_b", "conv3_w", "conv3_b",
    "lin1_w", "lin1_b", "bn1_scale", "bn1_shift",
    "lin2_w", "lin2_b", "bn2_scale", "bn2_shift",
    "lin3_w", "lin3_b", "bn3_scale", "bn3_shift",
    "lin4_w", "lin4_b", "bn4_scale", "bn4_shift",
    "sap_w", "sap_b", "proj_w", "proj_b",
    "sattn_wqkv", "sattn_bqkv", "sattn_wo", "sattn_bo",
    "ln1_g", "ln1_b",
    "cattn_wq", "cattn_bq", "cattn_wkv", "cattn_bkv", "cattn_wo", "cattn_bo",
    "ln2_g", "ln2_b",
    "ffn1_w", "ffn1_b", "ffn2_w", "ffn2_b",
    "ln3_g", "ln3_b",
)


# ------------------------------ fused kernel --------------------------------


def _unet_block_kernel(*args, n_head, d_model):
    """Whole UnetBlock forward for one batch element (one grid program)."""
    n_w = len(_W_NAMES)
    refs_ref, srcs_ref = args[0], args[1]
    w = dict(zip(_W_NAMES, args[2:2 + n_w]))
    out_ref, attn_ref = args[2 + n_w], args[3 + n_w]
    taps1_ref, taps2_ref, ffn_taps_ref, head_ref = args[4 + n_w:]

    d = d_model
    f32 = jnp.float32

    # ---------------- helpers (trace-time Python, VMEM-resident values) -------

    def conv3_replpad(x, taps_ref, wname, relu_input):
        """Conv1d(k=3, padding=1, padding_mode='replicate') as one im2col matmul."""
        if relu_input:
            x = jnp.maximum(x, 0.0)
        L, cin = x.shape
        # tap k=0 : x[l-1], replicate left edge
        taps_ref[0:1, 0:cin] = x[0:1]
        taps_ref[1:L, 0:cin] = x[0:L - 1]
        # tap k=1 : x[l]
        taps_ref[:, cin:2 * cin] = x
        # tap k=2 : x[l+1], replicate right edge
        taps_ref[0:L - 1, 2 * cin:3 * cin] = x[1:L]
        taps_ref[L - 1:L, 2 * cin:3 * cin] = x[L - 1:L]
        return jnp.dot(taps_ref[...], w[wname + "_w"][...],
                       preferred_element_type=f32) + w[wname + "_b"][...]

    def layer_norm(x, gname, bname):
        mu = jnp.mean(x, axis=-1, keepdims=True)
        var = jnp.mean(jnp.square(x - mu), axis=-1, keepdims=True)
        return (x - mu) * lax.rsqrt(var + 1e-5) * w[gname][...] + w[bname][...]

    def attn_core(q, k, v, wo_name, bo_name, want_weights):
        """Scaled dot-product attention; heads merged via VMEM scratch + one dot."""
        hd = d // n_head
        scale = 1.0 / math.sqrt(hd)
        aw = None
        for h in range(n_head):
            sl = slice(h * hd, (h + 1) * hd)
            s = lax.dot_general(q[:, sl] * scale, k[:, sl],
                                (((1,), (1,)), ((), ())),
                                preferred_element_type=f32)          # (Tq, Tk)
            m = jnp.max(s, axis=-1, keepdims=True)
            p = jnp.exp(s - m)
            p = p / jnp.sum(p, axis=-1, keepdims=True)
            if want_weights:
                aw = p if aw is None else aw + p
            head_ref[:, sl] = jnp.dot(p, v[:, sl], preferred_element_type=f32)
        o = jnp.dot(head_ref[...], w[wo_name][...],
                    preferred_element_type=f32) + w[bo_name][...]
        if want_weights:
            aw = aw * (1.0 / n_head)        # PyTorch average_attn_weights=True
        return o, aw

    # ---------------- UnetBlock convs: conv1 -> relu -> conv2 -> relu -> conv3 -
    r = refs_ref[0]                                                # (Lr, ref_dim)
    ref1 = conv3_replpad(r, taps1_ref, "conv1", relu_input=False)
    ref2 = conv3_replpad(ref1, taps2_ref, "conv2", relu_input=True)
    ref3 = conv3_replpad(ref2, taps2_ref, "conv3", relu_input=True)    # (Lr, d)

    # ---------------- SourceEncoder: 4 x (Linear -> relu -> eval-BN affine) ----
    t = srcs_ref[0]                                                # (Ls, input_dim)
    for i in (1, 2, 3, 4):
        h = jnp.dot(t, w[f"lin{i}_w"][...],
                    preferred_element_type=f32) + w[f"lin{i}_b"][...]
        h = jnp.maximum(h, 0.0)
        t = h * w[f"bn{i}_scale"][...] + w[f"bn{i}_shift"][...]

    # ------- SelfAttentionPooling(ref3) -> proj -> relu ; tgt *= spk_embed -----
    logits = jnp.dot(ref3, w["sap_w"][...],
                     preferred_element_type=f32) + w["sap_b"][...]     # (Lr, 1)
    mx = jnp.max(logits, axis=0, keepdims=True)
    pexp = jnp.exp(logits - mx)
    att = pexp / jnp.sum(pexp, axis=0, keepdims=True)                  # softmax(T)
    utter = jnp.sum(ref3 * att, axis=0, keepdims=True)                 # (1, d)
    spk = jnp.maximum(
        jnp.dot(utter, w["proj_w"][...], preferred_element_type=f32)
        + w["proj_b"][...], 0.0)                                       # (1, d)
    tgt = t * spk                                                      # (Ls, d)

    # ---------------- Extractor: self-attn (fused QKV) + add & norm ------------
    qkv = jnp.dot(tgt, w["sattn_wqkv"][...],
                  preferred_element_type=f32) + w["sattn_bqkv"][...]   # (Ls, 3d)
    sa, _ = attn_core(qkv[:, 0:d], qkv[:, d:2 * d], qkv[:, 2 * d:3 * d],
                      "sattn_wo", "sattn_bo", want_weights=False)
    tgt1 = layer_norm(tgt + sa, "ln1_g", "ln1_b")

    # ---------------- cross-attn (no_residual=True) + norm ---------------------
    q = jnp.dot(tgt1, w["cattn_wq"][...],
                preferred_element_type=f32) + w["cattn_bq"][...]       # (Ls, d)
    kv = jnp.dot(ref3, w["cattn_wkv"][...],
                 preferred_element_type=f32) + w["cattn_bkv"][...]     # (Lr, 2d)
    ca, aw = attn_core(q, kv[:, 0:d], kv[:, d:2 * d],
                       "cattn_wo", "cattn_bo", want_weights=True)
    tgt2 = layer_norm(ca, "ln2_g", "ln2_b")

    # ----- conv FFN: Conv1d(k=9, zero pad=4) -> relu -> Conv1d(k=1) + add&norm --
    L = tgt2.shape[0]
    ffn_taps_ref[...] = jnp.zeros_like(ffn_taps_ref)      # zero padding rows
    for k9 in range(9):
        off = k9 - 4
        cols = slice(k9 * d, (k9 + 1) * d)
        if off < 0:
            ffn_taps_ref[-off:L, cols] = tgt2[0:L + off, :]
        elif off == 0:
            ffn_taps_ref[:, cols] = tgt2
        else:
            ffn_taps_ref[0:L - off, cols] = tgt2[off:L, :]
    hid = jnp.maximum(
        jnp.dot(ffn_taps_ref[...], w["ffn1_w"][...],
                preferred_element_type=f32) + w["ffn1_b"][...], 0.0)   # (Ls, d_hid)
    ff = jnp.dot(hid, w["ffn2_w"][...],
                 preferred_element_type=f32) + w["ffn2_b"][...]        # (Ls, d)
    out = layer_norm(tgt2 + ff, "ln3_g", "ln3_b")

    out_ref[0] = out
    attn_ref[0] = aw


# ------------------------------ forward wrapper ------------------------------


def unet_block_forward(p, srcs, refs):
    """srcs: (N, input_dim, src_len), refs: (N, ref_dim, ref_len); masks are None."""
    n = srcs.shape[0]
    srcs_cl = jnp.transpose(srcs, (0, 2, 1)).astype(jnp.float32)   # (N, Ls, input_dim)
    refs_cl = jnp.transpose(refs, (0, 2, 1)).astype(jnp.float32)   # (N, Lr, ref_dim)
    ls = srcs_cl.shape[1]
    lr = refs_cl.shape[1]
    ref_dim = refs_cl.shape[2]
    d = p["conv1_w"].shape[-1]
    d_hid = p["ffn1_w"].shape[-1]
    n_head = int(p["n_head"])

    # Kernel-friendly parameter layouts (tiny one-time reshapes / concats).
    wd = dict(p)
    wd["conv1_w"] = p["conv1_w"].reshape(3 * ref_dim, d)   # im2col: taps stacked on K
    wd["conv2_w"] = p["conv2_w"].reshape(3 * d, d)
    wd["conv3_w"] = p["conv3_w"].reshape(3 * d, d)
    wd["ffn1_w"] = p["ffn1_w"].reshape(9 * d, d_hid)
    wd["sattn_wqkv"] = jnp.concatenate(
        [p["sattn_wq"], p["sattn_wk"], p["sattn_wv"]], axis=1)
    wd["sattn_bqkv"] = jnp.concatenate(
        [p["sattn_bq"], p["sattn_bk"], p["sattn_bv"]], axis=1)
    wd["cattn_wkv"] = jnp.concatenate([p["cattn_wk"], p["cattn_wv"]], axis=1)
    wd["cattn_bkv"] = jnp.concatenate([p["cattn_bk"], p["cattn_bv"]], axis=1)
    weights = [jnp.asarray(wd[name], jnp.float32) for name in _W_NAMES]

    def bat_spec(shape):
        return pl.BlockSpec((1,) + tuple(shape[1:]), lambda i: (i, 0, 0))

    def rep_spec(shape):
        return pl.BlockSpec(tuple(shape), lambda i: (0, 0))

    in_specs = ([bat_spec(refs_cl.shape), bat_spec(srcs_cl.shape)]
                + [rep_spec(wt.shape) for wt in weights])
    out_specs = (bat_spec((n, ls, d)), bat_spec((n, ls, lr)))
    out_shape = (jax.ShapeDtypeStruct((n, ls, d), jnp.float32),
                 jax.ShapeDtypeStruct((n, ls, lr), jnp.float32))
    scratch_shapes = [
        pltpu.VMEM((lr, 3 * ref_dim), jnp.float32),   # conv1 im2col taps
        pltpu.VMEM((lr, 3 * d), jnp.float32),         # conv2 / conv3 im2col taps
        pltpu.VMEM((ls, 9 * d), jnp.float32),         # FFN im2col taps
        pltpu.VMEM((ls, d), jnp.float32),             # concatenated attention heads
    ]

    kern = functools.partial(_unet_block_kernel, n_head=n_head, d_model=d)
    out, attn = pl.pallas_call(
        kern,
        grid=(n,),
        in_specs=in_specs,
        out_specs=out_specs,
        out_shape=out_shape,
        scratch_shapes=scratch_shapes,
        compiler_params=pltpu.CompilerParams(
            dimension_semantics=("parallel",)),   # batch axis shards over v7x's 2 TCs
    )(refs_cl, srcs_cl, *weights)

    out = jnp.transpose(out, (1, 0, 2))   # seq-first (Ls, N, d), PyTorch convention
    return out, [attn]


# ------------------------------ param init -----------------------------------


def init_params(key, d_model, input_dim, ref_dim, n_head=2, d_hid=1024):
    keys = iter(jax.random.split(key, 40))

    def nrm(shape, s=0.1):
        return (s * jax.random.normal(next(keys), shape)).astype(jnp.float32)

    bn_scale = float(1.0 / math.sqrt(1.0 + 1e-5))   # eval-mode BN folded affine
    zeros = lambda c: jnp.zeros((1, c), jnp.float32)
    ones = lambda c: jnp.ones((1, c), jnp.float32)

    p = {
        "n_head": n_head,
        # UnetBlock convs: stored as (K, Cin, Cout) == PyTorch (Cout,Cin,K).permute(2,1,0)
        "conv1_w": nrm((3, ref_dim, d_model)), "conv1_b": nrm((1, d_model)),
        "conv2_w": nrm((3, d_model, d_model)), "conv2_b": nrm((1, d_model)),
        "conv3_w": nrm((3, d_model, d_model)), "conv3_b": nrm((1, d_model)),
        # SourceEncoder linears (stored as (in, out))
        "lin1_w": nrm((input_dim, input_dim)), "lin1_b": nrm((1, input_dim)),
        "lin2_w": nrm((input_dim, d_model)), "lin2_b": nrm((1, d_model)),
        "lin3_w": nrm((d_model, d_model)), "lin3_b": nrm((1, d_model)),
        "lin4_w": nrm((d_model, d_model)), "lin4_b": nrm((1, d_model)),
        "bn1_scale": jnp.full((1, input_dim), bn_scale, jnp.float32), "bn1_shift": zeros(input_dim),
        "bn2_scale": jnp.full((1, d_model), bn_scale, jnp.float32), "bn2_shift": zeros(d_model),
        "bn3_scale": jnp.full((1, d_model), bn_scale, jnp.float32), "bn3_shift": zeros(d_model),
        "bn4_scale": jnp.full((1, d_model), bn_scale, jnp.float32), "bn4_shift": zeros(d_model),
        # SelfAttentionPooling + proj
        "sap_w": nrm((d_model, 1)), "sap_b": jnp.zeros((1, 1), jnp.float32),
        "proj_w": nrm((d_model, d_model)), "proj_b": zeros(d_model),
        # Extractor: self / cross attention (separate pieces; fused in the wrapper)
        "sattn_wq": nrm((d_model, d_model)), "sattn_wk": nrm((d_model, d_model)),
        "sattn_wv": nrm((d_model, d_model)), "sattn_wo": nrm((d_model, d_model)),
        "sattn_bq": zeros(d_model), "sattn_bk": zeros(d_model),
        "sattn_bv": zeros(d_model), "sattn_bo": zeros(d_model),
        "cattn_wq": nrm((d_model, d_model)), "cattn_wk": nrm((d_model, d_model)),
        "cattn_wv": nrm((d_model, d_model)), "cattn_wo": nrm((d_model, d_model)),
        "cattn_bq": zeros(d_model), "cattn_bk": zeros(d_model),
        "cattn_bv": zeros(d_model), "cattn_bo": zeros(d_model),
        # LayerNorms
        "ln1_g": ones(d_model), "ln1_b": zeros(d_model),
        "ln2_g": ones(d_model), "ln2_b": zeros(d_model),
        "ln3_g": ones(d_model), "ln3_b": zeros(d_model),
        # Extractor conv FFN (w1 stored as (K, Cin, Cout))
        "ffn1_w": nrm((9, d_model, d_hid), s=0.05), "ffn1_b": zeros(d_hid),
        "ffn2_w": nrm((d_hid, d_model), s=0.05), "ffn2_b": zeros(d_model),
    }
    return p


# ---------------------------------- main --------------------------------------


if __name__ == "__main__":
    N, src_len, ref_len = 2, 16, 16
    d_model, input_dim, ref_dim = 32, 16, 16

    key = jax.random.PRNGKey(0)
    k_src, k_ref, k_par = jax.random.split(key, 3)
    srcs = jax.random.normal(k_src, (N, input_dim, src_len), jnp.float32)
    refs = jax.random.normal(k_ref, (N, ref_dim, ref_len), jnp.float32)

    params = init_params(k_par, d_model, input_dim, ref_dim)

    out, attns = unet_block_forward(params, srcs, refs)
    out = jax.block_until_ready(out)
    attn = jax.block_until_ready(attns[0])

    assert out.shape == (src_len, N, d_model), out.shape
    assert attn.shape == (N, src_len, ref_len), attn.shape
    print("KERNEL_OK")
</pallas_src>

<mosaic_0001>
module attributes {stable_mosaic.version = 11 : i64} {
  func.func @_unet_block_kernel(%arg0: i32, %arg1: memref<1x16x16xf32, #tpu.memory_space<vmem>>, %arg2: memref<1x16x16xf32, #tpu.memory_space<vmem>>, %arg3: memref<48x32xf32, #tpu.memory_space<vmem>>, %arg4: memref<1x32xf32, #tpu.memory_space<vmem>>, %arg5: memref<96x32xf32, #tpu.memory_space<vmem>>, %arg6: memref<1x32xf32, #tpu.memory_space<vmem>>, %arg7: memref<96x32xf32, #tpu.memory_space<vmem>>, %arg8: memref<1x32xf32, #tpu.memory_space<vmem>>, %arg9: memref<16x16xf32, #tpu.memory_space<vmem>>, %arg10: memref<1x16xf32, #tpu.memory_space<vmem>>, %arg11: memref<1x16xf32, #tpu.memory_space<vmem>>, %arg12: memref<1x16xf32, #tpu.memory_space<vmem>>, %arg13: memref<16x32xf32, #tpu.memory_space<vmem>>, %arg14: memref<1x32xf32, #tpu.memory_space<vmem>>, %arg15: memref<1x32xf32, #tpu.memory_space<vmem>>, %arg16: memref<1x32xf32, #tpu.memory_space<vmem>>, %arg17: memref<32x32xf32, #tpu.memory_space<vmem>>, %arg18: memref<1x32xf32, #tpu.memory_space<vmem>>, %arg19: memref<1x32xf32, #tpu.memory_space<vmem>>, %arg20: memref<1x32xf32, #tpu.memory_space<vmem>>, %arg21: memref<32x32xf32, #tpu.memory_space<vmem>>, %arg22: memref<1x32xf32, #tpu.memory_space<vmem>>, %arg23: memref<1x32xf32, #tpu.memory_space<vmem>>, %arg24: memref<1x32xf32, #tpu.memory_space<vmem>>, %arg25: memref<32x1xf32, #tpu.memory_space<vmem>>, %arg26: memref<1x1xf32, #tpu.memory_space<vmem>>, %arg27: memref<32x32xf32, #tpu.memory_space<vmem>>, %arg28: memref<1x32xf32, #tpu.memory_space<vmem>>, %arg29: memref<32x96xf32, #tpu.memory_space<vmem>>, %arg30: memref<1x96xf32, #tpu.memory_space<vmem>>, %arg31: memref<32x32xf32, #tpu.memory_space<vmem>>, %arg32: memref<1x32xf32, #tpu.memory_space<vmem>>, %arg33: memref<1x32xf32, #tpu.memory_space<vmem>>, %arg34: memref<1x32xf32, #tpu.memory_space<vmem>>, %arg35: memref<32x32xf32, #tpu.memory_space<vmem>>, %arg36: memref<1x32xf32, #tpu.memory_space<vmem>>, %arg37: memref<32x64xf32, #tpu.memory_space<vmem>>, %arg38: memref<1x64xf32, #tpu.memory_space<vmem>>, %arg39: memref<32x32xf32, #tpu.memory_space<vmem>>, %arg40: memref<1x32xf32, #tpu.memory_space<vmem>>, %arg41: memref<1x32xf32, #tpu.memory_space<vmem>>, %arg42: memref<1x32xf32, #tpu.memory_space<vmem>>, %arg43: memref<288x1024xf32, #tpu.memory_space<vmem>>, %arg44: memref<1x1024xf32, #tpu.memory_space<vmem>>, %arg45: memref<1024x32xf32, #tpu.memory_space<vmem>>, %arg46: memref<1x32xf32, #tpu.memory_space<vmem>>, %arg47: memref<1x32xf32, #tpu.memory_space<vmem>>, %arg48: memref<1x32xf32, #tpu.memory_space<vmem>>, %arg49: memref<1x16x32xf32, #tpu.memory_space<vmem>>, %arg50: memref<1x16x16xf32, #tpu.memory_space<vmem>>, %arg51: memref<16x48xf32, #tpu.memory_space<vmem>>, %arg52: memref<16x96xf32, #tpu.memory_space<vmem>>, %arg53: memref<16x288xf32, #tpu.memory_space<vmem>>, %arg54: memref<16x32xf32, #tpu.memory_space<vmem>>) attributes {dimension_semantics = [#tpu.dimension_semantics<parallel>], iteration_bounds = array<i64: 2>, scalar_prefetch = 0 : i64, scratch_operands = 4 : i64, tpu.core_type = #tpu.core_type<tc>, window_params = [{transform_indices = @transform_0, window_bounds = array<i64: 1, 16, 16>}, {transform_indices = @transform_1, window_bounds = array<i64: 1, 16, 16>}, {pipeline_mode = #tpu.pipeline_mode<synchronous>, transform_indices = @transform_2, window_bounds = array<i64: 48, 32>}, {pipeline_mode = #tpu.pipeline_mode<synchronous>, transform_indices = @transform_3, window_bounds = array<i64: 1, 32>}, {pipeline_mode = #tpu.pipeline_mode<synchronous>, transform_indices = @transform_4, window_bounds = array<i64: 96, 32>}, {pipeline_mode = #tpu.pipeline_mode<synchronous>, transform_indices = @transform_5, window_bounds = array<i64: 1, 32>}, {pipeline_mode = #tpu.pipeline_mode<synchronous>, transform_indices = @transform_6, window_bounds = array<i64: 96, 32>}, {pipeline_mode = #tpu.pipeline_mode<synchronous>, transform_indices = @transform_7, window_bounds = array<i64: 1, 32>}, {pipeline_mode = #tpu.pipeline_mode<synchronous>, transform_indices = @transform_8, window_bounds = array<i64: 16, 16>}, {pipeline_mode = #tpu.pipeline_mode<synchronous>, transform_indices = @transform_9, window_bounds = array<i64: 1, 16>}, {pipeline_mode = #tpu.pipeline_mode<synchronous>, transform_indices = @transform_10, window_bounds = array<i64: 1, 16>}, {pipeline_mode = #tpu.pipeline_mode<synchronous>, transform_indices = @transform_11, window_bounds = array<i64: 1, 16>}, {pipeline_mode = #tpu.pipeline_mode<synchronous>, transform_indices = @transform_12, window_bounds = array<i64: 16, 32>}, {pipeline_mode = #tpu.pipeline_mode<synchronous>, transform_indices = @transform_13, window_bounds = array<i64: 1, 32>}, {pipeline_mode = #tpu.pipeline_mode<synchronous>, transform_indices = @transform_14, window_bounds = array<i64: 1, 32>}, {pipeline_mode = #tpu.pipeline_mode<synchronous>, transform_indices = @transform_15, window_bounds = array<i64: 1, 32>}, {pipeline_mode = #tpu.pipeline_mode<synchronous>, transform_indices = @transform_16, window_bounds = array<i64: 32, 32>}, {pipeline_mode = #tpu.pipeline_mode<synchronous>, transform_indices = @transform_17, window_bounds = array<i64: 1, 32>}, {pipeline_mode = #tpu.pipeline_mode<synchronous>, transform_indices = @transform_18, window_bounds = array<i64: 1, 32>}, {pipeline_mode = #tpu.pipeline_mode<synchronous>, transform_indices = @transform_19, window_bounds = array<i64: 1, 32>}, {pipeline_mode = #tpu.pipeline_mode<synchronous>, transform_indices = @transform_20, window_bounds = array<i64: 32, 32>}, {pipeline_mode = #tpu.pipeline_mode<synchronous>, transform_indices = @transform_21, window_bounds = array<i64: 1, 32>}, {pipeline_mode = #tpu.pipeline_mode<synchronous>, transform_indices = @transform_22, window_bounds = array<i64: 1, 32>}, {pipeline_mode = #tpu.pipeline_mode<synchronous>, transform_indices = @transform_23, window_bounds = array<i64: 1, 32>}, {pipeline_mode = #tpu.pipeline_mode<synchronous>, transform_indices = @transform_24, window_bounds = array<i64: 32, 1>}, {pipeline_mode = #tpu.pipeline_mode<synchronous>, transform_indices = @transform_25, window_bounds = array<i64: 1, 1>}, {pipeline_mode = #tpu.pipeline_mode<synchronous>, transform_indices = @transform_26, window_bounds = array<i64: 32, 32>}, {pipeline_mode = #tpu.pipeline_mode<synchronous>, transform_indices = @transform_27, window_bounds = array<i64: 1, 32>}, {pipeline_mode = #tpu.pipeline_mode<synchronous>, transform_indices = @transform_28, window_bounds = array<i64: 32, 96>}, {pipeline_mode = #tpu.pipeline_mode<synchronous>, transform_indices = @transform_29, window_bounds = array<i64: 1, 96>}, {pipeline_mode = #tpu.pipeline_mode<synchronous>, transform_indices = @transform_30, window_bounds = array<i64: 32, 32>}, {pipeline_mode = #tpu.pipeline_mode<synchronous>, transform_indices = @transform_31, window_bounds = array<i64: 1, 32>}, {pipeline_mode = #tpu.pipeline_mode<synchronous>, transform_indices = @transform_32, window_bounds = array<i64: 1, 32>}, {pipeline_mode = #tpu.pipeline_mode<synchronous>, transform_indices = @transform_33, window_bounds = array<i64: 1, 32>}, {pipeline_mode = #tpu.pipeline_mode<synchronous>, transform_indices = @transform_34, window_bounds = array<i64: 32, 32>}, {pipeline_mode = #tpu.pipeline_mode<synchronous>, transform_indices = @transform_35, window_bounds = array<i64: 1, 32>}, {pipeline_mode = #tpu.pipeline_mode<synchronous>, transform_indices = @transform_36, window_bounds = array<i64: 32, 64>}, {pipeline_mode = #tpu.pipeline_mode<synchronous>, transform_indices = @transform_37, window_bounds = array<i64: 1, 64>}, {pipeline_mode = #tpu.pipeline_mode<synchronous>, transform_indices = @transform_38, window_bounds = array<i64: 32, 32>}, {pipeline_mode = #tpu.pipeline_mode<synchronous>, transform_indices = @transform_39, window_bounds = array<i64: 1, 32>}, {pipeline_mode = #tpu.pipeline_mode<synchronous>, transform_indices = @transform_40, window_bounds = array<i64: 1, 32>}, {pipeline_mode = #tpu.pipeline_mode<synchronous>, transform_indices = @transform_41, window_bounds = array<i64: 1, 32>}, {pipeline_mode = #tpu.pipeline_mode<synchronous>, transform_indices = @transform_42, window_bounds = array<i64: 288, 1024>}, {pipeline_mode = #tpu.pipeline_mode<synchronous>, transform_indices = @transform_43, window_bounds = array<i64: 1, 1024>}, {pipeline_mode = #tpu.pipeline_mode<synchronous>, transform_indices = @transform_44, window_bounds = array<i64: 1024, 32>}, {pipeline_mode = #tpu.pipeline_mode<synchronous>, transform_indices = @transform_45, window_bounds = array<i64: 1, 32>}, {pipeline_mode = #tpu.pipeline_mode<synchronous>, transform_indices = @transform_46, window_bounds = array<i64: 1, 32>}, {pipeline_mode = #tpu.pipeline_mode<synchronous>, transform_indices = @transform_47, window_bounds = array<i64: 1, 32>}, {transform_indices = @transform_48, window_bounds = array<i64: 1, 16, 32>}, {transform_indices = @transform_49, window_bounds = array<i64: 1, 16, 16>}]} {
    %c0 = arith.constant 0 : index
    %c0_0 = arith.constant 0 : index
    %c0_1 = arith.constant 0 : index
    %0 = vector.load %arg1[%c0, %c0_0, %c0_1] : memref<1x16x16xf32, #tpu.memory_space<vmem>>, vector<1x16x16xf32>
    %1 = vector.shape_cast %0 : vector<1x16x16xf32> to vector<16x16xf32>
    %2 = vector.extract_strided_slice %1 {offsets = [0, 0], sizes = [1, 16], strides = [1, 1]} : vector<16x16xf32> to vector<1x16xf32>
    %c0_2 = arith.constant 0 : index
    %c0_3 = arith.constant 0 : index
    %3 = vector.load %arg51[%c0_2, %c0_3] : memref<16x48xf32, #tpu.memory_space<vmem>>, vector<1x16xf32>
    tpu.vector_store %arg51[%c0_2, %c0_3], %2 {strides = array<i32>} : memref<16x48xf32, #tpu.memory_space<vmem>>, vector<1x16xf32>,
    %4 = vector.extract_strided_slice %1 {offsets = [0, 0], sizes = [15, 16], strides = [1, 1]} : vector<16x16xf32> to vector<15x16xf32>
    %c1 = arith.constant 1 : index
    %c0_4 = arith.constant 0 : index
    %5 = vector.load %arg51[%c1, %c0_4] : memref<16x48xf32, #tpu.memory_space<vmem>>, vector<15x16xf32>
    tpu.vector_store %arg51[%c1, %c0_4], %4 {strides = array<i32>} : memref<16x48xf32, #tpu.memory_space<vmem>>, vector<15x16xf32>,
    %c0_5 = arith.constant 0 : index
    %c16 = arith.constant 16 : index
    %6 = vector.load %arg51[%c0_5, %c16] : memref<16x48xf32, #tpu.memory_space<vmem>>, vector<16x16xf32>
    tpu.vector_store %arg51[%c0_5, %c16], %1 {strides = array<i32>} : memref<16x48xf32, #tpu.memory_space<vmem>>, vector<16x16xf32>,
    %7 = vector.extract_strided_slice %1 {offsets = [1, 0], sizes = [15, 16], strides = [1, 1]} : vector<16x16xf32> to vector<15x16xf32>
    %c0_6 = arith.constant 0 : index
    %c32 = arith.constant 32 : index
    %8 = vector.load %arg51[%c0_6, %c32] : memref<16x48xf32, #tpu.memory_space<vmem>>, vector<15x16xf32>
    tpu.vector_store %arg51[%c0_6, %c32], %7 {strides = array<i32>} : memref<16x48xf32, #tpu.memory_space<vmem>>, vector<15x16xf32>,
    %9 = vector.extract_strided_slice %1 {offsets = [15, 0], sizes = [1, 16], strides = [1, 1]} : vector<16x16xf32> to vector<1x16xf32>
    %c15 = arith.constant 15 : index
    %c32_7 = arith.constant 32 : index
    %10 = vector.load %arg51[%c15, %c32_7] : memref<16x48xf32, #tpu.memory_space<vmem>>, vector<1x16xf32>
    tpu.vector_store %arg51[%c15, %c32_7], %9 {strides = array<i32>} : memref<16x48xf32, #tpu.memory_space<vmem>>, vector<1x16xf32>,
    %c0_8 = arith.constant 0 : index
    %c0_9 = arith.constant 0 : index
    %11 = vector.load %arg51[%c0_8, %c0_9] : memref<16x48xf32, #tpu.memory_space<vmem>>, vector<16x48xf32>
    %c0_10 = arith.constant 0 : index
    %c0_11 = arith.constant 0 : index
    %12 = vector.load %arg3[%c0_10, %c0_11] : memref<48x32xf32, #tpu.memory_space<vmem>>, vector<48x32xf32>
    %cst = arith.constant dense<0.000000e+00> : vector<16x32xf32>
    %13 = tpu.matmul %11, %12, %cst {dimension_numbers = #tpu.dot_dimension_numbers<[1], [0], [0], [1], [0, 0, 1, 1], [], []>} : vector<16x48xf32>, vector<48x32xf32>, vector<16x32xf32> -> vector<16x32xf32>
    %c0_12 = arith.constant 0 : index
    %c0_13 = arith.constant 0 : index
    %14 = vector.load %arg4[%c0_12, %c0_13] : memref<1x32xf32, #tpu.memory_space<vmem>>, vector<1x32xf32>
    %15 = vector.broadcast %14 : vector<1x32xf32> to vector<16x32xf32>
    %16 = arith.addf %13, %15 : vector<16x32xf32>
    %cst_14 = arith.constant 0.000000e+00 : f32
    %17 = vector.broadcast %cst_14 : f32 to vector<16x32xf32>
    %18 = arith.maximumf %16, %17 : vector<16x32xf32>
    %19 = vector.extract_strided_slice %18 {offsets = [0, 0], sizes = [1, 32], strides = [1, 1]} : vector<16x32xf32> to vector<1x32xf32>
    %c0_15 = arith.constant 0 : index
    %c0_16 = arith.constant 0 : index
    %20 = vector.load %arg52[%c0_15, %c0_16] : memref<16x96xf32, #tpu.memory_space<vmem>>, vector<1x32xf32>
    tpu.vector_store %arg52[%c0_15, %c0_16], %19 {strides = array<i32>} : memref<16x96xf32, #tpu.memory_space<vmem>>, vector<1x32xf32>,
    %21 = vector.extract_strided_slice %18 {offsets = [0, 0], sizes = [15, 32], strides = [1, 1]} : vector<16x32xf32> to vector<15x32xf32>
    %c1_17 = arith.constant 1 : index
    %c0_18 = arith.constant 0 : index
    %22 = vector.load %arg52[%c1_17, %c0_18] : memref<16x96xf32, #tpu.memory_space<vmem>>, vector<15x32xf32>
    tpu.vector_store %arg52[%c1_17, %c0_18], %21 {strides = array<i32>} : memref<16x96xf32, #tpu.memory_space<vmem>>, vector<15x32xf32>,
    %c0_19 = arith.constant 0 : index
    %c32_20 = arith.constant 32 : index
    %23 = vector.load %arg52[%c0_19, %c32_20] : memref<16x96xf32, #tpu.memory_space<vmem>>, vector<16x32xf32>
    tpu.vector_store %arg52[%c0_19, %c32_20], %18 {strides = array<i32>} : memref<16x96xf32, #tpu.memory_space<vmem>>, vector<16x32xf32>,
    %24 = vector.extract_strided_slice %18 {offsets = [1, 0], sizes = [15, 32], strides = [1, 1]} : vector<16x32xf32> to vector<15x32xf32>
    %c0_21 = arith.constant 0 : index
    %c64 = arith.constant 64 : index
    %25 = vector.load %arg52[%c0_21, %c64] : memref<16x96xf32, #tpu.memory_space<vmem>>, vector<15x32xf32>
    tpu.vector_store %arg52[%c0_21, %c64], %24 {strides = array<i32>} : memref<16x96xf32, #tpu.memory_space<vmem>>, vector<15x32xf32>,
    %26 = vector.extract_strided_slice %18 {offsets = [15, 0], sizes = [1, 32], strides = [1, 1]} : vector<16x32xf32> to vector<1x32xf32>
    %c15_22 = arith.constant 15 : index
    %c64_23 = arith.constant 64 : index
    %27 = vector.load %arg52[%c15_22, %c64_23] : memref<16x96xf32, #tpu.memory_space<vmem>>, vector<1x32xf32>
    tpu.vector_store %arg52[%c15_22, %c64_23], %26 {strides = array<i32>} : memref<16x96xf32, #tpu.memory_space<vmem>>, vector<1x32xf32>,
    %c0_24 = arith.constant 0 : index
    %c0_25 = arith.constant 0 : index
    %28 = vector.load %arg52[%c0_24, %c0_25] : memref<16x96xf32, #tpu.memory_space<vmem>>, vector<16x96xf32>
    %c0_26 = arith.constant 0 : index
    %c0_27 = arith.constant 0 : index
    %29 = vector.load %arg5[%c0_26, %c0_27] : memref<96x32xf32, #tpu.memory_space<vmem>>, vector<96x32xf32>
    %cst_28 = arith.constant dense<0.000000e+00> : vector<16x32xf32>
    %30 = tpu.matmul %28, %29, %cst_28 {dimension_numbers = #tpu.dot_dimension_numbers<[1], [0], [0], [1], [0, 0, 1, 1], [], []>} : vector<16x96xf32>, vector<96x32xf32>, vector<16x32xf32> -> vector<16x32xf32>
    %c0_29 = arith.constant 0 : index
    %c0_30 = arith.constant 0 : index
    %31 = vector.load %arg6[%c0_29, %c0_30] : memref<1x32xf32, #tpu.memory_space<vmem>>, vector<1x32xf32>
    %32 = vector.broadcast %31 : vector<1x32xf32> to vector<16x32xf32>
    %33 = arith.addf %30, %32 : vector<16x32xf32>
    %cst_31 = arith.constant 0.000000e+00 : f32
    %34 = vector.broadcast %cst_31 : f32 to vector<16x32xf32>
    %35 = arith.maximumf %33, %34 : vector<16x32xf32>
    %36 = vector.extract_strided_slice %35 {offsets = [0, 0], sizes = [1, 32], strides = [1, 1]} : vector<16x32xf32> to vector<1x32xf32>
    %c0_32 = arith.constant 0 : index
    %c0_33 = arith.constant 0 : index
    %37 = vector.load %arg52[%c0_32, %c0_33] : memref<16x96xf32, #tpu.memory_space<vmem>>, vector<1x32xf32>
    tpu.vector_store %arg52[%c0_32, %c0_33], %36 {strides = array<i32>} : memref<16x96xf32, #tpu.memory_space<vmem>>, vector<1x32xf32>,
    %38 = vector.extract_strided_slice %35 {offsets = [0, 0], sizes = [15, 32], strides = [1, 1]} : vector<16x32xf32> to vector<15x32xf32>
    %c1_34 = arith.constant 1 : index
    %c0_35 = arith.constant 0 : index
    %39 = vector.load %arg52[%c1_34, %c0_35] : memref<16x96xf32, #tpu.memory_space<vmem>>, vector<15x32xf32>
    tpu.vector_store %arg52[%c1_34, %c0_35], %38 {strides = array<i32>} : memref<16x96xf32, #tpu.memory_space<vmem>>, vector<15x32xf32>,
    %c0_36 = arith.constant 0 : index
    %c32_37 = arith.constant 32 : index
    %40 = vector.load %arg52[%c0_36, %c32_37] : memref<16x96xf32, #tpu.memory_space<vmem>>, vector<16x32xf32>
    tpu.vector_store %arg52[%c0_36, %c32_37], %35 {strides = array<i32>} : memref<16x96xf32, #tpu.memory_space<vmem>>, vector<16x32xf32>,
    %41 = vector.extract_strided_slice %35 {offsets = [1, 0], sizes = [15, 32], strides = [1, 1]} : vector<16x32xf32> to vector<15x32xf32>
    %c0_38 = arith.constant 0 : index
    %c64_39 = arith.constant 64 : index
    %42 = vector.load %arg52[%c0_38, %c64_39] : memref<16x96xf32, #tpu.memory_space<vmem>>, vector<15x32xf32>
    tpu.vector_store %arg52[%c0_38, %c64_39], %41 {strides = array<i32>} : memref<16x96xf32, #tpu.memory_space<vmem>>, vector<15x32xf32>,
    %43 = vector.extract_strided_slice %35 {offsets = [15, 0], sizes = [1, 32], strides = [1, 1]} : vector<16x32xf32> to vector<1x32xf32>
    %c15_40 = arith.constant 15 : index
    %c64_41 = arith.constant 64 : index
    %44 = vector.load %arg52[%c15_40, %c64_41] : memref<16x96xf32, #tpu.memory_space<vmem>>, vector<1x32xf32>
    tpu.vector_store %arg52[%c15_40, %c64_41], %43 {strides = array<i32>} : memref<16x96xf32, #tpu.memory_space<vmem>>, vector<1x32xf32>,
    %c0_42 = arith.constant 0 : index
    %c0_43 = arith.constant 0 : index
    %45 = vector.load %arg52[%c0_42, %c0_43] : memref<16x96xf32, #tpu.memory_space<vmem>>, vector<16x96xf32>
    %c0_44 = arith.constant 0 : index
    %c0_45 = arith.constant 0 : index
    %46 = vector.load %arg7[%c0_44, %c0_45] : memref<96x32xf32, #tpu.memory_space<vmem>>, vector<96x32xf32>
    %cst_46 = arith.constant dense<0.000000e+00> : vector<16x32xf32>
    %47 = tpu.matmul %45, %46, %cst_46 {dimension_numbers = #tpu.dot_dimension_numbers<[1], [0], [0], [1], [0, 0, 1, 1], [], []>} : vector<16x96xf32>, vector<96x32xf32>, vector<16x32xf32> -> vector<16x32xf32>
    %c0_47 = arith.constant 0 : index
    %c0_48 = arith.constant 0 : index
    %48 = vector.load %arg8[%c0_47, %c0_48] : memref<1x32xf32, #tpu.memory_space<vmem>>, vector<1x32xf32>
    %49 = vector.broadcast %48 : vector<1x32xf32> to vector<16x32xf32>
    %50 = arith.addf %47, %49 : vector<16x32xf32>
    %c0_49 = arith.constant 0 : index
    %c0_50 = arith.constant 0 : index
    %c0_51 = arith.constant 0 : index
    %51 = vector.load %arg2[%c0_49, %c0_50, %c0_51] : memref<1x16x16xf32, #tpu.memory_space<vmem>>, vector<1x16x16xf32>
    %52 = vector.shape_cast %51 : vector<1x16x16xf32> to vector<16x16xf32>
    %c0_52 = arith.constant 0 : index
    %c0_53 = arith.constant 0 : index
    %53 = vector.load %arg9[%c0_52, %c0_53] : memref<16x16xf32, #tpu.memory_space<vmem>>, vector<16x16xf32>
    %cst_54 = arith.constant dense<0.000000e+00> : vector<16x16xf32>
    %54 = tpu.matmul %52, %53, %cst_54 {dimension_numbers = #tpu.dot_dimension_numbers<[1], [0], [0], [1], [0, 0, 1, 1], [], []>} : vector<16x16xf32>, vector<16x16xf32>, vector<16x16xf32> -> vector<16x16xf32>
    %c0_55 = arith.constant 0 : index
    %c0_56 = arith.constant 0 : index
    %55 = vector.load %arg10[%c0_55, %c0_56] : memref<1x16xf32, #tpu.memory_space<vmem>>, vector<1x16xf32>
    %56 = vector.broadcast %55 : vector<1x16xf32> to vector<16x16xf32>
    %57 = arith.addf %54, %56 : vector<16x16xf32>
    %cst_57 = arith.constant 0.000000e+00 : f32
    %58 = vector.broadcast %cst_57 : f32 to vector<16x16xf32>
    %59 = arith.maximumf %57, %58 : vector<16x16xf32>
    %c0_58 = arith.constant 0 : index
    %c0_59 = arith.constant 0 : index
    %60 = vector.load %arg11[%c0_58, %c0_59] : memref<1x16xf32, #tpu.memory_space<vmem>>, vector<1x16xf32>
    %61 = vector.broadcast %60 : vector<1x16xf32> to vector<16x16xf32>
    %62 = arith.mulf %59, %61 : vector<16x16xf32>
    %c0_60 = arith.constant 0 : index
    %c0_61 = arith.constant 0 : index
    %63 = vector.load %arg12[%c0_60, %c0_61] : memref<1x16xf32, #tpu.memory_space<vmem>>, vector<1x16xf32>
    %64 = vector.broadcast %63 : vector<1x16xf32> to vector<16x16xf32>
    %65 = arith.addf %62, %64 : vector<16x16xf32>
    %c0_62 = arith.constant 0 : index
    %c0_63 = arith.constant 0 : index
    %66 = vector.load %arg13[%c0_62, %c0_63] : memref<16x32xf32, #tpu.memory_space<vmem>>, vector<16x32xf32>
    %cst_64 = arith.constant dense<0.000000e+00> : vector<16x32xf32>
    %67 = tpu.matmul %65, %66, %cst_64 {dimension_numbers = #tpu.dot_dimension_numbers<[1], [0], [0], [1], [0, 0, 1, 1], [], []>} : vector<16x16xf32>, vector<16x32xf32>, vector<16x32xf32> -> vector<16x32xf32>
    %c0_65 = arith.constant 0 : index
    %c0_66 = arith.constant 0 : index
    %68 = vector.load %arg14[%c0_65, %c0_66] : memref<1x32xf32, #tpu.memory_space<vmem>>, vector<1x32xf32>
    %69 = vector.broadcast %68 : vector<1x32xf32> to vector<16x32xf32>
    %70 = arith.addf %67, %69 : vector<16x32xf32>
    %cst_67 = arith.constant 0.000000e+00 : f32
    %71 = vector.broadcast %cst_67 : f32 to vector<16x32xf32>
    %72 = arith.maximumf %70, %71 : vector<16x32xf32>
    %c0_68 = arith.constant 0 : index
    %c0_69 = arith.constant 0 : index
    %73 = vector.load %arg15[%c0_68, %c0_69] : memref<1x32xf32, #tpu.memory_space<vmem>>, vector<1x32xf32>
    %74 = vector.broadcast %73 : vector<1x32xf32> to vector<16x32xf32>
    %75 = arith.mulf %72, %74 : vector<16x32xf32>
    %c0_70 = arith.constant 0 : index
    %c0_71 = arith.constant 0 : index
    %76 = vector.load %arg16[%c0_70, %c0_71] : memref<1x32xf32, #tpu.memory_space<vmem>>, vector<1x32xf32>
    %77 = vector.broadcast %76 : vector<1x32xf32> to vector<16x32xf32>
    %78 = arith.addf %75, %77 : vector<16x32xf32>
    %c0_72 = arith.constant 0 : index
    %c0_73 = arith.constant 0 : index
    %79 = vector.load %arg17[%c0_72, %c0_73] : memref<32x32xf32, #tpu.memory_space<vmem>>, vector<32x32xf32>
    %cst_74 = arith.constant dense<0.000000e+00> : vector<16x32xf32>
    %80 = tpu.matmul %78, %79, %cst_74 {dimension_numbers = #tpu.dot_dimension_numbers<[1], [0], [0], [1], [0, 0, 1, 1], [], []>} : vector<16x32xf32>, vector<32x32xf32>, vector<16x32xf32> -> vector<16x32xf32>
    %c0_75 = arith.constant 0 : index
    %c0_76 = arith.constant 0 : index
    %81 = vector.load %arg18[%c0_75, %c0_76] : memref<1x32xf32, #tpu.memory_space<vmem>>, vector<1x32xf32>
    %82 = vector.broadcast %81 : vector<1x32xf32> to vector<16x32xf32>
    %83 = arith.addf %80, %82 : vector<16x32xf32>
    %cst_77 = arith.constant 0.000000e+00 : f32
    %84 = vector.broadcast %cst_77 : f32 to vector<16x32xf32>
    %85 = arith.maximumf %83, %84 : vector<16x32xf32>
    %c0_78 = arith.constant 0 : index
    %c0_79 = arith.constant 0 : index
    %86 = vector.load %arg19[%c0_78, %c0_79] : memref<1x32xf32, #tpu.memory_space<vmem>>, vector<1x32xf32>
    %87 = vector.broadcast %86 : vector<1x32xf32> to vector<16x32xf32>
    %88 = arith.mulf %85, %87 : vector<16x32xf32>
    %c0_80 = arith.constant 0 : index
    %c0_81 = arith.constant 0 : index
    %89 = vector.load %arg20[%c0_80, %c0_81] : memref<1x32xf32, #tpu.memory_space<vmem>>, vector<1x32xf32>
    %90 = vector.broadcast %89 : vector<1x32xf32> to vector<16x32xf32>
    %91 = arith.addf %88, %90 : vector<16x32xf32>
    %c0_82 = arith.constant 0 : index
    %c0_83 = arith.constant 0 : index
    %92 = vector.load %arg21[%c0_82, %c0_83] : memref<32x32xf32, #tpu.memory_space<vmem>>, vector<32x32xf32>
    %cst_84 = arith.constant dense<0.000000e+00> : vector<16x32xf32>
    %93 = tpu.matmul %91, %92, %cst_84 {dimension_numbers = #tpu.dot_dimension_numbers<[1], [0], [0], [1], [0, 0, 1, 1], [], []>} : vector<16x32xf32>, vector<32x32xf32>, vector<16x32xf32> -> vector<16x32xf32>
    %c0_85 = arith.constant 0 : index
    %c0_86 = arith.constant 0 : index
    %94 = vector.load %arg22[%c0_85, %c0_86] : memref<1x32xf32, #tpu.memory_space<vmem>>, vector<1x32xf32>
    %95 = vector.broadcast %94 : vector<1x32xf32> to vector<16x32xf32>
    %96 = arith.addf %93, %95 : vector<16x32xf32>
    %cst_87 = arith.constant 0.000000e+00 : f32
    %97 = vector.broadcast %cst_87 : f32 to vector<16x32xf32>
    %98 = arith.maximumf %96, %97 : vector<16x32xf32>
    %c0_88 = arith.constant 0 : index
    %c0_89 = arith.constant 0 : index
    %99 = vector.load %arg23[%c0_88, %c0_89] : memref<1x32xf32, #tpu.memory_space<vmem>>, vector<1x32xf32>
    %100 = vector.broadcast %99 : vector<1x32xf32> to vector<16x32xf32>
    %101 = arith.mulf %98, %100 : vector<16x32xf32>
    %c0_90 = arith.constant 0 : index
    %c0_91 = arith.constant 0 : index
    %102 = vector.load %arg24[%c0_90, %c0_91] : memref<1x32xf32, #tpu.memory_space<vmem>>, vector<1x32xf32>
    %103 = vector.broadcast %102 : vector<1x32xf32> to vector<16x32xf32>
    %104 = arith.addf %101, %103 : vector<16x32xf32>
    %c0_92 = arith.constant 0 : index
    %c0_93 = arith.constant 0 : index
    %105 = vector.load %arg25[%c0_92, %c0_93] : memref<32x1xf32, #tpu.memory_space<vmem>>, vector<32x1xf32>
    %cst_94 = arith.constant dense<0.000000e+00> : vector<16x1xf32>
    %106 = tpu.matmul %50, %105, %cst_94 {dimension_numbers = #tpu.dot_dimension_numbers<[1], [0], [0], [1], [0, 0, 1, 1], [], []>} : vector<16x32xf32>, vector<32x1xf32>, vector<16x1xf32> -> vector<16x1xf32>
    %c0_95 = arith.constant 0 : index
    %c0_96 = arith.constant 0 : index
    %107 = vector.load %arg26[%c0_95, %c0_96] : memref<1x1xf32, #tpu.memory_space<vmem>>, vector<1x1xf32>
    %108 = vector.broadcast %107 : vector<1x1xf32> to vector<16x1xf32>
    %109 = arith.addf %106, %108 : vector<16x1xf32>
    %cst_97 = arith.constant dense<0xFF800000> : vector<1xf32>
    %110 = vector.multi_reduction <maximumf>, %109, %cst_97 [0] : vector<16x1xf32> to vector<1xf32>
    %111 = vector.shape_cast %110 : vector<1xf32> to vector<1x1xf32>
    %112 = vector.broadcast %111 : vector<1x1xf32> to vector<16x1xf32>
    %113 = arith.subf %109, %112 : vector<16x1xf32>
    %114 = math.exp %113 : vector<16x1xf32>
    %cst_98 = arith.constant dense<0.000000e+00> : vector<1xf32>
    %115 = vector.multi_reduction <add>, %114, %cst_98 [0] : vector<16x1xf32> to vector<1xf32>
    %116 = vector.shape_cast %115 : vector<1xf32> to vector<1x1xf32>
    %117 = vector.broadcast %116 : vector<1x1xf32> to vector<16x1xf32>
    %118 = arith.divf %114, %117 : vector<16x1xf32>
    %119 = vector.broadcast %118 : vector<16x1xf32> to vector<16x32xf32>
    %120 = arith.mulf %50, %119 : vector<16x32xf32>
    %cst_99 = arith.constant dense<0.000000e+00> : vector<32xf32>
    %121 = vector.multi_reduction <add>, %120, %cst_99 [0] : vector<16x32xf32> to vector<32xf32>
    %122 = vector.shape_cast %121 : vector<32xf32> to vector<1x32xf32>
    %c0_100 = arith.constant 0 : index
    %c0_101 = arith.constant 0 : index
    %123 = vector.load %arg27[%c0_100, %c0_101] : memref<32x32xf32, #tpu.memory_space<vmem>>, vector<32x32xf32>
    %cst_102 = arith.constant dense<0.000000e+00> : vector<1x32xf32>
    %124 = tpu.matmul %122, %123, %cst_102 {dimension_numbers = #tpu.dot_dimension_numbers<[1], [0], [0], [1], [0, 0, 1, 1], [], []>} : vector<1x32xf32>, vector<32x32xf32>, vector<1x32xf32> -> vector<1x32xf32>
    %c0_103 = arith.constant 0 : index
    %c0_104 = arith.constant 0 : index
    %125 = vector.load %arg28[%c0_103, %c0_104] : memref<1x32xf32, #tpu.memory_space<vmem>>, vector<1x32xf32>
    %126 = arith.addf %124, %125 : vector<1x32xf32>
    %cst_105 = arith.constant 0.000000e+00 : f32
    %127 = vector.broadcast %cst_105 : f32 to vector<1x32xf32>
    %128 = arith.maximumf %126, %127 : vector<1x32xf32>
    %129 = vector.broadcast %128 : vector<1x32xf32> to vector<16x32xf32>
    %130 = arith.mulf %104, %129 : vector<16x32xf32>
    %c0_106 = arith.constant 0 : index
    %c0_107 = arith.constant 0 : index
    %131 = vector.load %arg29[%c0_106, %c0_107] : memref<32x96xf32, #tpu.memory_space<vmem>>, vector<32x96xf32>
    %cst_108 = arith.constant dense<0.000000e+00> : vector<16x96xf32>
    %132 = tpu.matmul %130, %131, %cst_108 {dimension_numbers = #tpu.dot_dimension_numbers<[1], [0], [0], [1], [0, 0, 1, 1], [], []>} : vector<16x32xf32>, vector<32x96xf32>, vector<16x96xf32> -> vector<16x96xf32>
    %c0_109 = arith.constant 0 : index
    %c0_110 = arith.constant 0 : index
    %133 = vector.load %arg30[%c0_109, %c0_110] : memref<1x96xf32, #tpu.memory_space<vmem>>, vector<1x96xf32>
    %134 = vector.broadcast %133 : vector<1x96xf32> to vector<16x96xf32>
    %135 = arith.addf %132, %134 : vector<16x96xf32>
    %136 = vector.extract_strided_slice %135 {offsets = [0, 0], sizes = [16, 32], strides = [1, 1]} : vector<16x96xf32> to vector<16x32xf32>
    %137 = vector.extract_strided_slice %135 {offsets = [0, 32], sizes = [16, 32], strides = [1, 1]} : vector<16x96xf32> to vector<16x32xf32>
    %138 = vector.extract_strided_slice %135 {offsets = [0, 64], sizes = [16, 32], strides = [1, 1]} : vector<16x96xf32> to vector<16x32xf32>
    %139 = vector.extract_strided_slice %136 {offsets = [0, 0], sizes = [16, 16], strides = [1, 1]} : vector<16x32xf32> to vector<16x16xf32>
    %cst_111 = arith.constant 2.500000e-01 : f32
    %140 = vector.broadcast %cst_111 : f32 to vector<16x16xf32>
    %141 = arith.mulf %139, %140 : vector<16x16xf32>
    %142 = vector.extract_strided_slice %137 {offsets = [0, 0], sizes = [16, 16], strides = [1, 1]} : vector<16x32xf32> to vector<16x16xf32>
    %cst_112 = arith.constant dense<0.000000e+00> : vector<16x16xf32>
    %143 = tpu.matmul %141, %142, %cst_112 {dimension_numbers = #tpu.dot_dimension_numbers<[1], [1], [0], [0], [0, 0, 1, 0], [], []>} : vector<16x16xf32>, vector<16x16xf32>, vector<16x16xf32> -> vector<16x16xf32>
    %cst_113 = arith.constant dense<0xFF800000> : vector<16xf32>
    %144 = vector.multi_reduction <maximumf>, %143, %cst_113 [1] : vector<16x16xf32> to vector<16xf32>
    %145 = vector.shape_cast %144 : vector<16xf32> to vector<16x1xf32>
    %146 = vector.broadcast %145 : vector<16x1xf32> to vector<16x16xf32>
    %147 = arith.subf %143, %146 : vector<16x16xf32>
    %148 = math.exp %147 : vector<16x16xf32>
    %cst_114 = arith.constant dense<0.000000e+00> : vector<16xf32>
    %149 = vector.multi_reduction <add>, %148, %cst_114 [1] : vector<16x16xf32> to vector<16xf32>
    %150 = vector.shape_cast %149 : vector<16xf32> to vector<16x1xf32>
    %151 = vector.broadcast %150 : vector<16x1xf32> to vector<16x16xf32>
    %152 = arith.divf %148, %151 : vector<16x16xf32>
    %153 = vector.extract_strided_slice %138 {offsets = [0, 0], sizes = [16, 16], strides = [1, 1]} : vector<16x32xf32> to vector<16x16xf32>
    %cst_115 = arith.constant dense<0.000000e+00> : vector<16x16xf32>
    %154 = tpu.matmul %152, %153, %cst_115 {dimension_numbers = #tpu.dot_dimension_numbers<[1], [0], [0], [1], [0, 0, 1, 1], [], []>} : vector<16x16xf32>, vector<16x16xf32>, vector<16x16xf32> -> vector<16x16xf32>
    %c0_116 = arith.constant 0 : index
    %c0_117 = arith.constant 0 : index
    %155 = vector.load %arg54[%c0_116, %c0_117] : memref<16x32xf32, #tpu.memory_space<vmem>>, vector<16x16xf32>
    tpu.vector_store %arg54[%c0_116, %c0_117], %154 {strides = array<i32>} : memref<16x32xf32, #tpu.memory_space<vmem>>, vector<16x16xf32>,
    %156 = vector.extract_strided_slice %136 {offsets = [0, 16], sizes = [16, 16], strides = [1, 1]} : vector<16x32xf32> to vector<16x16xf32>
    %cst_118 = arith.constant 2.500000e-01 : f32
    %157 = vector.broadcast %cst_118 : f32 to vector<16x16xf32>
    %158 = arith.mulf %156, %157 : vector<16x16xf32>
    %159 = vector.extract_strided_slice %137 {offsets = [0, 16], sizes = [16, 16], strides = [1, 1]} : vector<16x32xf32> to vector<16x16xf32>
    %cst_119 = arith.constant dense<0.000000e+00> : vector<16x16xf32>
    %160 = tpu.matmul %158, %159, %cst_119 {dimension_numbers = #tpu.dot_dimension_numbers<[1], [1], [0], [0], [0, 0, 1, 0], [], []>} : vector<16x16xf32>, vector<16x16xf32>, vector<16x16xf32> -> vector<16x16xf32>
    %cst_120 = arith.constant dense<0xFF800000> : vector<16xf32>
    %161 = vector.multi_reduction <maximumf>, %160, %cst_120 [1] : vector<16x16xf32> to vector<16xf32>
    %162 = vector.shape_cast %161 : vector<16xf32> to vector<16x1xf32>
    %163 = vector.broadcast %162 : vector<16x1xf32> to vector<16x16xf32>
    %164 = arith.subf %160, %163 : vector<16x16xf32>
    %165 = math.exp %164 : vector<16x16xf32>
    %cst_121 = arith.constant dense<0.000000e+00> : vector<16xf32>
    %166 = vector.multi_reduction <add>, %165, %cst_121 [1] : vector<16x16xf32> to vector<16xf32>
    %167 = vector.shape_cast %166 : vector<16xf32> to vector<16x1xf32>
    %168 = vector.broadcast %167 : vector<16x1xf32> to vector<16x16xf32>
    %169 = arith.divf %165, %168 : vector<16x16xf32>
    %170 = vector.extract_strided_slice %138 {offsets = [0, 16], sizes = [16, 16], strides = [1, 1]} : vector<16x32xf32> to vector<16x16xf32>
    %cst_122 = arith.constant dense<0.000000e+00> : vector<16x16xf32>
    %171 = tpu.matmul %169, %170, %cst_122 {dimension_numbers = #tpu.dot_dimension_numbers<[1], [0], [0], [1], [0, 0, 1, 1], [], []>} : vector<16x16xf32>, vector<16x16xf32>, vector<16x16xf32> -> vector<16x16xf32>
    %c0_123 = arith.constant 0 : index
    %c16_124 = arith.constant 16 : index
    %172 = vector.load %arg54[%c0_123, %c16_124] : memref<16x32xf32, #tpu.memory_space<vmem>>, vector<16x16xf32>
    tpu.vector_store %arg54[%c0_123, %c16_124], %171 {strides = array<i32>} : memref<16x32xf32, #tpu.memory_space<vmem>>, vector<16x16xf32>,
    %c0_125 = arith.constant 0 : index
    %c0_126 = arith.constant 0 : index
    %173 = vector.load %arg54[%c0_125, %c0_126] : memref<16x32xf32, #tpu.memory_space<vmem>>, vector<16x32xf32>
    %c0_127 = arith.constant 0 : index
    %c0_128 = arith.constant 0 : index
    %174 = vector.load %arg31[%c0_127, %c0_128] : memref<32x32xf32, #tpu.memory_space<vmem>>, vector<32x32xf32>
    %cst_129 = arith.constant dense<0.000000e+00> : vector<16x32xf32>
    %175 = tpu.matmul %173, %174, %cst_129 {dimension_numbers = #tpu.dot_dimension_numbers<[1], [0], [0], [1], [0, 0, 1, 1], [], []>} : vector<16x32xf32>, vector<32x32xf32>, vector<16x32xf32> -> vector<16x32xf32>
    %c0_130 = arith.constant 0 : index
    %c0_131 = arith.constant 0 : index
    %176 = vector.load %arg32[%c0_130, %c0_131] : memref<1x32xf32, #tpu.memory_space<vmem>>, vector<1x32xf32>
    %177 = vector.broadcast %176 : vector<1x32xf32> to vector<16x32xf32>
    %178 = arith.addf %175, %177 : vector<16x32xf32>
    %179 = arith.addf %130, %178 : vector<16x32xf32>
    %cst_132 = arith.constant dense<0.000000e+00> : vector<16xf32>
    %180 = vector.multi_reduction <add>, %179, %cst_132 [1] : vector<16x32xf32> to vector<16xf32>
    %181 = vector.shape_cast %180 : vector<16xf32> to vector<16x1xf32>
    %cst_133 = arith.constant 3.200000e+01 : f32
    %182 = vector.broadcast %cst_133 : f32 to vector<16x1xf32>
    %183 = arith.divf %181, %182 : vector<16x1xf32>
    %184 = vector.broadcast %183 : vector<16x1xf32> to vector<16x32xf32>
    %185 = arith.subf %179, %184 : vector<16x32xf32>
    %186 = arith.mulf %185, %185 : vector<16x32xf32>
    %cst_134 = arith.constant dense<0.000000e+00> : vector<16xf32>
    %187 = vector.multi_reduction <add>, %186, %cst_134 [1] : vector<16x32xf32> to vector<16xf32>
    %188 = vector.shape_cast %187 : vector<16xf32> to vector<16x1xf32>
    %cst_135 = arith.constant 3.200000e+01 : f32
    %189 = vector.broadcast %cst_135 : f32 to vector<16x1xf32>
    %190 = arith.divf %188, %189 : vector<16x1xf32>
    %191 = vector.broadcast %183 : vector<16x1xf32> to vector<16x32xf32>
    %192 = arith.subf %179, %191 : vector<16x32xf32>
    %cst_136 = arith.constant 9.99999974E-6 : f32
    %193 = vector.broadcast %cst_136 : f32 to vector<16x1xf32>
    %194 = arith.addf %190, %193 : vector<16x1xf32>
    %195 = math.rsqrt %194 : vector<16x1xf32>
    %196 = vector.broadcast %195 : vector<16x1xf32> to vector<16x32xf32>
    %197 = arith.mulf %192, %196 : vector<16x32xf32>
    %c0_137 = arith.constant 0 : index
    %c0_138 = arith.constant 0 : index
    %198 = vector.load %arg33[%c0_137, %c0_138] : memref<1x32xf32, #tpu.memory_space<vmem>>, vector<1x32xf32>
    %199 = vector.broadcast %198 : vector<1x32xf32> to vector<16x32xf32>
    %200 = arith.mulf %197, %199 : vector<16x32xf32>
    %c0_139 = arith.constant 0 : index
    %c0_140 = arith.constant 0 : index
    %201 = vector.load %arg34[%c0_139, %c0_140] : memref<1x32xf32, #tpu.memory_space<vmem>>, vector<1x32xf32>
    %202 = vector.broadcast %201 : vector<1x32xf32> to vector<16x32xf32>
    %203 = arith.addf %200, %202 : vector<16x32xf32>
    %c0_141 = arith.constant 0 : index
    %c0_142 = arith.constant 0 : index
    %204 = vector.load %arg35[%c0_141, %c0_142] : memref<32x32xf32, #tpu.memory_space<vmem>>, vector<32x32xf32>
    %cst_143 = arith.constant dense<0.000000e+00> : vector<16x32xf32>
    %205 = tpu.matmul %203, %204, %cst_143 {dimension_numbers = #tpu.dot_dimension_numbers<[1], [0], [0], [1], [0, 0, 1, 1], [], []>} : vector<16x32xf32>, vector<32x32xf32>, vector<16x32xf32> -> vector<16x32xf32>
    %c0_144 = arith.constant 0 : index
    %c0_145 = arith.constant 0 : index
    %206 = vector.load %arg36[%c0_144, %c0_145] : memref<1x32xf32, #tpu.memory_space<vmem>>, vector<1x32xf32>
    %207 = vector.broadcast %206 : vector<1x32xf32> to vector<16x32xf32>
    %208 = arith.addf %205, %207 : vector<16x32xf32>
    %c0_146 = arith.constant 0 : index
    %c0_147 = arith.constant 0 : index
    %209 = vector.load %arg37[%c0_146, %c0_147] : memref<32x64xf32, #tpu.memory_space<vmem>>, vector<32x64xf32>
    %cst_148 = arith.constant dense<0.000000e+00> : vector<16x64xf32>
    %210 = tpu.matmul %50, %209, %cst_148 {dimension_numbers = #tpu.dot_dimension_numbers<[1], [0], [0], [1], [0, 0, 1, 1], [], []>} : vector<16x32xf32>, vector<32x64xf32>, vector<16x64xf32> -> vector<16x64xf32>
    %c0_149 = arith.constant 0 : index
    %c0_150 = arith.constant 0 : index
    %211 = vector.load %arg38[%c0_149, %c0_150] : memref<1x64xf32, #tpu.memory_space<vmem>>, vector<1x64xf32>
    %212 = vector.broadcast %211 : vector<1x64xf32> to vector<16x64xf32>
    %213 = arith.addf %210, %212 : vector<16x64xf32>
    %214 = vector.extract_strided_slice %213 {offsets = [0, 0], sizes = [16, 32], strides = [1, 1]} : vector<16x64xf32> to vector<16x32xf32>
    %215 = vector.extract_strided_slice %213 {offsets = [0, 32], sizes = [16, 32], strides = [1, 1]} : vector<16x64xf32> to vector<16x32xf32>
    %216 = vector.extract_strided_slice %208 {offsets = [0, 0], sizes = [16, 16], strides = [1, 1]} : vector<16x32xf32> to vector<16x16xf32>
    %cst_151 = arith.constant 2.500000e-01 : f32
    %217 = vector.broadcast %cst_151 : f32 to vector<16x16xf32>
    %218 = arith.mulf %216, %217 : vector<16x16xf32>
    %219 = vector.extract_strided_slice %214 {offsets = [0, 0], sizes = [16, 16], strides = [1, 1]} : vector<16x32xf32> to vector<16x16xf32>
    %cst_152 = arith.constant dense<0.000000e+00> : vector<16x16xf32>
    %220 = tpu.matmul %218, %219, %cst_152 {dimension_numbers = #tpu.dot_dimension_numbers<[1], [1], [0], [0], [0, 0, 1, 0], [], []>} : vector<16x16xf32>, vector<16x16xf32>, vector<16x16xf32> -> vector<16x16xf32>
    %cst_153 = arith.constant dense<0xFF800000> : vector<16xf32>
    %221 = vector.multi_reduction <maximumf>, %220, %cst_153 [1] : vector<16x16xf32> to vector<16xf32>
    %222 = vector.shape_cast %221 : vector<16xf32> to vector<16x1xf32>
    %223 = vector.broadcast %222 : vector<16x1xf32> to vector<16x16xf32>
    %224 = arith.subf %220, %223 : vector<16x16xf32>
    %225 = math.exp %224 : vector<16x16xf32>
    %cst_154 = arith.constant dense<0.000000e+00> : vector<16xf32>
    %226 = vector.multi_reduction <add>, %225, %cst_154 [1] : vector<16x16xf32> to vector<16xf32>
    %227 = vector.shape_cast %226 : vector<16xf32> to vector<16x1xf32>
    %228 = vector.broadcast %227 : vector<16x1xf32> to vector<16x16xf32>
    %229 = arith.divf %225, %228 : vector<16x16xf32>
    %230 = vector.extract_strided_slice %215 {offsets = [0, 0], sizes = [16, 16], strides = [1, 1]} : vector<16x32xf32> to vector<16x16xf32>
    %cst_155 = arith.constant dense<0.000000e+00> : vector<16x16xf32>
    %231 = tpu.matmul %229, %230, %cst_155 {dimension_numbers = #tpu.dot_dimension_numbers<[1], [0], [0], [1], [0, 0, 1, 1], [], []>} : vector<16x16xf32>, vector<16x16xf32>, vector<16x16xf32> -> vector<16x16xf32>
    %c0_156 = arith.constant 0 : index
    %c0_157 = arith.constant 0 : index
    %232 = vector.load %arg54[%c0_156, %c0_157] : memref<16x32xf32, #tpu.memory_space<vmem>>, vector<16x16xf32>
    tpu.vector_store %arg54[%c0_156, %c0_157], %231 {strides = array<i32>} : memref<16x32xf32, #tpu.memory_space<vmem>>, vector<16x16xf32>,
    %233 = vector.extract_strided_slice %208 {offsets = [0, 16], sizes = [16, 16], strides = [1, 1]} : vector<16x32xf32> to vector<16x16xf32>
    %cst_158 = arith.constant 2.500000e-01 : f32
    %234 = vector.broadcast %cst_158 : f32 to vector<16x16xf32>
    %235 = arith.mulf %233, %234 : vector<16x16xf32>
    %236 = vector.extract_strided_slice %214 {offsets = [0, 16], sizes = [16, 16], strides = [1, 1]} : vector<16x32xf32> to vector<16x16xf32>
    %cst_159 = arith.constant dense<0.000000e+00> : vector<16x16xf32>
    %237 = tpu.matmul %235, %236, %cst_159 {dimension_numbers = #tpu.dot_dimension_numbers<[1], [1], [0], [0], [0, 0, 1, 0], [], []>} : vector<16x16xf32>, vector<16x16xf32>, vector<16x16xf32> -> vector<16x16xf32>
    %cst_160 = arith.constant dense<0xFF800000> : vector<16xf32>
    %238 = vector.multi_reduction <maximumf>, %237, %cst_160 [1] : vector<16x16xf32> to vector<16xf32>
    %239 = vector.shape_cast %238 : vector<16xf32> to vector<16x1xf32>
    %240 = vector.broadcast %239 : vector<16x1xf32> to vector<16x16xf32>
    %241 = arith.subf %237, %240 : vector<16x16xf32>
    %242 = math.exp %241 : vector<16x16xf32>
    %cst_161 = arith.constant dense<0.000000e+00> : vector<16xf32>
    %243 = vector.multi_reduction <add>, %242, %cst_161 [1] : vector<16x16xf32> to vector<16xf32>
    %244 = vector.shape_cast %243 : vector<16xf32> to vector<16x1xf32>
    %245 = vector.broadcast %244 : vector<16x1xf32> to vector<16x16xf32>
    %246 = arith.divf %242, %245 : vector<16x16xf32>
    %247 = arith.addf %229, %246 : vector<16x16xf32>
    %248 = vector.extract_strided_slice %215 {offsets = [0, 16], sizes = [16, 16], strides = [1, 1]} : vector<16x32xf32> to vector<16x16xf32>
    %cst_162 = arith.constant dense<0.000000e+00> : vector<16x16xf32>
    %249 = tpu.matmul %246, %248, %cst_162 {dimension_numbers = #tpu.dot_dimension_numbers<[1], [0], [0], [1], [0, 0, 1, 1], [], []>} : vector<16x16xf32>, vector<16x16xf32>, vector<16x16xf32> -> vector<16x16xf32>
    %c0_163 = arith.constant 0 : index
    %c16_164 = arith.constant 16 : index
    %250 = vector.load %arg54[%c0_163, %c16_164] : memref<16x32xf32, #tpu.memory_space<vmem>>, vector<16x16xf32>
    tpu.vector_store %arg54[%c0_163, %c16_164], %249 {strides = array<i32>} : memref<16x32xf32, #tpu.memory_space<vmem>>, vector<16x16xf32>,
    %c0_165 = arith.constant 0 : index
    %c0_166 = arith.constant 0 : index
    %251 = vector.load %arg54[%c0_165, %c0_166] : memref<16x32xf32, #tpu.memory_space<vmem>>, vector<16x32xf32>
    %c0_167 = arith.constant 0 : index
    %c0_168 = arith.constant 0 : index
    %252 = vector.load %arg39[%c0_167, %c0_168] : memref<32x32xf32, #tpu.memory_space<vmem>>, vector<32x32xf32>
    %cst_169 = arith.constant dense<0.000000e+00> : vector<16x32xf32>
    %253 = tpu.matmul %251, %252, %cst_169 {dimension_numbers = #tpu.dot_dimension_numbers<[1], [0], [0], [1], [0, 0, 1, 1], [], []>} : vector<16x32xf32>, vector<32x32xf32>, vector<16x32xf32> -> vector<16x32xf32>
    %c0_170 = arith.constant 0 : index
    %c0_171 = arith.constant 0 : index
    %254 = vector.load %arg40[%c0_170, %c0_171] : memref<1x32xf32, #tpu.memory_space<vmem>>, vector<1x32xf32>
    %255 = vector.broadcast %254 : vector<1x32xf32> to vector<16x32xf32>
    %256 = arith.addf %253, %255 : vector<16x32xf32>
    %cst_172 = arith.constant 5.000000e-01 : f32
    %257 = vector.broadcast %cst_172 : f32 to vector<16x16xf32>
    %258 = arith.mulf %247, %257 : vector<16x16xf32>
    %cst_173 = arith.constant dense<0.000000e+00> : vector<16xf32>
    %259 = vector.multi_reduction <add>, %256, %cst_173 [1] : vector<16x32xf32> to vector<16xf32>
    %260 = vector.shape_cast %259 : vector<16xf32> to vector<16x1xf32>
    %cst_174 = arith.constant 3.200000e+01 : f32
    %261 = vector.broadcast %cst_174 : f32 to vector<16x1xf32>
    %262 = arith.divf %260, %261 : vector<16x1xf32>
    %263 = vector.broadcast %262 : vector<16x1xf32> to vector<16x32xf32>
    %264 = arith.subf %256, %263 : vector<16x32xf32>
    %265 = arith.mulf %264, %264 : vector<16x32xf32>
    %cst_175 = arith.constant dense<0.000000e+00> : vector<16xf32>
    %266 = vector.multi_reduction <add>, %265, %cst_175 [1] : vector<16x32xf32> to vector<16xf32>
    %267 = vector.shape_cast %266 : vector<16xf32> to vector<16x1xf32>
    %cst_176 = arith.constant 3.200000e+01 : f32
    %268 = vector.broadcast %cst_176 : f32 to vector<16x1xf32>
    %269 = arith.divf %267, %268 : vector<16x1xf32>
    %270 = vector.broadcast %262 : vector<16x1xf32> to vector<16x32xf32>
    %271 = arith.subf %256, %270 : vector<16x32xf32>
    %cst_177 = arith.constant 9.99999974E-6 : f32
    %272 = vector.broadcast %cst_177 : f32 to vector<16x1xf32>
    %273 = arith.addf %269, %272 : vector<16x1xf32>
    %274 = math.rsqrt %273 : vector<16x1xf32>
    %275 = vector.broadcast %274 : vector<16x1xf32> to vector<16x32xf32>
    %276 = arith.mulf %271, %275 : vector<16x32xf32>
    %c0_178 = arith.constant 0 : index
    %c0_179 = arith.constant 0 : index
    %277 = vector.load %arg41[%c0_178, %c0_179] : memref<1x32xf32, #tpu.memory_space<vmem>>, vector<1x32xf32>
    %278 = vector.broadcast %277 : vector<1x32xf32> to vector<16x32xf32>
    %279 = arith.mulf %276, %278 : vector<16x32xf32>
    %c0_180 = arith.constant 0 : index
    %c0_181 = arith.constant 0 : index
    %280 = vector.load %arg42[%c0_180, %c0_181] : memref<1x32xf32, #tpu.memory_space<vmem>>, vector<1x32xf32>
    %281 = vector.broadcast %280 : vector<1x32xf32> to vector<16x32xf32>
    %282 = arith.addf %279, %281 : vector<16x32xf32>
    %cst_182 = arith.constant 0.000000e+00 : f32
    %283 = vector.broadcast %cst_182 : f32 to vector<16x288xf32>
    %c0_183 = arith.constant 0 : index
    %c0_184 = arith.constant 0 : index
    %284 = vector.load %arg53[%c0_183, %c0_184] : memref<16x288xf32, #tpu.memory_space<vmem>>, vector<16x288xf32>
    tpu.vector_store %arg53[%c0_183, %c0_184], %283 {strides = array<i32>} : memref<16x288xf32, #tpu.memory_space<vmem>>, vector<16x288xf32>,
    %285 = vector.extract_strided_slice %282 {offsets = [0, 0], sizes = [12, 32], strides = [1, 1]} : vector<16x32xf32> to vector<12x32xf32>
    %c4 = arith.constant 4 : index
    %c0_185 = arith.constant 0 : index
    %286 = vector.load %arg53[%c4, %c0_185] : memref<16x288xf32, #tpu.memory_space<vmem>>, vector<12x32xf32>
    tpu.vector_store %arg53[%c4, %c0_185], %285 {strides = array<i32>} : memref<16x288xf32, #tpu.memory_space<vmem>>, vector<12x32xf32>,
    %287 = vector.extract_strided_slice %282 {offsets = [0, 0], sizes = [13, 32], strides = [1, 1]} : vector<16x32xf32> to vector<13x32xf32>
    %c3 = arith.constant 3 : index
    %c32_186 = arith.constant 32 : index
    %288 = vector.load %arg53[%c3, %c32_186] : memref<16x288xf32, #tpu.memory_space<vmem>>, vector<13x32xf32>
    tpu.vector_store %arg53[%c3, %c32_186], %287 {strides = array<i32>} : memref<16x288xf32, #tpu.memory_space<vmem>>, vector<13x32xf32>,
    %289 = vector.extract_strided_slice %282 {offsets = [0, 0], sizes = [14, 32], strides = [1, 1]} : vector<16x32xf32> to vector<14x32xf32>
    %c2 = arith.constant 2 : index
    %c64_187 = arith.constant 64 : index
    %290 = vector.load %arg53[%c2, %c64_187] : memref<16x288xf32, #tpu.memory_space<vmem>>, vector<14x32xf32>
    tpu.vector_store %arg53[%c2, %c64_187], %289 {strides = array<i32>} : memref<16x288xf32, #tpu.memory_space<vmem>>, vector<14x32xf32>,
    %291 = vector.extract_strided_slice %282 {offsets = [0, 0], sizes = [15, 32], strides = [1, 1]} : vector<16x32xf32> to vector<15x32xf32>
    %c1_188 = arith.constant 1 : index
    %c96 = arith.constant 96 : index
    %292 = vector.load %arg53[%c1_188, %c96] : memref<16x288xf32, #tpu.memory_space<vmem>>, vector<15x32xf32>
    tpu.vector_store %arg53[%c1_188, %c96], %291 {strides = array<i32>} : memref<16x288xf32, #tpu.memory_space<vmem>>, vector<15x32xf32>,
    %c0_189 = arith.constant 0 : index
    %c128 = arith.constant 128 : index
    %293 = vector.load %arg53[%c0_189, %c128] : memref<16x288xf32, #tpu.memory_space<vmem>>, vector<16x32xf32>
    tpu.vector_store %arg53[%c0_189, %c128], %282 {strides = array<i32>} : memref<16x288xf32, #tpu.memory_space<vmem>>, vector<16x32xf32>,
    %294 = vector.extract_strided_slice %282 {offsets = [1, 0], sizes = [15, 32], strides = [1, 1]} : vector<16x32xf32> to vector<15x32xf32>
    %c0_190 = arith.constant 0 : index
    %c160 = arith.constant 160 : index
    %295 = vector.load %arg53[%c0_190, %c160] : memref<16x288xf32, #tpu.memory_space<vmem>>, vector<15x32xf32>
    tpu.vector_store %arg53[%c0_190, %c160], %294 {strides = array<i32>} : memref<16x288xf32, #tpu.memory_space<vmem>>, vector<15x32xf32>,
    %296 = vector.extract_strided_slice %282 {offsets = [2, 0], sizes = [14, 32], strides = [1, 1]} : vector<16x32xf32> to vector<14x32xf32>
    %c0_191 = arith.constant 0 : index
    %c192 = arith.constant 192 : index
    %297 = vector.load %arg53[%c0_191, %c192] : memref<16x288xf32, #tpu.memory_space<vmem>>, vector<14x32xf32>
    tpu.vector_store %arg53[%c0_191, %c192], %296 {strides = array<i32>} : memref<16x288xf32, #tpu.memory_space<vmem>>, vector<14x32xf32>,
    %298 = vector.extract_strided_slice %282 {offsets = [3, 0], sizes = [13, 32], strides = [1, 1]} : vector<16x32xf32> to vector<13x32xf32>
    %c0_192 = arith.constant 0 : index
    %c224 = arith.constant 224 : index
    %299 = vector.load %arg53[%c0_192, %c224] : memref<16x288xf32, #tpu.memory_space<vmem>>, vector<13x32xf32>
    tpu.vector_store %arg53[%c0_192, %c224], %298 {strides = array<i32>} : memref<16x288xf32, #tpu.memory_space<vmem>>, vector<13x32xf32>,
    %300 = vector.extract_strided_slice %282 {offsets = [4, 0], sizes = [12, 32], strides = [1, 1]} : vector<16x32xf32> to vector<12x32xf32>
    %c0_193 = arith.constant 0 : index
    %c256 = arith.constant 256 : index
    %301 = vector.load %arg53[%c0_193, %c256] : memref<16x288xf32, #tpu.memory_space<vmem>>, vector<12x32xf32>
    tpu.vector_store %arg53[%c0_193, %c256], %300 {strides = array<i32>} : memref<16x288xf32, #tpu.memory_space<vmem>>, vector<12x32xf32>,
    %c0_194 = arith.constant 0 : index
    %c0_195 = arith.constant 0 : index
    %302 = vector.load %arg53[%c0_194, %c0_195] : memref<16x288xf32, #tpu.memory_space<vmem>>, vector<16x288xf32>
    %c0_196 = arith.constant 0 : index
    %c0_197 = arith.constant 0 : index
    %303 = vector.load %arg43[%c0_196, %c0_197] : memref<288x1024xf32, #tpu.memory_space<vmem>>, vector<288x1024xf32>
    %cst_198 = arith.constant dense<0.000000e+00> : vector<16x1024xf32>
    %304 = tpu.matmul %302, %303, %cst_198 {dimension_numbers = #tpu.dot_dimension_numbers<[1], [0], [0], [1], [0, 0, 1, 1], [], []>} : vector<16x288xf32>, vector<288x1024xf32>, vector<16x1024xf32> -> vector<16x1024xf32>
    %c0_199 = arith.constant 0 : index
    %c0_200 = arith.constant 0 : index
    %305 = vector.load %arg44[%c0_199, %c0_200] : memref<1x1024xf32, #tpu.memory_space<vmem>>, vector<1x1024xf32>
    %306 = vector.broadcast %305 : vector<1x1024xf32> to vector<16x1024xf32>
    %307 = arith.addf %304, %306 : vector<16x1024xf32>
    %cst_201 = arith.constant 0.000000e+00 : f32
    %308 = vector.broadcast %cst_201 : f32 to vector<16x1024xf32>
    %309 = arith.maximumf %307, %308 : vector<16x1024xf32>
    %c0_202 = arith.constant 0 : index
    %c0_203 = arith.constant 0 : index
    %310 = vector.load %arg45[%c0_202, %c0_203] : memref<1024x32xf32, #tpu.memory_space<vmem>>, vector<1024x32xf32>
    %cst_204 = arith.constant dense<0.000000e+00> : vector<16x32xf32>
    %311 = tpu.matmul %309, %310, %cst_204 {dimension_numbers = #tpu.dot_dimension_numbers<[1], [0], [0], [1], [0, 0, 1, 1], [], []>} : vector<16x1024xf32>, vector<1024x32xf32>, vector<16x32xf32> -> vector<16x32xf32>
    %c0_205 = arith.constant 0 : index
    %c0_206 = arith.constant 0 : index
    %312 = vector.load %arg46[%c0_205, %c0_206] : memref<1x32xf32, #tpu.memory_space<vmem>>, vector<1x32xf32>
    %313 = vector.broadcast %312 : vector<1x32xf32> to vector<16x32xf32>
    %314 = arith.addf %311, %313 : vector<16x32xf32>
    %315 = arith.addf %282, %314 : vector<16x32xf32>
    %cst_207 = arith.constant dense<0.000000e+00> : vector<16xf32>
    %316 = vector.multi_reduction <add>, %315, %cst_207 [1] : vector<16x32xf32> to vector<16xf32>
    %317 = vector.shape_cast %316 : vector<16xf32> to vector<16x1xf32>
    %cst_208 = arith.constant 3.200000e+01 : f32
    %318 = vector.broadcast %cst_208 : f32 to vector<16x1xf32>
    %319 = arith.divf %317, %318 : vector<16x1xf32>
    %320 = vector.broadcast %319 : vector<16x1xf32> to vector<16x32xf32>
    %321 = arith.subf %315, %320 : vector<16x32xf32>
    %322 = arith.mulf %321, %321 : vector<16x32xf32>
    %cst_209 = arith.constant dense<0.000000e+00> : vector<16xf32>
    %323 = vector.multi_reduction <add>, %322, %cst_209 [1] : vector<16x32xf32> to vector<16xf32>
    %324 = vector.shape_cast %323 : vector<16xf32> to vector<16x1xf32>
    %cst_210 = arith.constant 3.200000e+01 : f32
    %325 = vector.broadcast %cst_210 : f32 to vector<16x1xf32>
    %326 = arith.divf %324, %325 : vector<16x1xf32>
    %327 = vector.broadcast %319 : vector<16x1xf32> to vector<16x32xf32>
    %328 = arith.subf %315, %327 : vector<16x32xf32>
    %cst_211 = arith.constant 9.99999974E-6 : f32
    %329 = vector.broadcast %cst_211 : f32 to vector<16x1xf32>
    %330 = arith.addf %326, %329 : vector<16x1xf32>
    %331 = math.rsqrt %330 : vector<16x1xf32>
    %332 = vector.broadcast %331 : vector<16x1xf32> to vector<16x32xf32>
    %333 = arith.mulf %328, %332 : vector<16x32xf32>
    %c0_212 = arith.constant 0 : index
    %c0_213 = arith.constant 0 : index
    %334 = vector.load %arg47[%c0_212, %c0_213] : memref<1x32xf32, #tpu.memory_space<vmem>>, vector<1x32xf32>
    %335 = vector.broadcast %334 : vector<1x32xf32> to vector<16x32xf32>
    %336 = arith.mulf %333, %335 : vector<16x32xf32>
    %c0_214 = arith.constant 0 : index
    %c0_215 = arith.constant 0 : index
    %337 = vector.load %arg48[%c0_214, %c0_215] : memref<1x32xf32, #tpu.memory_space<vmem>>, vector<1x32xf32>
    %338 = vector.broadcast %337 : vector<1x32xf32> to vector<16x32xf32>
    %339 = arith.addf %336, %338 : vector<16x32xf32>
    %c0_216 = arith.constant 0 : index
    %c0_217 = arith.constant 0 : index
    %c0_218 = arith.constant 0 : index
    %340 = vector.load %arg49[%c0_216, %c0_217, %c0_218] : memref<1x16x32xf32, #tpu.memory_space<vmem>>, vector<1x16x32xf32>
    %341 = vector.shape_cast %340 : vector<1x16x32xf32> to vector<16x32xf32>
    %342 = vector.shape_cast %339 : vector<16x32xf32> to vector<1x16x32xf32>
    tpu.vector_store %arg49[%c0_216, %c0_217, %c0_218], %342 {strides = array<i32>} : memref<1x16x32xf32, #tpu.memory_space<vmem>>, vector<1x16x32xf32>,
    %c0_219 = arith.constant 0 : index
    %c0_220 = arith.constant 0 : index
    %c0_221 = arith.constant 0 : index
    %343 = vector.load %arg50[%c0_219, %c0_220, %c0_221] : memref<1x16x16xf32, #tpu.memory_space<vmem>>, vector<1x16x16xf32>
    %344 = vector.shape_cast %343 : vector<1x16x16xf32> to vector<16x16xf32>
    %345 = vector.shape_cast %258 : vector<16x16xf32> to vector<1x16x16xf32>
    tpu.vector_store %arg50[%c0_219, %c0_220, %c0_221], %345 {strides = array<i32>} : memref<1x16x16xf32, #tpu.memory_space<vmem>>, vector<1x16x16xf32>,
    return
  }
  func.func @transform_0(%arg0: i32) -> (i32, i32, i32) {
    %c0_i32 = arith.constant 0 : i32
    %c0_i32_0 = arith.constant 0 : i32
    %c0_i32_1 = arith.constant 0 : i32
    return %arg0, %c0_i32, %c0_i32_0 : i32, i32, i32
  }
  func.func @transform_1(%arg0: i32) -> (i32, i32, i32) {
    %c0_i32 = arith.constant 0 : i32
    %c0_i32_0 = arith.constant 0 : i32
    %c0_i32_1 = arith.constant 0 : i32
    return %arg0, %c0_i32, %c0_i32_0 : i32, i32, i32
  }
  func.func @transform_2(%arg0: i32) -> (i32, i32) {
    %c0_i32 = arith.constant 0 : i32
    %c0_i32_0 = arith.constant 0 : i32
    %c0_i32_1 = arith.constant 0 : i32
    return %c0_i32, %c0_i32_0 : i32, i32
  }
  func.func @transform_3(%arg0: i32) -> (i32, i32) {
    %c0_i32 = arith.constant 0 : i32
    %c0_i32_0 = arith.constant 0 : i32
    %c0_i32_1 = arith.constant 0 : i32
    return %c0_i32, %c0_i32_0 : i32, i32
  }
  func.func @transform_4(%arg0: i32) -> (i32, i32) {
    %c0_i32 = arith.constant 0 : i32
    %c0_i32_0 = arith.constant 0 : i32
    %c0_i32_1 = arith.constant 0 : i32
    return %c0_i32, %c0_i32_0 : i32, i32
  }
  func.func @transform_5(%arg0: i32) -> (i32, i32) {
    %c0_i32 = arith.constant 0 : i32
    %c0_i32_0 = arith.constant 0 : i32
    %c0_i32_1 = arith.constant 0 : i32
    return %c0_i32, %c0_i32_0 : i32, i32
  }
  func.func @transform_6(%arg0: i32) -> (i32, i32) {
    %c0_i32 = arith.constant 0 : i32
    %c0_i32_0 = arith.constant 0 : i32
    %c0_i32_1 = arith.constant 0 : i32
    return %c0_i32, %c0_i32_0 : i32, i32
  }
  func.func @transform_7(%arg0: i32) -> (i32, i32) {
    %c0_i32 = arith.constant 0 : i32
    %c0_i32_0 = arith.constant 0 : i32
    %c0_i32_1 = arith.constant 0 : i32
    return %c0_i32, %c0_i32_0 : i32, i32
  }
  func.func @transform_8(%arg0: i32) -> (i32, i32) {
    %c0_i32 = arith.constant 0 : i32
    %c0_i32_0 = arith.constant 0 : i32
    %c0_i32_1 = arith.constant 0 : i32
    return %c0_i32, %c0_i32_0 : i32, i32
  }
  func.func @transform_9(%arg0: i32) -> (i32, i32) {
    %c0_i32 = arith.constant 0 : i32
    %c0_i32_0 = arith.constant 0 : i32
    %c0_i32_1 = arith.constant 0 : i32
    return %c0_i32, %c0_i32_0 : i32, i32
  }
  func.func @transform_10(%arg0: i32) -> (i32, i32) {
    %c0_i32 = arith.constant 0 : i32
    %c0_i32_0 = arith.constant 0 : i32
    %c0_i32_1 = arith.constant 0 : i32
    return %c0_i32, %c0_i32_0 : i32, i32
  }
  func.func @transform_11(%arg0: i32) -> (i32, i32) {
    %c0_i32 = arith.constant 0 : i32
    %c0_i32_0 = arith.constant 0 : i32
    %c0_i32_1 = arith.constant 0 : i32
    return %c0_i32, %c0_i32_0 : i32, i32
  }
  func.func @transform_12(%arg0: i32) -> (i32, i32) {
    %c0_i32 = arith.constant 0 : i32
    %c0_i32_0 = arith.constant 0 : i32
    %c0_i32_1 = arith.constant 0 : i32
    return %c0_i32, %c0_i32_0 : i32, i32
  }
  func.func @transform_13(%arg0: i32) -> (i32, i32) {
    %c0_i32 = arith.constant 0 : i32
    %c0_i32_0 = arith.constant 0 : i32
    %c0_i32_1 = arith.constant 0 : i32
    return %c0_i32, %c0_i32_0 : i32, i32
  }
  func.func @transform_14(%arg0: i32) -> (i32, i32) {
    %c0_i32 = arith.constant 0 : i32
    %c0_i32_0 = arith.constant 0 : i32
    %c0_i32_1 = arith.constant 0 : i32
    return %c0_i32, %c0_i32_0 : i32, i32
  }
  func.func @transform_15(%arg0: i32) -> (i32, i32) {
    %c0_i32 = arith.constant 0 : i32
    %c0_i32_0 = arith.constant 0 : i32
    %c0_i32_1 = arith.constant 0 : i32
    return %c0_i32, %c0_i32_0 : i32, i32
  }
  func.func @transform_16(%arg0: i32) -> (i32, i32) {
    %c0_i32 = arith.constant 0 : i32
    %c0_i32_0 = arith.constant 0 : i32
    %c0_i32_1 = arith.constant 0 : i32
    return %c0_i32, %c0_i32_0 : i32, i32
  }
  func.func @transform_17(%arg0: i32) -> (i32, i32) {
    %c0_i32 = arith.constant 0 : i32
    %c0_i32_0 = arith.constant 0 : i32
    %c0_i32_1 = arith.constant 0 : i32
    return %c0_i32, %c0_i32_0 : i32, i32
  }
  func.func @transform_18(%arg0: i32) -> (i32, i32) {
    %c0_i32 = arith.constant 0 : i32
    %c0_i32_0 = arith.constant 0 : i32
    %c0_i32_1 = arith.constant 0 : i32
    return %c0_i32, %c0_i32_0 : i32, i32
  }
  func.func @transform_19(%arg0: i32) -> (i32, i32) {
    %c0_i32 = arith.constant 0 : i32
    %c0_i32_0 = arith.constant 0 : i32
    %c0_i32_1 = arith.constant 0 : i32
    return %c0_i32, %c0_i32_0 : i32, i32
  }
  func.func @transform_20(%arg0: i32) -> (i32, i32) {
    %c0_i32 = arith.constant 0 : i32
    %c0_i32_0 = arith.constant 0 : i32
    %c0_i32_1 = arith.constant 0 : i32
    return %c0_i32, %c0_i32_0 : i32, i32
  }
  func.func @transform_21(%arg0: i32) -> (i32, i32) {
    %c0_i32 = arith.constant 0 : i32
    %c0_i32_0 = arith.constant 0 : i32
    %c0_i32_1 = arith.constant 0 : i32
    return %c0_i32, %c0_i32_0 : i32, i32
  }
  func.func @transform_22(%arg0: i32) -> (i32, i32) {
    %c0_i32 = arith.constant 0 : i32
    %c0_i32_0 = arith.constant 0 : i32
    %c0_i32_1 = arith.constant 0 : i32
    return %c0_i32, %c0_i32_0 : i32, i32
  }
  func.func @transform_23(%arg0: i32) -> (i32, i32) {
    %c0_i32 = arith.constant 0 : i32
    %c0_i32_0 = arith.constant 0 : i32
    %c0_i32_1 = arith.constant 0 : i32
    return %c0_i32, %c0_i32_0 : i32, i32
  }
  func.func @transform_24(%arg0: i32) -> (i32, i32) {
    %c0_i32 = arith.constant 0 : i32
    %c0_i32_0 = arith.constant 0 : i32
    %c0_i32_1 = arith.constant 0 : i32
    return %c0_i32, %c0_i32_0 : i32, i32
  }
  func.func @transform_25(%arg0: i32) -> (i32, i32) {
    %c0_i32 = arith.constant 0 : i32
    %c0_i32_0 = arith.constant 0 : i32
    %c0_i32_1 = arith.constant 0 : i32
    return %c0_i32, %c0_i32_0 : i32, i32
  }
  func.func @transform_26(%arg0: i32) -> (i32, i32) {
    %c0_i32 = arith.constant 0 : i32
    %c0_i32_0 = arith.constant 0 : i32
    %c0_i32_1 = arith.constant 0 : i32
    return %c0_i32, %c0_i32_0 : i32, i32
  }
  func.func @transform_27(%arg0: i32) -> (i32, i32) {
    %c0_i32 = arith.constant 0 : i32
    %c0_i32_0 = arith.constant 0 : i32
    %c0_i32_1 = arith.constant 0 : i32
    return %c0_i32, %c0_i32_0 : i32, i32
  }
  func.func @transform_28(%arg0: i32) -> (i32, i32) {
    %c0_i32 = arith.constant 0 : i32
    %c0_i32_0 = arith.constant 0 : i32
    %c0_i32_1 = arith.constant 0 : i32
    return %c0_i32, %c0_i32_0 : i32, i32
  }
  func.func @transform_29(%arg0: i32) -> (i32, i32) {
    %c0_i32 = arith.constant 0 : i32
    %c0_i32_0 = arith.constant 0 : i32
    %c0_i32_1 = arith.constant 0 : i32
    return %c0_i32, %c0_i32_0 : i32, i32
  }
  func.func @transform_30(%arg0: i32) -> (i32, i32) {
    %c0_i32 = arith.constant 0 : i32
    %c0_i32_0 = arith.constant 0 : i32
    %c0_i32_1 = arith.constant 0 : i32
    return %c0_i32, %c0_i32_0 : i32, i32
  }
  func.func @transform_31(%arg0: i32) -> (i32, i32) {
    %c0_i32 = arith.constant 0 : i32
    %c0_i32_0 = arith.constant 0 : i32
    %c0_i32_1 = arith.constant 0 : i32
    return %c0_i32, %c0_i32_0 : i32, i32
  }
  func.func @transform_32(%arg0: i32) -> (i32, i32) {
    %c0_i32 = arith.constant 0 : i32
    %c0_i32_0 = arith.constant 0 : i32
    %c0_i32_1 = arith.constant 0 : i32
    return %c0_i32, %c0_i32_0 : i32, i32
  }
  func.func @transform_33(%arg0: i32) -> (i32, i32) {
    %c0_i32 = arith.constant 0 : i32
    %c0_i32_0 = arith.constant 0 : i32
    %c0_i32_1 = arith.constant 0 : i32
    return %c0_i32, %c0_i32_0 : i32, i32
  }
  func.func @transform_34(%arg0: i32) -> (i32, i32) {
    %c0_i32 = arith.constant 0 : i32
    %c0_i32_0 = arith.constant 0 : i32
    %c0_i32_1 = arith.constant 0 : i32
    return %c0_i32, %c0_i32_0 : i32, i32
  }
  func.func @transform_35(%arg0: i32) -> (i32, i32) {
    %c0_i32 = arith.constant 0 : i32
    %c0_i32_0 = arith.constant 0 : i32
    %c0_i32_1 = arith.constant 0 : i32
    return %c0_i32, %c0_i32_0 : i32, i32
  }
  func.func @transform_36(%arg0: i32) -> (i32, i32) {
    %c0_i32 = arith.constant 0 : i32
    %c0_i32_0 = arith.constant 0 : i32
    %c0_i32_1 = arith.constant 0 : i32
    return %c0_i32, %c0_i32_0 : i32, i32
  }
  func.func @transform_37(%arg0: i32) -> (i32, i32) {
    %c0_i32 = arith.constant 0 : i32
    %c0_i32_0 = arith.constant 0 : i32
    %c0_i32_1 = arith.constant 0 : i32
    return %c0_i32, %c0_i32_0 : i32, i32
  }
  func.func @transform_38(%arg0: i32) -> (i32, i32) {
    %c0_i32 = arith.constant 0 : i32
    %c0_i32_0 = arith.constant 0 : i32
    %c0_i32_1 = arith.constant 0 : i32
    return %c0_i32, %c0_i32_0 : i32, i32
  }
  func.func @transform_39(%arg0: i32) -> (i32, i32) {
    %c0_i32 = arith.constant 0 : i32
    %c0_i32_0 = arith.constant 0 : i32
    %c0_i32_1 = arith.constant 0 : i32
    return %c0_i32, %c0_i32_0 : i32, i32
  }
  func.func @transform_40(%arg0: i32) -> (i32, i32) {
    %c0_i32 = arith.constant 0 : i32
    %c0_i32_0 = arith.constant 0 : i32
    %c0_i32_1 = arith.constant 0 : i32
    return %c0_i32, %c0_i32_0 : i32, i32
  }
  func.func @transform_41(%arg0: i32) -> (i32, i32) {
    %c0_i32 = arith.constant 0 : i32
    %c0_i32_0 = arith.constant 0 : i32
    %c0_i32_1 = arith.constant 0 : i32
    return %c0_i32, %c0_i32_0 : i32, i32
  }
  func.func @transform_42(%arg0: i32) -> (i32, i32) {
    %c0_i32 = arith.constant 0 : i32
    %c0_i32_0 = arith.constant 0 : i32
    %c0_i32_1 = arith.constant 0 : i32
    return %c0_i32, %c0_i32_0 : i32, i32
  }
  func.func @transform_43(%arg0: i32) -> (i32, i32) {
    %c0_i32 = arith.constant 0 : i32
    %c0_i32_0 = arith.constant 0 : i32
    %c0_i32_1 = arith.constant 0 : i32
    return %c0_i32, %c0_i32_0 : i32, i32
  }
  func.func @transform_44(%arg0: i32) -> (i32, i32) {
    %c0_i32 = arith.constant 0 : i32
    %c0_i32_0 = arith.constant 0 : i32
    %c0_i32_1 = arith.constant 0 : i32
    return %c0_i32, %c0_i32_0 : i32, i32
  }
  func.func @transform_45(%arg0: i32) -> (i32, i32) {
    %c0_i32 = arith.constant 0 : i32
    %c0_i32_0 = arith.constant 0 : i32
    %c0_i32_1 = arith.constant 0 : i32
    return %c0_i32, %c0_i32_0 : i32, i32
  }
  func.func @transform_46(%arg0: i32) -> (i32, i32) {
    %c0_i32 = arith.constant 0 : i32
    %c0_i32_0 = arith.constant 0 : i32
    %c0_i32_1 = arith.constant 0 : i32
    return %c0_i32, %c0_i32_0 : i32, i32
  }
  func.func @transform_47(%arg0: i32) -> (i32, i32) {
    %c0_i32 = arith.constant 0 : i32
    %c0_i32_0 = arith.constant 0 : i32
    %c0_i32_1 = arith.constant 0 : i32
    return %c0_i32, %c0_i32_0 : i32, i32
  }
  func.func @transform_48(%arg0: i32) -> (i32, i32, i32) {
    %c0_i32 = arith.constant 0 : i32
    %c0_i32_0 = arith.constant 0 : i32
    %c0_i32_1 = arith.constant 0 : i32
    return %arg0, %c0_i32, %c0_i32_0 : i32, i32, i32
  }
  func.func @transform_49(%arg0: i32) -> (i32, i32, i32) {
    %c0_i32 = arith.constant 0 : i32
    %c0_i32_0 = arith.constant 0 : i32
    %c0_i32_1 = arith.constant 0 : i32
    return %arg0, %c0_i32, %c0_i32_0 : i32, i32, i32
  }
}

</mosaic_0001>

<bundles_post_ra>
// kernel: tpu_custom_call.1
= control target key start
LH: loop header
LB: loop body
LE: loop exit
PB: predicated region body
PF: predicated region fallthrough
CT: control target
= control target key end

     0   :  { %s9763_s6 = smov 1   ;;  %s9764_s10 = smov 2   ;;  %s11461_s0 = inlined_call_operand.smem [shape: u32[50], index: -1, kind: input, shape index: {}] }
   0x1   :  { %s9883_s5 = sld [smem:[%s11461_s0]]   ;;  %s9765_s14 = smov 3  }
   0x2   :  { %s9888_s9 = sld [smem:[%s11461_s0 + %s9763_s6]]   ;;  %s9766_s18 = smov 4  }
   0x3   :  { %s9893_s13 = sld [smem:[%s11461_s0 + %s9764_s10]]   ;;  %s9767_s22 = smov 5  }
   0x4   :  { %s9898_s17 = sld [smem:[%s11461_s0 + %s9765_s14]]   ;;  %s9768_s26 = smov 6  }
   0x5   :  { %s9903_s21 = sld [smem:[%s11461_s0 + %s9766_s18]]   ;;  %s9769_s30 = smov 7  }
   0x6   :  { %s9908_s25 = sld [smem:[%s11461_s0 + %s9767_s22]]   ;;  %s9770_s4 = smov 8  }
   0x7   :  { %11541 = sst [smem:[#allocation100_spill]] %s9883_s5  ;;  %s9771_s10 = smov 9  }
   0x8   :  { %11542 = sst [smem:[#allocation101_spill]] %s9888_s9  ;;  %s9772_s15 = smov 10  }
   0x9   :  { %11543 = sst [smem:[#allocation102_spill]] %s9893_s13  ;;  %s9773_s20 = smov 11  }
   0xa   :  { %11544 = sst [smem:[#allocation103_spill]] %s9898_s17  ;;  %s9775_s1 = smov 13  }
   0xb   :  { %11545 = sst [smem:[#allocation104_spill]] %s9903_s21  ;;  %s9776_s7 = smov 14  }
   0xc   :  { %11546 = sst [smem:[#allocation105_spill]] %s9908_s25  ;;  %s9778_s22 = smov 16  }
   0xd   :  { %s9913_s29 = sld [smem:[%s11461_s0 + %s9768_s26]]   ;;  %s9774_s26 = smov 12  }
   0xe   :  { %s9918_s3 = sld [smem:[%s11461_s0 + %s9769_s30]]   ;;  %s9779_s28 = smov 17  }
   0xf   :  { %s9923_s8 = sld [smem:[%s11461_s0 + %s9770_s4]]   ;;  %s9789_s16 = smov 27  }
  0x10   :  { %s9928_s14 = sld [smem:[%s11461_s0 + %s9771_s10]]   ;;  %s9788_s10 = smov 26  }
  0x11   :  { %s9933_s19 = sld [smem:[%s11461_s0 + %s9772_s15]]   ;;  %s9777_s15 = smov 15  }
  0x12   :  { %s9938_s24 = sld [smem:[%s11461_s0 + %s9773_s20]]   ;;  %s9790_s23 = smov 28  }
  0x13   :  { %11547 = sst [smem:[#allocation106_spill]] %s9913_s29 }
  0x14   :  { %11548 = sst [smem:[#allocation107_spill]] %s9918_s3 }
  0x15   :  { %11549 = sst [smem:[#allocation108_spill]] %s9923_s8 }
  0x16   :  { %11550 = sst [smem:[#allocation109_spill]] %s9928_s14  ;;  %s9800_s14 = smov 38  }
  0x17   :  { %11551 = sst [smem:[#allocation110_spill]] %s9933_s19 }
  0x18   :  { %11552 = sst [smem:[#allocation111_spill]] %s9938_s24 }
  0x19   :  { %s9943_s30 = sld [smem:[%s11461_s0 + %s9774_s26]]  }
  0x1a   :  { %s9948_s6 = sld [smem:[%s11461_s0 + %s9775_s1]]   ;;  %s9791_s1 = smov 29  }
  0x1b   :  { %s9953_s12 = sld [smem:[%s11461_s0 + %s9776_s7]]   ;;  %s9780_s7 = smov 18  }
  0x1c   :  { %s9958_s20 = sld [smem:[%s11461_s0 + %s9777_s15]]   ;;  %s9781_s15 = smov 19  }
  0x1d   :  { %s9963_s27 = sld [smem:[%s11461_s0 + %s9778_s22]]   ;;  %s9782_s22 = smov 20  }
  0x1e   :  { %s9968_s4 = sld [smem:[%s11461_s0 + %s9779_s28]]   ;;  %s9783_s28 = smov 21  }
  0x1f   :  { %s9973_s29 = sld [smem:[%s11461_s0 + %s9780_s7]]   ;;  %s9784_s7 = smov 22  }
  0x20   :  { %11553 = sst [smem:[#allocation112_spill]] %s9948_s6 }
  0x21   :  { %11554 = sst [smem:[#allocation113_spill]] %s9953_s12 }
  0x22   :  { %11555 = sst [smem:[#allocation114_spill]] %s9958_s20 }
  0x23   :  { %s9978_s21 = sld [smem:[%s11461_s0 + %s9781_s15]]   ;;  %s9785_s15 = smov 23  }
  0x24   :  { %11556 = sst [smem:[#allocation115_spill]] %s9968_s4 }
  0x25   :  { %s9983_s13 = sld [smem:[%s11461_s0 + %s9782_s22]]   ;;  %s9786_s22 = smov 24  }
  0x26   :  { %s9988_s9 = sld [smem:[%s11461_s0 + %s9783_s28]]   ;;  %s9787_s28 = smov 25  }
  0x27   :  { %s9993_s5 = sld [smem:[%s11461_s0 + %s9784_s7]]   ;;  %s9796_s7 = smov 34  }
  0x28   :  { %s10003_s4 = sld [smem:[%s11461_s0 + %s9786_s22]]  }
  0x29   :  { %11557 = sst [smem:[#allocation116_spill]] %s9978_s21 }
  0x2a   :  { %s9998_s21 = sld [smem:[%s11461_s0 + %s9785_s15]]  }
  0x2b   :  { %11558 = sst [smem:[#allocation117_spill]] %s9983_s13 }
  0x2c   :  { %11559 = sst [smem:[#allocation118_spill]] %s9988_s9 }
  0x2d   :  { %11560 = sst [smem:[#allocation119_spill]] %s9993_s5 }
  0x2e   :  { %11562 = sst [smem:[#allocation121_spill]] %s10003_s4 }
  0x2f   :  { %s6620_s9 = sld [smem:[%s11461_s0 + %s9787_s28]]  }
  0x30   :  { %11561 = sst [smem:[#allocation120_spill]] %s9998_s21 }
  0x31   :  { %s10011_s20 = sld [smem:[%s11461_s0 + %s9788_s10]]   ;;  %s9792_s10 = smov 30  }
  0x32   :  { %s10016_s21 = sld [smem:[%s11461_s0 + %s9789_s16]]   ;;  %s9793_s16 = smov 31  }
  0x33   :  { %s10021_s4 = sld [smem:[%s11461_s0 + %s9790_s23]]   ;;  %s9794_s23 = smov 32  }
  0x34   :  { %s10026_s6 = sld [smem:[%s11461_s0 + %s9791_s1]]   ;;  %s9795_s1 = smov 33  }
  0x35   :  { %s10031_s24 = sld [smem:[%s11461_s0 + %s9792_s10]]   ;;  %v105_v0 = vstv %s6620_s9  ;;  %s9797_s9 = smov 35  }
  0x36   :  { %s10041_s28 = sld [smem:[%s11461_s0 + %s9794_s23]]   ;;  %106 = vst [vmem:[#allocation6] sm:$0x1] %v105_v0  ;;  %s9798_s23 = smov 36  }
  0x37   :  { %s10046_s10 = sld [smem:[%s11461_s0 + %s9795_s1]]  }
  0x38   :  { %11563 = sst [smem:[#allocation122_spill]] %s10016_s21 }
  0x39   :  { %11564 = sst [smem:[#allocation123_spill]] %s10021_s4 }
  0x3a   :  { %11565 = sst [smem:[#allocation124_spill]] %s10026_s6  ;;  %s9799_s6 = smov 37  }
  0x3b   :  { %s10036_s21 = sld [smem:[%s11461_s0 + %s9793_s16]]  }
  0x3c   :  { %s10051_s16 = sld [smem:[%s11461_s0 + %s9796_s7]]  }
  0x3d   :  { %11567 = sst [smem:[#allocation126_spill]] %s10046_s10 }
  0x3e   :  { %s10056_s22 = sld [smem:[%s11461_s0 + %s9797_s9]]   ;;  %s9801_s9 = smov 39  }
  0x3f   :  { %s10061_s3 = sld [smem:[%s11461_s0 + %s9798_s23]]  }
  0x40   :  { %s10066_s10 = sld [smem:[%s11461_s0 + %s9799_s6]]   ;;  %s9803_s6 = smov 41  }
  0x41   :  { %11566 = sst [smem:[#allocation125_spill]] %s10036_s21  ;;  %s9802_s21 = smov 40  }
  0x42   :  { %11568 = sst [smem:[#allocation127_spill]] %s10051_s16 }
  0x43   :  { %s10071_s17 = sld [smem:[%s11461_s0 + %s9800_s14]]   ;;  %s9804_s14 = smov 42  }
  0x44   :  { %11569 = sst [smem:[#allocation128_spill]] %s10056_s22 }
  0x45   :  { %11570 = sst [smem:[#allocation129_spill]] %s10061_s3 }
  0x46   :  { %11571 = sst [smem:[#allocation130_spill]] %s10066_s10 }
  0x47   :  { %s10076_s22 = sld [smem:[%s11461_s0 + %s9801_s9]]   ;;  %s9805_s9 = smov 43  }
  0x48   :  { %s10081_s3 = sld [smem:[%s11461_s0 + %s9802_s21]]   ;;  %s9806_s21 = smov 44  }
  0x49   :  { %11572 = sst [smem:[#allocation131_spill]] %s10071_s17 }
  0x4a   :  { %s10086_s10 = sld [smem:[%s11461_s0 + %s9803_s6]]   ;;  %s9807_s6 = smov 45  }
  0x4b   :  { %s10091_s17 = sld [smem:[%s11461_s0 + %s9804_s14]]   ;;  %s9808_s14 = smov 46  }
  0x4d   :  { %11573 = sst [smem:[#allocation132_spill]] %s10076_s22 }
  0x4e   :  { %11574 = sst [smem:[#allocation133_spill]] %s10081_s3 }
  0x4f   :  { %s10096_s22 = sld [smem:[%s11461_s0 + %s9805_s9]]   ;;  %s9809_s9 = smov 47  }
  0x50   :  { %11575 = sst [smem:[#allocation134_spill]] %s10086_s10 }
  0x51   :  { %11576 = sst [smem:[#allocation135_spill]] %s10091_s17 }
  0x52   :  { %s10101_s3 = sld [smem:[%s11461_s0 + %s9806_s21]]   ;;  %s9810_s21 = smov 48  }
  0x53   :  { %s10106_s10 = sld [smem:[%s11461_s0 + %s9807_s6]]   ;;  %s9811_s6 = smov 49  }
  0x54   :  { %s10111_s17 = sld [smem:[%s11461_s0 + %s9808_s14]]  }
  0x55   :  { %11577 = sst [smem:[#allocation136_spill]] %s10096_s22 }
  0x56   :  { %s10116_s22 = sld [smem:[%s11461_s0 + %s9809_s9]]  }
  0x58   :  { %11578 = sst [smem:[#allocation137_spill]] %s10101_s3 }
  0x59   :  { %11579 = sst [smem:[#allocation138_spill]] %s10106_s10 }
  0x5a   :  { %11580 = sst [smem:[#allocation139_spill]] %s10111_s17 }
  0x5b   :  { %s10121_s3 = sld [smem:[%s11461_s0 + %s9810_s21]]  }
  0x5c   :  { %s10126_s10 = sld [smem:[%s11461_s0 + %s9811_s6]]  }
  0x61   :  { %11581 = sst [smem:[#allocation140_spill]] %s10121_s3 }
  0x62   :  { %11582 = sst [smem:[#allocation141_spill]] %s10126_s10 }
  0x63   :  { %107 = vsyncpa [#allocation8], 0 }
  0x64   :  { %109 = vsyncpa [#allocation8 + $0x1], 0 }
  0x65   :  { %110 = vsyncpa [#allocation11], 0 }
  0x66   :  { %112 = vsyncpa [#allocation11 + $0x1], 0 }
  0x67   :  { %113 = vsyncpa [#allocation14], 0 }
  0x68   :  { %114 = vsyncpa [#allocation17], 0 }
  0x69   :  { %115 = vsyncpa [#allocation20], 0 }
  0x6a   :  { %116 = vsyncpa [#allocation23], 0 }
  0x6b   :  { %117 = vsyncpa [#allocation26], 0 }
  0x6c   :  { %118 = vsyncpa [#allocation29], 0 }
  0x6d   :  { %119 = vsyncpa [#allocation32], 0 }
  0x6e   :  { %120 = vsyncpa [#allocation35], 0 }
  0x6f   :  { %121 = vsyncpa [#allocation38], 0 }
  0x70   :  { %122 = vsyncpa [#allocation41], 0 }
  0x71   :  { %123 = vsyncpa [#allocation44], 0 }
  0x72   :  { %124 = vsyncpa [#allocation47], 0 }
  0x73   :  { %125 = vsyncpa [#allocation50], 0 }
  0x74   :  { %126 = vsyncpa [#allocation53], 0 }
  0x75   :  { %127 = vsyncpa [#allocation56], 0 }
  0x76   :  { %128 = vsyncpa [#allocation59], 0 }
  0x77   :  { %129 = vsyncpa [#allocation62], 0 }
  0x78   :  { %130 = vsyncpa [#allocation65], 0 }
  0x79   :  { %131 = vsyncpa [#allocation68], 0 }
  0x7a   :  { %132 = vsyncpa [#allocation71], 0 }
  0x7b   :  { %133 = vsyncpa [#allocation9], 0 }
  0x7c   :  { %135 = vsyncpa [#allocation9 + $0x1], 0 }
  0x7d   :  { %136 = vsyncpa [#allocation74], 0 }
  0x7e   :  { %138 = vsyncpa [#allocation74 + $0x1], 0  ;;  %s10128_s0 = smov 0   ;;  %s10130_s14 = smov 0  }
  0x7f   :  { %s10132_s7 = smov 0   ;;  %s10134_s11 = smov 0  }
  0x80 LB: > { %s11583_s19 = sld [smem:[#allocation110_spill]]  ;;  %s11584_s17 = sld [smem:[#allocation139_spill]]  ;;  %s9749_s0 = sphi %s10128_s0, %s11696_s0   ;;  %s9761_s11 = sphi %s10134_s11, %s11694_s11   ;;  %s9757_s7 = sphi %s10132_s7, %s11698_s7   ;;  %s9753_s14 = sphi %s10130_s14, %s11697_s14  }
  0x81   : > { %s11585_s16 = sld [smem:[#allocation127_spill]]  ;;  %s11586_s13 = sld [smem:[#allocation117_spill]] }
  0x82   : > { %s11587_s12 = sld [smem:[#allocation113_spill]]  ;;  %s11588_s8 = sld [smem:[#allocation108_spill]] }
  0x83   : > { %s11589_s5 = sld [smem:[#allocation119_spill]]  ;;  %s11590_s4 = sld [smem:[#allocation123_spill]] }
  0x84   : > { %s11591_s25 = sld [smem:[#allocation105_spill]]  ;;  %11592 = sst [smem:[#allocation142_spill]] %s9749_s0 }
  0x85   : > { %s10149_s9 = sadd.s32 4294967295, %s9761_s11   ;;  %s6646_s15 = sadd.s32 4294967294, %s9761_s11  }
  0x86   : > { %s10153_s18 = sadd.s32 1, %s9761_s11   ;;  %s151_s21 = sadd.s32 1, %s9757_s7 }
  0x87   : > { %11593 = sst [smem:[#allocation143_spill]] %s10153_s18  ;;  %s148_s23 = ssub.s32 %s9761_s11, %s10153_s18 }
  0x88   : > { %p158_p0 = scmp.ne.s32.totalorder %s9757_s7, %s9753_s14  ;;  %p149_p1 = scmp.eq.s32.totalorder %s148_s23, 0 }
  0x89   : > { %p159_p2 = scmp.eq.s32.totalorder %s9761_s11, 0  ;;  %p164_p3 = scmp.ne.s32.totalorder %s9753_s14, %s9749_s0 }
  0x8a   : > { %p11530_p4 = scmp.eq.s32.totalorder %s10149_s9, 0  ;;  %p1180_p7 = scmp.eq.s32.totalorder %s10149_s9, 1 }
  0x8b   : > { %s10165_s26 = scalar_select %p149_p1, %s9757_s7, %s151_s21  }
  0x8c   : > { %p10167_p5 = por %p159_p2, %p158_p0  ;;  %p10173_p6 = por %p11530_p4, %p164_p3 }
  0x8d   : > { %11594 = sst [smem:[#allocation144_spill]] %s10165_s26  ;;  %p1186_p8 = scmp.eq.s32.totalorder %s6646_s15, 1 }
  0x8e   : > { %s11596_s1 = scalar_select %p10173_p6, 1, 0 }
  0x8f   : > { %p6647_p9 = scmp.ge.s32.totalorder %s9761_s11, 1  ;;  %p1219_p10 = scmp.lt.s32.totalorder %s9761_s11, 3 }
  0x90   : > { %p10180_p11 = por %p1180_p7, %p158_p0  ;;  %p10184_p12 = por %p1186_p8, %p164_p3 }
  0x91   : > { %p10188_p13 = pnand %p6647_p9, %p1219_p10 }
  0x92   : > { %s11597_s2 = scalar_select %p10180_p11, 1, 0 }
  0x93   : > { %s11599_s21 = scalar_select %p10184_p12, 1, 0 }
  0x94   : > { %11598 = sst [smem:[#allocation145_spill]] %s11597_s2  ;;  %1223 = sbr.rel (%p10188_p13) target bundleno = 1127 (0x467), region = 12 }
  0x95   : > { %11600 = sst [smem:[#allocation146_spill]] %s11599_s21  ;;  %s9812_s26 = smov (!%p10188_p13), [#allocation13]  }
  0x96   : > { %s11601_s23 = scalar_select %p10188_p13, 1, 0 }
  0x97   : > { %s1249_s15 = sshll.u32 (!%p10188_p13), %s9812_s26, 4  ;;  %s9813_s18 = smov (!%p10188_p13), [#allocation16]   ;;  %s1250_s15 = int_to_ptr.vmem [resolvable:$true] %s1249_s15 }
  0x98   : > { %s1273_s0 = sshll.u32 (!%p10188_p13), %s9813_s18, 4  ;;  %s8475_s3 = scalar_lea.hbm (!%p10188_p13), %s11591_s25, 16  ;;  %s10194_s0 = int_to_ptr.vmem [resolvable:$true] %s1273_s0 }
  0x99   : > { %p8476_p0 = scmp.ne.s32.totalorder (!%p10188_p13), %s11591_s25, %s8475_s3  ;;  %p8481_p3 = scmp.lt.u32.totalorder (!%p10188_p13), %s8475_s3, %s11591_s25 }
  0x9b   : > { %p8477_p1 = pnand %p8476_p0, %p11530_p4 }
  0x9d   : > { %p8478_p2 = pneg %p8477_p1 }
  0x9f   : > { %p8483_p7 = pnand %p8481_p3, %p8478_p2 }
  0xa1   : > { %8486 = shalt.err (!%p8483_p7)
}
  0xa2   : > { %s8487_s21 = scalar_lea.vmem %s1250_s15, 16  ;;  %s8493_s26 = scalar_lea.vmem %s1250_s15, 32 }
  0xa3   : > { %p8488_p8 = scmp.ne.s32.totalorder %s1250_s15, %s8487_s21  ;;  %p8494_p12 = scmp.lt.s32.totalorder %s1250_s15, %s1250_s15 }
  0xa4   : > { %p8495_p11 = scmp.lt.s32.totalorder %s8493_s26, %s8487_s21 }
  0xa5   : > { %p8489_p9 = pnand %p8488_p8, %p11530_p4 }
  0xa6   : > { %p8496_p6 = por %p8495_p11, %p8494_p12 }
  0xa7   : > { %p8490_p10 = pneg %p8489_p9 }
  0xa9   : > { %p8497_p13 = pnand %p8496_p6, %p8490_p10 }
  0xab   : > { %8500 = shalt.err (!%p8497_p13)
}
  0xac   : > { %7987 = dma.hbm_to_vmem [thread:$0]  (%p11530_p4), %s11591_s25, 16, %s1250_s15, [#allocation14]  }
  0xad   : > { %s8501_s3 = scalar_lea.hbm %s11588_s8, 256 }
  0xae   : > { %p8502_p0 = scmp.ne.s32.totalorder %s11588_s8, %s8501_s3  ;;  %p8507_p3 = scmp.lt.u32.totalorder %s8501_s3, %s11588_s8 }
  0xb0   : > { %p8503_p1 = pnand %p8502_p0, %p11530_p4 }
  0xb2   : > { %p8504_p2 = pneg %p8503_p1 }
  0xb4   : > { %p8509_p7 = pnand %p8507_p3, %p8504_p2 }
  0xb6   : > { %8512 = shalt.err (!%p8509_p7)
}
  0xb7   : > { %s8513_s18 = scalar_lea.vmem %s10194_s0, 256  ;;  %p8520_p13 = scmp.lt.s32.totalorder %s10194_s0, %s10194_s0 }
  0xb8   : > { %p8514_p6 = scmp.ne.s32.totalorder %s10194_s0, %s8513_s18  ;;  %p8521_p8 = scmp.lt.s32.totalorder %s8513_s18, %s8513_s18 }
  0xba   : > { %p8515_p11 = pnand %p8514_p6, %p11530_p4  ;;  %p8522_p9 = por %p8521_p8, %p8520_p13 }
  0xbc   : > { %p8516_p12 = pneg %p8515_p11 }
  0xbe   : > { %p8523_p10 = pnand %p8522_p9, %p8516_p12 }
  0xc0   : > { %8526 = shalt.err (!%p8523_p10)
}
  0xc1   : > { %s9814_s21 = smov 128   ;;  %s9815_s15 = smov 8  }
  0xc2   : > { %7991 = dma.hbm_to_vmem [thread:$0]  (%p11530_p4), %s11588_s8, 256, %s10194_s0, [#allocation17], %s9814_s21, %s9814_s21, %s9815_s15  }
  0xc3   : > { %s9816_s26 = smov [#allocation19]   ;;  %s9817_s18 = smov [#allocation22]  }
  0xc4   : > { %s1298_s3 = sshll.u32 %s9816_s26, 4  ;;  %s1319_s25 = sshll.u32 %s9817_s18, 4  ;;  %s1299_s3 = int_to_ptr.vmem [resolvable:$true] %s1298_s3  ;;  %s10224_s25 = int_to_ptr.vmem [resolvable:$true] %s1319_s25 }
  0xc5   : > { %s8527_s2 = scalar_lea.hbm %s11583_s19, 16 }
  0xc6   : > { %p8528_p0 = scmp.ne.s32.totalorder %s11583_s19, %s8527_s2  ;;  %p8533_p3 = scmp.lt.u32.totalorder %s8527_s2, %s11583_s19 }
  0xc8   : > { %p8529_p1 = pnand %p8528_p0, %p11530_p4 }
  0xca   : > { %p8530_p2 = pneg %p8529_p1 }
  0xcc   : > { %p8535_p7 = pnand %p8533_p3, %p8530_p2 }
  0xce   : > { %8538 = shalt.err (!%p8535_p7)
}
  0xcf   : > { %s8539_s10 = scalar_lea.vmem %s1299_s3, 16  ;;  %s8545_s0 = scalar_lea.vmem %s1299_s3, 32 }
  0xd0   : > { %p8540_p6 = scmp.ne.s32.totalorder %s1299_s3, %s8539_s10  ;;  %p8546_p13 = scmp.lt.s32.totalorder %s1299_s3, %s1299_s3 }
  0xd1   : > { %p8547_p8 = scmp.lt.s32.totalorder %s8545_s0, %s8539_s10 }
  0xd2   : > { %p8541_p11 = pnand %p8540_p6, %p11530_p4 }
  0xd3   : > { %p8548_p9 = por %p8547_p8, %p8546_p13 }
  0xd4   : > { %p8542_p12 = pneg %p8541_p11 }
  0xd6   : > { %p8549_p10 = pnand %p8548_p9, %p8542_p12 }
  0xd8   : > { %8552 = shalt.err (!%p8549_p10)
}
  0xd9   : > { %7995 = dma.hbm_to_vmem [thread:$0]  (%p11530_p4), %s11583_s19, 16, %s1299_s3, [#allocation20]  }
  0xda   : > { %s8553_s2 = scalar_lea.hbm %s9943_s30, 256 }
  0xdb   : > { %p8554_p0 = scmp.ne.s32.totalorder %s9943_s30, %s8553_s2  ;;  %p8559_p3 = scmp.lt.u32.totalorder %s8553_s2, %s9943_s30 }
  0xdd   : > { %p8555_p1 = pnand %p8554_p0, %p11530_p4 }
  0xdf   : > { %p8556_p2 = pneg %p8555_p1 }
  0xe1   : > { %p8561_p7 = pnand %p8559_p3, %p8556_p2 }
  0xe3   : > { %8564 = shalt.err (!%p8561_p7)
}
  0xe4   : > { %s8565_s10 = scalar_lea.vmem %s10224_s25, 256  ;;  %p8572_p13 = scmp.lt.s32.totalorder %s10224_s25, %s10224_s25 }
  0xe5   : > { %p8566_p6 = scmp.ne.s32.totalorder %s10224_s25, %s8565_s10  ;;  %p8573_p8 = scmp.lt.s32.totalorder %s8565_s10, %s8565_s10 }
  0xe7   : > { %p8567_p11 = pnand %p8566_p6, %p11530_p4  ;;  %p8574_p9 = por %p8573_p8, %p8572_p13 }
  0xe9   : > { %p8568_p12 = pneg %p8567_p11 }
  0xeb   : > { %p8575_p10 = pnand %p8574_p9, %p8568_p12 }
  0xed   : > { %8578 = shalt.err (!%p8575_p10)
}
  0xee   : > { %7999 = dma.hbm_to_vmem [thread:$0]  (%p11530_p4), %s9943_s30, 256, %s10224_s25, [#allocation23], %s9814_s21, %s9814_s21, %s9815_s15  }
  0xef   : > { %s9818_s26 = smov [#allocation25]   ;;  %s9819_s18 = smov [#allocation28]  }
  0xf0   : > { %s1344_s3 = sshll.u32 %s9818_s26, 4  ;;  %s1365_s0 = sshll.u32 %s9819_s18, 4  ;;  %s1345_s3 = int_to_ptr.vmem [resolvable:$true] %s1344_s3  ;;  %s10254_s0 = int_to_ptr.vmem [resolvable:$true] %s1365_s0 }
  0xf1   : > { %s8579_s2 = scalar_lea.hbm %s11587_s12, 16 }
  0xf2   : > { %p8580_p0 = scmp.ne.s32.totalorder %s11587_s12, %s8579_s2  ;;  %p8585_p3 = scmp.lt.u32.totalorder %s8579_s2, %s11587_s12 }
  0xf4   : > { %p8581_p1 = pnand %p8580_p0, %p11530_p4 }
  0xf6   : > { %p8582_p2 = pneg %p8581_p1 }
  0xf8   : > { %p8587_p7 = pnand %p8585_p3, %p8582_p2 }
  0xfa   : > { %8590 = shalt.err (!%p8587_p7)
}
  0xfb   : > { %s8591_s10 = scalar_lea.vmem %s1345_s3, 16  ;;  %s8597_s25 = scalar_lea.vmem %s1345_s3, 32 }
  0xfc   : > { %p8592_p6 = scmp.ne.s32.totalorder %s1345_s3, %s8591_s10  ;;  %p8598_p13 = scmp.lt.s32.totalorder %s1345_s3, %s1345_s3 }
  0xfd   : > { %p8599_p8 = scmp.lt.s32.totalorder %s8597_s25, %s8591_s10 }
  0xfe   : > { %p8593_p11 = pnand %p8592_p6, %p11530_p4 }
  0xff   : > { %p8600_p9 = por %p8599_p8, %p8598_p13 }
 0x100   : > { %p8594_p12 = pneg %p8593_p11 }
 0x102   : > { %p8601_p10 = pnand %p8600_p9, %p8594_p12 }
 0x104   : > { %8604 = shalt.err (!%p8601_p10)
}
 0x105   : > { %8003 = dma.hbm_to_vmem [thread:$0]  (%p11530_p4), %s11587_s12, 16, %s1345_s3, [#allocation26]  }
 0x106   : > { %s8605_s26 = scalar_lea.hbm %s9963_s27, 512 }
 0x107   : > { %p8606_p0 = scmp.ne.s32.totalorder %s9963_s27, %s8605_s26  ;;  %p8611_p3 = scmp.lt.u32.totalorder %s8605_s26, %s9963_s27 }
 0x109   : > { %p8607_p1 = pnand %p8606_p0, %p11530_p4 }
 0x10b   : > { %p8608_p2 = pneg %p8607_p1 }
 0x10d   : > { %p8613_p7 = pnand %p8611_p3, %p8608_p2 }
 0x10f   : > { %8616 = shalt.err (!%p8613_p7)
}
 0x110   : > { %s8617_s18 = scalar_lea.vmem %s10254_s0, 512  ;;  %p8624_p13 = scmp.lt.s32.totalorder %s10254_s0, %s10254_s0 }
 0x111   : > { %p8618_p6 = scmp.ne.s32.totalorder %s10254_s0, %s8617_s18  ;;  %p8625_p8 = scmp.lt.s32.totalorder %s8617_s18, %s8617_s18 }
 0x113   : > { %p8619_p11 = pnand %p8618_p6, %p11530_p4  ;;  %p8626_p9 = por %p8625_p8, %p8624_p13 }
 0x115   : > { %p8620_p12 = pneg %p8619_p11 }
 0x117   : > { %p8627_p10 = pnand %p8626_p9, %p8620_p12 }
 0x119   : > { %8630 = shalt.err (!%p8627_p10)
}
 0x11a   : > { %8007 = dma.hbm_to_vmem [thread:$0]  (%p11530_p4), %s9963_s27, 512, %s10254_s0, [#allocation29], %s9814_s21, %s9814_s21, %s9815_s15  }
 0x11b   : > { %s9820_s3 = smov [#allocation31]   ;;  %s9821_s10 = smov [#allocation34]  }
 0x11c   : > { %s1390_s2 = sshll.u32 %s9820_s3, 4  ;;  %s1411_s25 = sshll.u32 %s9821_s10, 4  ;;  %s1391_s2 = int_to_ptr.vmem [resolvable:$true] %s1390_s2  ;;  %s10284_s25 = int_to_ptr.vmem [resolvable:$true] %s1411_s25 }
 0x11d   : > { %s8631_s26 = scalar_lea.hbm %s9973_s29, 16 }
 0x11e   : > { %p8632_p0 = scmp.ne.s32.totalorder %s9973_s29, %s8631_s26  ;;  %p8637_p3 = scmp.lt.u32.totalorder %s8631_s26, %s9973_s29 }
 0x120   : > { %p8633_p1 = pnand %p8632_p0, %p11530_p4 }
 0x122   : > { %p8634_p2 = pneg %p8633_p1 }
 0x124   : > { %p8639_p7 = pnand %p8637_p3, %p8634_p2 }
 0x126   : > { %8642 = shalt.err (!%p8639_p7)
}
 0x127   : > { %s8643_s18 = scalar_lea.vmem %s1391_s2, 16  ;;  %s8649_s0 = scalar_lea.vmem %s1391_s2, 32 }
 0x128   : > { %p8644_p6 = scmp.ne.s32.totalorder %s1391_s2, %s8643_s18  ;;  %p8650_p13 = scmp.lt.s32.totalorder %s1391_s2, %s1391_s2 }
 0x129   : > { %p8651_p8 = scmp.lt.s32.totalorder %s8649_s0, %s8643_s18 }
 0x12a   : > { %p8645_p11 = pnand %p8644_p6, %p11530_p4 }
 0x12b   : > { %p8652_p9 = por %p8651_p8, %p8650_p13 }
 0x12c   : > { %p8646_p12 = pneg %p8645_p11 }
 0x12e   : > { %p8653_p10 = pnand %p8652_p9, %p8646_p12 }
 0x130   : > { %8656 = shalt.err (!%p8653_p10)
}
 0x131   : > { %8011 = dma.hbm_to_vmem [thread:$0]  (%p11530_p4), %s9973_s29, 16, %s1391_s2, [#allocation32]  }
 0x132   : > { %s8657_s3 = scalar_lea.hbm %s11586_s13, 512 }
 0x133   : > { %p8658_p0 = scmp.ne.s32.totalorder %s11586_s13, %s8657_s3  ;;  %p8663_p3 = scmp.lt.u32.totalorder %s8657_s3, %s11586_s13 }
 0x135   : > { %p8659_p1 = pnand %p8658_p0, %p11530_p4 }
 0x137   : > { %p8660_p2 = pneg %p8659_p1 }
 0x139   : > { %p8665_p7 = pnand %p8663_p3, %p8660_p2 }
 0x13b   : > { %8668 = shalt.err (!%p8665_p7)
}
 0x13c   : > { %s8669_s10 = scalar_lea.vmem %s10284_s25, 512  ;;  %p8676_p13 = scmp.lt.s32.totalorder %s10284_s25, %s10284_s25 }
 0x13d   : > { %p8670_p6 = scmp.ne.s32.totalorder %s10284_s25, %s8669_s10  ;;  %p8677_p8 = scmp.lt.s32.totalorder %s8669_s10, %s8669_s10 }
 0x13f   : > { %p8671_p11 = pnand %p8670_p6, %p11530_p4  ;;  %p8678_p9 = por %p8677_p8, %p8676_p13 }
 0x141   : > { %p8672_p12 = pneg %p8671_p11 }
 0x143   : > { %p8679_p10 = pnand %p8678_p9, %p8672_p12 }
 0x145   : > { %8682 = shalt.err (!%p8679_p10)
}
 0x146   : > { %8015 = dma.hbm_to_vmem [thread:$0]  (%p11530_p4), %s11586_s13, 512, %s10284_s25, [#allocation35], %s9814_s21, %s9814_s21, %s9815_s15  }
 0x147   : > { %s9822_s2 = smov [#allocation37]   ;;  %s9823_s18 = smov [#allocation40]  }
 0x148   : > { %s1436_s26 = sshll.u32 %s9822_s2, 4  ;;  %s1463_s0 = sshll.u32 %s9823_s18, 4  ;;  %s1437_s26 = int_to_ptr.vmem [resolvable:$true] %s1436_s26  ;;  %s10314_s0 = int_to_ptr.vmem [resolvable:$true] %s1463_s0 }
 0x149   : > { %s8683_s3 = scalar_lea.hbm %s11589_s5, 16 }
 0x14a   : > { %p8684_p0 = scmp.ne.s32.totalorder %s11589_s5, %s8683_s3  ;;  %p8689_p3 = scmp.lt.u32.totalorder %s8683_s3, %s11589_s5 }
 0x14c   : > { %p8685_p1 = pnand %p8684_p0, %p11530_p4 }
 0x14e   : > { %p8686_p2 = pneg %p8685_p1 }
 0x150   : > { %p8691_p7 = pnand %p8689_p3, %p8686_p2 }
 0x152   : > { %8694 = shalt.err (!%p8691_p7)
}
 0x153   : > { %s8695_s10 = scalar_lea.vmem %s1437_s26, 16  ;;  %s8701_s25 = scalar_lea.vmem %s1437_s26, 32 }
 0x154   : > { %p8696_p6 = scmp.ne.s32.totalorder %s1437_s26, %s8695_s10  ;;  %p8702_p13 = scmp.lt.s32.totalorder %s1437_s26, %s1437_s26 }
 0x155   : > { %p8703_p8 = scmp.lt.s32.totalorder %s8701_s25, %s8695_s10 }
 0x156   : > { %p8697_p11 = pnand %p8696_p6, %p11530_p4 }
 0x157   : > { %p8704_p9 = por %p8703_p8, %p8702_p13 }
 0x158   : > { %p8698_p12 = pneg %p8697_p11 }
 0x15a   : > { %p8705_p10 = pnand %p8704_p9, %p8698_p12 }
 0x15c   : > { %8708 = shalt.err (!%p8705_p10)
}
 0x15d   : > { %8019 = dma.hbm_to_vmem [thread:$0]  (%p11530_p4), %s11589_s5, 16, %s1437_s26, [#allocation38]  }
 0x15e   : > { %s8709_s2 = scalar_lea.hbm %s10011_s20, 512 }
 0x15f   : > { %p8710_p0 = scmp.ne.s32.totalorder %s10011_s20, %s8709_s2  ;;  %p8715_p3 = scmp.lt.u32.totalorder %s8709_s2, %s10011_s20 }
 0x161   : > { %p8711_p1 = pnand %p8710_p0, %p11530_p4 }
 0x163   : > { %p8712_p2 = pneg %p8711_p1 }
 0x165   : > { %p8717_p7 = pnand %p8715_p3, %p8712_p2 }
 0x167   : > { %8720 = shalt.err (!%p8717_p7)
}
 0x168   : > { %s8721_s18 = scalar_lea.vmem %s10314_s0, 512  ;;  %p8728_p13 = scmp.lt.s32.totalorder %s10314_s0, %s10314_s0 }
 0x169   : > { %p8722_p6 = scmp.ne.s32.totalorder %s10314_s0, %s8721_s18  ;;  %p8729_p8 = scmp.lt.s32.totalorder %s8721_s18, %s8721_s18 }
 0x16b   : > { %p8723_p11 = pnand %p8722_p6, %p11530_p4  ;;  %p8730_p9 = por %p8729_p8, %p8728_p13 }
 0x16d   : > { %p8724_p12 = pneg %p8723_p11 }
 0x16f   : > { %p8731_p10 = pnand %p8730_p9, %p8724_p12 }
 0x171   : > { %8734 = shalt.err (!%p8731_p10)
}
 0x172   : > { %8023 = dma.hbm_to_vmem [thread:$0]  (%p11530_p4), %s10011_s20, 512, %s10314_s0, [#allocation41], %s9814_s21, %s9814_s21, %s9815_s15  }
 0x173   : > { %s9824_s26 = smov [#allocation43]   ;;  %s9825_s10 = smov [#allocation46]  }
 0x174   : > { %s1487_s3 = sshll.u32 %s9824_s26, 4  ;;  %s1511_s25 = sshll.u32 %s9825_s10, 4  ;;  %s1488_s3 = int_to_ptr.vmem [resolvable:$true] %s1487_s3  ;;  %s10344_s25 = int_to_ptr.vmem [resolvable:$true] %s1511_s25 }
 0x175   : > { %s8735_s2 = scalar_lea.hbm %s11590_s4, 512 }
 0x176   : > { %p8736_p0 = scmp.ne.s32.totalorder %s11590_s4, %s8735_s2  ;;  %p8741_p3 = scmp.lt.u32.totalorder %s8735_s2, %s11590_s4 }
 0x178   : > { %p8737_p1 = pnand %p8736_p0, %p11530_p4 }
 0x17a   : > { %p8738_p2 = pneg %p8737_p1 }
 0x17c   : > { %p8743_p7 = pnand %p8741_p3, %p8738_p2 }
 0x17e   : > { %8746 = shalt.err (!%p8743_p7)
}
 0x17f   : > { %s8747_s18 = scalar_lea.vmem %s1488_s3, 512  ;;  %p8754_p13 = scmp.lt.s32.totalorder %s1488_s3, %s1488_s3 }
 0x180   : > { %p8748_p6 = scmp.ne.s32.totalorder %s1488_s3, %s8747_s18  ;;  %p8755_p8 = scmp.lt.s32.totalorder %s8747_s18, %s8747_s18 }
 0x182   : > { %p8749_p11 = pnand %p8748_p6, %p11530_p4  ;;  %p8756_p9 = por %p8755_p8, %p8754_p13 }
 0x184   : > { %p8750_p12 = pneg %p8749_p11 }
 0x186   : > { %p8757_p10 = pnand %p8756_p9, %p8750_p12 }
 0x188   : > { %8760 = shalt.err (!%p8757_p10)
}
 0x189   : > { %8027 = dma.hbm_to_vmem [thread:$0]  (%p11530_p4), %s11590_s4, 512, %s1488_s3, [#allocation44], %s9814_s21, %s9814_s21, %s9815_s15  }
 0x18a   : > { %s8761_s0 = scalar_lea.hbm %s10031_s24, 512 }
 0x18b   : > { %p8762_p0 = scmp.ne.s32.totalorder %s10031_s24, %s8761_s0  ;;  %p8767_p3 = scmp.lt.u32.totalorder %s8761_s0, %s10031_s24 }
 0x18d   : > { %p8763_p1 = pnand %p8762_p0, %p11530_p4 }
 0x18f   : > { %p8764_p2 = pneg %p8763_p1 }
 0x191   : > { %p8769_p7 = pnand %p8767_p3, %p8764_p2 }
 0x193   : > { %8772 = shalt.err (!%p8769_p7)
}
 0x194   : > { %s8773_s26 = scalar_lea.vmem %s10344_s25, 512  ;;  %p8780_p13 = scmp.lt.s32.totalorder %s10344_s25, %s10344_s25 }
 0x195   : > { %p8774_p6 = scmp.ne.s32.totalorder %s10344_s25, %s8773_s26  ;;  %p8781_p8 = scmp.lt.s32.totalorder %s8773_s26, %s8773_s26 }
 0x197   : > { %p8775_p11 = pnand %p8774_p6, %p11530_p4  ;;  %p8782_p9 = por %p8781_p8, %p8780_p13 }
 0x199   : > { %p8776_p12 = pneg %p8775_p11 }
 0x19b   : > { %p8783_p10 = pnand %p8782_p9, %p8776_p12 }
 0x19d   : > { %8786 = shalt.err (!%p8783_p10)
}
 0x19e   : > { %8031 = dma.hbm_to_vmem [thread:$0]  (%p11530_p4), %s10031_s24, 512, %s10344_s25, [#allocation47], %s9814_s21, %s9814_s21, %s9815_s15  }
 0x19f   : > { %s9826_s3 = smov [#allocation49]   ;;  %s9827_s2 = smov [#allocation52]  }
 0x1a0   : > { %s1536_s10 = sshll.u32 %s9826_s3, 4  ;;  %s1557_s18 = sshll.u32 %s9827_s2, 4  ;;  %s1537_s10 = int_to_ptr.vmem [resolvable:$true] %s1536_s10  ;;  %s10377_s18 = int_to_ptr.vmem [resolvable:$true] %s1557_s18 }
 0x1a1   : > { %s8787_s0 = scalar_lea.hbm %s10041_s28, 16 }
 0x1a2   : > { %p8788_p0 = scmp.ne.s32.totalorder %s10041_s28, %s8787_s0  ;;  %p8793_p3 = scmp.lt.u32.totalorder %s8787_s0, %s10041_s28 }
 0x1a4   : > { %p8789_p1 = pnand %p8788_p0, %p11530_p4 }
 0x1a6   : > { %p8790_p2 = pneg %p8789_p1 }
 0x1a8   : > { %p8795_p7 = pnand %p8793_p3, %p8790_p2 }
 0x1aa   : > { %8798 = shalt.err (!%p8795_p7)
}
 0x1ab   : > { %s8799_s26 = scalar_lea.vmem %s1537_s10, 16  ;;  %s8805_s25 = scalar_lea.vmem %s1537_s10, 32 }
 0x1ac   : > { %p8800_p6 = scmp.ne.s32.totalorder %s1537_s10, %s8799_s26  ;;  %p8806_p13 = scmp.lt.s32.totalorder %s1537_s10, %s1537_s10 }
 0x1ad   : > { %p8807_p8 = scmp.lt.s32.totalorder %s8805_s25, %s8799_s26 }
 0x1ae   : > { %p8801_p11 = pnand %p8800_p6, %p11530_p4 }
 0x1af   : > { %p8808_p9 = por %p8807_p8, %p8806_p13 }
 0x1b0   : > { %p8802_p12 = pneg %p8801_p11 }
 0x1b2   : > { %p8809_p10 = pnand %p8808_p9, %p8802_p12 }
 0x1b4   : > { %8812 = shalt.err (!%p8809_p10)
}
 0x1b5   : > { %8035 = dma.hbm_to_vmem [thread:$0]  (%p11530_p4), %s10041_s28, 16, %s1537_s10, [#allocation50]  }
 0x1b6   : > { %s8813_s3 = scalar_lea.hbm %s11585_s16, 512 }
 0x1b7   : > { %p8814_p0 = scmp.ne.s32.totalorder %s11585_s16, %s8813_s3  ;;  %p8819_p3 = scmp.lt.u32.totalorder %s8813_s3, %s11585_s16 }
 0x1b9   : > { %p8815_p1 = pnand %p8814_p0, %p11530_p4 }
 0x1bb   : > { %p8816_p2 = pneg %p8815_p1 }
 0x1bd   : > { %p8821_p7 = pnand %p8819_p3, %p8816_p2 }
 0x1bf   : > { %8824 = shalt.err (!%p8821_p7)
}
 0x1c0   : > { %s8825_s2 = scalar_lea.vmem %s10377_s18, 512  ;;  %p8832_p13 = scmp.lt.s32.totalorder %s10377_s18, %s10377_s18 }
 0x1c1   : > { %p8826_p6 = scmp.ne.s32.totalorder %s10377_s18, %s8825_s2  ;;  %p8833_p8 = scmp.lt.s32.totalorder %s8825_s2, %s8825_s2 }
 0x1c3   : > { %p8827_p11 = pnand %p8826_p6, %p11530_p4  ;;  %p8834_p9 = por %p8833_p8, %p8832_p13 }
 0x1c5   : > { %p8828_p12 = pneg %p8827_p11 }
 0x1c7   : > { %p8835_p10 = pnand %p8834_p9, %p8828_p12 }
 0x1c9   : > { %8838 = shalt.err (!%p8835_p10)
}
 0x1ca   : > { %s11602_s10 = sld [smem:[#allocation129_spill]]  ;;  %s9828_s0 = smov [#allocation55]  }
 0x1cb   : > { %8039 = dma.hbm_to_vmem [thread:$0]  (%p11530_p4), %s11585_s16, 512, %s10377_s18, [#allocation53], %s9814_s21, %s9814_s21, %s9815_s15  }
 0x1cc   : > { %s1581_s26 = sshll.u32 %s9828_s0, 4  ;;  %s9829_s25 = smov [#allocation58]   ;;  %s1582_s26 = int_to_ptr.vmem [resolvable:$true] %s1581_s26 }
 0x1cd   : > { %s1605_s3 = sshll.u32 %s9829_s25, 4  ;;  %s10407_s3 = int_to_ptr.vmem [resolvable:$true] %s1605_s3 }
 0x1d0   : > { %s8839_s2 = scalar_lea.hbm %s11602_s10, 512 }
 0x1d1   : > { %p8840_p0 = scmp.ne.s32.totalorder %s11602_s10, %s8839_s2  ;;  %p8845_p3 = scmp.lt.u32.totalorder %s8839_s2, %s11602_s10 }
 0x1d3   : > { %p8841_p1 = pnand %p8840_p0, %p11530_p4 }
 0x1d5   : > { %p8842_p2 = pneg %p8841_p1 }
 0x1d7   : > { %p8847_p7 = pnand %p8845_p3, %p8842_p2 }
 0x1d9   : > { %8850 = shalt.err (!%p8847_p7)
}
 0x1da   : > { %s8851_s4 = scalar_lea.vmem %s1582_s26, 512  ;;  %p8858_p13 = scmp.lt.s32.totalorder %s1582_s26, %s1582_s26 }
 0x1db   : > { %p8852_p6 = scmp.ne.s32.totalorder %s1582_s26, %s8851_s4  ;;  %p8859_p8 = scmp.lt.s32.totalorder %s8851_s4, %s8851_s4 }
 0x1dd   : > { %p8853_p11 = pnand %p8852_p6, %p11530_p4  ;;  %p8860_p9 = por %p8859_p8, %p8858_p13 }
 0x1df   : > { %p8854_p12 = pneg %p8853_p11 }
 0x1e1   : > { %p8861_p10 = pnand %p8860_p9, %p8854_p12 }
 0x1e3   : > { %8864 = shalt.err (!%p8861_p10)
}
 0x1e4   : > { %s11603_s18 = sld [smem:[#allocation131_spill]] }
 0x1e5   : > { %8043 = dma.hbm_to_vmem [thread:$0]  (%p11530_p4), %s11602_s10, 512, %s1582_s26, [#allocation56], %s9814_s21, %s9814_s21, %s9815_s15  }
 0x1ea   : > { %s8865_s0 = scalar_lea.hbm %s11603_s18, 512 }
 0x1eb   : > { %p8866_p0 = scmp.ne.s32.totalorder %s11603_s18, %s8865_s0  ;;  %p8871_p3 = scmp.lt.u32.totalorder %s8865_s0, %s11603_s18 }
 0x1ed   : > { %p8867_p1 = pnand %p8866_p0, %p11530_p4 }
 0x1ef   : > { %p8868_p2 = pneg %p8867_p1 }
 0x1f1   : > { %p8873_p7 = pnand %p8871_p3, %p8868_p2 }
 0x1f3   : > { %8876 = shalt.err (!%p8873_p7)
}
 0x1f4   : > { %s8877_s4 = scalar_lea.vmem %s10407_s3, 512  ;;  %p8884_p13 = scmp.lt.s32.totalorder %s10407_s3, %s10407_s3 }
 0x1f5   : > { %p8878_p6 = scmp.ne.s32.totalorder %s10407_s3, %s8877_s4  ;;  %p8885_p8 = scmp.lt.s32.totalorder %s8877_s4, %s8877_s4 }
 0x1f7   : > { %p8879_p11 = pnand %p8878_p6, %p11530_p4  ;;  %p8886_p9 = por %p8885_p8, %p8884_p13 }
 0x1f9   : > { %p8880_p12 = pneg %p8879_p11 }
 0x1fb   : > { %p8887_p10 = pnand %p8886_p9, %p8880_p12 }
 0x1fd   : > { %8890 = shalt.err (!%p8887_p10)
}
 0x1fe   : > { %s11604_s26 = sld [smem:[#allocation133_spill]]  ;;  %s9830_s25 = smov [#allocation61]  }
 0x1ff   : > { %8047 = dma.hbm_to_vmem [thread:$0]  (%p11530_p4), %s11603_s18, 512, %s10407_s3, [#allocation59], %s9814_s21, %s9814_s21, %s9815_s15  }
 0x200   : > { %s1630_s2 = sshll.u32 %s9830_s25, 4  ;;  %s9831_s0 = smov [#allocation64]   ;;  %s1631_s2 = int_to_ptr.vmem [resolvable:$true] %s1630_s2 }
 0x201   : > { %s1651_s5 = sshll.u32 %s9831_s0, 4  ;;  %s10440_s5 = int_to_ptr.vmem [resolvable:$true] %s1651_s5 }
 0x204   : > { %s8891_s4 = scalar_lea.hbm %s11604_s26, 16 }
 0x205   : > { %p8892_p0 = scmp.ne.s32.totalorder %s11604_s26, %s8891_s4  ;;  %p8897_p3 = scmp.lt.u32.totalorder %s8891_s4, %s11604_s26 }
 0x207   : > { %p8893_p1 = pnand %p8892_p0, %p11530_p4 }
 0x209   : > { %p8894_p2 = pneg %p8893_p1 }
 0x20b   : > { %p8899_p7 = pnand %p8897_p3, %p8894_p2 }
 0x20d   : > { %8902 = shalt.err (!%p8899_p7)
}
 0x20e   : > { %s8903_s8 = scalar_lea.vmem %s1631_s2, 16  ;;  %s8909_s21 = scalar_lea.vmem %s1631_s2, 32 }
 0x20f   : > { %p8904_p6 = scmp.ne.s32.totalorder %s1631_s2, %s8903_s8  ;;  %p8910_p13 = scmp.lt.s32.totalorder %s1631_s2, %s1631_s2 }
 0x210   : > { %p8911_p8 = scmp.lt.s32.totalorder %s8909_s21, %s8903_s8 }
 0x211   : > { %p8905_p11 = pnand %p8904_p6, %p11530_p4 }
 0x212   : > { %p8912_p9 = por %p8911_p8, %p8910_p13 }
 0x213   : > { %p8906_p12 = pneg %p8905_p11 }
 0x215   : > { %p8913_p10 = pnand %p8912_p9, %p8906_p12 }
 0x217   : > { %8916 = shalt.err (!%p8913_p10)
}
 0x218   : > { %s11605_s15 = sld [smem:[#allocation135_spill]] }
 0x219   : > { %8051 = dma.hbm_to_vmem [thread:$0]  (%p11530_p4), %s11604_s26, 16, %s1631_s2, [#allocation62]  }
 0x21e   : > { %s8917_s3 = scalar_lea.hbm %s11605_s15, 36864 }
 0x21f   : > { %p8918_p0 = scmp.ne.s32.totalorder %s11605_s15, %s8917_s3  ;;  %p8923_p3 = scmp.lt.u32.totalorder %s8917_s3, %s11605_s15 }
 0x221   : > { %p8919_p1 = pnand %p8918_p0, %p11530_p4 }
 0x223   : > { %p8920_p2 = pneg %p8919_p1 }
 0x225   : > { %p8925_p7 = pnand %p8923_p3, %p8920_p2 }
 0x227   : > { %8928 = shalt.err (!%p8925_p7)
}
 0x228   : > { %s8929_s8 = scalar_lea.vmem %s10440_s5, 36864  ;;  %p8936_p13 = scmp.lt.s32.totalorder %s10440_s5, %s10440_s5 }
 0x229   : > { %p8930_p6 = scmp.ne.s32.totalorder %s10440_s5, %s8929_s8  ;;  %p8937_p8 = scmp.lt.s32.totalorder %s8929_s8, %s8929_s8 }
 0x22b   : > { %p8931_p11 = pnand %p8930_p6, %p11530_p4  ;;  %p8938_p9 = por %p8937_p8, %p8936_p13 }
 0x22d   : > { %p8932_p12 = pneg %p8931_p11 }
 0x22f   : > { %p8939_p10 = pnand %p8938_p9, %p8932_p12 }
 0x231   : > { %8942 = shalt.err (!%p8939_p10)
}
 0x232   : > { %s9832_s25 = smov 1024   ;;  %s11606_s2 = sld [smem:[#allocation138_spill]] }
 0x233   : > { %s9833_s0 = smov 64   ;;  %s9834_s4 = smov [#allocation67]  }
 0x234   : > { %8055 = dma.hbm_to_vmem [thread:$0]  (%p11530_p4), %s11605_s15, 36864, %s10440_s5, [#allocation65], %s9832_s25, %s9832_s25, %s9833_s0  }
 0x235   : > { %s1679_s21 = sshll.u32 %s9834_s4, 4  ;;  %s9835_s3 = smov [#allocation12]   ;;  %s1680_s21 = int_to_ptr.vmem [resolvable:$true] %s1679_s21 }
 0x236   : > { %s1235_s10 = sshll.u32 %s9835_s3, 4  ;;  %s1236_s10 = int_to_ptr.vmem [resolvable:$true] %s1235_s10 }
 0x238   : > { %s8943_s8 = scalar_lea.hbm %s11606_s2, 16 }
 0x239   : > { %p8944_p0 = scmp.ne.s32.totalorder %s11606_s2, %s8943_s8  ;;  %p8949_p3 = scmp.lt.u32.totalorder %s8943_s8, %s11606_s2 }
 0x23b   : > { %p8945_p1 = pnand %p8944_p0, %p11530_p4 }
 0x23d   : > { %p8946_p2 = pneg %p8945_p1 }
 0x23f   : > { %p8951_p7 = pnand %p8949_p3, %p8946_p2 }
 0x241   : > { %8954 = shalt.err (!%p8951_p7)
}
 0x242   : > { %s8955_s12 = scalar_lea.vmem %s1680_s21, 16  ;;  %s8961_s5 = scalar_lea.vmem %s1680_s21, 32 }
 0x243   : > { %p8956_p6 = scmp.ne.s32.totalorder %s1680_s21, %s8955_s12  ;;  %p8962_p13 = scmp.lt.s32.totalorder %s1680_s21, %s1680_s21 }
 0x244   : > { %p8963_p8 = scmp.lt.s32.totalorder %s8961_s5, %s8955_s12 }
 0x245   : > { %p8957_p11 = pnand %p8956_p6, %p11530_p4 }
 0x246   : > { %p8964_p9 = por %p8963_p8, %p8962_p13 }
 0x247   : > { %p8958_p12 = pneg %p8957_p11 }
 0x249   : > { %p8965_p10 = pnand %p8964_p9, %p8958_p12 }
 0x24b   : > { %8968 = shalt.err (!%p8965_p10)
}
 0x24c   : > { %s11607_s25 = sld [smem:[#allocation103_spill]] }
 0x24d   : > { %8059 = dma.hbm_to_vmem [thread:$0]  (%p11530_p4), %s11606_s2, 16, %s1680_s21, [#allocation68]  }
 0x252   : > { %s8969_s0 = scalar_lea.hbm %s11607_s25, 16 }
 0x253   : > { %p8970_p0 = scmp.ne.s32.totalorder %s11607_s25, %s8969_s0  ;;  %p8975_p3 = scmp.lt.u32.totalorder %s8969_s0, %s11607_s25 }
 0x255   : > { %p8971_p1 = pnand %p8970_p0, %p11530_p4 }
 0x257   : > { %p8972_p2 = pneg %p8971_p1 }
 0x259   : > { %p8977_p7 = pnand %p8975_p3, %p8972_p2 }
 0x25b   : > { %8980 = shalt.err (!%p8977_p7)
}
 0x25c   : > { %s8981_s12 = scalar_lea.vmem %s1236_s10, 16  ;;  %s8987_s4 = scalar_lea.vmem %s1236_s10, 32 }
 0x25d   : > { %p8982_p6 = scmp.ne.s32.totalorder %s1236_s10, %s8981_s12  ;;  %p8988_p13 = scmp.lt.s32.totalorder %s1236_s10, %s1236_s10 }
 0x25e   : > { %p8989_p8 = scmp.lt.s32.totalorder %s8987_s4, %s8981_s12 }
 0x25f   : > { %p8983_p11 = pnand %p8982_p6, %p11530_p4 }
 0x260   : > { %p8990_p9 = por %p8989_p8, %p8988_p13 }
 0x261   : > { %p8984_p12 = pneg %p8983_p11 }
 0x263   : > { %p8991_p10 = pnand %p8990_p9, %p8984_p12 }
 0x265   : > { %8994 = shalt.err (!%p8991_p10)
}
 0x266   : > { %s11608_s21 = sld [smem:[#allocation107_spill]]  ;;  %s9836_s3 = smov [#allocation15]  }
 0x267   : > { %7985 = dma.hbm_to_vmem [thread:$0]  (%p11530_p4), %s11607_s25, 16, %s1236_s10, [#allocation11]  }
 0x268   : > { %s1263_s8 = sshll.u32 %s9836_s3, 4  ;;  %s9837_s5 = smov [#allocation18]   ;;  %s1264_s8 = int_to_ptr.vmem [resolvable:$true] %s1263_s8 }
 0x269   : > { %s1287_s0 = sshll.u32 %s9837_s5, 4  ;;  %s1288_s0 = int_to_ptr.vmem [resolvable:$true] %s1287_s0 }
 0x26c   : > { %s8995_s2 = scalar_lea.hbm %s11608_s21, 16 }
 0x26d   : > { %p8996_p0 = scmp.ne.s32.totalorder %s11608_s21, %s8995_s2  ;;  %p9001_p3 = scmp.lt.u32.totalorder %s8995_s2, %s11608_s21 }
 0x26f   : > { %p8997_p1 = pnand %p8996_p0, %p11530_p4 }
 0x271   : > { %p8998_p2 = pneg %p8997_p1 }
 0x273   : > { %p9003_p7 = pnand %p9001_p3, %p8998_p2 }
 0x275   : > { %9006 = shalt.err (!%p9003_p7)
}
 0x276   : > { %s9007_s12 = scalar_lea.vmem %s1264_s8, 16  ;;  %s9013_s10 = scalar_lea.vmem %s1264_s8, 32 }
 0x277   : > { %p9008_p6 = scmp.ne.s32.totalorder %s1264_s8, %s9007_s12  ;;  %p9014_p13 = scmp.lt.s32.totalorder %s1264_s8, %s1264_s8 }
 0x278   : > { %p9015_p8 = scmp.lt.s32.totalorder %s9013_s10, %s9007_s12 }
 0x279   : > { %p9009_p11 = pnand %p9008_p6, %p11530_p4 }
 0x27a   : > { %p9016_p9 = por %p9015_p8, %p9014_p13 }
 0x27b   : > { %p9010_p12 = pneg %p9009_p11 }
 0x27d   : > { %p9017_p10 = pnand %p9016_p9, %p9010_p12 }
 0x27f   : > { %9020 = shalt.err (!%p9017_p10)
}
 0x280   : > { %s11609_s4 = sld [smem:[#allocation109_spill]] }
 0x281   : > { %7989 = dma.hbm_to_vmem [thread:$0]  (%p11530_p4), %s11608_s21, 16, %s1264_s8, [#allocation14]  }
 0x286   : > { %s9021_s2 = scalar_lea.hbm %s11609_s4, 16 }
 0x287   : > { %p9022_p0 = scmp.ne.s32.totalorder %s11609_s4, %s9021_s2  ;;  %p9027_p3 = scmp.lt.u32.totalorder %s9021_s2, %s11609_s4 }
 0x289   : > { %p9023_p1 = pnand %p9022_p0, %p11530_p4 }
 0x28b   : > { %p9024_p2 = pneg %p9023_p1 }
 0x28d   : > { %p9029_p7 = pnand %p9027_p3, %p9024_p2 }
 0x28f   : > { %9032 = shalt.err (!%p9029_p7)
}
 0x290   : > { %s9033_s3 = scalar_lea.vmem %s1288_s0, 16  ;;  %s9039_s5 = scalar_lea.vmem %s1288_s0, 32 }
 0x291   : > { %p9034_p6 = scmp.ne.s32.totalorder %s1288_s0, %s9033_s3  ;;  %p9040_p13 = scmp.lt.s32.totalorder %s1288_s0, %s1288_s0 }
 0x292   : > { %p9041_p8 = scmp.lt.s32.totalorder %s9039_s5, %s9033_s3 }
 0x293   : > { %p9035_p11 = pnand %p9034_p6, %p11530_p4 }
 0x294   : > { %p9042_p9 = por %p9041_p8, %p9040_p13 }
 0x295   : > { %p9036_p12 = pneg %p9035_p11 }
 0x297   : > { %p9043_p10 = pnand %p9042_p9, %p9036_p12 }
 0x299   : > { %9046 = shalt.err (!%p9043_p10)
}
 0x29a   : > { %s11610_s8 = sld [smem:[#allocation111_spill]]  ;;  %s9838_s12 = smov [#allocation21]  }
 0x29b   : > { %7993 = dma.hbm_to_vmem [thread:$0]  (%p11530_p4), %s11609_s4, 16, %s1288_s0, [#allocation17]  }
 0x29c   : > { %s1309_s10 = sshll.u32 %s9838_s12, 4  ;;  %s9839_s2 = smov [#allocation24]   ;;  %s1310_s10 = int_to_ptr.vmem [resolvable:$true] %s1309_s10 }
 0x29d   : > { %s1333_s13 = sshll.u32 %s9839_s2, 4  ;;  %s1334_s13 = int_to_ptr.vmem [resolvable:$true] %s1333_s13 }
 0x2a0   : > { %s9047_s15 = scalar_lea.hbm %s11610_s8, 16 }
 0x2a1   : > { %p9048_p0 = scmp.ne.s32.totalorder %s11610_s8, %s9047_s15  ;;  %p9053_p3 = scmp.lt.u32.totalorder %s9047_s15, %s11610_s8 }
 0x2a3   : > { %p9049_p1 = pnand %p9048_p0, %p11530_p4 }
 0x2a5   : > { %p9050_p2 = pneg %p9049_p1 }
 0x2a7   : > { %p9055_p7 = pnand %p9053_p3, %p9050_p2 }
 0x2a9   : > { %9058 = shalt.err (!%p9055_p7)
}
 0x2aa   : > { %s9059_s3 = scalar_lea.vmem %s1310_s10, 16  ;;  %s9065_s0 = scalar_lea.vmem %s1310_s10, 32 }
 0x2ab   : > { %p9060_p6 = scmp.ne.s32.totalorder %s1310_s10, %s9059_s3  ;;  %p9066_p13 = scmp.lt.s32.totalorder %s1310_s10, %s1310_s10 }
 0x2ac   : > { %p9067_p8 = scmp.lt.s32.totalorder %s9065_s0, %s9059_s3 }
 0x2ad   : > { %p9061_p11 = pnand %p9060_p6, %p11530_p4 }
 0x2ae   : > { %p9068_p9 = por %p9067_p8, %p9066_p13 }
 0x2af   : > { %p9062_p12 = pneg %p9061_p11 }
 0x2b1   : > { %p9069_p10 = pnand %p9068_p9, %p9062_p12 }
 0x2b3   : > { %9072 = shalt.err (!%p9069_p10)
}
 0x2b4   : > { %s11611_s5 = sld [smem:[#allocation112_spill]] }
 0x2b5   : > { %7997 = dma.hbm_to_vmem [thread:$0]  (%p11530_p4), %s11610_s8, 16, %s1310_s10, [#allocation20]  }
 0x2ba   : > { %s9073_s15 = scalar_lea.hbm %s11611_s5, 16 }
 0x2bb   : > { %p9074_p0 = scmp.ne.s32.totalorder %s11611_s5, %s9073_s15  ;;  %p9079_p3 = scmp.lt.u32.totalorder %s9073_s15, %s11611_s5 }
 0x2bd   : > { %p9075_p1 = pnand %p9074_p0, %p11530_p4 }
 0x2bf   : > { %p9076_p2 = pneg %p9075_p1 }
 0x2c1   : > { %p9081_p7 = pnand %p9079_p3, %p9076_p2 }
 0x2c3   : > { %9084 = shalt.err (!%p9081_p7)
}
 0x2c4   : > { %s9085_s12 = scalar_lea.vmem %s1334_s13, 16  ;;  %s9091_s2 = scalar_lea.vmem %s1334_s13, 32 }
 0x2c5   : > { %p9086_p6 = scmp.ne.s32.totalorder %s1334_s13, %s9085_s12  ;;  %p9092_p13 = scmp.lt.s32.totalorder %s1334_s13, %s1334_s13 }
 0x2c6   : > { %p9093_p8 = scmp.lt.s32.totalorder %s9091_s2, %s9085_s12 }
 0x2c7   : > { %p9087_p11 = pnand %p9086_p6, %p11530_p4 }
 0x2c8   : > { %p9094_p9 = por %p9093_p8, %p9092_p13 }
 0x2c9   : > { %p9088_p12 = pneg %p9087_p11 }
 0x2cb   : > { %p9095_p10 = pnand %p9094_p9, %p9088_p12 }
 0x2cd   : > { %9098 = shalt.err (!%p9095_p10)
}
 0x2ce   : > { %s11612_s10 = sld [smem:[#allocation114_spill]]  ;;  %s9840_s3 = smov [#allocation27]  }
 0x2cf   : > { %8001 = dma.hbm_to_vmem [thread:$0]  (%p11530_p4), %s11611_s5, 16, %s1334_s13, [#allocation23]  }
 0x2d0   : > { %s1355_s0 = sshll.u32 %s9840_s3, 4  ;;  %s9841_s15 = smov [#allocation30]   ;;  %s1356_s0 = int_to_ptr.vmem [resolvable:$true] %s1355_s0 }
 0x2d1   : > { %s1379_s4 = sshll.u32 %s9841_s15, 4  ;;  %s1380_s4 = int_to_ptr.vmem [resolvable:$true] %s1379_s4 }
 0x2d4   : > { %s9099_s8 = scalar_lea.hbm %s11612_s10, 16 }
 0x2d5   : > { %p9100_p0 = scmp.ne.s32.totalorder %s11612_s10, %s9099_s8  ;;  %p9105_p3 = scmp.lt.u32.totalorder %s9099_s8, %s11612_s10 }
 0x2d7   : > { %p9101_p1 = pnand %p9100_p0, %p11530_p4 }
 0x2d9   : > { %p9102_p2 = pneg %p9101_p1 }
 0x2db   : > { %p9107_p7 = pnand %p9105_p3, %p9102_p2 }
 0x2dd   : > { %9110 = shalt.err (!%p9107_p7)
}
 0x2de   : > { %s9111_s12 = scalar_lea.vmem %s1356_s0, 16  ;;  %s9117_s13 = scalar_lea.vmem %s1356_s0, 32 }
 0x2df   : > { %p9112_p6 = scmp.ne.s32.totalorder %s1356_s0, %s9111_s12  ;;  %p9118_p13 = scmp.lt.s32.totalorder %s1356_s0, %s1356_s0 }
 0x2e0   : > { %p9119_p8 = scmp.lt.s32.totalorder %s9117_s13, %s9111_s12 }
 0x2e1   : > { %p9113_p11 = pnand %p9112_p6, %p11530_p4 }
 0x2e2   : > { %p9120_p9 = por %p9119_p8, %p9118_p13 }
 0x2e3   : > { %p9114_p12 = pneg %p9113_p11 }
 0x2e5   : > { %p9121_p10 = pnand %p9120_p9, %p9114_p12 }
 0x2e7   : > { %9124 = shalt.err (!%p9121_p10)
}
 0x2e8   : > { %s11613_s2 = sld [smem:[#allocation115_spill]] }
 0x2e9   : > { %8005 = dma.hbm_to_vmem [thread:$0]  (%p11530_p4), %s11612_s10, 16, %s1356_s0, [#allocation26]  }
 0x2ee   : > { %s9125_s8 = scalar_lea.hbm %s11613_s2, 16 }
 0x2ef   : > { %p9126_p0 = scmp.ne.s32.totalorder %s11613_s2, %s9125_s8  ;;  %p9131_p3 = scmp.lt.u32.totalorder %s9125_s8, %s11613_s2 }
 0x2f1   : > { %p9127_p1 = pnand %p9126_p0, %p11530_p4 }
 0x2f3   : > { %p9128_p2 = pneg %p9127_p1 }
 0x2f5   : > { %p9133_p7 = pnand %p9131_p3, %p9128_p2 }
 0x2f7   : > { %9136 = shalt.err (!%p9133_p7)
}
 0x2f8   : > { %s9137_s3 = scalar_lea.vmem %s1380_s4, 16  ;;  %s9143_s15 = scalar_lea.vmem %s1380_s4, 32 }
 0x2f9   : > { %p9138_p6 = scmp.ne.s32.totalorder %s1380_s4, %s9137_s3  ;;  %p9144_p13 = scmp.lt.s32.totalorder %s1380_s4, %s1380_s4 }
 0x2fa   : > { %p9145_p8 = scmp.lt.s32.totalorder %s9143_s15, %s9137_s3 }
 0x2fb   : > { %p9139_p11 = pnand %p9138_p6, %p11530_p4 }
 0x2fc   : > { %p9146_p9 = por %p9145_p8, %p9144_p13 }
 0x2fd   : > { %p9140_p12 = pneg %p9139_p11 }
 0x2ff   : > { %p9147_p10 = pnand %p9146_p9, %p9140_p12 }
 0x301   : > { %9150 = shalt.err (!%p9147_p10)
}
 0x302   : > { %s11614_s0 = sld [smem:[#allocation116_spill]]  ;;  %s9842_s13 = smov [#allocation33]  }
 0x303   : > { %8009 = dma.hbm_to_vmem [thread:$0]  (%p11530_p4), %s11613_s2, 16, %s1380_s4, [#allocation29]  }
 0x304   : > { %s1401_s8 = sshll.u32 %s9842_s13, 4  ;;  %s9843_s5 = smov [#allocation36]   ;;  %s1402_s8 = int_to_ptr.vmem [resolvable:$true] %s1401_s8 }
 0x305   : > { %s1425_s10 = sshll.u32 %s9843_s5, 4  ;;  %s1426_s10 = int_to_ptr.vmem [resolvable:$true] %s1425_s10 }
 0x308   : > { %s11615_s12 = smov %s11614_s0  ;;  %s9151_s16 = scalar_lea.hbm %s11614_s0, 16 }
 0x309   : > { %p9152_p0 = scmp.ne.s32.totalorder %s11615_s12, %s9151_s16  ;;  %p9157_p3 = scmp.lt.u32.totalorder %s9151_s16, %s11615_s12 }
 0x30b   : > { %p9153_p1 = pnand %p9152_p0, %p11530_p4 }
 0x30d   : > { %p9154_p2 = pneg %p9153_p1 }
 0x30f   : > { %p9159_p7 = pnand %p9157_p3, %p9154_p2 }
 0x311   : > { %9162 = shalt.err (!%p9159_p7)
}
 0x312   : > { %s9163_s3 = scalar_lea.vmem %s1402_s8, 16  ;;  %s9169_s4 = scalar_lea.vmem %s1402_s8, 32 }
 0x313   : > { %p9164_p6 = scmp.ne.s32.totalorder %s1402_s8, %s9163_s3  ;;  %p9170_p13 = scmp.lt.s32.totalorder %s1402_s8, %s1402_s8 }
 0x314   : > { %p9171_p8 = scmp.lt.s32.totalorder %s9169_s4, %s9163_s3 }
 0x315   : > { %p9165_p11 = pnand %p9164_p6, %p11530_p4 }
 0x316   : > { %p9172_p9 = por %p9171_p8, %p9170_p13 }
 0x317   : > { %p9166_p12 = pneg %p9165_p11 }
 0x319   : > { %p9173_p10 = pnand %p9172_p9, %p9166_p12 }
 0x31b   : > { %9176 = shalt.err (!%p9173_p10)
}
 0x31c   : > { %s11616_s5 = sld [smem:[#allocation118_spill]] }
 0x31d   : > { %8013 = dma.hbm_to_vmem [thread:$0]  (%p11530_p4), %s11615_s12, 16, %s1402_s8, [#allocation32]  }
 0x322   : > { %s9177_s16 = scalar_lea.hbm %s11616_s5, 16 }
 0x323   : > { %p9178_p0 = scmp.ne.s32.totalorder %s11616_s5, %s9177_s16  ;;  %p9183_p3 = scmp.lt.u32.totalorder %s9177_s16, %s11616_s5 }
 0x325   : > { %p9179_p1 = pnand %p9178_p0, %p11530_p4 }
 0x327   : > { %p9180_p2 = pneg %p9179_p1 }
 0x329   : > { %p9185_p7 = pnand %p9183_p3, %p9180_p2 }
 0x32b   : > { %9188 = shalt.err (!%p9185_p7)
}
 0x32c   : > { %s9189_s15 = scalar_lea.vmem %s1426_s10, 16  ;;  %s9195_s0 = scalar_lea.vmem %s1426_s10, 32 }
 0x32d   : > { %p9190_p6 = scmp.ne.s32.totalorder %s1426_s10, %s9189_s15  ;;  %p9196_p13 = scmp.lt.s32.totalorder %s1426_s10, %s1426_s10 }
 0x32e   : > { %p9197_p8 = scmp.lt.s32.totalorder %s9195_s0, %s9189_s15 }
 0x32f   : > { %p9191_p11 = pnand %p9190_p6, %p11530_p4 }
 0x330   : > { %p9198_p9 = por %p9197_p8, %p9196_p13 }
 0x331   : > { %p9192_p12 = pneg %p9191_p11 }
 0x333   : > { %p9199_p10 = pnand %p9198_p9, %p9192_p12 }
 0x335   : > { %9202 = shalt.err (!%p9199_p10)
}
 0x336   : > { %s11617_s13 = sld [smem:[#allocation120_spill]]  ;;  %s9844_s8 = smov [#allocation39]  }
 0x337   : > { %8017 = dma.hbm_to_vmem [thread:$0]  (%p11530_p4), %s11616_s5, 16, %s1426_s10, [#allocation35]  }
 0x338   : > { %s1447_s3 = sshll.u32 %s9844_s8, 4  ;;  %s9845_s4 = smov [#allocation42]   ;;  %s1448_s3 = int_to_ptr.vmem [resolvable:$true] %s1447_s3 }
 0x339   : > { %s1477_s16 = sshll.u32 %s9845_s4, 4  ;;  %s1478_s16 = int_to_ptr.vmem [resolvable:$true] %s1477_s16 }
 0x33c   : > { %s9203_s2 = scalar_lea.hbm %s11617_s13, 16 }
 0x33d   : > { %p9204_p0 = scmp.ne.s32.totalorder %s11617_s13, %s9203_s2  ;;  %p9209_p3 = scmp.lt.u32.totalorder %s9203_s2, %s11617_s13 }
 0x33f   : > { %p9205_p1 = pnand %p9204_p0, %p11530_p4 }
 0x341   : > { %p9206_p2 = pneg %p9205_p1 }
 0x343   : > { %p9211_p7 = pnand %p9209_p3, %p9206_p2 }
 0x345   : > { %9214 = shalt.err (!%p9211_p7)
}
 0x346   : > { %s9215_s15 = scalar_lea.vmem %s1448_s3, 16  ;;  %s9221_s10 = scalar_lea.vmem %s1448_s3, 32 }
 0x347   : > { %p9216_p6 = scmp.ne.s32.totalorder %s1448_s3, %s9215_s15  ;;  %p9222_p13 = scmp.lt.s32.totalorder %s1448_s3, %s1448_s3 }
 0x348   : > { %p9223_p8 = scmp.lt.s32.totalorder %s9221_s10, %s9215_s15 }
 0x349   : > { %p9217_p11 = pnand %p9216_p6, %p11530_p4 }
 0x34a   : > { %p9224_p9 = por %p9223_p8, %p9222_p13 }
 0x34b   : > { %p9218_p12 = pneg %p9217_p11 }
 0x34d   : > { %p9225_p10 = pnand %p9224_p9, %p9218_p12 }
 0x34f   : > { %9228 = shalt.err (!%p9225_p10)
}
 0x350   : > { %s11618_s0 = sld [smem:[#allocation122_spill]] }
 0x351   : > { %8021 = dma.hbm_to_vmem [thread:$0]  (%p11530_p4), %s11617_s13, 16, %s1448_s3, [#allocation38]  }
 0x356   : > { %s11619_s8 = smov %s11618_s0  ;;  %s9229_s2 = scalar_lea.hbm %s11618_s0, 16 }
 0x357   : > { %p9230_p0 = scmp.ne.s32.totalorder %s11619_s8, %s9229_s2  ;;  %p9235_p3 = scmp.lt.u32.totalorder %s9229_s2, %s11619_s8 }
 0x359   : > { %p9231_p1 = pnand %p9230_p0, %p11530_p4 }
 0x35b   : > { %p9232_p2 = pneg %p9231_p1 }
 0x35d   : > { %p9237_p7 = pnand %p9235_p3, %p9232_p2 }
 0x35f   : > { %9240 = shalt.err (!%p9237_p7)
}
 0x360   : > { %s9241_s4 = scalar_lea.vmem %s1478_s16, 16  ;;  %s9247_s15 = scalar_lea.vmem %s1478_s16, 32 }
 0x361   : > { %p9242_p6 = scmp.ne.s32.totalorder %s1478_s16, %s9241_s4  ;;  %p9248_p13 = scmp.lt.s32.totalorder %s1478_s16, %s1478_s16 }
 0x362   : > { %p9249_p8 = scmp.lt.s32.totalorder %s9247_s15, %s9241_s4 }
 0x363   : > { %p9243_p11 = pnand %p9242_p6, %p11530_p4 }
 0x364   : > { %p9250_p9 = por %p9249_p8, %p9248_p13 }
 0x365   : > { %p9244_p12 = pneg %p9243_p11 }
 0x367   : > { %p9251_p10 = pnand %p9250_p9, %p9244_p12 }
 0x369   : > { %9254 = shalt.err (!%p9251_p10)
}
 0x36a   : > { %s11620_s3 = sld [smem:[#allocation124_spill]]  ;;  %s9846_s10 = smov [#allocation45]  }
 0x36b   : > { %8025 = dma.hbm_to_vmem [thread:$0]  (%p11530_p4), %s11619_s8, 16, %s1478_s16, [#allocation41]  }
 0x36c   : > { %s1501_s0 = sshll.u32 %s9846_s10, 4  ;;  %s9847_s2 = smov [#allocation48]   ;;  %s1502_s0 = int_to_ptr.vmem [resolvable:$true] %s1501_s0 }
 0x36d   : > { %s1525_s5 = sshll.u32 %s9847_s2, 4  ;;  %s1526_s5 = int_to_ptr.vmem [resolvable:$true] %s1525_s5 }
 0x370   : > { %s9255_s12 = scalar_lea.hbm %s11620_s3, 16 }
 0x371   : > { %p9256_p0 = scmp.ne.s32.totalorder %s11620_s3, %s9255_s12  ;;  %p9261_p3 = scmp.lt.u32.totalorder %s9255_s12, %s11620_s3 }
 0x373   : > { %p9257_p1 = pnand %p9256_p0, %p11530_p4 }
 0x375   : > { %p9258_p2 = pneg %p9257_p1 }
 0x377   : > { %p9263_p7 = pnand %p9261_p3, %p9258_p2 }
 0x379   : > { %9266 = shalt.err (!%p9263_p7)
}
 0x37a   : > { %s9267_s4 = scalar_lea.vmem %s1502_s0, 16  ;;  %s9273_s16 = scalar_lea.vmem %s1502_s0, 32 }
 0x37b   : > { %p9268_p6 = scmp.ne.s32.totalorder %s1502_s0, %s9267_s4  ;;  %p9274_p13 = scmp.lt.s32.totalorder %s1502_s0, %s1502_s0 }
 0x37c   : > { %p9275_p8 = scmp.lt.s32.totalorder %s9273_s16, %s9267_s4 }
 0x37d   : > { %p9269_p11 = pnand %p9268_p6, %p11530_p4 }
 0x37e   : > { %p9276_p9 = por %p9275_p8, %p9274_p13 }
 0x37f   : > { %p9270_p12 = pneg %p9269_p11 }
 0x381   : > { %p9277_p10 = pnand %p9276_p9, %p9270_p12 }
 0x383   : > { %9280 = shalt.err (!%p9277_p10)
}
 0x384   : > { %s11621_s15 = sld [smem:[#allocation125_spill]] }
 0x385   : > { %8029 = dma.hbm_to_vmem [thread:$0]  (%p11530_p4), %s11620_s3, 16, %s1502_s0, [#allocation44]  }
 0x38a   : > { %s9281_s12 = scalar_lea.hbm %s11621_s15, 16 }
 0x38b   : > { %p9282_p0 = scmp.ne.s32.totalorder %s11621_s15, %s9281_s12  ;;  %p9287_p3 = scmp.lt.u32.totalorder %s9281_s12, %s11621_s15 }
 0x38d   : > { %p9283_p1 = pnand %p9282_p0, %p11530_p4 }
 0x38f   : > { %p9284_p2 = pneg %p9283_p1 }
 0x391   : > { %p9289_p7 = pnand %p9287_p3, %p9284_p2 }
 0x393   : > { %9292 = shalt.err (!%p9289_p7)
}
 0x394   : > { %s9293_s10 = scalar_lea.vmem %s1526_s5, 16  ;;  %s9299_s2 = scalar_lea.vmem %s1526_s5, 32 }
 0x395   : > { %p9294_p6 = scmp.ne.s32.totalorder %s1526_s5, %s9293_s10  ;;  %p9300_p13 = scmp.lt.s32.totalorder %s1526_s5, %s1526_s5 }
 0x396   : > { %p9301_p8 = scmp.lt.s32.totalorder %s9299_s2, %s9293_s10 }
 0x397   : > { %p9295_p11 = pnand %p9294_p6, %p11530_p4 }
 0x398   : > { %p9302_p9 = por %p9301_p8, %p9300_p13 }
 0x399   : > { %p9296_p12 = pneg %p9295_p11 }
 0x39b   : > { %p9303_p10 = pnand %p9302_p9, %p9296_p12 }
 0x39d   : > { %9306 = shalt.err (!%p9303_p10)
}
 0x39e   : > { %s11622_s0 = sld [smem:[#allocation126_spill]]  ;;  %s9848_s16 = smov [#allocation51]  }
 0x39f   : > { %8033 = dma.hbm_to_vmem [thread:$0]  (%p11530_p4), %s11621_s15, 16, %s1526_s5, [#allocation47]  }
 0x3a0   : > { %s1547_s12 = sshll.u32 %s9848_s16, 4  ;;  %s9849_s3 = smov [#allocation54]   ;;  %s1548_s12 = int_to_ptr.vmem [resolvable:$true] %s1547_s12 }
 0x3a1   : > { %s1571_s8 = sshll.u32 %s9849_s3, 4  ;;  %s1572_s8 = int_to_ptr.vmem [resolvable:$true] %s1571_s8 }
 0x3a4   : > { %s11623_s4 = smov %s11622_s0  ;;  %s9307_s13 = scalar_lea.hbm %s11622_s0, 16 }
 0x3a5   : > { %p9308_p0 = scmp.ne.s32.totalorder %s11623_s4, %s9307_s13  ;;  %p9313_p3 = scmp.lt.u32.totalorder %s9307_s13, %s11623_s4 }
 0x3a7   : > { %p9309_p1 = pnand %p9308_p0, %p11530_p4 }
 0x3a9   : > { %p9310_p2 = pneg %p9309_p1 }
 0x3ab   : > { %p9315_p7 = pnand %p9313_p3, %p9310_p2 }
 0x3ad   : > { %9318 = shalt.err (!%p9315_p7)
}
 0x3ae   : > { %s9319_s10 = scalar_lea.vmem %s1548_s12, 16  ;;  %s9325_s5 = scalar_lea.vmem %s1548_s12, 32 }
 0x3af   : > { %p9320_p6 = scmp.ne.s32.totalorder %s1548_s12, %s9319_s10  ;;  %p9326_p13 = scmp.lt.s32.totalorder %s1548_s12, %s1548_s12 }
 0x3b0   : > { %p9327_p8 = scmp.lt.s32.totalorder %s9325_s5, %s9319_s10 }
 0x3b1   : > { %p9321_p11 = pnand %p9320_p6, %p11530_p4 }
 0x3b2   : > { %p9328_p9 = por %p9327_p8, %p9326_p13 }
 0x3b3   : > { %p9322_p12 = pneg %p9321_p11 }
 0x3b5   : > { %p9329_p10 = pnand %p9328_p9, %p9322_p12 }
 0x3b7   : > { %9332 = shalt.err (!%p9329_p10)
}
 0x3b8   : > { %s11624_s3 = sld [smem:[#allocation128_spill]] }
 0x3b9   : > { %8037 = dma.hbm_to_vmem [thread:$0]  (%p11530_p4), %s11623_s4, 16, %s1548_s12, [#allocation50]  }
 0x3be   : > { %s9333_s13 = scalar_lea.hbm %s11624_s3, 16 }
 0x3bf   : > { %p9334_p0 = scmp.ne.s32.totalorder %s11624_s3, %s9333_s13  ;;  %p9339_p3 = scmp.lt.u32.totalorder %s9333_s13, %s11624_s3 }
 0x3c1   : > { %p9335_p1 = pnand %p9334_p0, %p11530_p4 }
 0x3c3   : > { %p9336_p2 = pneg %p9335_p1 }
 0x3c5   : > { %p9341_p7 = pnand %p9339_p3, %p9336_p2 }
 0x3c7   : > { %9344 = shalt.err (!%p9341_p7)
}
 0x3c8   : > { %s9345_s2 = scalar_lea.vmem %s1572_s8, 16  ;;  %s9351_s0 = scalar_lea.vmem %s1572_s8, 32 }
 0x3c9   : > { %p9346_p6 = scmp.ne.s32.totalorder %s1572_s8, %s9345_s2  ;;  %p9352_p13 = scmp.lt.s32.totalorder %s1572_s8, %s1572_s8 }
 0x3ca   : > { %p9353_p8 = scmp.lt.s32.totalorder %s9351_s0, %s9345_s2 }
 0x3cb   : > { %p9347_p11 = pnand %p9346_p6, %p11530_p4 }
 0x3cc   : > { %p9354_p9 = por %p9353_p8, %p9352_p13 }
 0x3cd   : > { %p9348_p12 = pneg %p9347_p11 }
 0x3cf   : > { %p9355_p10 = pnand %p9354_p9, %p9348_p12 }
 0x3d1   : > { %9358 = shalt.err (!%p9355_p10)
}
 0x3d2   : > { %s11625_s16 = sld [smem:[#allocation130_spill]]  ;;  %s9850_s12 = smov [#allocation57]  }
 0x3d3   : > { %8041 = dma.hbm_to_vmem [thread:$0]  (%p11530_p4), %s11624_s3, 16, %s1572_s8, [#allocation53]  }
 0x3d4   : > { %s1595_s10 = sshll.u32 %s9850_s12, 4  ;;  %s9851_s5 = smov [#allocation60]   ;;  %s1596_s10 = int_to_ptr.vmem [resolvable:$true] %s1595_s10 }
 0x3d5   : > { %s1619_s13 = sshll.u32 %s9851_s5, 4  ;;  %s1620_s13 = int_to_ptr.vmem [resolvable:$true] %s1619_s13 }
 0x3d8   : > { %s9359_s4 = scalar_lea.hbm %s11625_s16, 16 }
 0x3d9   : > { %p9360_p0 = scmp.ne.s32.totalorder %s11625_s16, %s9359_s4  ;;  %p9365_p3 = scmp.lt.u32.totalorder %s9359_s4, %s11625_s16 }
 0x3db   : > { %p9361_p1 = pnand %p9360_p0, %p11530_p4 }
 0x3dd   : > { %p9362_p2 = pneg %p9361_p1 }
 0x3df   : > { %p9367_p7 = pnand %p9365_p3, %p9362_p2 }
 0x3e1   : > { %9370 = shalt.err (!%p9367_p7)
}
 0x3e2   : > { %s9371_s2 = scalar_lea.vmem %s1596_s10, 16  ;;  %s9377_s8 = scalar_lea.vmem %s1596_s10, 32 }
 0x3e3   : > { %p9372_p6 = scmp.ne.s32.totalorder %s1596_s10, %s9371_s2  ;;  %p9378_p13 = scmp.lt.s32.totalorder %s1596_s10, %s1596_s10 }
 0x3e4   : > { %p9379_p8 = scmp.lt.s32.totalorder %s9377_s8, %s9371_s2 }
 0x3e5   : > { %p9373_p11 = pnand %p9372_p6, %p11530_p4 }
 0x3e6   : > { %p9380_p9 = por %p9379_p8, %p9378_p13 }
 0x3e7   : > { %p9374_p12 = pneg %p9373_p11 }
 0x3e9   : > { %p9381_p10 = pnand %p9380_p9, %p9374_p12 }
 0x3eb   : > { %9384 = shalt.err (!%p9381_p10)
}
 0x3ec   : > { %s11626_s0 = sld [smem:[#allocation132_spill]] }
 0x3ed   : > { %8045 = dma.hbm_to_vmem [thread:$0]  (%p11530_p4), %s11625_s16, 16, %s1596_s10, [#allocation56]  }
 0x3f2   : > { %s11627_s12 = smov %s11626_s0  ;;  %s9385_s4 = scalar_lea.hbm %s11626_s0, 16 }
 0x3f3   : > { %p9386_p0 = scmp.ne.s32.totalorder %s11627_s12, %s9385_s4  ;;  %p9391_p3 = scmp.lt.u32.totalorder %s9385_s4, %s11627_s12 }
 0x3f5   : > { %p9387_p1 = pnand %p9386_p0, %p11530_p4 }
 0x3f7   : > { %p9388_p2 = pneg %p9387_p1 }
 0x3f9   : > { %p9393_p7 = pnand %p9391_p3, %p9388_p2 }
 0x3fb   : > { %9396 = shalt.err (!%p9393_p7)
}
 0x3fc   : > { %s9397_s5 = scalar_lea.vmem %s1620_s13, 16  ;;  %s9403_s2 = scalar_lea.vmem %s1620_s13, 32 }
 0x3fd   : > { %p9398_p6 = scmp.ne.s32.totalorder %s1620_s13, %s9397_s5  ;;  %p9404_p13 = scmp.lt.s32.totalorder %s1620_s13, %s1620_s13 }
 0x3fe   : > { %p9405_p8 = scmp.lt.s32.totalorder %s9403_s2, %s9397_s5 }
 0x3ff   : > { %p9399_p11 = pnand %p9398_p6, %p11530_p4 }
 0x400   : > { %p9406_p9 = por %p9405_p8, %p9404_p13 }
 0x401   : > { %p9400_p12 = pneg %p9399_p11 }
 0x403   : > { %p9407_p10 = pnand %p9406_p9, %p9400_p12 }
 0x405   : > { %9410 = shalt.err (!%p9407_p10)
}
 0x406   : > { %s11628_s10 = sld [smem:[#allocation134_spill]]  ;;  %s9852_s8 = smov [#allocation63]  }
 0x407   : > { %8049 = dma.hbm_to_vmem [thread:$0]  (%p11530_p4), %s11627_s12, 16, %s1620_s13, [#allocation59]  }
 0x408   : > { %s1641_s0 = sshll.u32 %s9852_s8, 4  ;;  %s9853_s4 = smov [#allocation66]   ;;  %s1642_s0 = int_to_ptr.vmem [resolvable:$true] %s1641_s0 }
 0x409   : > { %s1665_s3 = sshll.u32 %s9853_s4, 4  ;;  %s1666_s3 = int_to_ptr.vmem [resolvable:$true] %s1665_s3 }
 0x40c   : > { %s9411_s15 = scalar_lea.hbm %s11628_s10, 16 }
 0x40d   : > { %p9412_p0 = scmp.ne.s32.totalorder %s11628_s10, %s9411_s15  ;;  %p9417_p3 = scmp.lt.u32.totalorder %s9411_s15, %s11628_s10 }
 0x40f   : > { %p9413_p1 = pnand %p9412_p0, %p11530_p4 }
 0x411   : > { %p9414_p2 = pneg %p9413_p1 }
 0x413   : > { %p9419_p7 = pnand %p9417_p3, %p9414_p2 }
 0x415   : > { %9422 = shalt.err (!%p9419_p7)
}
 0x416   : > { %s9423_s5 = scalar_lea.vmem %s1642_s0, 16  ;;  %s9429_s13 = scalar_lea.vmem %s1642_s0, 32 }
 0x417   : > { %p9424_p6 = scmp.ne.s32.totalorder %s1642_s0, %s9423_s5  ;;  %p9430_p13 = scmp.lt.s32.totalorder %s1642_s0, %s1642_s0 }
 0x418   : > { %p9431_p8 = scmp.lt.s32.totalorder %s9429_s13, %s9423_s5 }
 0x419   : > { %p9425_p11 = pnand %p9424_p6, %p11530_p4 }
 0x41a   : > { %p9432_p9 = por %p9431_p8, %p9430_p13 }
 0x41b   : > { %p9426_p12 = pneg %p9425_p11 }
 0x41d   : > { %p9433_p10 = pnand %p9432_p9, %p9426_p12 }
 0x41f   : > { %9436 = shalt.err (!%p9433_p10)
}
 0x420   : > { %s11629_s2 = sld [smem:[#allocation136_spill]] }
 0x421   : > { %8053 = dma.hbm_to_vmem [thread:$0]  (%p11530_p4), %s11628_s10, 16, %s1642_s0, [#allocation62]  }
 0x426   : > { %s9437_s15 = scalar_lea.hbm %s11629_s2, 128 }
 0x427   : > { %p9438_p0 = scmp.ne.s32.totalorder %s11629_s2, %s9437_s15  ;;  %p9443_p3 = scmp.lt.u32.totalorder %s9437_s15, %s11629_s2 }
 0x429   : > { %p9439_p1 = pnand %p9438_p0, %p11530_p4 }
 0x42b   : > { %p9440_p2 = pneg %p9439_p1 }
 0x42d   : > { %p9445_p7 = pnand %p9443_p3, %p9440_p2 }
 0x42f   : > { %9448 = shalt.err (!%p9445_p7)
}
 0x430   : > { %s9449_s8 = scalar_lea.vmem %s1666_s3, 128  ;;  %p9456_p13 = scmp.lt.s32.totalorder %s1666_s3, %s1666_s3 }
 0x431   : > { %p9450_p6 = scmp.ne.s32.totalorder %s1666_s3, %s9449_s8  ;;  %p9457_p8 = scmp.lt.s32.totalorder %s9449_s8, %s9449_s8 }
 0x433   : > { %p9451_p11 = pnand %p9450_p6, %p11530_p4  ;;  %p9458_p9 = por %p9457_p8, %p9456_p13 }
 0x435   : > { %p9452_p12 = pneg %p9451_p11 }
 0x437   : > { %p9459_p10 = pnand %p9458_p9, %p9452_p12 }
 0x439   : > { %9462 = shalt.err (!%p9459_p10)
}
 0x43a   : > { %8057 = dma.hbm_to_vmem [thread:$0]  (%p11530_p4), %s11629_s2, 128, %s1666_s3, [#allocation65]  }
 0x43b   : > { %s9854_s0 = smov [#allocation69]   ;;  %s9855_s5 = smov [#allocation70]  }
 0x43c   : > { %s1690_s4 = sshll.u32 %s9854_s0, 4  ;;  %s1701_s13 = sshll.u32 %s9855_s5, 4  ;;  %s1691_s4 = int_to_ptr.vmem [resolvable:$true] %s1690_s4  ;;  %s1702_s13 = int_to_ptr.vmem [resolvable:$true] %s1701_s13 }
 0x43d   : > { %s9463_s15 = scalar_lea.hbm %s11584_s17, 16 }
 0x43e   : > { %p9464_p0 = scmp.ne.s32.totalorder %s11584_s17, %s9463_s15  ;;  %p9469_p3 = scmp.lt.u32.totalorder %s9463_s15, %s11584_s17 }
 0x440   : > { %p9465_p1 = pnand %p9464_p0, %p11530_p4 }
 0x442   : > { %p9466_p2 = pneg %p9465_p1 }
 0x444   : > { %p9471_p7 = pnand %p9469_p3, %p9466_p2 }
 0x446   : > { %9474 = shalt.err (!%p9471_p7)
}
 0x447   : > { %s9475_s8 = scalar_lea.vmem %s1691_s4, 16  ;;  %s9481_s3 = scalar_lea.vmem %s1691_s4, 32 }
 0x448   : > { %p9476_p6 = scmp.ne.s32.totalorder %s1691_s4, %s9475_s8  ;;  %p9482_p13 = scmp.lt.s32.totalorder %s1691_s4, %s1691_s4 }
 0x449   : > { %p9483_p8 = scmp.lt.s32.totalorder %s9481_s3, %s9475_s8 }
 0x44a   : > { %p9477_p11 = pnand %p9476_p6, %p11530_p4 }
 0x44b   : > { %p9484_p9 = por %p9483_p8, %p9482_p13 }
 0x44c   : > { %p9478_p12 = pneg %p9477_p11 }
 0x44e   : > { %p9485_p10 = pnand %p9484_p9, %p9478_p12 }
 0x450   : > { %9488 = shalt.err (!%p9485_p10)
}
 0x451   : > { %8061 = dma.hbm_to_vmem [thread:$0]  (%p11530_p4), %s11584_s17, 16, %s1691_s4, [#allocation68]  }
 0x452   : > { %s9489_s0 = scalar_lea.hbm %s10116_s22, 16 }
 0x453   : > { %p9490_p0 = scmp.ne.s32.totalorder %s10116_s22, %s9489_s0  ;;  %p9495_p3 = scmp.lt.u32.totalorder %s9489_s0, %s10116_s22 }
 0x455   : > { %p9491_p1 = pnand %p9490_p0, %p11530_p4 }
 0x457   : > { %p9492_p2 = pneg %p9491_p1 }
 0x459   : > { %p9497_p7 = pnand %p9495_p3, %p9492_p2 }
 0x45b   : > { %9500 = shalt.err (!%p9497_p7)
}
 0x45c   : > { %s9501_s5 = scalar_lea.vmem %s1702_s13, 16  ;;  %s9507_s15 = scalar_lea.vmem %s1702_s13, 32 }
 0x45d   : > { %p9502_p6 = scmp.ne.s32.totalorder %s1702_s13, %s9501_s5  ;;  %p9508_p13 = scmp.lt.s32.totalorder %s1702_s13, %s1702_s13 }
 0x45e   : > { %p9509_p8 = scmp.lt.s32.totalorder %s9507_s15, %s9501_s5 }
 0x45f   : > { %p9503_p11 = pnand %p9502_p6, %p11530_p4 }
 0x460   : > { %p9510_p9 = por %p9509_p8, %p9508_p13 }
 0x461   : > { %p9504_p12 = pneg %p9503_p11 }
 0x463   : > { %p9511_p10 = pnand %p9510_p9, %p9504_p12 }
 0x465   : > { %9514 = shalt.err (!%p9511_p10)
}
 0x466   : > { %8063 = dma.hbm_to_vmem [thread:$0]  (%p11530_p4), %s10116_s22, 16, %s1702_s13, [#allocation71]  }
 0x467 PF: > { %s11630_s4 = sld [smem:[#allocation100_spill]]  ;;  %p8206_p1 = scmp.lt.s32.totalorder %s9761_s11, 2 }
 0x468   : > { %s1712_s8 = sand.u32 1, %s9757_s7   ;;  %s11531_s3 = sshll.u32 %s9761_s11, 8 }
 0x469   : > { %s10691_s0 = sshll.u32 %s1712_s8, 4  ;;  %p10701_p2 = pnand %p8206_p1, %p10167_p5 }
 0x46a   : > { %s1716_s13 = scalar_lea.vmem [#allocation7], %s10691_s0  ;;  %s10707_s10 = scalar_lea.sflag [#allocation8], %s1712_s8 }
 0x46b   : > { %s1723_s15 = sshll.u32 %s1716_s13, 4  ;;  %p9517_p7 = pneg %p10701_p2  ;;  %s10705_s15 = int_to_ptr.vmem [resolvable:$true] %s1723_s15 }
 0x46d   : > { %s10696_s5 = scalar_lea.hbm %s11630_s4, %s11531_s3  ;;  %s9520_s13 = scalar_lea.hbm %s11630_s4, 512 }
 0x46e   : > { %s9515_s12 = scalar_lea.hbm %s10696_s5, 256  ;;  %p9521_p12 = scmp.lt.u32.totalorder %s10696_s5, %s11630_s4 }
 0x46f   : > { %p9516_p3 = scmp.ne.s32.totalorder %s10696_s5, %s9515_s12  ;;  %p9522_p5 = scmp.lt.u32.totalorder %s9520_s13, %s9515_s12 }
 0x470   : > { %p9524_p8 = scmp.lt.u32.totalorder %s9515_s12, %s10696_s5 }
 0x471   : > { %p9518_p6 = pnand %p9517_p7, %p9516_p3  ;;  %p9523_p13 = por %p9522_p5, %p9521_p12 }
 0x473   : > { %p9519_p11 = pneg %p9518_p6  ;;  %p9525_p9 = por %p9524_p8, %p9523_p13 }
 0x475   : > { %p9526_p10 = pnand %p9525_p9, %p9519_p11 }
 0x477   : > { %9529 = shalt.err (!%p9526_p10)
}
 0x478   : > { %s9530_s6 = scalar_lea.vmem %s10705_s15, 256  ;;  %s9856_s8 = smov [#allocation7]  }
 0x479   : > { %p9531_p1 = scmp.ne.s32.totalorder %s10705_s15, %s9530_s6  ;;  %s9535_s3 = sshll.u32 %s9856_s8, 4  ;;  %s9536_s3 = int_to_ptr.vmem [resolvable:$false] %s9535_s3 }
 0x47a   : > { %s9537_s4 = scalar_lea.vmem %s9536_s3, 512  ;;  %p9538_p3 = scmp.lt.s32.totalorder %s10705_s15, %s9536_s3 }
 0x47b   : > { %p9533_p0 = pnand %p9531_p1, %p9517_p7  ;;  %p9539_p6 = scmp.lt.s32.totalorder %s9537_s4, %s9530_s6 }
 0x47d   : > { %p9534_p4 = pneg %p9533_p0  ;;  %p9540_p12 = por %p9539_p6, %p9538_p3 }
 0x47f   : > { %p9541_p5 = pnand %p9540_p12, %p9534_p4 }
 0x481   : > { %9544 = shalt.err (!%p9541_p5)
}
 0x482   : > { %s9857_s12 = smov 128   ;;  %s11632_s13 = sld [smem:[#allocation101_spill]] }
 0x483   : > { %s9858_s8 = smov 8   ;;  %s1733_s4 = sand.u32 1, %s9761_s11  }
 0x484   : > { %8155 = dma.hbm_to_vmem [thread:$0]  (!%p10701_p2), %s10696_s5, 256, %s10705_s15, %s10707_s10, %s9857_s12, %s9857_s12, %s9858_s8  }
 0x485   : > { %s11633_s3 = sshll.u32 %s9761_s11, 8  ;;  %s1737_s16 = scalar_lea.vmem [#allocation10], %s10691_s0 }
 0x486   : > { %s1744_s17 = sshll.u32 %s1737_s16, 4  ;;  %s10743_s18 = scalar_lea.sflag [#allocation11], %s1733_s4  ;;  %s10741_s17 = int_to_ptr.vmem [resolvable:$true] %s1744_s17 }
 0x488   : > { %s10738_s6 = scalar_lea.hbm %s11632_s13, %s11633_s3  ;;  %s9550_s10 = scalar_lea.hbm %s11632_s13, 512 }
 0x489   : > { %s9545_s19 = scalar_lea.hbm %s10738_s6, 256  ;;  %p9551_p13 = scmp.lt.u32.totalorder %s10738_s6, %s11632_s13 }
 0x48a   : > { %p9546_p4 = scmp.ne.s32.totalorder %s10738_s6, %s9545_s19  ;;  %p9552_p8 = scmp.lt.u32.totalorder %s9550_s10, %s9545_s19 }
 0x48b   : > { %p9554_p10 = scmp.lt.u32.totalorder %s9545_s19, %s10738_s6 }
 0x48c   : > { %p9548_p0 = pnand %p9546_p4, %p9517_p7  ;;  %p9553_p9 = por %p9552_p8, %p9551_p13 }
 0x48e   : > { %p9549_p11 = pneg %p9548_p0  ;;  %p9555_p1 = por %p9554_p10, %p9553_p9 }
 0x490   : > { %p9556_p3 = pnand %p9555_p1, %p9549_p11 }
 0x492   : > { %9559 = shalt.err (!%p9556_p3)
}
 0x493   : > { %s9560_s16 = scalar_lea.vmem %s10741_s17, 256  ;;  %s9859_s0 = smov [#allocation10]  }
 0x494   : > { %p9561_p6 = scmp.ne.s32.totalorder %s10741_s17, %s9560_s16  ;;  %s9565_s5 = sshll.u32 %s9859_s0, 4  ;;  %s9566_s5 = int_to_ptr.vmem [resolvable:$false] %s9565_s5 }
 0x495   : > { %s9567_s15 = scalar_lea.vmem %s9566_s5, 512  ;;  %p9568_p4 = scmp.lt.s32.totalorder %s10741_s17, %s9566_s5 }
 0x496   : > { %p9563_p12 = pnand %p9561_p6, %p9517_p7  ;;  %p9569_p0 = scmp.lt.s32.totalorder %s9567_s15, %s9560_s16 }
 0x498   : > { %p9564_p5 = pneg %p9563_p12  ;;  %p9570_p13 = por %p9569_p0, %p9568_p4 }
 0x49a   : > { %p9571_p8 = pnand %p9570_p13, %p9564_p5 }
 0x49c   : > { %9574 = shalt.err (!%p9571_p8)
}
 0x49d   : > { %8158 = dma.hbm_to_vmem [thread:$0]  (!%p10701_p2), %s10738_s6, 256, %s10741_s17, %s10743_s18, %s9857_s12, %s9857_s12, %s9858_s8  }
 0x49e   : > { %p11634_p7 = scmp.ne.s32.totalorder %s11601_s23, 0 }
 0x49f   : > { %s10771_s19 = sand.u32 (!%p11634_p7), 1, %s9753_s14   ;;  %p11635_p11 = scmp.ne.s32.totalorder (!%p11634_p7), %s11596_s1, 0 }
 0x4a0   : > { %1756 = sbr.rel (%p11634_p7) target bundleno = 7419 (0x1cfb), region = 212  ;;  %s10774_s4 = sshll.u32 (!%p11634_p7), %s10771_s19, 4 }
 0x4a1   : > { %s1759_s2 = scalar_lea.sflag (!%p11634_p7), [#allocation8], %s10771_s19  ;;  %s1762_s3 = scalar_lea.vmem (!%p11634_p7), [#allocation7], %s10774_s4 }
 0x4a7   : > { %9648 = dma.done.wait (%p11635_p11), %s1759_s2, 256  }
 0x4a8   : > { %9650 = vsyncadd (%p11635_p11), %s1759_s2, 4294967040  ;;  %s1767_s17 = sand.u32 1, %s10149_s9   ;;  %s1771_s18 = scalar_lea.vmem [#allocation10], %s10774_s4 }
 0x4a9   : > { %s1768_s23 = scalar_lea.sflag [#allocation11], %s1767_s17 }
 0x4aa   : > { %9652 = dma.done.wait (%p11635_p11), %s1768_s23, 256  }
 0x4ab   : > { %9654 = vsyncadd (%p11635_p11), %s1768_s23, 4294967040  ;;  %p11636_p2 = scmp.eq.s32.totalorder %s10149_s9, 0 }
 0x4ad   : > { %9656 = dma.done.wait (%p11636_p2), [#allocation11], 16   ;;  %p11637_p9 = pmov %p11636_p2 }
 0x4ae   : > { %p11638_p10 = pmov %p11636_p2 }
 0x4af   : > { %9658 = vsyncadd (%p11637_p9), [#allocation11], 4294967280 }
 0x4b0   : > { %9660 = dma.done.wait (%p11638_p10), [#allocation14], 32   ;;  %p11639_p1 = pmov %p11636_p2 }
 0x4b2   : > { %9662 = vsyncadd (%p11639_p1), [#allocation14], 4294967264  ;;  %p11640_p3 = pmov %p11639_p1 }
 0x4b3   : > { %p11641_p6 = pmov %p11639_p1 }
 0x4b4   : > { %9664 = dma.done.wait (%p11640_p3), [#allocation17], 272  }
 0x4b5   : > { %9666 = vsyncadd (%p11641_p6), [#allocation17], 4294967024  ;;  %p11642_p12 = pmov %p11639_p1 }
 0x4b6   : > { %p11643_p5 = pmov %p11639_p1 }
 0x4b7   : > { %9668 = dma.done.wait (%p11642_p12), [#allocation20], 32  }
 0x4b8   : > { %9670 = vsyncadd (%p11643_p5), [#allocation20], 4294967264  ;;  %p11644_p4 = pmov %p11639_p1 }
 0x4b9   : > { %p11645_p0 = pmov %p11639_p1 }
 0x4ba   : > { %9672 = dma.done.wait (%p11644_p4), [#allocation23], 272  }
 0x4bb   : > { %9674 = vsyncadd (%p11645_p0), [#allocation23], 4294967024  ;;  %p11646_p13 = pmov %p11645_p0 }
 0x4bc   : > { %p11647_p8 = pmov %p11645_p0 }
 0x4bd   : > { %9676 = dma.done.wait (%p11646_p13), [#allocation26], 32  }
 0x4be   : > { %9678 = vsyncadd (%p11647_p8), [#allocation26], 4294967264  ;;  %p11648_p7 = pmov %p11645_p0 }
 0x4bf   : > { %p11649_p11 = pmov %p11645_p0 }
 0x4c0   : > { %9680 = dma.done.wait (%p11648_p7), [#allocation29], 528  }
 0x4c1   : > { %9682 = vsyncadd (%p11649_p11), [#allocation29], 4294966768  ;;  %p11650_p2 = pmov %p11645_p0 }
 0x4c2   : > { %p11651_p9 = pmov %p11645_p0 }
 0x4c3   : > { %9684 = dma.done.wait (%p11650_p2), [#allocation32], 32  }
 0x4c4   : > { %9686 = vsyncadd (%p11651_p9), [#allocation32], 4294967264  ;;  %p11652_p10 = pmov %p11645_p0 }
 0x4c5   : > { %p11653_p1 = pmov %p11645_p0 }
 0x4c6   : > { %9688 = dma.done.wait (%p11652_p10), [#allocation35], 528  }
 0x4c7   : > { %9690 = vsyncadd (%p11653_p1), [#allocation35], 4294966768  ;;  %p11654_p3 = pmov %p11645_p0 }
 0x4c8   : > { %p11655_p6 = pmov %p11645_p0 }
 0x4c9   : > { %9692 = dma.done.wait (%p11654_p3), [#allocation38], 32  }
 0x4ca   : > { %9694 = vsyncadd (%p11655_p6), [#allocation38], 4294967264  ;;  %p11656_p12 = pmov %p11645_p0 }
 0x4cb   : > { %p11657_p5 = pmov %p11645_p0 }
 0x4cc   : > { %9696 = dma.done.wait (%p11656_p12), [#allocation41], 528  }
 0x4cd   : > { %9698 = vsyncadd (%p11657_p5), [#allocation41], 4294966768  ;;  %p11658_p4 = pmov %p11645_p0 }
 0x4cf   : > { %9700 = dma.done.wait (%p11658_p4), [#allocation44], 528  }
 0x4d0   : > { %9702 = vsyncadd (%p11645_p0), [#allocation44], 4294966768  ;;  %p11659_p13 = pmov %p11645_p0 }
 0x4d1   : > { %p11660_p8 = pmov %p11645_p0 }
 0x4d2   : > { %9704 = dma.done.wait (%p11659_p13), [#allocation47], 528  }
 0x4d3   : > { %9706 = vsyncadd (%p11660_p8), [#allocation47], 4294966768  ;;  %p11661_p7 = pmov %p11645_p0 }
 0x4d4   : > { %p11662_p11 = pmov %p11645_p0 }
 0x4d5   : > { %9708 = dma.done.wait (%p11661_p7), [#allocation50], 32  }
 0x4d6   : > { %9710 = vsyncadd (%p11662_p11), [#allocation50], 4294967264  ;;  %p11663_p2 = pmov %p11645_p0 }
 0x4d7   : > { %p11664_p9 = pmov %p11645_p0 }
 0x4d8   : > { %9712 = dma.done.wait (%p11663_p2), [#allocation53], 528  }
 0x4d9   : > { %9714 = vsyncadd (%p11664_p9), [#allocation53], 4294966768  ;;  %p11665_p10 = pmov %p11645_p0 }
 0x4da   : > { %p11666_p1 = pmov %p11645_p0 }
 0x4db   : > { %9716 = dma.done.wait (%p11665_p10), [#allocation56], 528  }
 0x4dc   : > { %9718 = vsyncadd (%p11666_p1), [#allocation56], 4294966768  ;;  %p11667_p3 = pmov %p11645_p0 }
 0x4dd   : > { %p11668_p6 = pmov %p11645_p0 }
 0x4de   : > { %9720 = dma.done.wait (%p11667_p3), [#allocation59], 528  }
 0x4df   : > { %9722 = vsyncadd (%p11668_p6), [#allocation59], 4294966768  ;;  %p11669_p12 = pmov %p11645_p0 }
 0x4e0   : > { %p11670_p5 = pmov %p11645_p0 }
 0x4e1   : > { %9724 = dma.done.wait (%p11669_p12), [#allocation62], 32  }
 0x4e2   : > { %9726 = vsyncadd (%p11670_p5), [#allocation62], 4294967264  ;;  %p11671_p4 = pmov %p11645_p0 }
 0x4e4   : > { %9728 = dma.done.wait (%p11671_p4), [#allocation65], 36992  }
 0x4e5   : > { %9730 = vsyncadd (%p11645_p0), [#allocation65], 4294930304  ;;  %p11672_p13 = pmov %p11645_p0 }
 0x4e6   : > { %p11673_p8 = pmov %p11645_p0 }
 0x4e7   : > { %9732 = dma.done.wait (%p11672_p13), [#allocation68], 32  }
 0x4e8   : > { %9734 = vsyncadd (%p11673_p8), [#allocation68], 4294967264  ;;  %p11674_p7 = pmov %p11645_p0 }
 0x4e9   : > { %p11675_p11 = pmov %p11645_p0 }
 0x4ea   : > { %9736 = dma.done.wait (%p11674_p7), [#allocation71], 16  }
 0x4eb   : > { %9738 = vsyncadd (%p11675_p11), [#allocation71], 4294967280  ;;  %s11676_s1 = sld [smem:[#allocation102_spill]]  ;;  %vm2058_vm0 = vcmask 122880   ;;  %vm2060_vm1 = vcmask 130048   ;;  %vm2062_vm2 = vcmask 129024  }
 0x4ec   : > { %v2056_v1 = vld [vmem:[%s1762_s3] sm:$0xff]  ;;  %v2057_v2 = vld [vmem:[%s1762_s3 + $0x8] sm:$0xff]  ;;  %s9860_s12 = smov 16   ;;  %s9861_s8 = smov 32   ;;  %vm2072_vm3 = vcmask 261248   ;;  %vm2081_vm4 = vcmask 392449  }
 0x4ed   : > { %2066 = vrot.lane.b32.xlu0 %v2056_v1, %s9860_s12  ;;  %2059 = vst.msk [vmem:[#allocation2] sm:$0x1] %vm2058_vm0, %v2056_v1  ;;  %2075 = vrot.lane.b32.xlu1 %v2056_v1, %s9861_s8  ;;  %s11677_s6 = sld [smem:[#allocation104_spill]]  ;;  %vm2083_vm5 = vcmask 392448   ;;  %vm2085_vm6 = vcmask 392455   ;;  %vm2102_vm7 = vcmask 392192  }
 0x4ee   : > { %2061 = vst.msk [vmem:[#allocation2 + $0x1] sm:$0xff] %vm2060_vm1, %v2056_v1  ;;  %v6740_v35 = vld [vmem:[#allocation12] ss:$0 sm:$0xff]  ;;  %vm2190_vm8 = vcmask 260096   ;;  %vm2186_vm9 = vcmask 253952   ;;  %vm2188_vm10 = vcmask 261120  }
 0x4ef   : > { %2063 = vst.msk [vmem:[#allocation2 + $0x9] sm:$0x7f] %vm2062_vm2, %v2057_v2  ;;  %v2446_v43 = vld [vmem:[#allocation16] sm:$0xff]  ;;  %v2447_v44 = vld [vmem:[#allocation16 + $0x8] sm:$0xff]  ;;  %s9862_s10 = smov 64   ;;  %vm2200_vm11 = vcmask 523520  }
 0x4f0   : > { %v7418_v45 = vpack.c.bf16 %v2447_v44, %v2446_v43  ;;  %vm2211_vm12 = vcmask 785920   ;;  %vm2213_vm13 = vcmask 785927   ;;  %vm2209_vm14 = vcmask 785921   ;;  %s11678_s16 = sld [smem:[#allocation106_spill]]  ;;  %v2444_v51 = vld [vmem:[%s1771_s18] sm:$0xff]  ;;  %v2445_v53 = vld [vmem:[%s1771_s18 + $0x8] sm:$0xff] }
 0x4f1   : > { %v2089_v3 = vld [vmem:[%s11676_s1] sm:$0xff]  ;;  %v2090_v4 = vld [vmem:[%s11676_s1 + $0x8] sm:$0xff]  ;;  %v2091_v5 = vld [vmem:[%s11676_s1 + $0x10] sm:$0xff]  ;;  %2068 = vrot.lane.b32.xlu0 %v2057_v2, %s9860_s12  ;;  %vm2236_vm15 = vcmask 785408   ;;  %s11679_s0 = sld [smem:[#allocation121_spill]]  ;;  %vm2982_vm0 = vcmask 7168  }
 0x4f2   : > { %v7358_v6 = vpack.c.bf16 %v2090_v4, %v2089_v3  ;;  %v2092_v7 = vld [vmem:[%s11676_s1 + $0x18] sm:$0xff]  ;;  %v2093_v9 = vld [vmem:[%s11676_s1 + $0x20] sm:$0xff]  ;;  %v2094_v10 = vld [vmem:[%s11676_s1 + $0x28] sm:$0xff]  ;;  %2077 = vrot.lane.b32.xlu1 %v2057_v2, %s9861_s8  ;;  %vm9865_vm2 = vmmov 0   ;;  %s9867_s15 = smov 80   ;;  %s9868_s2 = smov 96  }
 0x4f3   : > { %v7362_v8 = vpack.c.bf16 %v2092_v7, %v2091_v5  ;;  %v7366_v11 = vpack.c.bf16 %v2094_v10, %v2093_v9  ;;  %v2217_v18 = vld [vmem:[%s11677_s6] sm:$0xff]  ;;  %v2218_v19 = vld [vmem:[%s11677_s6 + $0x8] sm:$0xff]  ;;  %v2219_v20 = vld [vmem:[%s11677_s6 + $0x10] sm:$0xff]  ;;  %s9869_s3 = smov 112   ;;  %s9870_s17 = smov 48  }
 0x4f4   : > { %7359 = vmatprep.subr.bf16.mxu0 %v7358_v6  ;;  %v7370_v21 = vpack.c.bf16 %v2218_v19, %v2217_v18  ;;  %v2220_v22 = vld [vmem:[%s11677_s6 + $0x18] sm:$0xff]  ;;  %v2221_v24 = vld [vmem:[%s11677_s6 + $0x20] sm:$0xff]  ;;  %v2222_v25 = vld [vmem:[%s11677_s6 + $0x28] sm:$0xff]  ;;  %s11092_s23 = scalar_lea.vmem [#allocation73], %s10774_s4  ;;  %s11683_s18 = sld [smem:[#allocation137_spill]] }
 0x4f5   : > { %7361 = vmatpush3.bf16.msra.mxu0 %v7358_v6  ;;  %v7374_v23 = vpack.c.bf16 %v2220_v22, %v2219_v20  ;;  %v7378_v26 = vpack.c.bf16 %v2222_v25, %v2221_v24  ;;  %v2223_v27 = vld [vmem:[%s11677_s6 + $0x30] sm:$0xff]  ;;  %v2224_v28 = vld [vmem:[%s11677_s6 + $0x38] sm:$0xff]  ;;  %v2225_v30 = vld [vmem:[%s11677_s6 + $0x40] sm:$0xff] }
 0x4f6   : > { %7363 = vmatprep.subr.bf16.mxu0 %v7362_v8  ;;  %7371 = vmatprep.subr.bf16.mxu1 %v7370_v21  ;;  %v7382_v29 = vpack.c.bf16 %v2224_v28, %v2223_v27  ;;  %v2226_v31 = vld [vmem:[%s11677_s6 + $0x48] sm:$0xff]  ;;  %v2227_v33 = vld [vmem:[%s11677_s6 + $0x50] sm:$0xff]  ;;  %v2228_v34 = vld [vmem:[%s11677_s6 + $0x58] sm:$0xff] }
 0x4f7   : > { %7373 = vmatpush3.bf16.msra.mxu1 %v7370_v21  ;;  %v7386_v32 = vpack.c.bf16 %v2226_v31, %v2225_v30  ;;  %v7390_v36 = vpack.c.bf16 %v2228_v34, %v2227_v33  ;;  %v2344_v54 = vld [vmem:[%s11678_s16] sm:$0xff]  ;;  %v2345_v55 = vld [vmem:[%s11678_s16 + $0x8] sm:$0xff]  ;;  %v2346_v60 = vld [vmem:[%s11678_s16 + $0x10] sm:$0xff]  ;;  %s11680_s5 = smov %s11679_s0 }
 0x4f8   : > { %7375 = vmatprep.subr.bf16.mxu1 %v7374_v23  ;;  %v2556_v56 = vld [vmem:[#allocation22] sm:$0xff]  ;;  %v7394_v57 = vpack.c.bf16 %v2345_v55, %v2344_v54  ;;  %v2557_v58 = vld [vmem:[#allocation22 + $0x8] sm:$0xff]  ;;  %v2350_v2 = vld [vmem:[%s11678_s16 + $0x30] sm:$0xff] }
 0x4f9   : > { %7365 = vmatpush3.bf16.msra.mxu0 %v7362_v8  ;;  %v7422_v59 = vpack.c.bf16 %v2557_v58, %v2556_v56  ;;  %v2347_v61 = vld [vmem:[%s11678_s16 + $0x18] sm:$0xff]  ;;  %v2348_v63 = vld [vmem:[%s11678_s16 + $0x20] sm:$0xff]  ;;  %v2349_v0 = vld [vmem:[%s11678_s16 + $0x28] sm:$0xff] }
 0x4fa   : > { %7367 = vmatprep.subr.bf16.mxu0 %v7366_v11  ;;  %v7398_v62 = vpack.c.bf16 %v2347_v61, %v2346_v60  ;;  %v7402_v1 = vpack.c.bf16 %v2349_v0, %v2348_v63  ;;  %v2351_v3 = vld [vmem:[%s11678_s16 + $0x38] sm:$0xff]  ;;  %v2352_v5 = vld [vmem:[%s11678_s16 + $0x40] sm:$0xff]  ;;  %v2353_v6 = vld [vmem:[%s11678_s16 + $0x48] sm:$0xff] }
 0x4fb   : > { %7377 = vmatpush3.bf16.msra.mxu1 %v7374_v23  ;;  %v7406_v4 = vpack.c.bf16 %v2351_v3, %v2350_v2  ;;  %v7410_v7 = vpack.c.bf16 %v2353_v6, %v2352_v5  ;;  %v2354_v8 = vld [vmem:[%s11678_s16 + $0x50] sm:$0xff]  ;;  %v2355_v9 = vld [vmem:[%s11678_s16 + $0x58] sm:$0xff]  ;;  %v6743_v10 = vld [vmem:[#allocation13] ss:$0 sm:$0xff] }
 0x4fc   : > { %7379 = vmatprep.subr.bf16.mxu1 %v7378_v26  ;;  %v6752_v22 = vld [vmem:[#allocation19] ss:$0 sm:$0xff]  ;;  %v6753_v25 = vld [vmem:[#allocation21] ss:$0 sm:$0xff]  ;;  %v2668_v33 = vld [vmem:[#allocation28 + $0x10] sm:$0xff] }
 0x4fd   : > { %7369 = vmatpush3.bf16.msra.mxu0 %v7366_v11  ;;  %v7414_v11 = vpack.c.bf16 %v2355_v9, %v2354_v8  ;;  %v2666_v31 = vld [vmem:[#allocation28] sm:$0xff]  ;;  %v2779_v63 = vld [vmem:[#allocation34 + $0x8] sm:$0xff]  ;;  %v2780_v0 = vld [vmem:[#allocation34 + $0x10] sm:$0xff] }
 0x4fe   : > { %7395 = vmatprep.subr.bf16.mxu0 %v7394_v57  ;;  %v2893_v58 = vld [vmem:[%s11680_s5 + $0x18] sm:$0xff]  ;;  %v6759_v9 = vld [vmem:[#allocation30] ss:$0 sm:$0xff] }
 0x4ff   : > { %7381 = vmatpush3.bf16.msra.mxu1 %v7378_v26  ;;  %v2781_v2 = vld [vmem:[#allocation34 + $0x18] sm:$0xff] }
 0x500   : > { %7383 = vmatprep.subr.bf16.mxu1 %v7382_v29  ;;  %v7438_v3 = vpack.c.bf16 %v2781_v2, %v2780_v0 }
 0x503   : > { %7385 = vmatpush3.bf16.msra.mxu1 %v7382_v29 }
 0x504   : > { %7387 = vmatprep.subr.bf16.mxu1 %v7386_v32 }
 0x507   : > { %7389 = vmatpush3.bf16.msra.mxu1 %v7386_v32  ;;  %v2667_v32 = vld [vmem:[#allocation28 + $0x8] sm:$0xff] }
 0x508   : > { %7391 = vmatprep.subr.bf16.mxu1 %v7390_v36  ;;  %v7426_v34 = vpack.c.bf16 %v2667_v32, %v2666_v31 }
 0x50b   : > { %7393 = vmatpush3.bf16.msra.mxu1 %v7390_v36 }
 0x50c   : > { %7419 = vmatprep.subr.bf16.mxu1 %v7418_v45 }
 0x55f   : > { %v2067_v12 = vpop.permute.xlu0 %2066  ;;  %v2076_v13 = vpop.permute.xlu1 %2075 }
 0x560   : > { %2073 = vst.msk [vmem:[#allocation2] sm:$0xff] %vm2072_vm3, %v2067_v12 }
 0x561   : > { %2082 = vst.msk [vmem:[#allocation2 - $0x1] sm:$0xfe] %vm2081_vm4, %v2076_v13  ;;  %vm11007_vm4 = vmpackc.low %vm2060_vm1, %vm2060_vm1 }
 0x563   : > { %v2069_v14 = vpop.permute.xlu0 %2068 }
 0x564   : > { %v2078_v15 = vpop.permute.xlu1 %2077  ;;  %2074 = vst.msk [vmem:[#allocation2 + $0x8] sm:$0xff] %vm2072_vm3, %v2069_v14 }
 0x565   : > { %2084 = vst.msk [vmem:[#allocation2 + $0x7] sm:$0xff] %vm2083_vm5, %v2078_v15  ;;  %vm4593_vm5 = vcmask 257024  }
 0x566   : > { %2086 = vst.msk [vmem:[#allocation2 + $0x8] sm:$0x80] %vm2085_vm6, %v2078_v15  ;;  %vm4552_vm6 = vcmask 1046528  }
 0x56c   : > { %v2087_v16 = vld [vmem:[#allocation2] sm:$0xff] }
 0x56d   : > { %v2088_v17 = vld [vmem:[#allocation2 + $0x8] sm:$0xff]  ;;  %7132 = vmatprep.mubr.msk.f32.mxu0 %vm2102_vm7, %v2087_v16  ;;  %v6749_v16 = vld [vmem:[#allocation18] ss:$0 sm:$0xff] }
 0x56e   : > { %7133 = vmatmul.mubr.msk.f32.vlgmr.msra.gmra.mrb[0].mxu0 %vm2102_vm7, %v2088_v17  ;;  %vm4565_vm7 = vcmask 1045504  }
 0x56f   : > { %7397 = vmatpush3.bf16.msra.mxu0 %v7394_v57  ;;  %v2892_v57 = vld [vmem:[%s11680_s5 + $0x10] sm:$0xff] }
 0x570   : > { %7399 = vmatprep.subr.bf16.mxu0 %v7398_v62  ;;  %v7446_v61 = vpack.c.bf16 %v2893_v58, %v2892_v57  ;;  %v9864_v58 = vmov 0.0|0.0  }
 0x573   : > { %7401 = vmatpush3.bf16.msra.mxu0 %v7398_v62  ;;  %v2778_v62 = vld [vmem:[#allocation34] sm:$0xff] }
 0x574   : > { %7403 = vmatprep.subr.bf16.mxu0 %v7402_v1 }
 0x577   : > { %7405 = vmatpush3.bf16.msra.mxu0 %v7402_v1  ;;  %v7434_v1 = vpack.c.bf16 %v2779_v63, %v2778_v62  ;;  %v9866_v62 = vmov 0.0  }
 0x578   : > { %7407 = vmatprep.subr.bf16.mxu0 %v7406_v4  ;;  %4493 = vst [vmem:[#allocation4] sm:$0xff] %v9866_v62  ;;  %4494 = vst [vmem:[#allocation4 + $0x8] sm:$0xff] %v9866_v62 }
 0x579   : > { %4495 = vst.msk [vmem:[#allocation4 + $0x10] sm:$0xff] %vm2188_vm10, %v9866_v62  ;;  %4496 = vst [vmem:[#allocation4 + $0x18] sm:$0xff] %v9866_v62 }
 0x57a   : > { %4497 = vst [vmem:[#allocation4 + $0x20] sm:$0xff] %v9866_v62  ;;  %4498 = vst.msk [vmem:[#allocation4 + $0x28] sm:$0xff] %vm2188_vm10, %v9866_v62 }
 0x57b   : > { %7409 = vmatpush3.bf16.msra.mxu0 %v7406_v4  ;;  %v6746_v4 = vld [vmem:[#allocation15] ss:$0 sm:$0xff] }
 0x57c   : > { %7411 = vmatprep.subr.bf16.mxu0 %v7410_v7 }
 0x57f   : > { %7413 = vmatpush3.bf16.msra.mxu0 %v7410_v7 }
 0x580   : > { %7415 = vmatprep.subr.bf16.mxu0 %v7414_v11 }
 0x583   : > { %7417 = vmatpush3.bf16.msra.mxu0 %v7414_v11 }
 0x584   : > { %7435 = vmatprep.subr.bf16.mxu0 %v7434_v1 }
 0x641   : > { %v7134_v37 = vpop.f32.mrb[0].mxu0 }
 0x642   : > { %v2181_v38 = vadd.f32 %v7134_v37, %v6740_v35  ;;  %v2175_v39 = vpop.f32.mrb[1].mxu0  ;;  %v2890_v37 = vld [vmem:[%s11679_s0] sm:$0xff] }
 0x643   : > { %v2176_v40 = vadd.f32 %v6740_v35, %v2175_v39  ;;  %v2669_v35 = vld [vmem:[#allocation28 + $0x18] sm:$0xff] }
 0x644   : > { %v2185_v41 = vmax.f32 %v2181_v38, 0.0  ;;  %v7430_v36 = vpack.c.bf16 %v2669_v35, %v2668_v33  ;;  %v2891_v38 = vld [vmem:[%s11680_s5 + $0x8] sm:$0xff] }
 0x645   : > { %v2184_v42 = vmax.f32 %v2176_v40, 0.0  ;;  %v7442_v39 = vpack.c.bf16 %v2891_v38, %v2890_v37 }
 0x646   : > { %2191 = vst.msk [vmem:[#allocation3 + $0x9] sm:$0x7f] %vm2190_vm8, %v2185_v41  ;;  %2196 = vrot.lane.b32.xlu1 %v2185_v41, %s9861_s8 }
 0x647   : > { %2187 = vst.msk [vmem:[#allocation3] sm:$0x1] %vm2186_vm9, %v2184_v42  ;;  %2194 = vrot.lane.b32.xlu0 %v2184_v42, %s9861_s8 }
 0x648   : > { %2189 = vst.msk [vmem:[#allocation3 + $0x1] sm:$0xff] %vm2188_vm10, %v2184_v42 }
 0x64a   : > { %2205 = vrot.lane.b32.xlu1 %v2185_v41, %s9862_s10 }
 0x64b   : > { %2203 = vrot.lane.b32.xlu0 %v2184_v42, %s9862_s10 }
 0x6b8   : > { %v2197_v46 = vpop.permute.xlu1 %2196 }
 0x6b9   : > { %2202 = vst.msk [vmem:[#allocation3 + $0x8] sm:$0xff] %vm2200_vm11, %v2197_v46  ;;  %v2195_v47 = vpop.permute.xlu0 %2194  ;;  %v6754_v46 = vld [vmem:[#allocation24] ss:$0 sm:$0xff] }
 0x6ba   : > { %2201 = vst.msk [vmem:[#allocation3] sm:$0xff] %vm2200_vm11, %v2195_v47 }
 0x6bc   : > { %v2206_v48 = vpop.permute.xlu1 %2205 }
 0x6bd   : > { %2212 = vst.msk [vmem:[#allocation3 + $0x7] sm:$0xff] %vm2211_vm12, %v2206_v48  ;;  %v2204_v49 = vpop.permute.xlu0 %2203 }
 0x6be   : > { %2214 = vst.msk [vmem:[#allocation3 + $0x8] sm:$0x80] %vm2213_vm13, %v2206_v48 }
 0x6bf   : > { %2210 = vst.msk [vmem:[#allocation3 - $0x1] sm:$0xfe] %vm2209_vm14, %v2204_v49 }
 0x6c5   : > { %v2216_v52 = vld [vmem:[#allocation3 + $0x8] sm:$0xff] }
 0x6c6   : > { %v2215_v50 = vld [vmem:[#allocation3] sm:$0xff] }
 0x6c7   : > { %7159 = vmatprep.mubr.msk.f32.mxu1 %vm2236_vm15, %v2215_v50  ;;  %v6757_v50 = vld [vmem:[#allocation25] ss:$0 sm:$0xff] }
 0x6c8   : > { %7160 = vmatmul.mubr.msk.f32.vlgmr.msra.gmra.mrb[0].mxu1 %vm2236_vm15, %v2216_v52 }
 0x6c9   : > { %7421 = vmatpush3.bf16.msra.mxu1 %v7418_v45  ;;  %7193 = vmatprep.mubr.msk.f32.mxu1 %vm2060_vm1, %v2444_v51 }
 0x6ca   : > { %7423 = vmatprep.subr.bf16.mxu1 %v7422_v59 }
 0x6cc   : > { %7194 = vmatmul.mubr.msk.f32.vlgmr.msra.gmra.mrb[2].mxu1 %vm2060_vm1, %v2445_v53  ;;  %v6758_v53 = vld [vmem:[#allocation27] ss:$0 sm:$0xff] }
 0x6cd   : > { %7425 = vmatpush3.bf16.msra.mxu1 %v7422_v59 }
 0x6ce   : > { %7427 = vmatprep.subr.bf16.mxu1 %v7426_v34 }
 0x79b   : > { %v7161_v12 = vpop.f32.mrb[0].mxu1 }
 0x79c   : > { %v2315_v13 = vadd.f32 %v7161_v12, %v6743_v10  ;;  %v2309_v14 = vpop.f32.mrb[1].mxu1 }
 0x79d   : > { %v2310_v15 = vadd.f32 %v6743_v10, %v2309_v14 }
 0x79e   : > { %v2319_v17 = vmax.f32 %v2315_v13, 0.0  ;;  %v6762_v13 = vld [vmem:[#allocation31] ss:$0 sm:$0xff] }
 0x79f   : > { %v2318_v18 = vmax.f32 %v2310_v15, 0.0  ;;  %v7195_v19 = vpop.f32.mrb[2].mxu1 }
 0x7a0   : > { %2322 = vst.msk [vmem:[#allocation3 + $0x9] sm:$0x7f] %vm2190_vm8, %v2319_v17  ;;  %2327 = vrot.lane.b32.xlu1 %v2319_v17, %s9861_s8  ;;  %v2533_v20 = vadd.f32 %v7195_v19, %v6749_v16  ;;  %v2527_v21 = vpop.f32.mrb[3].mxu1  ;;  %vm4578_vm8 = vcmask 1044480  }
 0x7a1   : > { %2320 = vst.msk [vmem:[#allocation3] sm:$0x1] %vm2186_vm9, %v2318_v18  ;;  %2325 = vrot.lane.b32.xlu0 %v2318_v18, %s9861_s8  ;;  %v2528_v23 = vadd.f32 %v6749_v16, %v2527_v21  ;;  %v6763_v16 = vld [vmem:[#allocation33] ss:$0 sm:$0xff]  ;;  %vm4510_vm9 = vcmask 1042432  }
 0x7a2   : > { %2321 = vst.msk [vmem:[#allocation3 + $0x1] sm:$0xff] %vm2188_vm10, %v2318_v18  ;;  %v2537_v24 = vmax.f32 %v2533_v20, 0.0 }
 0x7a3   : > { %v2536_v26 = vmax.f32 %v2528_v23, 0.0  ;;  %v6769_v23 = vld [vmem:[#allocation6] ss:$0 sm:$0xff] }
 0x7a4   : > { %2335 = vrot.lane.b32.xlu1 %v2319_v17, %s9862_s10  ;;  %v2546_v27 = vmul.f32 %v6752_v22, %v2537_v24 }
 0x7a5   : > { %2333 = vrot.lane.b32.xlu0 %v2318_v18, %s9862_s10  ;;  %v2545_v28 = vmul.f32 %v6752_v22, %v2536_v26  ;;  %v9863_v22 = vmov 0  }
 0x7a6   : > { %v2555_v29 = vadd.f32 %v6753_v25, %v2546_v27  ;;  %8389 = vset.pattern.permute.xlu1 %v9863_v22  ;;  %8388 = vset.pattern.permute.xlu0 %v9863_v22  ;;  %v6764_v22 = vld [vmem:[#allocation36] ss:$0 sm:$0xff] }
 0x7a7   : > { %v2554_v30 = vadd.f32 %v6753_v25, %v2545_v28 }
 0x7a9   : > { %7200 = vmatprep.mubr.msk.f32.mxu1 %vm2060_vm1, %v2554_v30 }
 0x7aa   : > { %7201 = vmatmul.mubr.msk.f32.vlgmr.msra.gmra.mrb[4].mxu1 %vm2060_vm1, %v2555_v29 }
 0x7ab   : > { %7429 = vmatpush3.bf16.msra.mxu1 %v7426_v34 }
 0x7ac   : > { %7431 = vmatprep.subr.bf16.mxu1 %v7430_v36 }
 0x7af   : > { %7433 = vmatpush3.bf16.msra.mxu1 %v7430_v36 }
 0x7b0   : > { %7443 = vmatprep.subr.bf16.mxu1 %v7442_v39 }
 0x812   : > { %v2328_v40 = vpop.permute.xlu1 %2327 }
 0x813   : > { %2332 = vst.msk [vmem:[#allocation3 + $0x8] sm:$0xff] %vm2200_vm11, %v2328_v40  ;;  %v2326_v41 = vpop.permute.xlu0 %2325 }
 0x814   : > { %2331 = vst.msk [vmem:[#allocation3] sm:$0xff] %vm2200_vm11, %v2326_v41 }
 0x816   : > { %v2336_v42 = vpop.permute.xlu1 %2335 }
 0x817   : > { %2340 = vst.msk [vmem:[#allocation3 + $0x7] sm:$0xff] %vm2211_vm12, %v2336_v42  ;;  %v2334_v43 = vpop.permute.xlu0 %2333 }
 0x818   : > { %2341 = vst.msk [vmem:[#allocation3 + $0x8] sm:$0x80] %vm2213_vm13, %v2336_v42  ;;  %vm4523_vm13 = vcmask 1041408  }
 0x819   : > { %2339 = vst.msk [vmem:[#allocation3 - $0x1] sm:$0xfe] %vm2209_vm14, %v2334_v43  ;;  %vm4536_vm14 = vcmask 1040384  }
 0x81f   : > { %v2343_v45 = vld [vmem:[#allocation3 + $0x8] sm:$0xff] }
 0x820   : > { %v2342_v44 = vld [vmem:[#allocation3] sm:$0xff] }
 0x821   : > { %7186 = vmatprep.mubr.msk.f32.mxu0 %vm2236_vm15, %v2342_v44 }
 0x822   : > { %7187 = vmatmul.mubr.msk.f32.vlgmr.msra.gmra.mrb[2].mxu0 %vm2236_vm15, %v2343_v45  ;;  %vm4563_vm15 = vcmask 522496  }
 0x823   : > { %7437 = vmatpush3.bf16.msra.mxu0 %v7434_v1 }
 0x824   : > { %7439 = vmatprep.subr.bf16.mxu0 %v7438_v3 }
 0x827   : > { %7441 = vmatpush3.bf16.msra.mxu0 %v7438_v3 }
 0x828   : > { %7450 = vmatprep.subr.bf16.mxu0 %v9864_v58 }
 0x87d   : > { %v7202_v47 = vpop.f32.mrb[4].mxu1 }
 0x87e   : > { %v2643_v48 = vadd.f32 %v7202_v47, %v6754_v46  ;;  %v2637_v49 = vpop.f32.mrb[5].mxu1 }
 0x87f   : > { %v2638_v51 = vadd.f32 %v6754_v46, %v2637_v49 }
 0x880   : > { %v2647_v52 = vmax.f32 %v2643_v48, 0.0 }
 0x881   : > { %v2646_v54 = vmax.f32 %v2638_v51, 0.0 }
 0x882   : > { %v2656_v55 = vmul.f32 %v6757_v50, %v2647_v52 }
 0x883   : > { %v2655_v56 = vmul.f32 %v6757_v50, %v2646_v54 }
 0x884   : > { %v2665_v59 = vadd.f32 %v6758_v53, %v2656_v55  ;;  %v3031_v55 = vld [vmem:[#allocation40] sm:$0xff] }
 0x885   : > { %v2664_v60 = vadd.f32 %v6758_v53, %v2655_v56  ;;  %v3032_v56 = vld [vmem:[#allocation40 + $0x8] sm:$0xff] }
 0x886   : > { %v7451_v57 = vpack.c.bf16 %v3032_v56, %v3031_v55 }
 0x887   : > { %7211 = vmatprep.mubr.msk.f32.mxu1 %vm2188_vm10, %v2664_v60  ;;  %v3034_v60 = vld [vmem:[#allocation40 + $0x18] sm:$0xff] }
 0x888   : > { %7212 = vmatmul.mubr.msk.f32.vlgmr.msra.gmra.mrb[6].mxu1 %vm2188_vm10, %v2665_v59  ;;  %v3033_v59 = vld [vmem:[#allocation40 + $0x10] sm:$0xff] }
 0x889   : > { %7445 = vmatpush3.bf16.msra.mxu1 %v7442_v39 }
 0x88a   : > { %7447 = vmatprep.subr.bf16.mxu1 %v7446_v61 }
 0x88d   : > { %7449 = vmatpush3.bf16.msra.mxu1 %v7446_v61  ;;  %v7454_v61 = vpack.c.bf16 %v3034_v60, %v3033_v59 }
 0x8f5   : > { %v7188_v5 = vpop.f32.mrb[2].mxu0 }
 0x8f6   : > { %v2435_v6 = vpop.f32.mrb[3].mxu0  ;;  %v10957_v8 = vadd.f32 %v7188_v5, %v6746_v4 }
 0x8f7   : > { %v10955_v7 = vadd.f32 %v6746_v4, %v2435_v6 }
 0x8f9   : > { %7233 = vmatprep.mubr.msk.f32.mxu1 %vm2188_vm10, %v10955_v7 }
 0x8fa   : > { %7234 = vmatmul.mubr.msk.f32.vlgmr.msra.gmra.mrb[8].mxu1 %vm2188_vm10, %v10957_v8 }
 0x95b   : > { %v7213_v10 = vpop.f32.mrb[6].mxu1 }
 0x95c   : > { %v2755_v11 = vadd.f32 %v7213_v10, %v6759_v9  ;;  %v2749_v12 = vpop.f32.mrb[7].mxu1 }
 0x95d   : > { %v2750_v14 = vadd.f32 %v6759_v9, %v2749_v12 }
 0x95e   : > { %v2759_v15 = vmax.f32 %v2755_v11, 0.0 }
 0x95f   : > { %v2758_v17 = vmax.f32 %v2750_v14, 0.0 }
 0x960   : > { %v2768_v18 = vmul.f32 %v6762_v13, %v2759_v15 }
 0x961   : > { %v2767_v19 = vmul.f32 %v6762_v13, %v2758_v17  ;;  %v3117_v17 = vld [vmem:[#allocation43 + $0x8] sm:$0xff] }
 0x962   : > { %v2777_v20 = vadd.f32 %v6763_v16, %v2768_v18 }
 0x963   : > { %v2776_v21 = vadd.f32 %v6763_v16, %v2767_v19  ;;  %v3116_v16 = vld [vmem:[#allocation43] sm:$0xff]  ;;  %v3118_v19 = vld [vmem:[#allocation43 + $0x10] sm:$0xff] }
 0x964   : > { %v7456_v18 = vpack.c.bf16 %v3117_v17, %v3116_v16 }
 0x965   : > { %7222 = vmatprep.mubr.msk.f32.mxu0 %vm2188_vm10, %v2776_v21 }
 0x966   : > { %7223 = vmatmul.mubr.msk.f32.vlgmr.msra.gmra.mrb[4].mxu0 %vm2188_vm10, %v2777_v20  ;;  %7457 = vmatprep.subr.bf16.mxu1 %v7456_v18  ;;  %v3119_v20 = vld [vmem:[#allocation43 + $0x18] sm:$0xff] }
 0x967   : > { %7452 = vmatpush3.bf16.msra.mxu0 %v7451_v57  ;;  %7244 = vmatprep.mubr.msk.f32.mxu0 %vm9865_vm2, %v9866_v62  ;;  %v7460_v21 = vpack.c.bf16 %v3119_v20, %v3118_v19  ;;  %vm4520_vm2 = vcmask 523523  }
 0x968   : > { %7453 = vmatprep.subr.bf16.mxu0 %v9864_v58  ;;  %7459 = vmatpush3.bf16.msra.mxu1 %v7456_v18 }
 0x969   : > { %7461 = vmatprep.subr.bf16.mxu1 %v7460_v21 }
 0x96b   : > { %7455 = vmatpush3.bf16.msra.mxu0 %v7454_v61 }
 0x96c   : > { %7463 = vmatpush3.bf16.msra.mxu1 %v7460_v21 }
 0x9cd   : > { %v7235_v24 = vpop.f32.mrb[8].mxu1 }
 0x9ce   : > { %v2979_v25 = vadd.f32 %v7235_v24, %v6769_v23  ;;  %v2973_v26 = vpop.f32.mrb[9].mxu1 }
 0x9cf   : > { %v2974_v27 = vadd.f32 %v6769_v23, %v2973_v26 }
 0x9d0   : > { %v2984_v28 = vsel %vm2982_vm0, %v2979_v25, -inf }
 0x9d1   : > { %v2983_v29 = vsel %vm2982_vm0, %v2974_v27, -inf }
 0x9d2   : > { %v2985_v30 = vmax.f32 %v2983_v29, %v2984_v28  ;;  %v6767_v29 = vld [vmem:[#allocation37] ss:$0 sm:$0xff] }
 0x9d4   : > { %v2986_v31 = vrot.slane %v2985_v30, 4 }
 0x9d6   : > { %v2987_v32 = vmax.f32 %v2985_v30, %v2986_v31  ;;  %v3035_v30 = vld [vmem:[#allocation42] sm:$0x1] }
 0x9d8   : > { %v2988_v33 = vrot.slane %v2987_v32, 2 }
 0x9da   : > { %v2989_v34 = vmax.f32 %v2987_v32, %v2988_v33 }
 0x9dc   : > { %v2990_v35 = vrot.slane %v2989_v34, 1 }
 0x9de   : > { %v2991_v36 = vmax.f32 %v2989_v34, %v2990_v35 }
 0x9e0   : > { %v2992_v37 = vsub.f32 %v2974_v27, %v2991_v36  ;;  %v2993_v38 = vsub.f32 %v2979_v25, %v2991_v36  ;;  %v3110_v25 = vlaneseq }
 0x9e2   : > { %v2994_v39 = vmul.f32 1.442695, %v2992_v37  ;;  %v2996_v40 = vmul.f32 1.442695, %v2993_v38  ;;  %v10983_v28 = vshrl.u32 %v3110_v25, 7 }
 0x9e3   : > { %v6768_v37 = vld [vmem:[#allocation39] ss:$0 sm:$0xff] }
 0x9e4   : > { %8425 = vpow2.f32 %v2994_v39  ;;  %v3112_v35 = vsub.s32 0, %v10983_v28 }
 0x9e5   : > { %8427 = vpow2.f32 %v2996_v40 }
 0x9ee   : > { %v8426_v41 = vpop.eup %8425 }
 0x9ef   : > { %v8428_v42 = vpop.eup %8427  ;;  %v2998_v43 = vsel %vm2982_vm0, %v8426_v41, 0.0 }
 0x9f0   : > { %v2999_v44 = vsel %vm2982_vm0, %v8428_v42, 0.0  ;;  %vm4576_vm0 = vcmask 783872  }
 0x9f1   : > { %v3000_v45 = vadd.f32 %v2999_v44, %v2998_v43  ;;  %v6773_v44 = vld [vmem:[#allocation45] ss:$0 sm:$0xff] }
 0x9f3   : > { %v3001_v46 = vrot.slane %v3000_v45, 4 }
 0x9f5   : > { %v3002_v47 = vadd.f32 %v3001_v46, %v3000_v45 }
 0x9f7   : > { %v3003_v48 = vrot.slane %v3002_v47, 2 }
 0x9f9   : > { %v3004_v49 = vadd.f32 %v3003_v48, %v3002_v47 }
 0x9fb   : > { %v3005_v50 = vrot.slane %v3004_v49, 1 }
 0x9fd   : > { %v3006_v51 = vadd.f32 %v3005_v50, %v3004_v49 }
 0x9ff   : > { %8429 = vrcp.f32 %v3006_v51 }
 0xa09   : > { %v8430_v52 = vpop.eup %8429 }
 0xa0a   : > { %v3009_v53 = vmul.f32 %v8430_v52, %v8428_v42  ;;  %v3008_v54 = vmul.f32 %v8430_v52, %v8426_v41 }
 0xa0c   : > { %3017 = vperm.xlu1 %8389, %v3009_v53   ;;  %3012 = vperm.xlu0 %8388, %v3008_v54  }
 0xa39   : > { %v7224_v63 = vpop.f32.mrb[4].mxu0 }
 0xa3a   : > { %v2861_v0 = vpop.f32.mrb[5].mxu0  ;;  %v2867_v23 = vadd.f32 %v7224_v63, %v6764_v22 }
 0xa3b   : > { %v2862_v24 = vadd.f32 %v6764_v22, %v2861_v0 }
 0xa3c   : > { %v2871_v26 = vmax.f32 %v2867_v23, 0.0 }
 0xa3d   : > { %v2870_v27 = vmax.f32 %v2862_v24, 0.0 }
 0xa3e   : > { %v2880_v32 = vmul.f32 %v6767_v29, %v2871_v26 }
 0xa3f   : > { %v2879_v33 = vmul.f32 %v6767_v29, %v2870_v27 }
 0xa40   : > { %v2889_v39 = vadd.f32 %v6768_v37, %v2880_v32 }
 0xa41   : > { %v2888_v40 = vadd.f32 %v6768_v37, %v2879_v33 }
 0xa8b   : > { %v3018_v1 = vpop.permute.xlu1 %3017  ;;  %v3013_v2 = vpop.permute.xlu0 %3012 }
 0xa8c   : > { %v3021_v3 = vmul.f32 %v3018_v1, %v10957_v8  ;;  %v3020_v4 = vmul.f32 %v3013_v2, %v10955_v7 }
 0xa8e   : > { %v3023_v5 = vsel %vm2188_vm10, %v3021_v3, 0.0  ;;  %v3022_v6 = vsel %vm2188_vm10, %v3020_v4, 0.0 }
 0xa8f   : > { %v3024_v9 = vadd.f32 %v3023_v5, %v3022_v6 }
 0xa91   : > { %v3025_v10 = vrot.slane %v3024_v9, 4 }
 0xa93   : > { %v3026_v11 = vadd.f32 %v3025_v10, %v3024_v9 }
 0xa95   : > { %v3027_v12 = vrot.slane %v3026_v11, 2 }
 0xa97   : > { %v3028_v13 = vadd.f32 %v3027_v12, %v3026_v11 }
 0xa99   : > { %v3029_v14 = vrot.slane %v3028_v13, 1 }
 0xa9b   : > { %v3030_v15 = vadd.f32 %v3029_v14, %v3028_v13 }
 0xa9d   : > { %7245 = vmatmul.mubr.msk.f32.vlgmr.msra.gmra.mrb[6].mxu0 %vm2188_vm10, %v3030_v15 }
 0xb70   : > { %v3105_v31 = vpop.f32.mrb[6].mxu0 }
 0xb71   : > { %v3106_v34 = vadd.f32 %v3105_v31, %v3035_v30  ;;  %v7246_v36 = vpop.f32.mrb[7].mxu0 }
 0xb73   : > { %v3109_v38 = vmax.f32 %v3106_v34, 0.0 }
 0xb75   : > { %v3113_v41 = vrot.slane %v3109_v38, %v3112_v35 }
 0xb77   : > { %v10988_v42 = vmul.f32 %v3113_v41, %v2888_v40  ;;  %v10990_v43 = vmul.f32 %v3113_v41, %v2889_v39 }
 0xb79   : > { %7255 = vmatprep.mubr.msk.f32.mxu1 %vm2188_vm10, %v10988_v42 }
 0xb7a   : > { %7256 = vmatmul.mubr.msk.f32.vlgmr.msra.gmra.mrb[10].mxu1 %vm2188_vm10, %v10990_v43 }
 0xc4d   : > { %v7257_v45 = vpop.f32.mrb[10].mxu1 }
 0xc4e   : > { %v3205_v46 = vadd.f32 %v7257_v45, %v6773_v44  ;;  %v3199_v47 = vpop.f32.mrb[11].mxu1 }
 0xc4f   : > { %v3200_v48 = vadd.f32 %v6773_v44, %v3199_v47 }
 0xc50   : > { %v3209_v51 = vmul.f32 0.25, %v3205_v46 }
 0xc51   : > { %v10996_v49 = vpack.i.bf16 %v3205_v46, %v3200_v48  ;;  %v3208_v50 = vmul.f32 0.25, %v3200_v48 }
 0xc53   : > { %8396 = vrot.lane.b32.xlu0 %v10996_v49, %s9867_s15  ;;  %8391 = vrot.lane.b32.xlu1 %v10996_v49, %s9868_s2 }
 0xc54   : > { %7262 = vmatprep.mubr.msk.f32.mxu0 %vm2060_vm1, %v3208_v50 }
 0xc57   : > { %3414 = vrot.lane.b32.xlu0 %v3209_v51, %s9869_s3  ;;  %3412 = vrot.lane.b32.xlu1 %v3208_v50, %s9869_s3 }
 0xcc5   : > { %v8397_v52 = vpop.permute.xlu0 %8396  ;;  %v8392_v53 = vpop.permute.xlu1 %8391 }
 0xcc6   : > { %v8399_v54 = vunpack.i.h.bf16 %v8397_v52  ;;  %v8398_v55 = vunpack.i.l.bf16 %v8397_v52  ;;  %v8394_v56 = vunpack.i.h.bf16 %v8392_v53  ;;  %v8393_v57 = vunpack.i.l.bf16 %v8392_v53 }
 0xcc8   : > { %v7464_v59 = vpack.c.bf16 %v8394_v56, %v8393_v57  ;;  %v7474_v60 = vpack.c.bf16 %v8399_v54, %v8398_v55  ;;  %v3624_v54 = vld [vmem:[#allocation46] sm:$0xff]  ;;  %v3625_v55 = vld [vmem:[#allocation46 + $0x8] sm:$0xff]  ;;  %v3626_v57 = vld [vmem:[#allocation46 + $0x10] sm:$0xff] }
 0xcc9   : > { %v3413_v61 = vpop.permute.xlu1 %3412  ;;  %v3415_v63 = vpop.permute.xlu0 %3414  ;;  %v7484_v56 = vpack.c.bf16 %v3625_v55, %v3624_v54 }
 0xcca   : > { %7466 = vmatprep.subr.msk.bf16.mxu0 %vm11007_vm4, %v7464_v59 }
 0xccb   : > { %7469 = vmatpush3.bf16.xpose.msk.msra.mxu0 %vm11007_vm4, %v7464_v59  ;;  %v3627_v59 = vld [vmem:[#allocation46 + $0x18] sm:$0xff] }
 0xccc   : > { %7476 = vmatprep.subr.msk.bf16.mxu0 %vm11007_vm4, %v7474_v60 }
 0xcd2   : > { %7263 = vmatmul.mubr.msk.f32.vlgmr.msra.gmra.mrb[8].mxu0 %vm2060_vm1, %v3209_v51 }
 0xcd3   : > { %7479 = vmatpush3.bf16.xpose.msk.msra.mxu0 %vm11007_vm4, %v7474_v60  ;;  %7276 = vmatprep.mubr.msk.f32.mxu0 %vm2060_vm1, %v3413_v61  ;;  %v7488_v60 = vpack.c.bf16 %v3627_v59, %v3626_v57  ;;  %v3855_v61 = vld [vmem:[#allocation55] sm:$0xff] }
 0xcda   : > { %7277 = vmatmul.mubr.msk.f32.vlgmr.msra.gmra.mrb[10].mxu0 %vm2060_vm1, %v3415_v63  ;;  %v3856_v63 = vld [vmem:[#allocation55 + $0x8] sm:$0xff] }
 0xda5   : > { %v7264_v0 = vpop.f32.mrb[8].mxu0 }
 0xda6   : > { %v3292_v1 = vpop.f32.mrb[9].mxu0  ;;  %v3304_v2 = vsel %vm2060_vm1, %v7264_v0, -inf }
 0xda7   : > { %3305 = vmax.xlane.f32.xlu0 %v3304_v2  ;;  %v3301_v3 = vsel %vm2060_vm1, %v3292_v1, -inf }
 0xda8   : > { %3302 = vmax.xlane.f32.xlu1 %v3301_v3 }
 0xdad   : > { %v7278_v4 = vpop.f32.mrb[10].mxu0 }
 0xdae   : > { %v3494_v5 = vpop.f32.mrb[11].mxu0  ;;  %v3506_v6 = vsel %vm2060_vm1, %v7278_v4, -inf }
 0xdaf   : > { %3507 = vmax.xlane.f32.xlu1 %v3506_v6  ;;  %v3503_v9 = vsel %vm2060_vm1, %v3494_v5, -inf }
 0xdb0   : > { %3504 = vmax.xlane.f32.xlu0 %v3503_v9  ;;  %v3857_v9 = vld [vmem:[#allocation55 + $0x10] sm:$0xff] }
 0xe34   : > { %v3306_v10 = vpop.xlane.xlu0 %3305 }
 0xe35   : > { %v3308_v11 = vsub.f32 %v7264_v0, %v3306_v10  ;;  %v3303_v12 = vpop.xlane.xlu1 %3302  ;;  %v3858_v10 = vld [vmem:[#allocation55 + $0x18] sm:$0xff] }
 0xe36   : > { %v3307_v13 = vsub.f32 %v3292_v1, %v3303_v12  ;;  %v7500_v1 = vpack.c.bf16 %v3856_v63, %v3855_v61  ;;  %v7504_v12 = vpack.c.bf16 %v3858_v10, %v3857_v9 }
 0xe37   : > { %v3311_v14 = vmul.f32 1.442695, %v3308_v11 }
 0xe38   : > { %v3309_v15 = vmul.f32 1.442695, %v3307_v13 }
 0xe39   : > { %8431 = vpow2.f32 %v3311_v14  ;;  %v3763_v14 = vld [vmem:[#allocation52] sm:$0xff] }
 0xe3a   : > { %8433 = vpow2.f32 %v3309_v15  ;;  %v3764_v15 = vld [vmem:[#allocation52 + $0x8] sm:$0xff] }
 0xe3c   : > { %v3508_v16 = vpop.xlane.xlu1 %3507 }
 0xe3d   : > { %v3510_v17 = vsub.f32 %v7278_v4, %v3508_v16  ;;  %v3505_v18 = vpop.xlane.xlu0 %3504  ;;  %v7492_v16 = vpack.c.bf16 %v3764_v15, %v3763_v14 }
 0xe3e   : > { %v3509_v19 = vsub.f32 %v3494_v5, %v3505_v18  ;;  %v3766_v18 = vld [vmem:[#allocation52 + $0x18] sm:$0xff] }
 0xe3f   : > { %v3513_v20 = vmul.f32 1.442695, %v3510_v17  ;;  %7493 = vmatprep.subr.bf16.mxu0 %v7492_v16  ;;  %v3765_v17 = vld [vmem:[#allocation52 + $0x10] sm:$0xff] }
 0xe40   : > { %v3511_v21 = vmul.f32 1.442695, %v3509_v19  ;;  %7495 = vmatpush3.bf16.msra.mxu0 %v7492_v16  ;;  %v7496_v19 = vpack.c.bf16 %v3766_v18, %v3765_v17 }
 0xe41   : > { %8435 = vpow2.f32 %v3513_v20  ;;  %v6788_v20 = vld [vmem:[#allocation48] ss:$0 sm:$0xff] }
 0xe42   : > { %8437 = vpow2.f32 %v3511_v21  ;;  %7497 = vmatprep.subr.bf16.mxu0 %v7496_v19 }
 0xe43   : > { %v8432_v22 = vpop.eup %8431 }
 0xe44   : > { %v8434_v23 = vpop.eup %8433  ;;  %v3316_v24 = vsel %vm2060_vm1, %v8432_v22, 0.0  ;;  %7499 = vmatpush3.bf16.msra.mxu0 %v7496_v19 }
 0xe45   : > { %3317 = vadd.xlane.f32.xlu1 %v3316_v24  ;;  %v3313_v25 = vsel %vm2060_vm1, %v8434_v23, 0.0 }
 0xe46   : > { %3314 = vadd.xlane.f32.xlu0 %v3313_v25 }
 0xe4b   : > { %v8436_v26 = vpop.eup %8435 }
 0xe4c   : > { %v8438_v27 = vpop.eup %8437  ;;  %v3518_v29 = vsel %vm2060_vm1, %v8436_v26, 0.0 }
 0xe4d   : > { %3519 = vadd.xlane.f32.xlu1 %v3518_v29  ;;  %v3515_v30 = vsel %vm2060_vm1, %v8438_v27, 0.0 }
 0xe4e   : > { %3516 = vadd.xlane.f32.xlu0 %v3515_v30 }
 0xe5e   : > { %8406 = vrot.lane.b32.xlu1 %v10996_v49, %s9870_s17  ;;  %s9871_s17 = smov [#allocation73]  }
 0xe5f   : > { %s9579_s1 = sshll.u32 %s9871_s17, 4  ;;  %s9580_s1 = int_to_ptr.vmem [resolvable:$false] %s9579_s1 }
 0xe60   : > { %s9581_s5 = scalar_lea.vmem %s9580_s1, 512 }
 0xe64   : > { %8401 = vrot.lane.b32.xlu0 %v10996_v49, %s9862_s10 }
 0xed2   : > { %v3318_v32 = vpop.xlane.xlu1 %3317 }
 0xed3   : > { %v3315_v31 = vpop.xlane.xlu0 %3314 }
 0xed4   : > { %8439 = vrcp.f32 %v3315_v31 }
 0xed5   : > { %8441 = vrcp.f32 %v3318_v32 }
 0xeda   : > { %v3520_v33 = vpop.xlane.xlu1 %3519 }
 0xedb   : > { %v3517_v34 = vpop.xlane.xlu0 %3516 }
 0xedc   : > { %8443 = vrcp.f32 %v3517_v34 }
 0xedd   : > { %8445 = vrcp.f32 %v3520_v33 }
 0xede   : > { %v8440_v36 = vpop.eup %8439  ;;  %v8407_v37 = vpop.permute.xlu1 %8406 }
 0xedf   : > { %v8402_v38 = vpop.permute.xlu0 %8401  ;;  %v3320_v39 = vmul.f32 %v8440_v36, %v8434_v23  ;;  %v8409_v40 = vunpack.i.h.bf16 %v8407_v37  ;;  %v8408_v41 = vunpack.i.l.bf16 %v8407_v37  ;;  %v8442_v47 = vpop.eup %8441 }
 0xee0   : > { %v8404_v44 = vunpack.i.h.bf16 %v8402_v38  ;;  %v8403_v45 = vunpack.i.l.bf16 %v8402_v38  ;;  %v3322_v50 = vmul.f32 %v8442_v47, %v8432_v22 }
 0xee1   : > { %7269 = vmatprep.mubr.msk.f32.mxu1 %vm2060_vm1, %v3320_v39  ;;  %v7480_v48 = vpack.c.bf16 %v8409_v40, %v8408_v41 }
 0xee2   : > { %v7470_v46 = vpack.c.bf16 %v8404_v44, %v8403_v45 }
 0xee4   : > { %7471 = vmatprep.subr.bf16.mxu1 %v7470_v46 }
 0xee5   : > { %7473 = vmatpush3.bf16.msra.mxu1 %v7470_v46 }
 0xee6   : > { %v8444_v49 = vpop.eup %8443  ;;  %7481 = vmatprep.subr.bf16.mxu1 %v7480_v48 }
 0xee7   : > { %v8446_v51 = vpop.eup %8445  ;;  %v3522_v52 = vmul.f32 %v8444_v49, %v8438_v27 }
 0xee8   : > { %7270 = vmatmul.mubr.msk.f32.vlgmr.msra.gmra.mrb[12].mxu1 %vm2060_vm1, %v3322_v50  ;;  %v3524_v53 = vmul.f32 %v8446_v51, %v8436_v26  ;;  %v6796_v26 = vld [vmem:[#allocation57] ss:$0 sm:$0xff] }
 0xee9   : > { %7483 = vmatpush3.bf16.msra.mxu1 %v7480_v48  ;;  %7283 = vmatprep.mubr.msk.f32.mxu1 %vm2060_vm1, %v3522_v52 }
 0xeea   : > { %7485 = vmatprep.subr.bf16.mxu1 %v7484_v56 }
 0xeec   : > { %7284 = vmatmul.mubr.msk.f32.vlgmr.msra.gmra.mrb[14].mxu1 %vm2060_vm1, %v3524_v53  ;;  %v6791_v53 = vld [vmem:[#allocation49] ss:$0 sm:$0xff] }
 0xeed   : > { %7487 = vmatpush3.bf16.msra.mxu1 %v7484_v56 }
 0xeee   : > { %7489 = vmatprep.subr.bf16.mxu1 %v7488_v60 }
 0xef1   : > { %7491 = vmatpush3.bf16.msra.mxu1 %v7488_v60  ;;  %v6792_v60 = vld [vmem:[#allocation51] ss:$0 sm:$0xff] }
 0xef2   : > { %7501 = vmatprep.subr.bf16.mxu1 %v7500_v1 }
 0xfbb   : > { %v7271_v0 = vpop.f32.mrb[12].mxu1 }
 0xfbc   : > { %3411 = vst.msk [vmem:[#allocation5 + $0x8] sm:$0xff] %vm2060_vm1, %v7271_v0  ;;  %v3401_v2 = vpop.f32.mrb[13].mxu1 }
 0xfbd   : > { %3410 = vst.msk [vmem:[#allocation5] sm:$0xff] %vm2060_vm1, %v3401_v2 }
 0xfbf   : > { %v7285_v3 = vpop.f32.mrb[14].mxu1 }
 0xfc0   : > { %3616 = vrot.lane.b32.xlu0 %v7285_v3, %s9860_s12  ;;  %v3603_v4 = vpop.f32.mrb[15].mxu1 }
 0xfc1   : > { %3614 = vrot.lane.b32.xlu1 %v3603_v4, %s9860_s12  ;;  %v6793_v4 = vld [vmem:[#allocation54] ss:$0 sm:$0xff] }
0x1032   : > { %v3617_v5 = vpop.permute.xlu0 %3616 }
0x1033   : > { %3621 = vst.msk [vmem:[#allocation5 + $0x8] sm:$0xff] %vm2072_vm3, %v3617_v5  ;;  %v3615_v6 = vpop.permute.xlu1 %3614 }
0x1034   : > { %3620 = vst.msk [vmem:[#allocation5] sm:$0xff] %vm2072_vm3, %v3615_v6 }
0x103a   : > { %v3623_v13 = vld [vmem:[#allocation5 + $0x8] sm:$0xff] }
0x103b   : > { %v3622_v11 = vld [vmem:[#allocation5] sm:$0xff] }
0x103c   : > { %7294 = vmatprep.mubr.msk.f32.mxu1 %vm2188_vm10, %v3622_v11 }
0x103d   : > { %7295 = vmatmul.mubr.msk.f32.vlgmr.msra.gmra.mrb[16].mxu1 %vm2188_vm10, %v3623_v13 }
0x103e   : > { %7503 = vmatpush3.bf16.msra.mxu1 %v7500_v1  ;;  %7316 = vmatprep.mubr.msk.f32.mxu1 %vm2188_vm10, %v10955_v7 }
0x103f   : > { %7505 = vmatprep.subr.bf16.mxu1 %v7504_v12 }
0x1042   : > { %7507 = vmatpush3.bf16.msra.mxu1 %v7504_v12 }
0x1045   : > { %7317 = vmatmul.mubr.msk.f32.vlgmr.msra.gmra.mrb[18].mxu1 %vm2188_vm10, %v10957_v8 }
0x1110   : > { %v7296_v21 = vpop.f32.mrb[16].mxu1 }
0x1111   : > { %v3713_v22 = vadd.f32 %v7296_v21, %v6788_v20  ;;  %v3707_v23 = vpop.f32.mrb[17].mxu1 }
0x1112   : > { %v3708_v7 = vadd.f32 %v6788_v20, %v3707_v23 }
0x1113   : > { %v3717_v24 = vadd.f32 %v3713_v22, %v10990_v43 }
0x1114   : > { %v3716_v25 = vadd.f32 %v3708_v7, %v10988_v42 }
0x1115   : > { %v3721_v8 = vsel %vm2188_vm10, %v3717_v24, 0.0 }
0x1116   : > { %3722 = vadd.xlane.f32.xlu0 %v3721_v8  ;;  %v3718_v27 = vsel %vm2188_vm10, %v3716_v25, 0.0 }
0x1117   : > { %3719 = vadd.xlane.f32.xlu1 %v3718_v27 }
0x1118   : > { %v7318_v29 = vpop.f32.mrb[18].mxu1 }
0x1119   : > { %v3938_v30 = vadd.f32 %v7318_v29, %v6796_v26  ;;  %v3932_v31 = vpop.f32.mrb[19].mxu1 }
0x111a   : > { %v3933_v32 = vadd.f32 %v6796_v26, %v3932_v31 }
0x111c   : > { %v7508_v33 = vpack.c.bf16 %v3938_v30, %v3933_v32  ;;  %v11053_v34 = vpack.i.bf16 %v3938_v30, %v3933_v32 }
0x111e   : > { %7510 = vmatprep.subr.msk.bf16.mxu0 %vm11007_vm4, %v7508_v33 }
0x11a3   : > { %v3723_v43 = vpop.xlane.xlu0 %3722 }
0x11a4   : > { %v3726_v36 = vmul.f32 0.03125, %v3723_v43  ;;  %v3720_v42 = vpop.xlane.xlu1 %3719 }
0x11a5   : > { %v3725_v37 = vmul.f32 0.03125, %v3720_v42 }
0x11a6   : > { %v3728_v38 = vsub.f32 %v3717_v24, %v3726_v36 }
0x11a7   : > { %v3727_v39 = vsub.f32 %v3716_v25, %v3725_v37 }
0x11a8   : > { %v3730_v40 = vmul.f32 %v3728_v38, %v3728_v38 }
0x11a9   : > { %v3729_v41 = vmul.f32 %v3727_v39, %v3727_v39 }
0x11aa   : > { %v3734_v44 = vsel %vm2188_vm10, %v3730_v40, 0.0 }
0x11ab   : > { %3735 = vadd.xlane.f32.xlu1 %v3734_v44  ;;  %v3731_v45 = vsel %vm2188_vm10, %v3729_v41, 0.0 }
0x11ac   : > { %3732 = vadd.xlane.f32.xlu0 %v3731_v45 }
0x11c2   : > { %8411 = vrot.lane.b32.xlu0 %v11053_v34, %s9869_s3 }
0x1238   : > { %v3736_v46 = vpop.xlane.xlu1 %3735 }
0x1239   : > { %v3738_v47 = vmul.f32 0.03125, %v3736_v46  ;;  %v3733_v48 = vpop.xlane.xlu0 %3732 }
0x123a   : > { %v3737_v49 = vmul.f32 0.03125, %v3733_v48 }
0x123b   : > { %v3740_v50 = vadd.f32 1e-05, %v3738_v47 }
0x123c   : > { %v3739_v51 = vadd.f32 1e-05, %v3737_v49 }
0x123d   : > { %8447 = vrsqrt.f32 %v3740_v50  ;;  %v8412_v56 = vpop.permute.xlu0 %8411 }
0x123e   : > { %8449 = vrsqrt.f32 %v3739_v51  ;;  %v8414_v63 = vunpack.i.h.bf16 %v8412_v56  ;;  %v8413_v0 = vunpack.i.l.bf16 %v8412_v56 }
0x1240   : > { %v7518_v3 = vpack.c.bf16 %v8414_v63, %v8413_v0 }
0x1247   : > { %v8448_v52 = vpop.eup %8447 }
0x1248   : > { %v8450_v54 = vpop.eup %8449  ;;  %v3744_v55 = vmul.f32 %v8448_v52, %v3728_v38 }
0x1249   : > { %v3743_v57 = vmul.f32 %v8450_v54, %v3727_v39 }
0x124a   : > { %v3753_v59 = vmul.f32 %v6791_v53, %v3744_v55 }
0x124b   : > { %v3752_v61 = vmul.f32 %v6791_v53, %v3743_v57 }
0x124c   : > { %v3762_v2 = vadd.f32 %v6792_v60, %v3753_v59 }
0x124d   : > { %v3761_v1 = vadd.f32 %v6792_v60, %v3752_v61 }
0x124f   : > { %7305 = vmatprep.mubr.msk.f32.mxu0 %vm2188_vm10, %v3761_v1 }
0x1250   : > { %7306 = vmatmul.mubr.msk.f32.vlgmr.msra.gmra.mrb[12].mxu0 %vm2188_vm10, %v3762_v2 }
0x1251   : > { %7513 = vmatpush3.bf16.xpose.msk.msra.mxu0 %vm11007_vm4, %v7508_v33 }
0x1252   : > { %7520 = vmatprep.subr.msk.bf16.mxu0 %vm11007_vm4, %v7518_v3 }
0x1323   : > { %v7307_v5 = vpop.f32.mrb[12].mxu0 }
0x1324   : > { %v3852_v6 = vadd.f32 %v7307_v5, %v6793_v4  ;;  %v3846_v9 = vpop.f32.mrb[13].mxu0  ;;  %v4356_v5 = vld [vmem:[#allocation58 + $0x8] sm:$0xff] }
0x1325   : > { %v3847_v10 = vadd.f32 %v6793_v4, %v3846_v9  ;;  %v4355_v4 = vld [vmem:[#allocation58] sm:$0xff]  ;;  %v4357_v9 = vld [vmem:[#allocation58 + $0x10] sm:$0xff] }
0x1326   : > { %v3942_v12 = vmul.f32 0.25, %v3852_v6  ;;  %v7528_v6 = vpack.c.bf16 %v4356_v5, %v4355_v4  ;;  %v4641_v5 = vld [vmem:[#allocation64 + $0x140] sm:$0xff] }
0x1327   : > { %v3941_v11 = vmul.f32 0.25, %v3847_v10  ;;  %v4358_v10 = vld [vmem:[#allocation58 + $0x18] sm:$0xff] }
0x1329   : > { %4141 = vrot.lane.b32.xlu1 %v3941_v11, %s9869_s3  ;;  %7323 = vmatprep.mubr.msk.f32.mxu0 %vm2060_vm1, %v3941_v11  ;;  %v7532_v11 = vpack.c.bf16 %v4358_v10, %v4357_v9  ;;  %v4643_v9 = vld [vmem:[#allocation64 + $0x150] sm:$0xff] }
0x132a   : > { %7324 = vmatmul.mubr.msk.f32.vlgmr.msra.gmra.mrb[14].mxu0 %vm2060_vm1, %v3942_v12 }
0x132b   : > { %7523 = vmatpush3.bf16.xpose.msk.msra.mxu0 %vm11007_vm4, %v7518_v3  ;;  %vm4533_vm4 = vcmask 785922  }
0x132d   : > { %4143 = vrot.lane.b32.xlu1 %v3942_v12, %s9869_s3 }
0x139b   : > { %v4142_v13 = vpop.permute.xlu1 %4141 }
0x139c   : > { %7337 = vmatprep.mubr.msk.f32.mxu0 %vm2060_vm1, %v4142_v13 }
0x139f   : > { %v4144_v14 = vpop.permute.xlu1 %4143 }
0x13a0   : > { %7338 = vmatmul.mubr.msk.f32.vlgmr.msra.gmra.mrb[16].mxu0 %vm2060_vm1, %v4144_v14 }
0x13fd   : > { %v7325_v15 = vpop.f32.mrb[14].mxu0 }
0x13fe   : > { %v4021_v16 = vpop.f32.mrb[15].mxu0  ;;  %v4033_v17 = vsel %vm2060_vm1, %v7325_v15, -inf }
0x13ff   : > { %4034 = vmax.xlane.f32.xlu1 %v4033_v17  ;;  %v4030_v18 = vsel %vm2060_vm1, %v4021_v16, -inf }
0x1400   : > { %4031 = vmax.xlane.f32.xlu0 %v4030_v18 }
0x1473   : > { %v7339_v19 = vpop.f32.mrb[16].mxu0 }
0x1474   : > { %v4223_v20 = vpop.f32.mrb[17].mxu0  ;;  %v4235_v21 = vsel %vm2060_vm1, %v7339_v19, -inf }
0x1475   : > { %v4232_v58 = vsel %vm2060_vm1, %v4223_v20, -inf }
0x1476   : > { %4233 = vmax.xlane.f32.xlu0 %v4232_v58 }
0x147a   : > { %4236 = vmax.xlane.f32.xlu0 %v4235_v21 }
0x148c   : > { %v4035_v22 = vpop.xlane.xlu1 %4034 }
0x148d   : > { %v4037_v23 = vsub.f32 %v7325_v15, %v4035_v22  ;;  %v4032_v7 = vpop.xlane.xlu0 %4031 }
0x148e   : > { %v4036_v24 = vsub.f32 %v4021_v16, %v4032_v7 }
0x148f   : > { %v4040_v25 = vmul.f32 1.442695, %v4037_v23 }
0x1490   : > { %v4038_v8 = vmul.f32 1.442695, %v4036_v24 }
0x1491   : > { %8451 = vpow2.f32 %v4040_v25 }
0x1492   : > { %8453 = vpow2.f32 %v4038_v8 }
0x149b   : > { %v8452_v26 = vpop.eup %8451 }
0x149c   : > { %v8454_v27 = vpop.eup %8453  ;;  %v4045_v29 = vsel %vm2060_vm1, %v8452_v26, 0.0 }
0x149d   : > { %4046 = vadd.xlane.f32.xlu0 %v4045_v29  ;;  %v4042_v30 = vsel %vm2060_vm1, %v8454_v27, 0.0 }
0x149e   : > { %4043 = vadd.xlane.f32.xlu1 %v4042_v30 }
0x1503   : > { %v4234_v31 = vpop.xlane.xlu0 %4233 }
0x1504   : > { %v4238_v32 = vsub.f32 %v4223_v20, %v4234_v31  ;;  %v6811_v20 = vld [vmem:[#allocation60] ss:$0 sm:$0xff] }
0x1506   : > { %v4240_v33 = vmul.f32 1.442695, %v4238_v32 }
0x1507   : > { %v4237_v43 = vpop.xlane.xlu0 %4236 }
0x1508   : > { %8455 = vpow2.f32 %v4240_v33  ;;  %v4239_v36 = vsub.f32 %v7339_v19, %v4237_v43 }
0x150a   : > { %v4242_v42 = vmul.f32 1.442695, %v4239_v36  ;;  %v4602_v36 = vld [vmem:[#allocation64 + $0x8] sm:$0xff] }
0x150c   : > { %8457 = vpow2.f32 %v4242_v42  ;;  %v4610_v42 = vld [vmem:[#allocation64 + $0x48] sm:$0xff] }
0x1512   : > { %v8456_v37 = vpop.eup %8455 }
0x1513   : > { %v4244_v38 = vsel %vm2060_vm1, %v8456_v37, 0.0 }
0x1514   : > { %4245 = vadd.xlane.f32.xlu1 %v4244_v38  ;;  %v7536_v38 = vpack.c.bf16 %v4610_v42, %v4602_v36  ;;  %v4690_v36 = vld [vmem:[#allocation64 + $0x2c8] sm:$0xff]  ;;  %v4684_v42 = vld [vmem:[#allocation64 + $0x298] sm:$0xff] }
0x1516   : > { %v8458_v39 = vpop.eup %8457  ;;  %7537 = vmatprep.subr.bf16.mxu0 %v7536_v38 }
0x1517   : > { %v4247_v40 = vsel %vm2060_vm1, %v8458_v39, 0.0 }
0x1518   : > { %4248 = vadd.xlane.f32.xlu0 %v4247_v40  ;;  %v4601_v40 = vld [vmem:[#allocation64] sm:$0xff] }
0x1525   : > { %8416 = vrot.lane.b32.xlu1 %v11053_v34, %s9868_s2 }
0x152a   : > { %v4047_v46 = vpop.xlane.xlu0 %4046 }
0x152b   : > { %v4044_v41 = vpop.xlane.xlu1 %4043 }
0x152c   : > { %8459 = vrcp.f32 %v4044_v41  ;;  %v4609_v41 = vld [vmem:[#allocation64 + $0x40] sm:$0xff] }
0x152d   : > { %8461 = vrcp.f32 %v4047_v46  ;;  %v4603_v46 = vld [vmem:[#allocation64 + $0x10] sm:$0xff] }
0x152e   : > { %8421 = vrot.lane.b32.xlu0 %v11053_v34, %s9867_s15  ;;  %s6089_s15 = sshll.u32 %s11092_s23, 4  ;;  %s11385_s15 = int_to_ptr.vmem [resolvable:$true] %s6089_s15 }
0x152f   : > { %s9575_s3 = scalar_lea.vmem %s11385_s15, 256  ;;  %p9582_p3 = scmp.lt.s32.totalorder %s11385_s15, %s9580_s1 }
0x1530   : > { %p9576_p2 = scmp.ne.s32.totalorder %s11385_s15, %s9575_s3  ;;  %p9583_p6 = scmp.lt.s32.totalorder %s9581_s5, %s9575_s3 }
0x1532   : > { %p9584_p12 = por %p9583_p6, %p9582_p3 }
0x1536   : > { %v8460_v44 = vpop.eup %8459 }
0x1537   : > { %v4049_v45 = vmul.f32 %v8460_v44, %v8454_v27  ;;  %v8462_v53 = vpop.eup %8461 }
0x1538   : > { %v4051_v57 = vmul.f32 %v8462_v53, %v8452_v26 }
0x1539   : > { %7330 = vmatprep.mubr.msk.f32.mxu1 %vm2060_vm1, %v4049_v45 }
0x15a1   : > { %v4246_v47 = vpop.xlane.xlu1 %4245 }
0x15a2   : > { %8463 = vrcp.f32 %v4246_v47  ;;  %v4611_v47 = vld [vmem:[#allocation64 + $0x50] sm:$0xff] }
0x15a5   : > { %v8417_v48 = vpop.permute.xlu1 %8416  ;;  %v4249_v49 = vpop.xlane.xlu0 %4248 }
0x15a6   : > { %v8419_v50 = vunpack.i.h.bf16 %v8417_v48  ;;  %v8418_v51 = vunpack.i.l.bf16 %v8417_v48  ;;  %8465 = vrcp.f32 %v4249_v49  ;;  %v4618_v48 = vld [vmem:[#allocation64 + $0x88] sm:$0xff]  ;;  %v7610_v49 = vpack.c.bf16 %v4611_v47, %v4603_v46  ;;  %v4691_v47 = vld [vmem:[#allocation64 + $0x2d0] sm:$0xff] }
0x15a8   : > { %v7514_v52 = vpack.c.bf16 %v8419_v50, %v8418_v51  ;;  %v4626_v50 = vld [vmem:[#allocation64 + $0xc8] sm:$0xff]  ;;  %v4620_v51 = vld [vmem:[#allocation64 + $0x98] sm:$0xff] }
0x15a9   : > { %v8422_v54 = vpop.permute.xlu0 %8421  ;;  %v7540_v53 = vpack.c.bf16 %v4626_v50, %v4618_v48  ;;  %v4698_v48 = vld [vmem:[#allocation64 + $0x308] sm:$0xff]  ;;  %v4700_v50 = vld [vmem:[#allocation64 + $0x318] sm:$0xff] }
0x15aa   : > { %v8424_v55 = vunpack.i.h.bf16 %v8422_v54  ;;  %v8423_v56 = vunpack.i.l.bf16 %v8422_v54  ;;  %7515 = vmatprep.subr.bf16.mxu1 %v7514_v52 }
0x15ab   : > { %7517 = vmatpush3.bf16.msra.mxu1 %v7514_v52  ;;  %v4628_v52 = vld [vmem:[#allocation64 + $0xd8] sm:$0xff] }
0x15ac   : > { %v8464_v34 = vpop.eup %8463  ;;  %v7524_v59 = vpack.c.bf16 %v8424_v55, %v8423_v56  ;;  %v7612_v54 = vpack.c.bf16 %v4628_v52, %v4620_v51  ;;  %v4617_v55 = vld [vmem:[#allocation64 + $0x80] sm:$0xff]  ;;  %v4708_v51 = vld [vmem:[#allocation64 + $0x358] sm:$0xff] }
0x15ad   : > { %v4251_v60 = vmul.f32 %v8464_v34, %v8456_v37  ;;  %v4604_v37 = vld [vmem:[#allocation64 + $0x18] sm:$0xff]  ;;  %v4625_v56 = vld [vmem:[#allocation64 + $0xc0] sm:$0xff]  ;;  %v4619_v34 = vld [vmem:[#allocation64 + $0x90] sm:$0xff] }
0x15ae   : > { %7331 = vmatmul.mubr.msk.f32.vlgmr.msra.gmra.mrb[20].mxu1 %vm2060_vm1, %v4051_v57  ;;  %7525 = vmatprep.subr.bf16.mxu1 %v7524_v59 }
0x15af   : > { %7527 = vmatpush3.bf16.msra.mxu1 %v7524_v59  ;;  %v4254_v61 = vadd.f32 %v4251_v60, %v4049_v45  ;;  %7344 = vmatprep.mubr.msk.f32.mxu1 %vm2060_vm1, %v4251_v60  ;;  %v7538_v45 = vpack.c.bf16 %v4609_v41, %v4601_v40  ;;  %v4627_v59 = vld [vmem:[#allocation64 + $0xd0] sm:$0xff]  ;;  %v4634_v60 = vld [vmem:[#allocation64 + $0x108] sm:$0xff]  ;;  %v4681_v41 = vld [vmem:[#allocation64 + $0x280] sm:$0xff] }
0x15b0   : > { %v8466_v63 = vpop.eup %8465  ;;  %7529 = vmatprep.subr.bf16.mxu1 %v7528_v6 }
0x15b1   : > { %v4253_v0 = vmul.f32 %v8466_v63, %v8458_v39  ;;  %v4447_v1 = vmul.f32 0.5, %v4254_v61  ;;  %v4612_v39 = vld [vmem:[#allocation64 + $0x58] sm:$0xff]  ;;  %7539 = vmatpush1.bf16.msra.mxu0 %v7538_v45  ;;  %v4642_v61 = vld [vmem:[#allocation64 + $0x148] sm:$0xff]  ;;  %v7614_v63 = vpack.c.bf16 %v4627_v59, %v4619_v34  ;;  %v4683_v45 = vld [vmem:[#allocation64 + $0x290] sm:$0xff] }
0x15b2   : > { %v7608_v44 = vpack.c.bf16 %v4612_v39, %v4604_v37  ;;  %7541 = vmatprep.subr.bf16.mxu0 %v7540_v53  ;;  %v4692_v37 = vld [vmem:[#allocation64 + $0x2d8] sm:$0xff]  ;;  %v7630_v53 = vpack.c.bf16 %v4691_v47, %v4683_v45  ;;  %v4699_v34 = vld [vmem:[#allocation64 + $0x310] sm:$0xff]  ;;  %v4762_v45 = vld [vmem:[#allocation64 + $0x508] sm:$0xff] }
0x15b3   : > { %v4255_v2 = vadd.f32 %v4253_v0, %v4051_v57  ;;  %7345 = vmatmul.mubr.msk.f32.vlgmr.msra.gmra.mrb[22].mxu1 %vm2060_vm1, %v4253_v0  ;;  %6052 = vst.msk [vmem:[%s11092_s23] sm:$0xff] %vm2060_vm1, %v4447_v1  ;;  %v7542_v57 = vpack.c.bf16 %v4625_v56, %v4617_v55  ;;  %v7544_v0 = vpack.c.bf16 %v4642_v61, %v4634_v60  ;;  %v4636_v1 = vld [vmem:[#allocation64 + $0x118] sm:$0xff]  ;;  %v4697_v55 = vld [vmem:[#allocation64 + $0x300] sm:$0xff]  ;;  %v4707_v59 = vld [vmem:[#allocation64 + $0x350] sm:$0xff] }
0x15b4   : > { %7531 = vmatpush3.bf16.msra.mxu1 %v7528_v6  ;;  %v4635_v6 = vld [vmem:[#allocation64 + $0x110] sm:$0xff]  ;;  %v7628_v46 = vpack.c.bf16 %v4692_v37, %v4684_v42  ;;  %v4705_v56 = vld [vmem:[#allocation64 + $0x340] sm:$0xff]  ;;  %v4714_v60 = vld [vmem:[#allocation64 + $0x388] sm:$0xff] }
0x15b5   : > { %v4448_v3 = vmul.f32 0.5, %v4255_v2  ;;  %7533 = vmatprep.subr.bf16.mxu1 %v7532_v11  ;;  %v4644_v2 = vld [vmem:[#allocation64 + $0x158] sm:$0xff]  ;;  %7543 = vmatpush1.bf16.msra.mxu0 %v7542_v57  ;;  %v7632_v57 = vpack.c.bf16 %v4708_v51, %v4700_v50  ;;  %v4722_v61 = vld [vmem:[#allocation64 + $0x3c8] sm:$0xff]  ;;  %v4761_v50 = vld [vmem:[#allocation64 + $0x500] sm:$0xff] }
0x15b6   : > { %v7616_v4 = vpack.c.bf16 %v4644_v2, %v4636_v1  ;;  %7545 = vmatprep.subr.bf16.mxu0 %v7544_v0  ;;  %v4724_v0 = vld [vmem:[#allocation64 + $0x3d8] sm:$0xff]  ;;  %v7562_v1 = vpack.c.bf16 %v4705_v56, %v4697_v55  ;;  %v7634_v2 = vpack.c.bf16 %v4707_v59, %v4699_v34  ;;  %v4769_v51 = vld [vmem:[#allocation64 + $0x540] sm:$0xff]  ;;  %v4771_v55 = vld [vmem:[#allocation64 + $0x550] sm:$0xff] }
0x15b7   : > { %6053 = vst.msk [vmem:[%s11092_s23 + $0x8] sm:$0xff] %vm2060_vm1, %v4448_v3  ;;  %v4633_v3 = vld [vmem:[#allocation64 + $0x100] sm:$0xff]  ;;  %v4764_v47 = vld [vmem:[#allocation64 + $0x518] sm:$0xff]  ;;  %v4786_v59 = vld [vmem:[#allocation64 + $0x5c8] sm:$0xff] }
0x15b8   : > { %7535 = vmatpush3.bf16.msra.mxu1 %v7532_v11  ;;  %v7546_v10 = vpack.c.bf16 %v4641_v5, %v4633_v3  ;;  %v4650_v11 = vld [vmem:[#allocation64 + $0x188] sm:$0xff]  ;;  %v7564_v3 = vpack.c.bf16 %v4722_v61, %v4714_v60  ;;  %v4721_v5 = vld [vmem:[#allocation64 + $0x3c0] sm:$0xff]  ;;  %v6814_v56 = vld [vmem:[#allocation61] ss:$0 sm:$0xff] }
0x15b9   : > { %7609 = vmatprep.subr.bf16.mxu1 %v7608_v44  ;;  %v4689_v44 = vld [vmem:[#allocation64 + $0x2c0] sm:$0xff]  ;;  %v4780_v60 = vld [vmem:[#allocation64 + $0x598] sm:$0xff] }
0x15ba   : > { %7547 = vmatpush1.bf16.msra.mxu0 %v7546_v10  ;;  %v7558_v52 = vpack.c.bf16 %v4689_v44, %v4681_v41  ;;  %v4723_v10 = vld [vmem:[#allocation64 + $0x3d0] sm:$0xff] }
0x1681   : > { %v7332_v12 = vpop.f32.mrb[20].mxu1 }
0x1682   : > { %4140 = vst.msk [vmem:[#allocation5 + $0x8] sm:$0xff] %vm2060_vm1, %v7332_v12  ;;  %v4130_v13 = vpop.f32.mrb[21].mxu1  ;;  %v4658_v12 = vld [vmem:[#allocation64 + $0x1c8] sm:$0xff] }
0x1683   : > { %4139 = vst.msk [vmem:[#allocation5] sm:$0xff] %vm2060_vm1, %v4130_v13  ;;  %v4652_v13 = vld [vmem:[#allocation64 + $0x198] sm:$0xff]  ;;  %vm4507_vm1 = vcmask 261124  }
0x1686   : > { %v7346_v14 = vpop.f32.mrb[22].mxu1 }
0x1687   : > { %v4334_v15 = vpop.f32.mrb[23].mxu1 }
0x1688   : > { %4345 = vrot.lane.b32.xlu1 %v4334_v15, %s9860_s12  ;;  %v7548_v15 = vpack.c.bf16 %v4658_v12, %v4650_v11  ;;  %v4730_v11 = vld [vmem:[#allocation64 + $0x408] sm:$0xff] }
0x1689   : > { %v4738_v12 = vld [vmem:[#allocation64 + $0x448] sm:$0xff] }
0x168a   : > { %7549 = vmatprep.subr.bf16.mxu0 %v7548_v15 }
0x168c   : > { %4347 = vrot.lane.b32.xlu1 %v7346_v14, %s9860_s12  ;;  %v7618_v14 = vpack.c.bf16 %v4643_v9, %v4635_v6  ;;  %v4715_v6 = vld [vmem:[#allocation64 + $0x390] sm:$0xff]  ;;  %s11684_s12 = sld [smem:[#allocation141_spill]] }
0x16fa   : > { %v4346_v16 = vpop.permute.xlu1 %4345 }
0x16fb   : > { %4351 = vst.msk [vmem:[#allocation5] sm:$0xff] %vm2072_vm3, %v4346_v16  ;;  %v4660_v16 = vld [vmem:[#allocation64 + $0x1d8] sm:$0xff] }
0x16fe   : > { %v4348_v17 = vpop.permute.xlu1 %4347 }
0x16ff   : > { %4352 = vst.msk [vmem:[#allocation5 + $0x8] sm:$0xff] %vm2072_vm3, %v4348_v17  ;;  %v4649_v17 = vld [vmem:[#allocation64 + $0x180] sm:$0xff]  ;;  %vm4501_vm3 = vcmask 1043456  }
0x1702   : > { %v4353_v18 = vld [vmem:[#allocation5] sm:$0xff] }
0x1703   : > { %7355 = vmatprep.mubr.msk.f32.mxu1 %vm2188_vm10, %v4353_v18  ;;  %v4657_v18 = vld [vmem:[#allocation64 + $0x1c0] sm:$0xff] }
0x1706   : > { %v4354_v19 = vld [vmem:[#allocation5 + $0x8] sm:$0xff] }
0x1707   : > { %7356 = vmatmul.mubr.msk.f32.vlgmr.msra.gmra.mrb[24].mxu1 %vm2188_vm10, %v4354_v19  ;;  %v7620_v19 = vpack.c.bf16 %v4660_v16, %v4652_v13  ;;  %v4732_v13 = vld [vmem:[#allocation64 + $0x418] sm:$0xff]  ;;  %v7638_v16 = vpack.c.bf16 %v4723_v10, %v4715_v6  ;;  %v4779_v6 = vld [vmem:[#allocation64 + $0x590] sm:$0xff] }
0x1708   : > { %7611 = vmatpush1.bf16.msra.mxu1 %v7610_v49  ;;  %v4706_v49 = vld [vmem:[#allocation64 + $0x348] sm:$0xff]  ;;  %v6815_v10 = vld [vmem:[#allocation63] ss:$0 sm:$0xff] }
0x1709   : > { %7613 = vmatprep.subr.bf16.mxu1 %v7612_v54  ;;  %v7560_v54 = vpack.c.bf16 %v4706_v49, %v4698_v48  ;;  %v4772_v49 = vld [vmem:[#allocation64 + $0x558] sm:$0xff] }
0x170c   : > { %7615 = vmatpush1.bf16.msra.mxu1 %v7614_v63  ;;  %v4716_v63 = vld [vmem:[#allocation64 + $0x398] sm:$0xff] }
0x170d   : > { %7617 = vmatprep.subr.bf16.mxu1 %v7616_v4  ;;  %v4713_v4 = vld [vmem:[#allocation64 + $0x380] sm:$0xff]  ;;  %v7636_v9 = vpack.c.bf16 %v4724_v0, %v4716_v63  ;;  %v4788_v0 = vld [vmem:[#allocation64 + $0x5d8] sm:$0xff] }
0x170e   : > { %v7566_v15 = vpack.c.bf16 %v4721_v5, %v4713_v4  ;;  %v7652_v4 = vpack.c.bf16 %v4788_v0, %v4780_v60  ;;  %v4850_v0 = vld [vmem:[#allocation64 + $0x7c8] sm:$0xff] }
0x1710   : > { %7619 = vmatpush1.bf16.msra.mxu1 %v7618_v14  ;;  %v4740_v14 = vld [vmem:[#allocation64 + $0x458] sm:$0xff] }
0x1711   : > { %7621 = vmatprep.subr.bf16.mxu1 %v7620_v19  ;;  %v4737_v19 = vld [vmem:[#allocation64 + $0x440] sm:$0xff] }
0x17da   : > { %v7357_v58 = vpop.f32.mrb[24].mxu1 }
0x17db   : > { %v4444_v21 = vadd.f32 %v7357_v58, %v6811_v20  ;;  %v4438_v22 = vpop.f32.mrb[25].mxu1  ;;  %v4659_v58 = vld [vmem:[#allocation64 + $0x1d0] sm:$0xff] }
0x17dc   : > { %v4439_v23 = vadd.f32 %v6811_v20, %v4438_v22  ;;  %v4651_v20 = vld [vmem:[#allocation64 + $0x190] sm:$0xff]  ;;  %v4674_v22 = vld [vmem:[#allocation64 + $0x248] sm:$0xff] }
0x17dd   : > { %v4452_v7 = vsel %vm2188_vm10, %v4444_v21, 0.0 }
0x17de   : > { %4453 = vadd.xlane.f32.xlu1 %v4452_v7  ;;  %v4449_v24 = vsel %vm2188_vm10, %v4439_v23, 0.0  ;;  %v4676_v7 = vld [vmem:[#allocation64 + $0x258] sm:$0xff] }
0x17df   : > { %4450 = vadd.xlane.f32.xlu0 %v4449_v24  ;;  %v7550_v24 = vpack.c.bf16 %v4657_v18, %v4649_v17  ;;  %v7568_v17 = vpack.c.bf16 %v4738_v12, %v4730_v11  ;;  %v4729_v18 = vld [vmem:[#allocation64 + $0x400] sm:$0xff] }
0x17e1   : > { %7551 = vmatpush1.bf16.msra.mxu0 %v7550_v24  ;;  %v4756_v24 = vld [vmem:[#allocation64 + $0x4d8] sm:$0xff] }
0x186b   : > { %v4454_v25 = vpop.xlane.xlu1 %4453 }
0x186c   : > { %v4456_v8 = vmul.f32 0.03125, %v4454_v25  ;;  %v4451_v26 = vpop.xlane.xlu0 %4450  ;;  %v7622_v25 = vpack.c.bf16 %v4659_v58, %v4651_v20  ;;  %v4731_v20 = vld [vmem:[#allocation64 + $0x410] sm:$0xff]  ;;  %v7640_v58 = vpack.c.bf16 %v4740_v14, %v4732_v13  ;;  %v4794_v13 = vld [vmem:[#allocation64 + $0x608] sm:$0xff] }
0x186d   : > { %v4455_v27 = vmul.f32 0.03125, %v4451_v26  ;;  %v4665_v26 = vld [vmem:[#allocation64 + $0x200] sm:$0xff]  ;;  %v4802_v14 = vld [vmem:[#allocation64 + $0x648] sm:$0xff] }
0x186e   : > { %v11108_v29 = vsub.f32 %v4444_v21, %v4456_v8  ;;  %v4666_v21 = vld [vmem:[#allocation64 + $0x208] sm:$0xff]  ;;  %7623 = vmatpush1.bf16.msra.mxu1 %v7622_v25  ;;  %v7570_v25 = vpack.c.bf16 %v4737_v19, %v4729_v18  ;;  %v4804_v18 = vld [vmem:[#allocation64 + $0x658] sm:$0xff]  ;;  %v4793_v19 = vld [vmem:[#allocation64 + $0x600] sm:$0xff] }
0x186f   : > { %v11110_v30 = vsub.f32 %v4439_v23, %v4455_v27  ;;  %v4668_v23 = vld [vmem:[#allocation64 + $0x218] sm:$0xff]  ;;  %v7552_v8 = vpack.c.bf16 %v4674_v22, %v4666_v21  ;;  %v4673_v27 = vld [vmem:[#allocation64 + $0x240] sm:$0xff]  ;;  %v4739_v21 = vld [vmem:[#allocation64 + $0x450] sm:$0xff] }
0x1870   : > { %v4460_v33 = vmul.f32 %v11108_v29, %v11108_v29  ;;  %v7554_v38 = vpack.c.bf16 %v4673_v27, %v4665_v26  ;;  %v4746_v22 = vld [vmem:[#allocation64 + $0x488] sm:$0xff]  ;;  %v4745_v27 = vld [vmem:[#allocation64 + $0x480] sm:$0xff] }
0x1871   : > { %v4459_v31 = vmul.f32 %v11110_v30, %v11110_v30  ;;  %7553 = vmatprep.subr.bf16.mxu0 %v7552_v8  ;;  %v7642_v8 = vpack.c.bf16 %v4739_v21, %v4731_v20  ;;  %v4801_v20 = vld [vmem:[#allocation64 + $0x640] sm:$0xff] }
0x1872   : > { %v4464_v43 = vsel %vm2188_vm10, %v4460_v33, 0.0  ;;  %v4675_v33 = vld [vmem:[#allocation64 + $0x250] sm:$0xff]  ;;  %7555 = vmatpush1.bf16.msra.mxu0 %v7554_v38 }
0x1873   : > { %v4461_v32 = vsel %vm2188_vm10, %v4459_v31, 0.0  ;;  %v4667_v31 = vld [vmem:[#allocation64 + $0x210] sm:$0xff] }
0x1874   : > { %4462 = vadd.xlane.f32.xlu0 %v4461_v32  ;;  %v7624_v32 = vpack.c.bf16 %v4676_v7, %v4668_v23  ;;  %v7626_v39 = vpack.c.bf16 %v4675_v33, %v4667_v31  ;;  %v4754_v23 = vld [vmem:[#allocation64 + $0x4c8] sm:$0xff]  ;;  %v4748_v7 = vld [vmem:[#allocation64 + $0x498] sm:$0xff]  ;;  %v4753_v31 = vld [vmem:[#allocation64 + $0x4c0] sm:$0xff] }
0x1875   : > { %v7572_v26 = vpack.c.bf16 %v4754_v23, %v4746_v22  ;;  %v4747_v33 = vld [vmem:[#allocation64 + $0x490] sm:$0xff]  ;;  %v7586_v22 = vpack.c.bf16 %v4801_v20, %v4793_v19  ;;  %v4858_v19 = vld [vmem:[#allocation64 + $0x808] sm:$0xff] }
0x1876   : > { %7625 = vmatprep.subr.bf16.mxu1 %v7624_v32  ;;  %v7644_v32 = vpack.c.bf16 %v4756_v24, %v4748_v7  ;;  %v4795_v23 = vld [vmem:[#allocation64 + $0x610] sm:$0xff]  ;;  %v4866_v20 = vld [vmem:[#allocation64 + $0x848] sm:$0xff] }
0x1877   : > { %7627 = vmatpush1.bf16.msra.mxu1 %v7626_v39  ;;  %v4803_v7 = vld [vmem:[#allocation64 + $0x650] sm:$0xff] }
0x1878   : > { %4465 = vadd.xlane.f32.xlu0 %v4464_v43  ;;  %v4682_v43 = vld [vmem:[#allocation64 + $0x288] sm:$0xff]  ;;  %7629 = vmatprep.subr.bf16.mxu1 %v7628_v46  ;;  %v7658_v24 = vpack.c.bf16 %v4803_v7, %v4795_v23  ;;  %v4868_v23 = vld [vmem:[#allocation64 + $0x858] sm:$0xff] }
0x1879   : > { %v7556_v40 = vpack.c.bf16 %v4690_v36, %v4682_v43  ;;  %v4755_v43 = vld [vmem:[#allocation64 + $0x4d0] sm:$0xff]  ;;  %v7574_v36 = vpack.c.bf16 %v4753_v31, %v4745_v27  ;;  %v4770_v46 = vld [vmem:[#allocation64 + $0x548] sm:$0xff]  ;;  %v4812_v31 = vld [vmem:[#allocation64 + $0x698] sm:$0xff] }
0x187a   : > { %v7646_v42 = vpack.c.bf16 %v4755_v43, %v4747_v33  ;;  %v7576_v48 = vpack.c.bf16 %v4770_v46, %v4762_v45  ;;  %v4818_v27 = vld [vmem:[#allocation64 + $0x6c8] sm:$0xff]  ;;  %v4809_v33 = vld [vmem:[#allocation64 + $0x680] sm:$0xff] }
0x187b   : > { %7557 = vmatprep.subr.bf16.mxu0 %v7556_v40  ;;  %7631 = vmatpush1.bf16.msra.mxu1 %v7630_v53  ;;  %v7578_v53 = vpack.c.bf16 %v4769_v51, %v4761_v50  ;;  %v4826_v46 = vld [vmem:[#allocation64 + $0x708] sm:$0xff]  ;;  %v4828_v50 = vld [vmem:[#allocation64 + $0x718] sm:$0xff] }
0x187c   : > { %7559 = vmatpush1.bf16.msra.mxu0 %v7558_v52  ;;  %7633 = vmatprep.subr.bf16.mxu1 %v7632_v57  ;;  %v7648_v52 = vpack.c.bf16 %v4772_v49, %v4764_v47  ;;  %v4778_v57 = vld [vmem:[#allocation64 + $0x588] sm:$0xff]  ;;  %v4836_v51 = vld [vmem:[#allocation64 + $0x758] sm:$0xff] }
0x187d   : > { %7561 = vmatprep.subr.bf16.mxu0 %v7560_v54  ;;  %v4763_v54 = vld [vmem:[#allocation64 + $0x510] sm:$0xff]  ;;  %v7580_v63 = vpack.c.bf16 %v4786_v59, %v4778_v57  ;;  %v4834_v47 = vld [vmem:[#allocation64 + $0x748] sm:$0xff]  ;;  %v7664_v59 = vpack.c.bf16 %v4836_v51, %v4828_v50  ;;  %v4876_v51 = vld [vmem:[#allocation64 + $0x898] sm:$0xff] }
0x187e   : > { %v7650_v34 = vpack.c.bf16 %v4771_v55, %v4763_v54  ;;  %v7592_v49 = vpack.c.bf16 %v4834_v47, %v4826_v46  ;;  %v4827_v54 = vld [vmem:[#allocation64 + $0x710] sm:$0xff]  ;;  %v4882_v50 = vld [vmem:[#allocation64 + $0x8c8] sm:$0xff] }
0x187f   : > { %7635 = vmatpush1.bf16.msra.mxu1 %v7634_v2  ;;  %v4785_v2 = vld [vmem:[#allocation64 + $0x5c0] sm:$0xff]  ;;  %v4835_v55 = vld [vmem:[#allocation64 + $0x750] sm:$0xff] }
0x1880   : > { %7563 = vmatpush1.bf16.msra.mxu0 %v7562_v1  ;;  %7637 = vmatprep.subr.bf16.mxu1 %v7636_v9  ;;  %v4777_v1 = vld [vmem:[#allocation64 + $0x580] sm:$0xff]  ;;  %v4787_v9 = vld [vmem:[#allocation64 + $0x5d0] sm:$0xff] }
0x1881   : > { %7565 = vmatprep.subr.bf16.mxu0 %v7564_v3  ;;  %v7582_v5 = vpack.c.bf16 %v4785_v2, %v4777_v1  ;;  %v7654_v11 = vpack.c.bf16 %v4787_v9, %v4779_v6  ;;  %v4844_v1 = vld [vmem:[#allocation64 + $0x798] sm:$0xff]  ;;  %v4849_v6 = vld [vmem:[#allocation64 + $0x7c0] sm:$0xff]  ;;  %v4859_v47 = vld [vmem:[#allocation64 + $0x810] sm:$0xff] }
0x1883   : > { %7639 = vmatpush1.bf16.msra.mxu1 %v7638_v16 }
0x1884   : > { %7567 = vmatpush1.bf16.msra.mxu0 %v7566_v15  ;;  %7641 = vmatprep.subr.bf16.mxu1 %v7640_v58  ;;  %v4796_v15 = vld [vmem:[#allocation64 + $0x618] sm:$0xff] }
0x1885   : > { %7569 = vmatprep.subr.bf16.mxu0 %v7568_v17  ;;  %v7584_v17 = vpack.c.bf16 %v4802_v14, %v4794_v13  ;;  %v7656_v21 = vpack.c.bf16 %v4804_v18, %v4796_v15 }
0x1887   : > { %7643 = vmatpush1.bf16.msra.mxu1 %v7642_v8 }
0x1888   : > { %7571 = vmatpush1.bf16.msra.mxu0 %v7570_v25  ;;  %7645 = vmatprep.subr.bf16.mxu1 %v7644_v32  ;;  %v4820_v32 = vld [vmem:[#allocation64 + $0x6d8] sm:$0xff] }
0x1889   : > { %7573 = vmatprep.subr.bf16.mxu0 %v7572_v26  ;;  %v4810_v26 = vld [vmem:[#allocation64 + $0x688] sm:$0xff] }
0x188b   : > { %7647 = vmatpush1.bf16.msra.mxu1 %v7646_v42  ;;  %v7660_v42 = vpack.c.bf16 %v4820_v32, %v4812_v31 }
0x188c   : > { %7575 = vmatpush1.bf16.msra.mxu0 %v7574_v36  ;;  %7649 = vmatprep.subr.bf16.mxu1 %v7648_v52  ;;  %v7588_v36 = vpack.c.bf16 %v4818_v27, %v4810_v26  ;;  %v4825_v52 = vld [vmem:[#allocation64 + $0x700] sm:$0xff] }
0x188d   : > { %7577 = vmatprep.subr.bf16.mxu0 %v7576_v48 }
0x188f   : > { %7651 = vmatpush1.bf16.msra.mxu1 %v7650_v34 }
0x1890   : > { %7579 = vmatpush1.bf16.msra.mxu0 %v7578_v53  ;;  %7653 = vmatprep.subr.bf16.mxu1 %v7652_v4  ;;  %v4833_v53 = vld [vmem:[#allocation64 + $0x740] sm:$0xff]  ;;  %v4852_v4 = vld [vmem:[#allocation64 + $0x7d8] sm:$0xff] }
0x1891   : > { %7581 = vmatprep.subr.bf16.mxu0 %v7580_v63  ;;  %v7594_v60 = vpack.c.bf16 %v4833_v53, %v4825_v52  ;;  %v4842_v63 = vld [vmem:[#allocation64 + $0x788] sm:$0xff]  ;;  %v7668_v9 = vpack.c.bf16 %v4852_v4, %v4844_v1  ;;  %v4884_v52 = vld [vmem:[#allocation64 + $0x8d8] sm:$0xff]  ;;  %v4873_v53 = vld [vmem:[#allocation64 + $0x880] sm:$0xff] }
0x1892   : > { %v4614_v1 = vld [vmem:[#allocation64 + $0x68] sm:$0xff]  ;;  %v4616_v4 = vld [vmem:[#allocation64 + $0x78] sm:$0xff] }
0x1893   : > { %7655 = vmatpush1.bf16.msra.mxu1 %v7654_v11  ;;  %v4851_v11 = vld [vmem:[#allocation64 + $0x7d0] sm:$0xff] }
0x1894   : > { %7583 = vmatpush1.bf16.msra.mxu0 %v7582_v5  ;;  %7657 = vmatprep.subr.bf16.mxu1 %v7656_v21  ;;  %v4841_v5 = vld [vmem:[#allocation64 + $0x780] sm:$0xff] }
0x1895   : > { %7585 = vmatprep.subr.bf16.mxu0 %v7584_v17  ;;  %v7598_v13 = vpack.c.bf16 %v4849_v6, %v4841_v5 }
0x1897   : > { %7659 = vmatpush1.bf16.msra.mxu1 %v7658_v24 }
0x1898   : > { %7587 = vmatpush1.bf16.msra.mxu0 %v7586_v22  ;;  %7661 = vmatprep.subr.bf16.mxu1 %v7660_v42  ;;  %v7600_v22 = vpack.c.bf16 %v4866_v20, %v4858_v19  ;;  %v4624_v19 = vld [vmem:[#allocation64 + $0xb8] sm:$0xff] }
0x1899   : > { %7589 = vmatprep.subr.bf16.mxu0 %v7588_v36  ;;  %v4632_v20 = vld [vmem:[#allocation64 + $0xf8] sm:$0xff] }
0x1901   : > { %v4463_v37 = vpop.xlane.xlu0 %4462 }
0x1902   : > { %v4467_v38 = vmul.f32 0.03125, %v4463_v37  ;;  %v4817_v37 = vld [vmem:[#allocation64 + $0x6c0] sm:$0xff] }
0x1904   : > { %v4469_v39 = vadd.f32 1e-05, %v4467_v38  ;;  %v4811_v38 = vld [vmem:[#allocation64 + $0x690] sm:$0xff] }
0x1905   : > { %v4466_v40 = vpop.xlane.xlu0 %4465 }
0x1906   : > { %8467 = vrsqrt.f32 %v4469_v39  ;;  %v4468_v41 = vmul.f32 0.03125, %v4466_v40  ;;  %v4819_v39 = vld [vmem:[#allocation64 + $0x6d0] sm:$0xff]  ;;  %v7590_v40 = vpack.c.bf16 %v4817_v37, %v4809_v33 }
0x1908   : > { %v4470_v44 = vadd.f32 1e-05, %v4468_v41  ;;  %v7662_v41 = vpack.c.bf16 %v4819_v39, %v4811_v38  ;;  %7591 = vmatpush1.bf16.msra.mxu0 %v7590_v40 }
0x1909   : > { %7593 = vmatprep.subr.bf16.mxu0 %v7592_v49  ;;  %v4874_v49 = vld [vmem:[#allocation64 + $0x888] sm:$0xff] }
0x190a   : > { %8469 = vrsqrt.f32 %v4470_v44  ;;  %7663 = vmatpush1.bf16.msra.mxu1 %v7662_v41  ;;  %v4857_v41 = vld [vmem:[#allocation64 + $0x800] sm:$0xff] }
0x190b   : > { %7665 = vmatprep.subr.bf16.mxu1 %v7664_v59 }
0x190c   : > { %7595 = vmatpush1.bf16.msra.mxu0 %v7594_v60 }
0x1910   : > { %v8468_v61 = vpop.eup %8467 }
0x1911   : > { %v4473_v3 = vmul.f32 %v8468_v61, %v11110_v30  ;;  %v7666_v61 = vpack.c.bf16 %v4835_v55, %v4827_v54 }
0x1913   : > { %v4482_v12 = vmul.f32 %v6814_v56, %v4473_v3  ;;  %v7596_v3 = vpack.c.bf16 %v4850_v0, %v4842_v63  ;;  %7667 = vmatpush1.bf16.msra.mxu1 %v7666_v61  ;;  %v7604_v61 = vpack.c.bf16 %v4882_v50, %v4874_v49  ;;  %v7676_v63 = vpack.c.bf16 %v4884_v52, %v4876_v51  ;;  %v4606_v0 = vld [vmem:[#allocation64 + $0x28] sm:$0xff]  ;;  %v4653_v51 = vld [vmem:[#allocation64 + $0x1a0] sm:$0xff] }
0x1914   : > { %v8470_v16 = vpop.eup %8469  ;;  %7669 = vmatprep.subr.bf16.mxu1 %v7668_v9  ;;  %v4661_v52 = vld [vmem:[#allocation64 + $0x1e0] sm:$0xff] }
0x1915   : > { %v11119_v30 = vadd.f32 %v6815_v10, %v4482_v12  ;;  %v4474_v58 = vmul.f32 %v8470_v16, %v11108_v29  ;;  %7597 = vmatprep.subr.bf16.mxu0 %v7596_v3  ;;  %v4608_v3 = vld [vmem:[#allocation64 + $0x38] sm:$0xff] }
0x1916   : > { %7599 = vmatpush1.bf16.msra.mxu0 %v7598_v13  ;;  %v4613_v13 = vld [vmem:[#allocation64 + $0x60] sm:$0xff] }
0x1917   : > { %4550 = vst.msk [vmem:[#allocation4 + $0x8] sm:$0xff] %vm2188_vm10, %v11119_v30  ;;  %v4483_v25 = vmul.f32 %v6814_v56, %v4474_v58  ;;  %v4524_v8 = vrot.slane %v11119_v30, 6  ;;  %v4502_v29 = vrot.slane %v11119_v30, 4  ;;  %v4537_v44 = vrot.slane %v11119_v30, 7  ;;  %v4860_v58 = vld [vmem:[#allocation64 + $0x818] sm:$0xff]  ;;  %7601 = vmatprep.subr.bf16.mxu0 %v7600_v22  ;;  %v4621_v22 = vld [vmem:[#allocation64 + $0xa0] sm:$0xff] }
0x1918   : > { %v4553_v56 = vrot.slane %v11119_v30, 1  ;;  %v4566_v12 = vrot.slane %v11119_v30, 2  ;;  %v4511_v14 = vrot.slane %v11119_v30, 5  ;;  %v4579_v21 = vrot.slane %v11119_v30, 3 }
0x1919   : > { %v11126_v43 = vadd.f32 %v6815_v10, %v4483_v25  ;;  %4527 = vrot.lane.b32.xlu1 %v4524_v8, %s9862_s10  ;;  %4508 = vst.msk [vmem:[#allocation4] sm:$0xf0] %vm4507_vm1, %v4502_v29  ;;  %v4843_v10 = vld [vmem:[#allocation64 + $0x790] sm:$0xff]  ;;  %v7672_v7 = vpack.c.bf16 %v4868_v23, %v4860_v58  ;;  %vm4546_vm1 = vcmask 1048321   ;;  %v4629_v23 = vld [vmem:[#allocation64 + $0xe0] sm:$0xff] }
0x191a   : > { %v7670_v15 = vpack.c.bf16 %v4851_v11, %v4843_v10  ;;  %v7680_v10 = vpack.c.bf16 %v4614_v1, %v4606_v0  ;;  %v7752_v11 = vpack.c.bf16 %v4616_v4, %v4608_v3  ;;  %v4669_v1 = vld [vmem:[#allocation64 + $0x220] sm:$0xff] }
0x191b   : > { %4551 = vst.msk [vmem:[#allocation4 + $0x20] sm:$0xff] %vm2188_vm10, %v11126_v43  ;;  %v4554_v45 = vrot.slane %v11126_v43, 1  ;;  %v4503_v48 = vrot.slane %v11126_v43, 4  ;;  %v4567_v57 = vrot.slane %v11126_v43, 2  ;;  %v4580_v17 = vrot.slane %v11126_v43, 3  ;;  %v4677_v3 = vld [vmem:[#allocation64 + $0x260] sm:$0xff] }
0x191c   : > { %v4512_v18 = vrot.slane %v11126_v43, 5  ;;  %7671 = vmatpush1.bf16.msra.mxu1 %v7670_v15  ;;  %v4525_v26 = vrot.slane %v11126_v43, 6  ;;  %v4538_v31 = vrot.slane %v11126_v43, 7  ;;  %v4615_v15 = vld [vmem:[#allocation64 + $0x70] sm:$0xff] }
0x191d   : > { %4540 = vrot.lane.b32.xlu1 %v4537_v44, %s9868_s2  ;;  %4558 = vrot.lane.b32.xlu0 %v4554_v45, %s9861_s8  ;;  %v4504_v34 = vsel %vm4501_vm3, %v4502_v29, %v4503_v48  ;;  %4594 = vst.msk [vmem:[#allocation4 + $0x28] sm:$0xf] %vm4593_vm5, %v4503_v48  ;;  %v4555_v2 = vsel %vm4552_vm6, %v4553_v56, %v4554_v45  ;;  %vm4548_vm3 = vcmask 1048320   ;;  %vm4589_vm5 = vcmask 1045248   ;;  %v4867_v48 = vld [vmem:[#allocation64 + $0x850] sm:$0xff]  ;;  %v4881_v56 = vld [vmem:[#allocation64 + $0x8c0] sm:$0xff] }
0x191e   : > { %4509 = vst.msk [vmem:[#allocation4 + $0x18] sm:$0xff] %vm2188_vm10, %v4504_v34  ;;  %4592 = vst.msk [vmem:[#allocation4 + $0x10] sm:$0xff] %vm2188_vm10, %v4504_v34  ;;  %v4568_v16 = vsel %vm4565_vm7, %v4566_v12, %v4567_v57  ;;  %v4581_v24 = vsel %vm4578_vm8, %v4579_v21, %v4580_v17  ;;  %v4513_v25 = vsel %vm4510_vm9, %v4511_v14, %v4512_v18  ;;  %7673 = vmatprep.subr.bf16.mxu1 %v7672_v7  ;;  %v4875_v34 = vld [vmem:[#allocation64 + $0x890] sm:$0xff]  ;;  %v4605_v12 = vld [vmem:[#allocation64 + $0x20] sm:$0xff] }
0x191f   : > { %v4526_v27 = vsel %vm4523_vm13, %v4524_v8, %v4525_v26  ;;  %v4539_v29 = vsel %vm4536_vm14, %v4537_v44, %v4538_v31  ;;  %v4865_v44 = vld [vmem:[#allocation64 + $0x840] sm:$0xff]  ;;  %v7674_v55 = vpack.c.bf16 %v4867_v48, %v4859_v47  ;;  %v7606_v5 = vpack.c.bf16 %v4881_v56, %v4873_v53  ;;  %v4630_v18 = vld [vmem:[#allocation64 + $0xe8] sm:$0xff]  ;;  %v4623_v7 = vld [vmem:[#allocation64 + $0xb0] sm:$0xff] }
0x1920   : > { %v7602_v54 = vpack.c.bf16 %v4865_v44, %v4857_v41  ;;  %v7682_v58 = vpack.c.bf16 %v4613_v13, %v4605_v12  ;;  %v4638_v31 = vld [vmem:[#allocation64 + $0x128] sm:$0xff]  ;;  %v4656_v47 = vld [vmem:[#allocation64 + $0x1b8] sm:$0xff]  ;;  %v4663_v56 = vld [vmem:[#allocation64 + $0x1f0] sm:$0xff] }
0x1921   : > { %4571 = vrot.lane.b32.xlu0 %v4567_v57, %s9862_s10  ;;  %4556 = vrot.lane.b32.xlu1 %v4555_v2, %s9861_s8  ;;  %v4883_v57 = vld [vmem:[#allocation64 + $0x8d0] sm:$0xff]  ;;  %v4654_v41 = vld [vmem:[#allocation64 + $0x1a8] sm:$0xff]  ;;  %v4664_v48 = vld [vmem:[#allocation64 + $0x1f8] sm:$0xff] }
0x1922   : > { %v7678_v6 = vpack.c.bf16 %v4883_v57, %v4875_v34  ;;  %v4670_v34 = vld [vmem:[#allocation64 + $0x228] sm:$0xff]  ;;  %v4688_v12 = vld [vmem:[#allocation64 + $0x2b8] sm:$0xff] }
0x1923   : > { %v4678_v57 = vld [vmem:[#allocation64 + $0x268] sm:$0xff]  ;;  %v4696_v13 = vld [vmem:[#allocation64 + $0x2f8] sm:$0xff] }
0x1924   : > { %v7696_v4 = vpack.c.bf16 %v4678_v57, %v4670_v34  ;;  %v4733_v34 = vld [vmem:[#allocation64 + $0x420] sm:$0xff] }
0x1925   : > { %4514 = vrot.lane.b32.xlu0 %v4511_v14, %s9861_s8  ;;  %4569 = vrot.lane.b32.xlu1 %v4568_v16, %s9862_s10  ;;  %v4607_v14 = vld [vmem:[#allocation64 + $0x30] sm:$0xff]  ;;  %v4741_v57 = vld [vmem:[#allocation64 + $0x460] sm:$0xff] }
0x1926   : > { %v7754_v21 = vpack.c.bf16 %v4615_v15, %v4607_v14  ;;  %v7698_v14 = vpack.c.bf16 %v4677_v3, %v4669_v1  ;;  %v4750_v1 = vld [vmem:[#allocation64 + $0x4a8] sm:$0xff] }
0x1927   : > { %v4758_v3 = vld [vmem:[#allocation64 + $0x4e8] sm:$0xff] }
0x1929   : > { %4582 = vrot.lane.b32.xlu0 %v4581_v24, %s9868_s2  ;;  %4516 = vrot.lane.b32.xlu1 %v4513_v25, %s9861_s8  ;;  %v4631_v24 = vld [vmem:[#allocation64 + $0xf0] sm:$0xff]  ;;  %v11191_v25 = vld [vmem:[#allocation4 + $0x10] sm:$0xff]  ;;  %s11685_s8 = sld [smem:[#allocation145_spill]] }
0x192d   : > { %4584 = vrot.lane.b32.xlu0 %v4580_v17, %s9868_s2  ;;  %4529 = vrot.lane.b32.xlu1 %v4526_v27, %s9862_s10  ;;  %v4622_v17 = vld [vmem:[#allocation64 + $0xa8] sm:$0xff]  ;;  %v7756_v27 = vpack.c.bf16 %v4632_v20, %v4624_v19  ;;  %v7772_v20 = vpack.c.bf16 %v4696_v13, %v4688_v12  ;;  %v7716_v12 = vpack.c.bf16 %v4758_v3, %v4750_v1  ;;  %v4813_v1 = vld [vmem:[#allocation64 + $0x6a0] sm:$0xff]  ;;  %s6837_s10 = sshll.u32 %s10149_s9, 8 }
0x192e   : > { %v7684_v26 = vpack.c.bf16 %v4630_v18, %v4622_v17  ;;  %v4685_v17 = vld [vmem:[#allocation64 + $0x2a0] sm:$0xff]  ;;  %s11382_s0 = scalar_lea.hbm %s11684_s12, %s6837_s10 }
0x192f   : > { %v4693_v18 = vld [vmem:[#allocation64 + $0x2e0] sm:$0xff]  ;;  %p11686_p9 = scmp.ne.s32.totalorder %s11685_s8, 0 }
0x1930   : > { %v4821_v3 = vld [vmem:[#allocation64 + $0x6e0] sm:$0xff] }
0x1931   : > { %4542 = vrot.lane.b32.xlu1 %v4539_v29, %s9868_s2  ;;  %v4646_v29 = vld [vmem:[#allocation64 + $0x168] sm:$0xff]  ;;  %s6060_s2 = scalar_lea.sflag [#allocation74], %s10771_s19  ;;  %p9577_p10 = pnand %p9576_p2, %p11686_p9 }
0x1932   : > { %v7688_v44 = vpack.c.bf16 %v4646_v29, %v4638_v31  ;;  %v4701_v31 = vld [vmem:[#allocation64 + $0x320] sm:$0xff] }
0x1933   : > { %v4709_v29 = vld [vmem:[#allocation64 + $0x360] sm:$0xff]  ;;  %p9578_p1 = pneg %p9577_p10 }
0x1935   : > { %p9585_p5 = pnand %p9584_p12, %p9578_p1 }
0x198b   : > { %v4528_v32 = vpop.permute.xlu1 %4527 }
0x198f   : > { %v4541_v33 = vpop.permute.xlu1 %4540  ;;  %v4559_v36 = vpop.permute.xlu0 %4558 }
0x1990   : > { %4564 = vst.msk [vmem:[#allocation4 + $0x20] sm:$0x7f] %vm4563_vm15, %v4559_v36  ;;  %v11197_v36 = vld [vmem:[#allocation4 + $0x28] sm:$0xff] }
0x1993   : > { %v4572_v42 = vpop.permute.xlu0 %4571  ;;  %v4557_v8 = vpop.permute.xlu1 %4556 }
0x1994   : > { %4577 = vst.msk [vmem:[#allocation4 + $0x20] sm:$0x3f] %vm4576_vm0, %v4572_v42  ;;  %v7686_v42 = vpack.c.bf16 %v4629_v23, %v4621_v22  ;;  %v4702_v22 = vld [vmem:[#allocation64 + $0x328] sm:$0xff] }
0x1995   : > { %4562 = vst.msk [vmem:[#allocation4 + $0x8] sm:$0xff] %vm2200_vm11, %v4557_v8  ;;  %v7758_v8 = vpack.c.bf16 %v4631_v24, %v4623_v7  ;;  %v4710_v23 = vld [vmem:[#allocation64 + $0x368] sm:$0xff]  ;;  %v4704_v7 = vld [vmem:[#allocation64 + $0x338] sm:$0xff] }
0x1996   : > { %v4712_v24 = vld [vmem:[#allocation64 + $0x378] sm:$0xff] }
0x1997   : > { %v4515_v37 = vpop.permute.xlu0 %4514  ;;  %v4570_v38 = vpop.permute.xlu1 %4569 }
0x1998   : > { %4521 = vst.msk [vmem:[#allocation4] sm:$0xf8] %vm4520_vm2, %v4515_v37  ;;  %v4637_v37 = vld [vmem:[#allocation64 + $0x120] sm:$0xff] }
0x1999   : > { %4575 = vst.msk [vmem:[#allocation4 + $0x8] sm:$0xff] %vm2211_vm12, %v4570_v38  ;;  %v4645_v38 = vld [vmem:[#allocation64 + $0x160] sm:$0xff] }
0x199a   : > { %4534 = vst.msk [vmem:[#allocation4] sm:$0xfc] %vm4533_vm4, %v4528_v32  ;;  %v4640_v32 = vld [vmem:[#allocation64 + $0x138] sm:$0xff]  ;;  %v7690_v49 = vpack.c.bf16 %v4645_v38, %v4637_v37  ;;  %v4718_v37 = vld [vmem:[#allocation64 + $0x3a8] sm:$0xff] }
0x199b   : > { %4547 = vst.msk [vmem:[#allocation4] sm:$0xfe] %vm4546_vm1, %v4541_v33  ;;  %v4583_v39 = vpop.permute.xlu0 %4582  ;;  %v4517_v40 = vpop.permute.xlu1 %4516  ;;  %v4648_v33 = vld [vmem:[#allocation64 + $0x178] sm:$0xff]  ;;  %v4726_v38 = vld [vmem:[#allocation64 + $0x3e8] sm:$0xff] }
0x199c   : > { %4588 = vst.msk [vmem:[#allocation4 + $0x8] sm:$0xff] %vm4548_vm3, %v4583_v39  ;;  %v4639_v39 = vld [vmem:[#allocation64 + $0x130] sm:$0xff] }
0x199d   : > { %4522 = vst.msk [vmem:[#allocation4 + $0x18] sm:$0xff] %vm2200_vm11, %v4517_v40  ;;  %v4647_v40 = vld [vmem:[#allocation64 + $0x170] sm:$0xff] }
0x199e   : > { %v7762_v50 = vpack.c.bf16 %v4647_v40, %v4639_v39  ;;  %v4720_v39 = vld [vmem:[#allocation64 + $0x3b8] sm:$0xff] }
0x199f   : > { %v4585_v45 = vpop.permute.xlu0 %4584  ;;  %v4530_v46 = vpop.permute.xlu1 %4529  ;;  %v4728_v40 = vld [vmem:[#allocation64 + $0x3f8] sm:$0xff] }
0x19a0   : > { %4590 = vst.msk [vmem:[#allocation4 + $0x20] sm:$0x1f] %vm4589_vm5, %v4585_v45  ;;  %v7760_v45 = vpack.c.bf16 %v4648_v33, %v4640_v32  ;;  %v7704_v32 = vpack.c.bf16 %v4710_v23, %v4702_v22  ;;  %v7776_v33 = vpack.c.bf16 %v4712_v24, %v4704_v7  ;;  %v4765_v22 = vld [vmem:[#allocation64 + $0x520] sm:$0xff] }
0x19a1   : > { %4535 = vst.msk [vmem:[#allocation4 + $0x18] sm:$0xff] %vm2211_vm12, %v4530_v46  ;;  %v4662_v46 = vld [vmem:[#allocation64 + $0x1e8] sm:$0xff]  ;;  %v4773_v23 = vld [vmem:[#allocation64 + $0x560] sm:$0xff] }
0x19a2   : > { %v11177_v2 = vld [vmem:[#allocation4] sm:$0xff]  ;;  %v7692_v53 = vpack.c.bf16 %v4662_v46, %v4654_v41  ;;  %v7706_v41 = vpack.c.bf16 %v4709_v29, %v4701_v31  ;;  %v4725_v46 = vld [vmem:[#allocation64 + $0x3e0] sm:$0xff] }
0x19a3   : > { %v4543_v59 = vpop.permute.xlu1 %4542  ;;  %v11172_v60 = vld [vmem:[#allocation4 + $0x8] sm:$0xff]  ;;  %v4782_v31 = vld [vmem:[#allocation64 + $0x5a8] sm:$0xff] }
0x19a4   : > { %4549 = vst.msk [vmem:[#allocation4 + $0x18] sm:$0xff] %vm4548_vm3, %v4543_v59  ;;  %5001 = vmatprep.mubr.f32.mxu0 %v11172_v60  ;;  %5155 = vmatprep.mubr.f32.mxu1 %v11172_v60  ;;  %v4672_v59 = vld [vmem:[#allocation64 + $0x238] sm:$0xff]  ;;  %v4790_v29 = vld [vmem:[#allocation64 + $0x5e8] sm:$0xff] }
0x19a5   : > { %5002 = vmatmul.mubr.f32.vlgmr.msra.gmra.mrb[18].mxu0 %v11177_v2  ;;  %5156 = vmatmul.mubr.f32.vlgmr.msra.gmra.mrb[26].mxu1 %v11177_v2 }
0x19a6   : > { %7603 = vmatpush1.bf16.msra.mxu0 %v7602_v54  ;;  %7675 = vmatpush1.bf16.msra.mxu1 %v7674_v55  ;;  %v7764_v54 = vpack.c.bf16 %v4664_v48, %v4656_v47  ;;  %v4655_v55 = vld [vmem:[#allocation64 + $0x1b0] sm:$0xff]  ;;  %v7708_v47 = vpack.c.bf16 %v4726_v38, %v4718_v37  ;;  %v7780_v48 = vpack.c.bf16 %v4728_v40, %v4720_v39  ;;  %v4781_v37 = vld [vmem:[#allocation64 + $0x5a0] sm:$0xff] }
0x19a7   : > { %v11181_v9 = vld [vmem:[#allocation4 + $0x20] sm:$0xff]  ;;  %7605 = vmatprep.subr.bf16.mxu0 %v7604_v61  ;;  %7677 = vmatprep.subr.bf16.mxu1 %v7676_v63  ;;  %v4680_v61 = vld [vmem:[#allocation64 + $0x278] sm:$0xff]  ;;  %v7694_v63 = vpack.c.bf16 %v4661_v52, %v4653_v51  ;;  %v7766_v0 = vpack.c.bf16 %v4663_v56, %v4655_v55  ;;  %v4789_v38 = vld [vmem:[#allocation64 + $0x5e0] sm:$0xff]  ;;  %v7724_v39 = vpack.c.bf16 %v4790_v29, %v4782_v31 }
0x19a8   : > { %5007 = vmatprep.mubr.f32.mxu0 %v11181_v9  ;;  %5161 = vmatprep.mubr.f32.mxu1 %v11181_v9  ;;  %v4734_v51 = vld [vmem:[#allocation64 + $0x428] sm:$0xff]  ;;  %v4845_v31 = vld [vmem:[#allocation64 + $0x7a0] sm:$0xff] }
0x19a9   : > { %v4742_v52 = vld [vmem:[#allocation64 + $0x468] sm:$0xff]  ;;  %v4853_v29 = vld [vmem:[#allocation64 + $0x7e0] sm:$0xff] }
0x19aa   : > { %7607 = vmatpush1.bf16.msra.mxu0 %v7606_v5  ;;  %7679 = vmatpush1.bf16.msra.mxu1 %v7678_v6  ;;  %v4671_v5 = vld [vmem:[#allocation64 + $0x230] sm:$0xff] }
0x19ab   : > { %v11185_v16 = vld [vmem:[#allocation4 + $0x18] sm:$0xff]  ;;  %7681 = vmatprep.subr.bf16.mxu0 %v7680_v10  ;;  %7753 = vmatprep.subr.bf16.mxu1 %v7752_v11  ;;  %v4679_v6 = vld [vmem:[#allocation64 + $0x270] sm:$0xff] }
0x19ac   : > { %5008 = vmatmul.mubr.f32.gmra.mrb[20].mxu0 %v11185_v16  ;;  %5162 = vmatmul.mubr.f32.gmra.mrb[28].mxu1 %v11185_v16  ;;  %v4686_v10 = vld [vmem:[#allocation64 + $0x2a8] sm:$0xff]  ;;  %v7770_v15 = vpack.c.bf16 %v4679_v6, %v4671_v5  ;;  %v7714_v5 = vpack.c.bf16 %v4741_v57, %v4733_v34 }
0x19ad   : > { %5078 = vmatprep.mubr.f32.mxu0 %v9866_v62  ;;  %5232 = vmatprep.mubr.f32.mxu1 %v9866_v62  ;;  %v4694_v11 = vld [vmem:[#allocation64 + $0x2e8] sm:$0xff] }
0x19ae   : > { %v7700_v19 = vpack.c.bf16 %v4694_v11, %v4686_v10  ;;  %v4749_v10 = vld [vmem:[#allocation64 + $0x4a0] sm:$0xff]  ;;  %v4814_v34 = vld [vmem:[#allocation64 + $0x6a8] sm:$0xff] }
0x19af   : > { %v4757_v11 = vld [vmem:[#allocation64 + $0x4e0] sm:$0xff]  ;;  %v4822_v57 = vld [vmem:[#allocation64 + $0x6e8] sm:$0xff] }
0x19b0   : > { %6816 = vmatmul.mubr.msk.f32.vlgmr.msra.gmra.mrb[18].mxu0 %vm2188_vm10, %v11191_v25  ;;  %6818 = vmatmul.mubr.msk.f32.vlgmr.msra.gmra.mrb[26].mxu1 %vm2188_vm10, %v11191_v25 }
0x19b1   : > { %7683 = vmatpush1.bf16.msra.mxu0 %v7682_v58  ;;  %7755 = vmatpush1.bf16.msra.mxu1 %v7754_v21  ;;  %v4687_v58 = vld [vmem:[#allocation64 + $0x2b0] sm:$0xff] }
0x19b2   : > { %5084 = vmatprep.mubr.f32.mxu0 %v9866_v62  ;;  %5238 = vmatprep.mubr.f32.mxu1 %v9866_v62  ;;  %v4695_v21 = vld [vmem:[#allocation64 + $0x2f0] sm:$0xff] }
0x19b3   : > { %7685 = vmatprep.subr.bf16.mxu0 %v7684_v26  ;;  %7757 = vmatprep.subr.bf16.mxu1 %v7756_v27  ;;  %v7702_v26 = vpack.c.bf16 %v4693_v18, %v4685_v17  ;;  %v7774_v27 = vpack.c.bf16 %v4695_v21, %v4687_v58  ;;  %v4766_v17 = vld [vmem:[#allocation64 + $0x528] sm:$0xff]  ;;  %v7718_v58 = vpack.c.bf16 %v4757_v11, %v4749_v10 }
0x19b4   : > { %6817 = vmatmul.mubr.msk.f32.gmra.mrb[20].mxu0 %vm2188_vm10, %v11197_v36  ;;  %6819 = vmatmul.mubr.msk.f32.gmra.mrb[28].mxu1 %vm2188_vm10, %v11197_v36  ;;  %v4774_v18 = vld [vmem:[#allocation64 + $0x568] sm:$0xff] }
0x19b5   : > { %7687 = vmatpush1.bf16.msra.mxu0 %v7686_v42  ;;  %7759 = vmatpush1.bf16.msra.mxu1 %v7758_v8  ;;  %v4703_v42 = vld [vmem:[#allocation64 + $0x330] sm:$0xff]  ;;  %v7720_v7 = vpack.c.bf16 %v4774_v18, %v4766_v17  ;;  %v4830_v10 = vld [vmem:[#allocation64 + $0x728] sm:$0xff]  ;;  %v4829_v17 = vld [vmem:[#allocation64 + $0x720] sm:$0xff] }
0x19b6   : > { %5309 = vmatprep.mubr.f32.mxu0 %v11172_v60  ;;  %5463 = vmatprep.mubr.f32.mxu1 %v11172_v60  ;;  %v7768_v60 = vpack.c.bf16 %v4680_v61, %v4672_v59  ;;  %v4711_v8 = vld [vmem:[#allocation64 + $0x370] sm:$0xff]  ;;  %v7712_v59 = vpack.c.bf16 %v4742_v52, %v4734_v51  ;;  %v4797_v51 = vld [vmem:[#allocation64 + $0x620] sm:$0xff]  ;;  %v4838_v11 = vld [vmem:[#allocation64 + $0x768] sm:$0xff] }
0x19b7   : > { %7689 = vmatprep.subr.bf16.mxu0 %v7688_v44  ;;  %7761 = vmatprep.subr.bf16.mxu1 %v7760_v45  ;;  %v7778_v44 = vpack.c.bf16 %v4711_v8, %v4703_v42  ;;  %v4717_v45 = vld [vmem:[#allocation64 + $0x3a0] sm:$0xff]  ;;  %v7722_v42 = vpack.c.bf16 %v4773_v23, %v4765_v22  ;;  %v4846_v22 = vld [vmem:[#allocation64 + $0x7a8] sm:$0xff] }
0x19b8   : > { %v7710_v55 = vpack.c.bf16 %v4725_v46, %v4717_v45  ;;  %v4798_v45 = vld [vmem:[#allocation64 + $0x628] sm:$0xff]  ;;  %v4805_v52 = vld [vmem:[#allocation64 + $0x660] sm:$0xff] }
0x19b9   : > { %7691 = vmatpush1.bf16.msra.mxu0 %v7690_v49  ;;  %7763 = vmatpush1.bf16.msra.mxu1 %v7762_v50  ;;  %v4719_v49 = vld [vmem:[#allocation64 + $0x3b0] sm:$0xff]  ;;  %v4806_v46 = vld [vmem:[#allocation64 + $0x668] sm:$0xff]  ;;  %v4837_v18 = vld [vmem:[#allocation64 + $0x760] sm:$0xff] }
0x19ba   : > { %7693 = vmatprep.subr.bf16.mxu0 %v7692_v53  ;;  %7765 = vmatprep.subr.bf16.mxu1 %v7764_v54  ;;  %v4727_v50 = vld [vmem:[#allocation64 + $0x3f0] sm:$0xff]  ;;  %v4736_v53 = vld [vmem:[#allocation64 + $0x438] sm:$0xff]  ;;  %v4854_v23 = vld [vmem:[#allocation64 + $0x7e8] sm:$0xff] }
0x19bb   : > { %v4744_v54 = vld [vmem:[#allocation64 + $0x478] sm:$0xff]  ;;  %v7782_v56 = vpack.c.bf16 %v4727_v50, %v4719_v49  ;;  %v7726_v49 = vpack.c.bf16 %v4789_v38, %v4781_v37  ;;  %v4862_v37 = vld [vmem:[#allocation64 + $0x828] sm:$0xff] }
0x19bc   : > { %v7784_v61 = vpack.c.bf16 %v4744_v54, %v4736_v53  ;;  %v7728_v53 = vpack.c.bf16 %v4806_v46, %v4798_v45  ;;  %v4870_v38 = vld [vmem:[#allocation64 + $0x868] sm:$0xff] }
0x19bd   : > { %7695 = vmatpush1.bf16.msra.mxu0 %v7694_v63  ;;  %7767 = vmatpush1.bf16.msra.mxu1 %v7766_v0  ;;  %v4735_v63 = vld [vmem:[#allocation64 + $0x430] sm:$0xff]  ;;  %v7744_v45 = vpack.c.bf16 %v4870_v38, %v4862_v37  ;;  %v5591_v38 = vld [vmem:[%s11683_s18 + $0xb0] sm:$0xff] }
0x19be   : > { %7697 = vmatprep.subr.bf16.mxu0 %v7696_v4  ;;  %7769 = vmatprep.subr.bf16.mxu1 %v7768_v60  ;;  %v4743_v0 = vld [vmem:[#allocation64 + $0x470] sm:$0xff]  ;;  %v4752_v4 = vld [vmem:[#allocation64 + $0x4b8] sm:$0xff] }
0x19bf   : > { %v4760_v60 = vld [vmem:[#allocation64 + $0x4f8] sm:$0xff]  ;;  %v7786_v6 = vpack.c.bf16 %v4743_v0, %v4735_v63  ;;  %v7730_v63 = vpack.c.bf16 %v4805_v52, %v4797_v51  ;;  %v4878_v51 = vld [vmem:[#allocation64 + $0x8a8] sm:$0xff] }
0x19c0   : > { %v7788_v13 = vpack.c.bf16 %v4760_v60, %v4752_v4  ;;  %v7732_v4 = vpack.c.bf16 %v4822_v57, %v4814_v34  ;;  %v4886_v52 = vld [vmem:[#allocation64 + $0x8e8] sm:$0xff]  ;;  %v4877_v34 = vld [vmem:[#allocation64 + $0x8a0] sm:$0xff] }
0x19c1   : > { %7699 = vmatpush1.bf16.msra.mxu0 %v7698_v14  ;;  %7771 = vmatpush1.bf16.msra.mxu1 %v7770_v15  ;;  %v4751_v14 = vld [vmem:[#allocation64 + $0x4b0] sm:$0xff]  ;;  %v4885_v57 = vld [vmem:[#allocation64 + $0x8e0] sm:$0xff] }
0x19c2   : > { %7701 = vmatprep.subr.bf16.mxu0 %v7700_v19  ;;  %7773 = vmatprep.subr.bf16.mxu1 %v7772_v20  ;;  %v4759_v15 = vld [vmem:[#allocation64 + $0x4f0] sm:$0xff]  ;;  %v4768_v19 = vld [vmem:[#allocation64 + $0x538] sm:$0xff] }
0x19c3   : > { %v4776_v20 = vld [vmem:[#allocation64 + $0x578] sm:$0xff]  ;;  %v7790_v21 = vpack.c.bf16 %v4759_v15, %v4751_v14  ;;  %v7734_v14 = vpack.c.bf16 %v4821_v3, %v4813_v1  ;;  %v5585_v1 = vld [vmem:[%s11683_s18 + $0x80] sm:$0xff] }
0x19c4   : > { %v7792_v24 = vpack.c.bf16 %v4776_v20, %v4768_v19  ;;  %v7736_v19 = vpack.c.bf16 %v4838_v11, %v4830_v10  ;;  %v5586_v3 = vld [vmem:[%s11683_s18 + $0x88] sm:$0xff]  ;;  %v5569_v11 = vld [vmem:[%s11683_s18] sm:$0xff] }
0x19c5   : > { %7703 = vmatpush1.bf16.msra.mxu0 %v7702_v26  ;;  %7775 = vmatpush1.bf16.msra.mxu1 %v7774_v27  ;;  %v4767_v26 = vld [vmem:[#allocation64 + $0x530] sm:$0xff] }
0x19c6   : > { %7705 = vmatprep.subr.bf16.mxu0 %v7704_v32  ;;  %7777 = vmatprep.subr.bf16.mxu1 %v7776_v33  ;;  %v4775_v27 = vld [vmem:[#allocation64 + $0x570] sm:$0xff]  ;;  %v4784_v32 = vld [vmem:[#allocation64 + $0x5b8] sm:$0xff] }
0x19c7   : > { %v4792_v33 = vld [vmem:[#allocation64 + $0x5f8] sm:$0xff]  ;;  %v7794_v8 = vpack.c.bf16 %v4775_v27, %v4767_v26  ;;  %v7738_v26 = vpack.c.bf16 %v4837_v18, %v4829_v17  ;;  %v5620_v18 = vld [vmem:[%s11683_s18 + $0x198] sm:$0xff] }
0x19c8   : > { %v7796_v40 = vpack.c.bf16 %v4792_v33, %v4784_v32  ;;  %v7740_v32 = vpack.c.bf16 %v4854_v23, %v4846_v22  ;;  %v5619_v17 = vld [vmem:[%s11683_s18 + $0x190] sm:$0xff] }
0x19c9   : > { %7707 = vmatpush1.bf16.msra.mxu0 %v7706_v41  ;;  %7779 = vmatpush1.bf16.msra.mxu1 %v7778_v44  ;;  %v4783_v41 = vld [vmem:[#allocation64 + $0x5b0] sm:$0xff]  ;;  %v5603_v22 = vld [vmem:[%s11683_s18 + $0x110] sm:$0xff]  ;;  %v7860_v23 = vpack.c.bf16 %v5620_v18, %v5619_v17 }
0x19ca   : > { %7709 = vmatprep.subr.bf16.mxu0 %v7708_v47  ;;  %7781 = vmatprep.subr.bf16.mxu1 %v7780_v48  ;;  %v4791_v44 = vld [vmem:[#allocation64 + $0x5f0] sm:$0xff]  ;;  %v4800_v47 = vld [vmem:[#allocation64 + $0x638] sm:$0xff] }
0x19cb   : > { %v4808_v48 = vld [vmem:[#allocation64 + $0x678] sm:$0xff]  ;;  %v7798_v50 = vpack.c.bf16 %v4791_v44, %v4783_v41  ;;  %v7742_v41 = vpack.c.bf16 %v4853_v29, %v4845_v31  ;;  %v5629_v17 = vld [vmem:[%s11683_s18 + $0x1e0] sm:$0xff] }
0x19cc   : > { %v7800_v54 = vpack.c.bf16 %v4808_v48, %v4800_v47  ;;  %v4861_v47 = vld [vmem:[#allocation64 + $0x820] sm:$0xff]  ;;  %v5622_v31 = vld [vmem:[%s11683_s18 + $0x1a8] sm:$0xff] }
0x19cd   : > { %7711 = vmatpush1.bf16.msra.mxu0 %v7710_v55  ;;  %7783 = vmatpush1.bf16.msra.mxu1 %v7782_v56  ;;  %v4799_v55 = vld [vmem:[#allocation64 + $0x630] sm:$0xff]  ;;  %v4869_v48 = vld [vmem:[#allocation64 + $0x860] sm:$0xff] }
0x19ce   : > { %7713 = vmatprep.subr.bf16.mxu0 %v7712_v59  ;;  %7785 = vmatprep.subr.bf16.mxu1 %v7784_v61  ;;  %v4807_v56 = vld [vmem:[#allocation64 + $0x670] sm:$0xff]  ;;  %v4816_v59 = vld [vmem:[#allocation64 + $0x6b8] sm:$0xff] }
0x19cf   : > { %v4824_v61 = vld [vmem:[#allocation64 + $0x6f8] sm:$0xff]  ;;  %v7802_v0 = vpack.c.bf16 %v4807_v56, %v4799_v55  ;;  %v7746_v55 = vpack.c.bf16 %v4869_v48, %v4861_v47  ;;  %v5576_v48 = vld [vmem:[%s11683_s18 + $0x38] sm:$0xff] }
0x19d0   : > { %v7804_v60 = vpack.c.bf16 %v4824_v61, %v4816_v59  ;;  %v7748_v59 = vpack.c.bf16 %v4886_v52, %v4878_v51  ;;  %v5575_v47 = vld [vmem:[%s11683_s18 + $0x30] sm:$0xff]  ;;  %v5593_v51 = vld [vmem:[%s11683_s18 + $0xc0] sm:$0xff]  ;;  %v5594_v52 = vld [vmem:[%s11683_s18 + $0xc8] sm:$0xff] }
0x19d1   : > { %7715 = vmatpush1.bf16.msra.mxu0 %v7714_v5  ;;  %7787 = vmatpush1.bf16.msra.mxu1 %v7786_v6  ;;  %v4815_v5 = vld [vmem:[#allocation64 + $0x6b0] sm:$0xff] }
0x19d2   : > { %7717 = vmatprep.subr.bf16.mxu0 %v7716_v12  ;;  %7789 = vmatprep.subr.bf16.mxu1 %v7788_v13  ;;  %v4823_v6 = vld [vmem:[#allocation64 + $0x6f0] sm:$0xff]  ;;  %v4832_v12 = vld [vmem:[#allocation64 + $0x738] sm:$0xff] }
0x19d3   : > { %v4840_v13 = vld [vmem:[#allocation64 + $0x778] sm:$0xff]  ;;  %v7806_v15 = vpack.c.bf16 %v4823_v6, %v4815_v5  ;;  %v7750_v5 = vpack.c.bf16 %v4885_v57, %v4877_v34  ;;  %v7840_v34 = vpack.c.bf16 %v5594_v52, %v5593_v51  ;;  %v5577_v57 = vld [vmem:[%s11683_s18 + $0x40] sm:$0xff] }
0x19d4   : > { %v7808_v20 = vpack.c.bf16 %v4840_v13, %v4832_v12  ;;  %v5570_v12 = vld [vmem:[%s11683_s18 + $0x8] sm:$0xff]  ;;  %v5601_v13 = vld [vmem:[%s11683_s18 + $0x100] sm:$0xff] }
0x19d5   : > { %7719 = vmatpush1.bf16.msra.mxu0 %v7718_v58  ;;  %7791 = vmatpush1.bf16.msra.mxu1 %v7790_v21  ;;  %v4831_v58 = vld [vmem:[#allocation64 + $0x730] sm:$0xff] }
0x19d6   : > { %7721 = vmatprep.subr.bf16.mxu0 %v7720_v7  ;;  %7793 = vmatprep.subr.bf16.mxu1 %v7792_v24  ;;  %v4839_v21 = vld [vmem:[#allocation64 + $0x770] sm:$0xff]  ;;  %v4848_v7 = vld [vmem:[#allocation64 + $0x7b8] sm:$0xff] }
0x19d7   : > { %v4856_v24 = vld [vmem:[#allocation64 + $0x7f8] sm:$0xff]  ;;  %v7810_v27 = vpack.c.bf16 %v4839_v21, %v4831_v58  ;;  %v5572_v21 = vld [vmem:[%s11683_s18 + $0x18] sm:$0xff] }
0x19d8   : > { %v7812_v33 = vpack.c.bf16 %v4856_v24, %v4848_v7  ;;  %v5571_v58 = vld [vmem:[%s11683_s18 + $0x10] sm:$0xff]  ;;  %v5604_v7 = vld [vmem:[%s11683_s18 + $0x118] sm:$0xff]  ;;  %v5589_v24 = vld [vmem:[%s11683_s18 + $0xa0] sm:$0xff] }
0x19d9   : > { %7723 = vmatpush1.bf16.msra.mxu0 %v7722_v42  ;;  %7795 = vmatpush1.bf16.msra.mxu1 %v7794_v8  ;;  %v4847_v42 = vld [vmem:[#allocation64 + $0x7b0] sm:$0xff]  ;;  %v7830_v29 = vpack.c.bf16 %v5572_v21, %v5571_v58 }
0x19da   : > { %7725 = vmatprep.subr.bf16.mxu0 %v7724_v39  ;;  %7797 = vmatprep.subr.bf16.mxu1 %v7796_v40  ;;  %v4855_v8 = vld [vmem:[#allocation64 + $0x7f0] sm:$0xff]  ;;  %v4864_v39 = vld [vmem:[#allocation64 + $0x838] sm:$0xff] }
0x19db   : > { %v4872_v40 = vld [vmem:[#allocation64 + $0x878] sm:$0xff]  ;;  %v7814_v44 = vpack.c.bf16 %v4855_v8, %v4847_v42  ;;  %v5573_v42 = vld [vmem:[%s11683_s18 + $0x20] sm:$0xff] }
0x19dc   : > { %v7816_v46 = vpack.c.bf16 %v4872_v40, %v4864_v39  ;;  %v5574_v8 = vld [vmem:[%s11683_s18 + $0x28] sm:$0xff]  ;;  %v5592_v39 = vld [vmem:[%s11683_s18 + $0xb8] sm:$0xff]  ;;  %v5623_v40 = vld [vmem:[%s11683_s18 + $0x1b0] sm:$0xff] }
0x19dd   : > { %7727 = vmatpush1.bf16.msra.mxu0 %v7726_v49  ;;  %7799 = vmatpush1.bf16.msra.mxu1 %v7798_v50  ;;  %v4863_v49 = vld [vmem:[#allocation64 + $0x830] sm:$0xff] }
0x19de   : > { %7729 = vmatprep.subr.bf16.mxu0 %v7728_v53  ;;  %7801 = vmatprep.subr.bf16.mxu1 %v7800_v54  ;;  %v4871_v50 = vld [vmem:[#allocation64 + $0x870] sm:$0xff]  ;;  %v4880_v53 = vld [vmem:[#allocation64 + $0x8b8] sm:$0xff] }
0x19df   : > { %v4888_v54 = vld [vmem:[#allocation64 + $0x8f8] sm:$0xff]  ;;  %v7818_v56 = vpack.c.bf16 %v4871_v50, %v4863_v49  ;;  %v5581_v58 = vld [vmem:[%s11683_s18 + $0x60] sm:$0xff] }
0x19e0   : > { %v7820_v61 = vpack.c.bf16 %v4888_v54, %v4880_v53  ;;  %v5607_v49 = vld [vmem:[%s11683_s18 + $0x130] sm:$0xff]  ;;  %v5625_v53 = vld [vmem:[%s11683_s18 + $0x1c0] sm:$0xff]  ;;  %v5626_v54 = vld [vmem:[%s11683_s18 + $0x1c8] sm:$0xff] }
0x19e1   : > { %7731 = vmatpush1.bf16.msra.mxu0 %v7730_v63  ;;  %7803 = vmatpush1.bf16.msra.mxu1 %v7802_v0  ;;  %v4879_v63 = vld [vmem:[#allocation64 + $0x8b0] sm:$0xff] }
0x19e2   : > { %7733 = vmatprep.subr.bf16.mxu0 %v7732_v4  ;;  %7805 = vmatprep.subr.bf16.mxu1 %v7804_v60  ;;  %v4887_v0 = vld [vmem:[#allocation64 + $0x8f0] sm:$0xff] }
0x19e3   : > { %v5617_v4 = vld [vmem:[%s11683_s18 + $0x180] sm:$0xff]  ;;  %v5618_v60 = vld [vmem:[%s11683_s18 + $0x188] sm:$0xff]  ;;  %v7822_v6 = vpack.c.bf16 %v4887_v0, %v4879_v63  ;;  %v7872_v63 = vpack.c.bf16 %v5626_v54, %v5625_v53 }
0x19e4   : > { %v7856_v10 = vpack.c.bf16 %v5618_v60, %v5617_v4  ;;  %v5610_v0 = vld [vmem:[%s11683_s18 + $0x148] sm:$0xff]  ;;  %v5627_v4 = vld [vmem:[%s11683_s18 + $0x1d0] sm:$0xff]  ;;  %v5628_v60 = vld [vmem:[%s11683_s18 + $0x1d8] sm:$0xff] }
0x19e5   : > { %7735 = vmatpush1.bf16.msra.mxu0 %v7734_v14  ;;  %7807 = vmatpush1.bf16.msra.mxu1 %v7806_v15  ;;  %v5602_v14 = vld [vmem:[%s11683_s18 + $0x108] sm:$0xff]  ;;  %v5588_v15 = vld [vmem:[%s11683_s18 + $0x98] sm:$0xff] }
0x19e6   : > { %7737 = vmatprep.subr.bf16.mxu0 %v7736_v19  ;;  %7809 = vmatprep.subr.bf16.mxu1 %v7808_v20  ;;  %v7826_v19 = vpack.c.bf16 %v5570_v12, %v5569_v11  ;;  %v5580_v11 = vld [vmem:[%s11683_s18 + $0x58] sm:$0xff]  ;;  %v5611_v12 = vld [vmem:[%s11683_s18 + $0x150] sm:$0xff]  ;;  %v5630_v18 = vld [vmem:[%s11683_s18 + $0x1e8] sm:$0xff] }
0x19e7   : > { %v5582_v21 = vld [vmem:[%s11683_s18 + $0x68] sm:$0xff] }
0x19e9   : > { %7739 = vmatpush1.bf16.msra.mxu0 %v7738_v26  ;;  %7811 = vmatpush1.bf16.msra.mxu1 %v7810_v27  ;;  %v5590_v26 = vld [vmem:[%s11683_s18 + $0xa8] sm:$0xff]  ;;  %v5621_v27 = vld [vmem:[%s11683_s18 + $0x1a0] sm:$0xff] }
0x19ea   : > { %7741 = vmatprep.subr.bf16.mxu0 %v7740_v32  ;;  %7813 = vmatprep.subr.bf16.mxu1 %v7812_v33  ;;  %v7862_v32 = vpack.c.bf16 %v5604_v7, %v5603_v22  ;;  %v7832_v33 = vpack.c.bf16 %v5590_v26, %v5589_v24  ;;  %v7864_v37 = vpack.c.bf16 %v5622_v31, %v5621_v27  ;;  %v5613_v22 = vld [vmem:[%s11683_s18 + $0x160] sm:$0xff]  ;;  %v5614_v7 = vld [vmem:[%s11683_s18 + $0x168] sm:$0xff]  ;;  %v5599_v24 = vld [vmem:[%s11683_s18 + $0xf0] sm:$0xff] }
0x19eb   : > { %v5600_v26 = vld [vmem:[%s11683_s18 + $0xf8] sm:$0xff]  ;;  %v5631_v27 = vld [vmem:[%s11683_s18 + $0x1f0] sm:$0xff] }
0x19ec   : > { %v5632_v31 = vld [vmem:[%s11683_s18 + $0x1f8] sm:$0xff] }
0x19ed   : > { %7743 = vmatpush1.bf16.msra.mxu0 %v7742_v41  ;;  %7815 = vmatpush1.bf16.msra.mxu1 %v7814_v44  ;;  %v5624_v41 = vld [vmem:[%s11683_s18 + $0x1b8] sm:$0xff]  ;;  %v7834_v44 = vpack.c.bf16 %v5574_v8, %v5573_v42  ;;  %v5583_v42 = vld [vmem:[%s11683_s18 + $0x70] sm:$0xff] }
0x19ee   : > { %7745 = vmatprep.subr.bf16.mxu0 %v7744_v45  ;;  %7817 = vmatprep.subr.bf16.mxu1 %v7816_v46  ;;  %v7836_v46 = vpack.c.bf16 %v5592_v39, %v5591_v38  ;;  %v7868_v50 = vpack.c.bf16 %v5624_v41, %v5623_v40  ;;  %v5584_v8 = vld [vmem:[%s11683_s18 + $0x78] sm:$0xff]  ;;  %v5649_v38 = vld [vmem:[%s11683_s18 + $0x280] sm:$0xff]  ;;  %v5650_v39 = vld [vmem:[%s11683_s18 + $0x288] sm:$0xff] }
0x19ef   : > { %v5681_v40 = vld [vmem:[%s11683_s18 + $0x380] sm:$0xff]  ;;  %v5682_v41 = vld [vmem:[%s11683_s18 + $0x388] sm:$0xff] }
0x19f0   : > { %5310 = vmatmul.mubr.f32.vlgmr.msra.gmra.mrb[22].mxu0 %v11177_v2  ;;  %5464 = vmatmul.mubr.f32.vlgmr.msra.gmra.mrb[30].mxu1 %v11177_v2  ;;  %v7824_v2 = vpack.c.bf16 %v5586_v3, %v5585_v1  ;;  %v5595_v1 = vld [vmem:[%s11683_s18 + $0xd0] sm:$0xff]  ;;  %v5596_v3 = vld [vmem:[%s11683_s18 + $0xd8] sm:$0xff] }
0x19f1   : > { %5315 = vmatprep.mubr.f32.mxu0 %v11181_v9  ;;  %7747 = vmatpush1.bf16.msra.mxu0 %v7746_v55  ;;  %v7838_v55 = vpack.c.bf16 %v5576_v48, %v5575_v47  ;;  %v7920_v47 = vpack.c.bf16 %v5682_v41, %v5681_v40  ;;  %v4901_v48 = vsub.s32 2, %v10983_v28 }
0x19f2   : > { %5469 = vmatprep.mubr.f32.mxu1 %v11181_v9  ;;  %7819 = vmatpush1.bf16.msra.mxu1 %v7818_v56  ;;  %v5587_v9 = vld [vmem:[%s11683_s18 + $0x90] sm:$0xff] }
0x19f3   : > { %7749 = vmatprep.subr.bf16.mxu0 %v7748_v59  ;;  %7821 = vmatprep.subr.bf16.mxu1 %v7820_v61  ;;  %v7828_v20 = vpack.c.bf16 %v5588_v15, %v5587_v9  ;;  %v5578_v59 = vld [vmem:[%s11683_s18 + $0x48] sm:$0xff]  ;;  %v5609_v61 = vld [vmem:[%s11683_s18 + $0x140] sm:$0xff] }
0x19f4   : > { %5316 = vmatmul.mubr.f32.gmra.mrb[24].mxu0 %v11185_v16  ;;  %5470 = vmatmul.mubr.f32.gmra.mrb[32].mxu1 %v11185_v16  ;;  %v7858_v16 = vpack.c.bf16 %v5602_v14, %v5601_v13  ;;  %v7876_v13 = vpack.c.bf16 %v5628_v60, %v5627_v4  ;;  %v5612_v14 = vld [vmem:[%s11683_s18 + $0x158] sm:$0xff]  ;;  %v5597_v9 = vld [vmem:[%s11683_s18 + $0xe0] sm:$0xff]  ;;  %v5598_v15 = vld [vmem:[%s11683_s18 + $0xe8] sm:$0xff] }
0x19f5   : > { %7751 = vmatpush1.bf16.msra.mxu0 %v7750_v5  ;;  %5386 = vmatprep.mubr.f32.mxu0 %v9866_v62  ;;  %v7842_v5 = vpack.c.bf16 %v5578_v59, %v5577_v57  ;;  %v5665_v59 = vld [vmem:[%s11683_s18 + $0x300] sm:$0xff]  ;;  %v5652_v4 = vld [vmem:[%s11683_s18 + $0x298] sm:$0xff]  ;;  %v5683_v60 = vld [vmem:[%s11683_s18 + $0x390] sm:$0xff] }
0x19f6   : > { %7823 = vmatpush1.bf16.msra.mxu1 %v7822_v6  ;;  %5540 = vmatprep.mubr.f32.mxu1 %v9866_v62  ;;  %v7874_v6 = vpack.c.bf16 %v5610_v0, %v5609_v61  ;;  %v5666_v61 = vld [vmem:[%s11683_s18 + $0x308] sm:$0xff] }
0x19f7   : > { %7825 = vmatprep.subr.bf16.mxu0 %v7824_v2  ;;  %7857 = vmatprep.subr.bf16.mxu1 %v7856_v10  ;;  %v7844_v2 = vpack.c.bf16 %v5596_v3, %v5595_v1  ;;  %v5579_v10 = vld [vmem:[%s11683_s18 + $0x50] sm:$0xff] }
0x19f8   : > { %6820 = vmatmul.mubr.msk.f32.vlgmr.msra.gmra.mrb[22].mxu0 %vm2188_vm10, %v11191_v25 }
0x19f9   : > { %6822 = vmatmul.mubr.msk.f32.vlgmr.msra.gmra.mrb[30].mxu1 %vm2188_vm10, %v11191_v25  ;;  %5392 = vmatprep.mubr.f32.mxu0 %v9866_v62  ;;  %v5605_v25 = vld [vmem:[%s11683_s18 + $0x120] sm:$0xff] }
0x19fa   : > { %5546 = vmatprep.mubr.f32.mxu1 %v9866_v62  ;;  %7827 = vmatpush3.bf16.msra.mxu0 %v7826_v19  ;;  %v5606_v62 = vld [vmem:[%s11683_s18 + $0x128] sm:$0xff]  ;;  %v7846_v19 = vpack.c.bf16 %v5580_v11, %v5579_v10  ;;  %v7922_v11 = vpack.c.bf16 %v5666_v61, %v5665_v59  ;;  %v5657_v59 = vld [vmem:[%s11683_s18 + $0x2c0] sm:$0xff] }
0x19fb   : > { %7859 = vmatpush3.bf16.msra.mxu1 %v7858_v16  ;;  %7829 = vmatprep.subr.bf16.mxu0 %v7828_v20  ;;  %v7866_v45 = vpack.c.bf16 %v5606_v62, %v5605_v25  ;;  %v7878_v16 = vpack.c.bf16 %v5612_v14, %v5611_v12  ;;  %v7848_v20 = vpack.c.bf16 %v5598_v15, %v5597_v9  ;;  %v5615_v25 = vld [vmem:[%s11683_s18 + $0x170] sm:$0xff]  ;;  %v5616_v62 = vld [vmem:[%s11683_s18 + $0x178] sm:$0xff]  ;;  %v5658_v61 = vld [vmem:[%s11683_s18 + $0x2c8] sm:$0xff] }
0x19fc   : > { %6821 = vmatmul.mubr.msk.f32.gmra.mrb[24].mxu0 %vm2188_vm10, %v11197_v36  ;;  %7861 = vmatprep.subr.bf16.mxu1 %v7860_v23  ;;  %v7880_v23 = vpack.c.bf16 %v5630_v18, %v5629_v17  ;;  %v5635_v12 = vld [vmem:[%s11683_s18 + $0x210] sm:$0xff] }
0x19fd   : > { %6823 = vmatmul.mubr.msk.f32.gmra.mrb[32].mxu1 %vm2188_vm10, %v11197_v36  ;;  %v5608_v36 = vld [vmem:[%s11683_s18 + $0x138] sm:$0xff] }
0x19fe   : > { %7831 = vmatpush3.bf16.msra.mxu0 %v7830_v29  ;;  %v7870_v56 = vpack.c.bf16 %v5608_v36, %v5607_v49  ;;  %v7850_v29 = vpack.c.bf16 %v5582_v21, %v5581_v58  ;;  %v11294_v49 = vld [vmem:[#allocation66] sm:$0xff]  ;;  %v4905_v36 = vsub.s32 3, %v10983_v28 }
0x19ff   : > { %7863 = vmatpush3.bf16.msra.mxu1 %v7862_v32  ;;  %7833 = vmatprep.subr.bf16.mxu0 %v7832_v33  ;;  %v7882_v32 = vpack.c.bf16 %v5614_v7, %v5613_v22  ;;  %v7852_v33 = vpack.c.bf16 %v5600_v26, %v5599_v24  ;;  %v4894_v51 = vrot.slane %v11294_v49, %v3112_v35  ;;  %v5668_v24 = vld [vmem:[%s11683_s18 + $0x318] sm:$0xff]  ;;  %v5653_v26 = vld [vmem:[%s11683_s18 + $0x2a0] sm:$0xff] }
0x1a00   : > { %7865 = vmatprep.subr.bf16.mxu1 %v7864_v37  ;;  %v7884_v37 = vpack.c.bf16 %v5632_v31, %v5631_v27  ;;  %v4902_v52 = vrot.slane %v11294_v49, %v4901_v48  ;;  %v4906_v54 = vrot.slane %v11294_v49, %v4905_v36  ;;  %v5656_v48 = vld [vmem:[%s11683_s18 + $0x2b8] sm:$0xff] }
0x1a01   : > { %v5688_v36 = vld [vmem:[%s11683_s18 + $0x3b8] sm:$0xff] }
0x1a02   : > { %7835 = vmatpush3.bf16.msra.mxu0 %v7834_v44  ;;  %v7854_v44 = vpack.c.bf16 %v5584_v8, %v5583_v42 }
0x1a03   : > { %7867 = vmatpush3.bf16.msra.mxu1 %v7866_v45  ;;  %7837 = vmatprep.subr.bf16.mxu0 %v7836_v46  ;;  %v7886_v45 = vpack.c.bf16 %v5616_v62, %v5615_v25  ;;  %v7888_v46 = vpack.c.bf16 %v5650_v39, %v5649_v38  ;;  %v5637_v62 = vld [vmem:[%s11683_s18 + $0x220] sm:$0xff]  ;;  %v5638_v38 = vld [vmem:[%s11683_s18 + $0x228] sm:$0xff] }
0x1a04   : > { %7869 = vmatprep.subr.bf16.mxu1 %v7868_v50  ;;  %v4897_v50 = vsub.s32 1, %v10983_v28 }
0x1a06   : > { %7839 = vmatpush3.bf16.msra.mxu0 %v7838_v55  ;;  %v4898_v53 = vrot.slane %v11294_v49, %v4897_v50  ;;  %v5633_v55 = vld [vmem:[%s11683_s18 + $0x200] sm:$0xff]  ;;  %v5687_v50 = vld [vmem:[%s11683_s18 + $0x3b0] sm:$0xff] }
0x1a07   : > { %7871 = vmatpush3.bf16.msra.mxu1 %v7870_v56  ;;  %7841 = vmatprep.subr.bf16.mxu0 %v7840_v34  ;;  %v5634_v56 = vld [vmem:[%s11683_s18 + $0x208] sm:$0xff] }
0x1a08   : > { %7873 = vmatprep.subr.bf16.mxu1 %v7872_v63  ;;  %v5651_v63 = vld [vmem:[%s11683_s18 + $0x290] sm:$0xff]  ;;  %v7890_v10 = vpack.c.bf16 %v5634_v56, %v5633_v55  ;;  %v7932_v56 = vpack.c.bf16 %v5688_v36, %v5687_v50  ;;  %v4909_v50 = vsub.s32 4, %v10983_v28  ;;  %v4917_v36 = vsub.s32 6, %v10983_v28 }
0x1a09   : > { %v7892_v17 = vpack.c.bf16 %v5652_v4, %v5651_v63  ;;  %v5689_v63 = vld [vmem:[%s11683_s18 + $0x3c0] sm:$0xff]  ;;  %v5642_v4 = vld [vmem:[%s11683_s18 + $0x248] sm:$0xff] }
0x1a0a   : > { %7843 = vmatpush3.bf16.msra.mxu0 %v7842_v5  ;;  %v5684_v5 = vld [vmem:[%s11683_s18 + $0x398] sm:$0xff] }
0x1a0b   : > { %7875 = vmatpush3.bf16.msra.mxu1 %v7874_v6  ;;  %7845 = vmatprep.subr.bf16.mxu0 %v7844_v2  ;;  %v7924_v18 = vpack.c.bf16 %v5684_v5, %v5683_v60  ;;  %v7904_v60 = vpack.c.bf16 %v5658_v61, %v5657_v59 }
0x1a0c   : > { %7877 = vmatprep.subr.bf16.mxu1 %v7876_v13 }
0x1a0e   : > { %7847 = vmatpush3.bf16.msra.mxu0 %v7846_v19  ;;  %v5636_v19 = vld [vmem:[%s11683_s18 + $0x218] sm:$0xff] }
0x1a0f   : > { %7879 = vmatpush3.bf16.msra.mxu1 %v7878_v16  ;;  %7849 = vmatprep.subr.bf16.mxu0 %v7848_v20  ;;  %v5667_v16 = vld [vmem:[%s11683_s18 + $0x310] sm:$0xff]  ;;  %v7894_v25 = vpack.c.bf16 %v5636_v19, %v5635_v12 }
0x1a10   : > { %7881 = vmatprep.subr.bf16.mxu1 %v7880_v23  ;;  %v5691_v12 = vld [vmem:[%s11683_s18 + $0x3d0] sm:$0xff] }
0x1a12   : > { %7851 = vmatpush3.bf16.msra.mxu0 %v7850_v29  ;;  %v5654_v29 = vld [vmem:[%s11683_s18 + $0x2a8] sm:$0xff] }
0x1a13   : > { %7883 = vmatpush3.bf16.msra.mxu1 %v7882_v32  ;;  %7853 = vmatprep.subr.bf16.mxu0 %v7852_v33  ;;  %v5685_v32 = vld [vmem:[%s11683_s18 + $0x3a0] sm:$0xff]  ;;  %v5686_v33 = vld [vmem:[%s11683_s18 + $0x3a8] sm:$0xff]  ;;  %v7896_v41 = vpack.c.bf16 %v5654_v29, %v5653_v26 }
0x1a14   : > { %7885 = vmatprep.subr.bf16.mxu1 %v7884_v37  ;;  %v7926_v37 = vpack.c.bf16 %v5668_v24, %v5667_v16  ;;  %v5675_v16 = vld [vmem:[%s11683_s18 + $0x350] sm:$0xff]  ;;  %v5645_v26 = vld [vmem:[%s11683_s18 + $0x260] sm:$0xff] }
0x1a16   : > { %7855 = vmatpush3.bf16.msra.mxu0 %v7854_v44  ;;  %v7928_v44 = vpack.c.bf16 %v5686_v33, %v5685_v32  ;;  %v5677_v32 = vld [vmem:[%s11683_s18 + $0x360] sm:$0xff]  ;;  %v5678_v33 = vld [vmem:[%s11683_s18 + $0x368] sm:$0xff] }
0x1a17   : > { %7887 = vmatpush3.bf16.msra.mxu1 %v7886_v45  ;;  %7889 = vmatprep.subr.bf16.mxu0 %v7888_v46  ;;  %v5669_v45 = vld [vmem:[%s11683_s18 + $0x320] sm:$0xff]  ;;  %v5670_v46 = vld [vmem:[%s11683_s18 + $0x328] sm:$0xff] }
0x1a18   : > { %7921 = vmatprep.subr.bf16.mxu1 %v7920_v47  ;;  %v5655_v47 = vld [vmem:[%s11683_s18 + $0x2b0] sm:$0xff] }
0x1a19   : > { %v7900_v55 = vpack.c.bf16 %v5656_v48, %v5655_v47 }
0x1a83   : > { %v5080_v34 = vpop.f32.mrb[18].mxu0  ;;  %v5234_v57 = vpop.f32.mrb[26].mxu1 }
0x1a84   : > { %v7952_v0 = vadd.f32 %v5080_v34, %v4894_v51  ;;  %v7956_v1 = vadd.f32 %v5234_v57, %v4902_v52  ;;  %v5082_v3 = vpop.f32.mrb[19].mxu0  ;;  %v5236_v35 = vpop.f32.mrb[27].mxu1  ;;  %v5671_v34 = vld [vmem:[%s11683_s18 + $0x330] sm:$0xff]  ;;  %v5672_v57 = vld [vmem:[%s11683_s18 + $0x338] sm:$0xff] }
0x1a85   : > { %v7953_v6 = vadd.f32 %v5082_v3, %v4898_v53  ;;  %v7957_v2 = vadd.f32 %v5236_v35, %v4906_v54  ;;  %v7934_v3 = vpack.c.bf16 %v5672_v57, %v5671_v34  ;;  %v5641_v35 = vld [vmem:[%s11683_s18 + $0x240] sm:$0xff] }
0x1a86   : > { %v5553_v20 = vmax.f32 %v7952_v0, 0.0  ;;  %v5555_v58 = vmax.f32 %v7956_v1, 0.0  ;;  %v5690_v0 = vld [vmem:[%s11683_s18 + $0x3c8] sm:$0xff] }
0x1a87   : > { %v5554_v13 = vmax.f32 %v7953_v6, 0.0  ;;  %v5556_v14 = vmax.f32 %v7957_v2, 0.0  ;;  %v5086_v9 = vpop.f32.mrb[20].mxu0  ;;  %v5240_v15 = vpop.f32.mrb[28].mxu1  ;;  %v7936_v5 = vpack.c.bf16 %v5690_v0, %v5689_v63  ;;  %v5673_v6 = vld [vmem:[%s11683_s18 + $0x340] sm:$0xff]  ;;  %v5674_v2 = vld [vmem:[%s11683_s18 + $0x348] sm:$0xff] }
0x1a88   : > { %v7954_v21 = vadd.f32 %v5086_v9, %v4894_v51  ;;  %v7958_v22 = vadd.f32 %v5240_v15, %v4902_v52  ;;  %v5088_v23 = vpop.f32.mrb[21].mxu0  ;;  %v5242_v7 = vpop.f32.mrb[29].mxu1  ;;  %v7898_v51 = vpack.c.bf16 %v5638_v38, %v5637_v62  ;;  %v7930_v52 = vpack.c.bf16 %v5670_v46, %v5669_v45  ;;  %v5643_v15 = vld [vmem:[%s11683_s18 + $0x250] sm:$0xff]  ;;  %v5680_v46 = vld [vmem:[%s11683_s18 + $0x378] sm:$0xff] }
0x1a89   : > { %v7955_v27 = vadd.f32 %v5088_v23, %v4898_v53  ;;  %v7959_v31 = vadd.f32 %v5242_v7, %v4906_v54  ;;  %5768 = vmatprep.mubr.f32.mxu0 %v5554_v13  ;;  %5843 = vmatprep.mubr.f32.mxu1 %v5556_v14  ;;  %v5639_v53 = vld [vmem:[%s11683_s18 + $0x230] sm:$0xff]  ;;  %v5640_v54 = vld [vmem:[%s11683_s18 + $0x238] sm:$0xff]  ;;  %v7906_v14 = vpack.c.bf16 %v5642_v4, %v5641_v35  ;;  %v5694_v23 = vld [vmem:[%s11683_s18 + $0x3e8] sm:$0xff] }
0x1a8a   : > { %5769 = vmatmul.mubr.f32.vlgmr.msra.gmra.mrb[26].mxu0 %v5553_v20  ;;  %5844 = vmatmul.mubr.f32.vlgmr.msra.gmra.mrb[34].mxu1 %v5555_v58  ;;  %v5561_v39 = vmax.f32 %v7954_v21, 0.0  ;;  %v5563_v40 = vmax.f32 %v7958_v22, 0.0  ;;  %v7902_v1 = vpack.c.bf16 %v5640_v54, %v5639_v53  ;;  %v5692_v13 = vld [vmem:[%s11683_s18 + $0x3d8] sm:$0xff]  ;;  %v7938_v9 = vpack.c.bf16 %v5674_v2, %v5673_v6  ;;  %v5661_v58 = vld [vmem:[%s11683_s18 + $0x2e0] sm:$0xff]  ;;  %v5662_v21 = vld [vmem:[%s11683_s18 + $0x2e8] sm:$0xff] }
0x1a8b   : > { %v5562_v42 = vmax.f32 %v7955_v27, 0.0  ;;  %v5564_v8 = vmax.f32 %v7959_v31, 0.0  ;;  %7891 = vmatpush3.bf16.msra.mxu0 %v7890_v10  ;;  %7923 = vmatpush3.bf16.msra.mxu1 %v7922_v11  ;;  %v5659_v10 = vld [vmem:[%s11683_s18 + $0x2d0] sm:$0xff]  ;;  %v5660_v11 = vld [vmem:[%s11683_s18 + $0x2d8] sm:$0xff]  ;;  %v7940_v19 = vpack.c.bf16 %v5692_v13, %v5691_v12  ;;  %v5693_v22 = vld [vmem:[%s11683_s18 + $0x3e0] sm:$0xff]  ;;  %v7912_v31 = vpack.c.bf16 %v5662_v21, %v5661_v58 }
0x1a8c   : > { %7893 = vmatprep.subr.bf16.mxu0 %v7892_v17  ;;  %7925 = vmatprep.subr.bf16.mxu1 %v7924_v18  ;;  %v5644_v17 = vld [vmem:[%s11683_s18 + $0x258] sm:$0xff]  ;;  %v7908_v18 = vpack.c.bf16 %v5660_v11, %v5659_v10  ;;  %v5646_v27 = vld [vmem:[%s11683_s18 + $0x268] sm:$0xff]  ;;  %v7944_v29 = vpack.c.bf16 %v5694_v23, %v5693_v22  ;;  %v7946_v38 = vpack.c.bf16 %v5678_v33, %v5677_v32  ;;  %v5679_v45 = vld [vmem:[%s11683_s18 + $0x370] sm:$0xff] }
0x1a8d   : > { %5773 = vmatprep.mubr.f32.mxu0 %v5562_v42  ;;  %5848 = vmatprep.mubr.f32.mxu1 %v5564_v8  ;;  %v5676_v20 = vld [vmem:[%s11683_s18 + $0x358] sm:$0xff]  ;;  %v7910_v7 = vpack.c.bf16 %v5644_v17, %v5643_v15  ;;  %v5663_v42 = vld [vmem:[%s11683_s18 + $0x2f0] sm:$0xff]  ;;  %v7914_v62 = vpack.c.bf16 %v5646_v27, %v5645_v26  ;;  %v7950_v48 = vpack.c.bf16 %v5680_v46, %v5679_v45 }
0x1a8e   : > { %5774 = vmatmul.mubr.f32.gmra.mrb[28].mxu0 %v5561_v39  ;;  %5849 = vmatmul.mubr.f32.gmra.mrb[36].mxu1 %v5563_v40  ;;  %v7942_v24 = vpack.c.bf16 %v5676_v20, %v5675_v16  ;;  %v5664_v8 = vld [vmem:[%s11683_s18 + $0x2f8] sm:$0xff]  ;;  %v5647_v39 = vld [vmem:[%s11683_s18 + $0x270] sm:$0xff]  ;;  %v4910_v53 = vrot.slane %v11294_v49, %v4909_v50  ;;  %v4918_v54 = vrot.slane %v11294_v49, %v4917_v36 }
0x1a8f   : > { %7895 = vmatpush3.bf16.msra.mxu0 %v7894_v25  ;;  %7927 = vmatpush3.bf16.msra.mxu1 %v7926_v37  ;;  %v5695_v25 = vld [vmem:[%s11683_s18 + $0x3f0] sm:$0xff]  ;;  %v5696_v37 = vld [vmem:[%s11683_s18 + $0x3f8] sm:$0xff]  ;;  %v7916_v40 = vpack.c.bf16 %v5664_v8, %v5663_v42 }
0x1a90   : > { %7897 = vmatprep.subr.bf16.mxu0 %v7896_v41  ;;  %7929 = vmatprep.subr.bf16.mxu1 %v7928_v44  ;;  %v7948_v41 = vpack.c.bf16 %v5696_v37, %v5695_v25  ;;  %v5648_v44 = vld [vmem:[%s11683_s18 + $0x278] sm:$0xff] }
0x1a91   : > { %v7918_v47 = vpack.c.bf16 %v5648_v44, %v5647_v39  ;;  %v6824_v16 = vld [vmem:[#allocation67] ss:$0 sm:$0xff] }
0x1a93   : > { %7899 = vmatpush3.bf16.msra.mxu0 %v7898_v51  ;;  %7931 = vmatpush3.bf16.msra.mxu1 %v7930_v52  ;;  %v4913_v51 = vsub.s32 5, %v10983_v28  ;;  %v4921_v52 = vsub.s32 7, %v10983_v28 }
0x1a94   : > { %7901 = vmatprep.subr.bf16.mxu0 %v7900_v55  ;;  %7933 = vmatprep.subr.bf16.mxu1 %v7932_v56 }
0x1a95   : > { %v4914_v55 = vrot.slane %v11294_v49, %v4913_v51  ;;  %v4922_v56 = vrot.slane %v11294_v49, %v4921_v52 }
0x1a97   : > { %7903 = vmatpush3.bf16.msra.mxu0 %v7902_v1  ;;  %7935 = vmatpush3.bf16.msra.mxu1 %v7934_v3 }
0x1a98   : > { %7905 = vmatprep.subr.bf16.mxu0 %v7904_v60  ;;  %7937 = vmatprep.subr.bf16.mxu1 %v7936_v5 }
0x1a9b   : > { %7907 = vmatpush3.bf16.msra.mxu0 %v7906_v14  ;;  %7939 = vmatpush3.bf16.msra.mxu1 %v7938_v9 }
0x1a9c   : > { %7909 = vmatprep.subr.bf16.mxu0 %v7908_v18  ;;  %7941 = vmatprep.subr.bf16.mxu1 %v7940_v19 }
0x1a9f   : > { %7911 = vmatpush3.bf16.msra.mxu0 %v7910_v7  ;;  %7943 = vmatpush3.bf16.msra.mxu1 %v7942_v24 }
0x1aa0   : > { %7913 = vmatprep.subr.bf16.mxu0 %v7912_v31  ;;  %7945 = vmatprep.subr.bf16.mxu1 %v7944_v29 }
0x1aa3   : > { %7915 = vmatpush3.bf16.msra.mxu0 %v7914_v62  ;;  %7947 = vmatpush3.bf16.msra.mxu1 %v7946_v38 }
0x1aa4   : > { %7917 = vmatprep.subr.bf16.mxu0 %v7916_v40  ;;  %7949 = vmatprep.subr.bf16.mxu1 %v7948_v41 }
0x1aa7   : > { %7919 = vmatpush3.bf16.msra.mxu0 %v7918_v47  ;;  %7951 = vmatpush3.bf16.msra.mxu1 %v7950_v48 }
0x1acb   : > { %v5388_v34 = vpop.f32.mrb[22].mxu0 }
0x1acc   : > { %v7960_v57 = vadd.f32 %v5388_v34, %v4910_v53  ;;  %v5542_v59 = vpop.f32.mrb[30].mxu1  ;;  %v5390_v61 = vpop.f32.mrb[23].mxu0 }
0x1acd   : > { %v7964_v63 = vadd.f32 %v5542_v59, %v4918_v54  ;;  %v7961_v0 = vadd.f32 %v5390_v61, %v4914_v55  ;;  %v5544_v1 = vpop.f32.mrb[31].mxu1 }
0x1ace   : > { %v7965_v3 = vadd.f32 %v5544_v1, %v4922_v56  ;;  %v5557_v60 = vmax.f32 %v7960_v57, 0.0 }
0x1acf   : > { %v5558_v35 = vmax.f32 %v7961_v0, 0.0  ;;  %v5394_v4 = vpop.f32.mrb[24].mxu0  ;;  %v5559_v10 = vmax.f32 %v7964_v63, 0.0 }
0x1ad0   : > { %v5560_v28 = vmax.f32 %v7965_v3, 0.0  ;;  %v7962_v5 = vadd.f32 %v5394_v4, %v4910_v53  ;;  %v5548_v6 = vpop.f32.mrb[32].mxu1  ;;  %v5396_v2 = vpop.f32.mrb[25].mxu0 }
0x1ad1   : > { %v7966_v11 = vadd.f32 %v5548_v6, %v4918_v54  ;;  %v7963_v12 = vadd.f32 %v5396_v2, %v4914_v55  ;;  %v5550_v13 = vpop.f32.mrb[33].mxu1  ;;  %5918 = vmatprep.mubr.f32.mxu0 %v5558_v35 }
0x1ad2   : > { %v7967_v49 = vadd.f32 %v5550_v13, %v4922_v56  ;;  %5993 = vmatprep.mubr.f32.mxu1 %v5560_v28  ;;  %5919 = vmatmul.mubr.f32.vlgmr.msra.gmra.mrb[30].mxu0 %v5557_v60  ;;  %v5565_v9 = vmax.f32 %v7962_v5, 0.0 }
0x1ad3   : > { %v5566_v14 = vmax.f32 %v7963_v12, 0.0  ;;  %5994 = vmatmul.mubr.f32.vlgmr.msra.gmra.mrb[38].mxu1 %v5559_v10  ;;  %v5567_v17 = vmax.f32 %v7966_v11, 0.0 }
0x1ad4   : > { %v5568_v15 = vmax.f32 %v7967_v49, 0.0 }
0x1ad5   : > { %5923 = vmatprep.mubr.f32.mxu0 %v5566_v14 }
0x1ad6   : > { %5998 = vmatprep.mubr.f32.mxu1 %v5568_v15  ;;  %5924 = vmatmul.mubr.f32.gmra.mrb[32].mxu0 %v5565_v9 }
0x1ad7   : > { %5999 = vmatmul.mubr.f32.gmra.mrb[40].mxu1 %v5567_v17 }
0x1b5d   : > { %v7000_v18 = vpop.f32.mrb[26].mxu0  ;;  %v7038_v19 = vpop.f32.mrb[34].mxu1 }
0x1b5e   : > { %v7001_v20 = vpop.f32.mrb[27].mxu0  ;;  %v7039_v58 = vpop.f32.mrb[35].mxu1 }
0x1b5f   : > { %v7002_v21 = vadd.f32 %v7001_v20, %v7000_v18  ;;  %v7040_v22 = vadd.f32 %v7039_v58, %v7038_v19 }
0x1b61   : > { %v5771_v23 = vadd.f32 %v7002_v21, %v6824_v16  ;;  %v7003_v7 = vpop.f32.mrb[28].mxu0  ;;  %v7041_v24 = vpop.f32.mrb[36].mxu1 }
0x1b62   : > { %v7004_v26 = vpop.f32.mrb[29].mxu0  ;;  %v7042_v27 = vpop.f32.mrb[37].mxu1 }
0x1b63   : > { %v5846_v31 = vadd.f32 %v7040_v22, %v5771_v23  ;;  %v7005_v29 = vadd.f32 %v7004_v26, %v7003_v7  ;;  %v7043_v32 = vadd.f32 %v7042_v27, %v7041_v24 }
0x1b65   : > { %v5776_v33 = vadd.f32 %v7005_v29, %v6824_v16 }
0x1b67   : > { %v5851_v42 = vadd.f32 %v7043_v32, %v5776_v33 }
0x1ba5   : > { %v7076_v8 = vpop.f32.mrb[30].mxu0 }
0x1ba6   : > { %v7114_v25 = vpop.f32.mrb[38].mxu1  ;;  %v7077_v37 = vpop.f32.mrb[31].mxu0 }
0x1ba7   : > { %v7078_v62 = vadd.f32 %v7077_v37, %v7076_v8  ;;  %v7115_v38 = vpop.f32.mrb[39].mxu1 }
0x1ba8   : > { %v7116_v39 = vadd.f32 %v7115_v38, %v7114_v25 }
0x1ba9   : > { %v5921_v40 = vadd.f32 %v7078_v62, %v5846_v31  ;;  %v7079_v41 = vpop.f32.mrb[32].mxu0 }
0x1baa   : > { %v7117_v44 = vpop.f32.mrb[40].mxu1  ;;  %v7080_v45 = vpop.f32.mrb[33].mxu0 }
0x1bab   : > { %v5996_v46 = vadd.f32 %v7116_v39, %v5921_v40  ;;  %v7081_v47 = vadd.f32 %v7080_v45, %v7079_v41  ;;  %v7118_v48 = vpop.f32.mrb[41].mxu1 }
0x1bac   : > { %v7119_v50 = vadd.f32 %v7118_v48, %v7117_v44 }
0x1bad   : > { %v5926_v36 = vadd.f32 %v7081_v47, %v5851_v42  ;;  %v6004_v51 = vadd.f32 %v5996_v46, %v11119_v30 }
0x1baf   : > { %v6001_v52 = vadd.f32 %v7119_v50, %v5926_v36  ;;  %v6006_v53 = vsel %vm2188_vm10, %v6004_v51, 0.0 }
0x1bb0   : > { %6007 = vadd.xlane.f32.xlu0 %v6006_v53 }
0x1bb1   : > { %v6005_v54 = vadd.f32 %v6001_v52, %v11126_v43 }
0x1bb3   : > { %v6009_v55 = vsel %vm2188_vm10, %v6005_v54, 0.0 }
0x1bb4   : > { %6010 = vadd.xlane.f32.xlu1 %v6009_v55 }
0x1c3d   : > { %v6008_v56 = vpop.xlane.xlu0 %6007 }
0x1c3e   : > { %v6012_v34 = vmul.f32 0.03125, %v6008_v56 }
0x1c40   : > { %v6014_v57 = vsub.f32 %v6004_v51, %v6012_v34 }
0x1c41   : > { %v6011_v59 = vpop.xlane.xlu1 %6010 }
0x1c42   : > { %v6013_v30 = vmul.f32 0.03125, %v6011_v59  ;;  %v6016_v61 = vmul.f32 %v6014_v57, %v6014_v57 }
0x1c44   : > { %v6015_v63 = vsub.f32 %v6005_v54, %v6013_v30  ;;  %v6018_v0 = vsel %vm2188_vm10, %v6016_v61, 0.0 }
0x1c45   : > { %6019 = vadd.xlane.f32.xlu0 %v6018_v0 }
0x1c46   : > { %v6017_v1 = vmul.f32 %v6015_v63, %v6015_v63 }
0x1c48   : > { %v6021_v43 = vsel %vm2188_vm10, %v6017_v1, 0.0 }
0x1c49   : > { %6022 = vadd.xlane.f32.xlu0 %v6021_v43 }
0x1c4a   : > { %9588 = shalt.err (!%p9585_p5)
}
0x1c4b   : > { %s9589_s23 = scalar_lea.hbm %s11382_s0, 256  ;;  %s9593_s17 = scalar_lea.hbm %s11684_s12, 512 }
0x1c4c   : > { %p9590_p4 = scmp.ne.s32.totalorder %s11382_s0, %s9589_s23  ;;  %p9594_p8 = scmp.lt.u32.totalorder %s11382_s0, %s11684_s12 }
0x1c4d   : > { %p9595_p7 = scmp.lt.u32.totalorder %s9593_s17, %s9589_s23  ;;  %p9597_p2 = scmp.lt.u32.totalorder %s9589_s23, %s11382_s0 }
0x1c4e   : > { %p9591_p0 = pnand %p9590_p4, %p11686_p9 }
0x1c4f   : > { %p9596_p11 = por %p9595_p7, %p9594_p8 }
0x1c50   : > { %p9592_p13 = pneg %p9591_p0 }
0x1c51   : > { %p9598_p10 = por %p9597_p2, %p9596_p11 }
0x1c53   : > { %p9599_p1 = pnand %p9598_p10, %p9592_p13 }
0x1c55   : > { %9602 = shalt.err (!%p9599_p1)
}
0x1c56   : > { %s11539_s1 = smov 128   ;;  %s11540_s5 = smov 8   ;;  %v6825_v2 = vld [vmem:[#allocation69] ss:$0 sm:$0xff]  ;;  %v6826_v11 = vld [vmem:[#allocation70] ss:$0 sm:$0xff] }
0x1c57   : > { %8149 = dma.vmem_to_hbm [thread:$0]  (%p11686_p9), %s11385_s15, 256, %s11382_s0, %s6060_s2, %s11539_s1, %s11539_s1, %s11540_s5  }
0x1c58   : > { %s11687_s3 = sld [smem:[#allocation140_spill]]  ;;  %s2048_s0 = scalar_lea.vmem [#allocation72], %s10774_s4 }
0x1c59   : > { %s6073_s15 = sshll.u32 %s2048_s0, 4  ;;  %s6055_s23 = scalar_lea.sflag [#allocation9], %s10771_s19  ;;  %s11417_s15 = int_to_ptr.vmem [resolvable:$true] %s6073_s15 }
0x1c5a   : > { %s9603_s17 = scalar_lea.vmem %s11417_s15, 256  ;;  %s9874_s4 = smov [#allocation72]  }
0x1c5b   : > { %p9604_p3 = scmp.ne.s32.totalorder %s11417_s15, %s9603_s17  ;;  %s9607_s1 = sshll.u32 %s9874_s4, 4  ;;  %s9608_s1 = int_to_ptr.vmem [resolvable:$false] %s9607_s1 }
0x1c5c   : > { %s9609_s5 = scalar_lea.vmem %s9608_s1, 512  ;;  %p9610_p5 = scmp.lt.s32.totalorder %s11417_s15, %s9608_s1 }
0x1c5d   : > { %p9605_p6 = pnand %p9604_p3, %p11686_p9  ;;  %p9611_p4 = scmp.lt.s32.totalorder %s9609_s5, %s9603_s17 }
0x1c5e   : > { %s11415_s2 = scalar_lea.hbm %s11687_s3, %s6837_s10 }
0x1c5f   : > { %p9606_p12 = pneg %p9605_p6  ;;  %p9612_p0 = por %p9611_p4, %p9610_p5 }
0x1c61   : > { %p9613_p13 = pnand %p9612_p0, %p9606_p12 }
0x1cd2   : > { %v6020_v3 = vpop.xlane.xlu0 %6019 }
0x1cd3   : > { %v6024_v35 = vmul.f32 0.03125, %v6020_v3 }
0x1cd5   : > { %v6026_v4 = vadd.f32 1e-05, %v6024_v35 }
0x1cd6   : > { %v6023_v60 = vpop.xlane.xlu0 %6022 }
0x1cd7   : > { %8471 = vrsqrt.f32 %v6026_v4  ;;  %v6025_v28 = vmul.f32 0.03125, %v6023_v60 }
0x1cd9   : > { %v6027_v5 = vadd.f32 1e-05, %v6025_v28 }
0x1cdb   : > { %8473 = vrsqrt.f32 %v6027_v5 }
0x1ce1   : > { %v8472_v6 = vpop.eup %8471 }
0x1ce2   : > { %v6030_v10 = vmul.f32 %v8472_v6, %v6014_v57 }
0x1ce4   : > { %v6039_v12 = vmul.f32 %v6825_v2, %v6030_v10 }
0x1ce5   : > { %v8474_v13 = vpop.eup %8473 }
0x1ce6   : > { %v6048_v49 = vadd.f32 %v6826_v11, %v6039_v12  ;;  %v6031_v14 = vmul.f32 %v8474_v13, %v6015_v63 }
0x1ce8   : > { %v6040_v9 = vmul.f32 %v6825_v2, %v6031_v14  ;;  %6050 = vst.msk [vmem:[%s2048_s0] sm:$0xff] %vm2188_vm10, %v6048_v49 }
0x1cea   : > { %v6049_v15 = vadd.f32 %v6826_v11, %v6040_v9 }
0x1cec   : > { %6051 = vst.msk [vmem:[%s2048_s0 + $0x8] sm:$0xff] %vm2188_vm10, %v6049_v15 }
0x1ced   : > { %9616 = shalt.err (!%p9613_p13)
}
0x1cee   : > { %s9617_s9 = scalar_lea.hbm %s11415_s2, 256  ;;  %s9621_s10 = scalar_lea.hbm %s11687_s3, 512 }
0x1cef   : > { %p9618_p8 = scmp.ne.s32.totalorder %s11415_s2, %s9617_s9  ;;  %p9622_p2 = scmp.lt.u32.totalorder %s11415_s2, %s11687_s3 }
0x1cf0   : > { %p9623_p10 = scmp.lt.u32.totalorder %s9621_s10, %s9617_s9  ;;  %p9625_p3 = scmp.lt.u32.totalorder %s9617_s9, %s11415_s2 }
0x1cf1   : > { %p9619_p7 = pnand %p9618_p8, %p11686_p9 }
0x1cf2   : > { %p9624_p1 = por %p9623_p10, %p9622_p2 }
0x1cf3   : > { %p9620_p11 = pneg %p9619_p7 }
0x1cf4   : > { %p9626_p6 = por %p9625_p3, %p9624_p1 }
0x1cf6   : > { %p9627_p12 = pnand %p9626_p6, %p9620_p11 }
0x1cf8   : > { %9630 = shalt.err (!%p9627_p12)
}
0x1cf9   : > { %s11688_s1 = smov 8   ;;  %s11689_s5 = smov 128  }
0x1cfa   : > { %8148 = dma.vmem_to_hbm [thread:$0]  (%p11686_p9), %s11417_s15, 256, %s11415_s2, %s6055_s23, %s11689_s5, %s11689_s5, %s11688_s1  }
0x1cfb PF: > { %s11690_s0 = sld [smem:[#allocation142_spill]]  ;;  %s11691_s17 = sld [smem:[#allocation146_spill]] }
0x1cfc   : > { %p11693_p4 = scmp.ge.s32.totalorder %s9761_s11, 2 }
0x1d01   : > { %s6104_s4 = sand.u32 1, %s11690_s0   ;;  %p11692_p5 = scmp.ne.s32.totalorder %s11691_s17, 0 }
0x1d02   : > { %s6105_s9 = scalar_lea.sflag [#allocation9], %s6104_s4 }
0x1d03   : > { %p8160_p0 = pnand %p11693_p4, %p11692_p5 }
0x1d05   : > { %9740 = dma.done.wait (!%p8160_p0), %s6105_s9, 256  }
0x1d06   : > { %9742 = vsyncadd (!%p8160_p0), %s6105_s9, 4294967040  ;;  %s6114_s8 = scalar_lea.sflag [#allocation74], %s6104_s4 }
0x1d07   : > { %9744 = dma.done.wait (!%p8160_p0), %s6114_s8, 256  }
0x1d08   : > { %9746 = vsyncadd (!%p8160_p0), %s6114_s8, 4294967040  ;;  %s11694_s11 = sld [smem:[#allocation143_spill]]  ;;  %s11695_s19 = sld [smem:[#allocation144_spill]] }
0x1d09   : > { %s11696_s0 = smov %s9753_s14  ;;  %s11697_s14 = smov %s9757_s7 }
0x1d0e   : > { %p141_p9 = scmp.ge.s32.totalorder %s11694_s11, 4   ;;  %s11698_s7 = smov %s11695_s19 }
0x1d10   :  { %143 = sbr.rel (!%p141_p9) target bundleno = 128 (0x80), region = 496 }
0x1d17   :  { %6119 = vsyncpa [#allocation8], 1 }
0x1d18   :  { %6121 = vsyncpa [#allocation8 + $0x1], 1 }
0x1d19   :  { %6122 = vsyncpa [#allocation11], 1 }
0x1d1a   :  { %6124 = vsyncpa [#allocation11 + $0x1], 1 }
0x1d1b   :  { %6125 = vsyncpa [#allocation14], 1 }
0x1d1c   :  { %6126 = vsyncpa [#allocation17], 1 }
0x1d1d   :  { %6127 = vsyncpa [#allocation20], 1 }
0x1d1e   :  { %6128 = vsyncpa [#allocation23], 1 }
0x1d1f   :  { %6129 = vsyncpa [#allocation26], 1 }
0x1d20   :  { %6130 = vsyncpa [#allocation29], 1 }
0x1d21   :  { %6131 = vsyncpa [#allocation32], 1 }
0x1d22   :  { %6132 = vsyncpa [#allocation35], 1 }
0x1d23   :  { %6133 = vsyncpa [#allocation38], 1 }
0x1d24   :  { %6134 = vsyncpa [#allocation41], 1 }
0x1d25   :  { %6135 = vsyncpa [#allocation44], 1 }
0x1d26   :  { %6136 = vsyncpa [#allocation47], 1 }
0x1d27   :  { %6137 = vsyncpa [#allocation50], 1 }
0x1d28   :  { %6138 = vsyncpa [#allocation53], 1 }
0x1d29   :  { %6139 = vsyncpa [#allocation56], 1 }
0x1d2a   :  { %6140 = vsyncpa [#allocation59], 1 }
0x1d2b   :  { %6141 = vsyncpa [#allocation62], 1 }
0x1d2c   :  { %6142 = vsyncpa [#allocation65], 1 }
0x1d2d   :  { %6143 = vsyncpa [#allocation68], 1 }
0x1d2e   :  { %6144 = vsyncpa [#allocation71], 1 }
0x1d2f   :  { %6145 = vsyncpa [#allocation9], 1 }
0x1d30   :  { %6147 = vsyncpa [#allocation9 + $0x1], 1 }
0x1d31   :  { %6148 = vsyncpa [#allocation74], 1 }
0x1d32   :  { %6150 = vsyncpa [#allocation74 + $0x1], 1 }

</bundles_post_ra>
